<compile_context>
chip_gen: v5e
topology: v5e:2x2
jax: 0.10.0
libtpu: 0.0.40
codegen_flags: <defaults>
</compile_context>

<pallas_src>
import math
import numpy as np
import jax
import jax.numpy as jnp
from jax.experimental import pallas as pl
from jax.experimental.pallas import tpu as pltpu

F32 = jnp.float32
_EPS_NORM = 1e-8      # eps of gvp-pytorch _norm_no_nan
_EPS_LN = 1e-5        # torch.nn.LayerNorm default eps

# ---------------------------------------------------------------------------
# Generation-dependent budgets (v5e/v6e: 128 MiB VMEM, v7x: 64 MiB per TC)
# ---------------------------------------------------------------------------
try:
    _VMEM_CAP = int(pltpu.get_tpu_info().vmem_capacity_bytes)
except Exception:
    _VMEM_CAP = 64 * 1024 * 1024
_BIG_VMEM = _VMEM_CAP >= 96 * 1024 * 1024
_VMEM_LIMIT = (96 * 1024 * 1024) if _BIG_VMEM else min(_VMEM_CAP // 2, 32 * 1024 * 1024)
_ROW_TILE = 1024 if _BIG_VMEM else 512     # rows per grid step, node/edge kernels
_SEG_TM = 512 if _BIG_VMEM else 256        # segment-tile rows, scatter matmul
_SEG_TK = 1024 if _BIG_VMEM else 512       # item-tile cols, scatter matmul


def _round_up(x, m):
    return ((x + m - 1) // m) * m


def _gvp_args(p):
    return (p['wh'], p['wss'], p['wsv'], p['wsb'], p['wv'])


# ---------------------------------------------------------------------------
# In-kernel math building blocks
# ---------------------------------------------------------------------------

def _gvp_parts(s, v_parts, whT, wssT, wsvT, wsb, wvT):
    """Linear GVP (activations=(None, None), no vector gate) on per-component vectors."""
    vh = [jnp.dot(vc, whT, preferred_element_type=F32) for vc in v_parts]
    vn = jnp.sqrt(jnp.maximum(vh[0] * vh[0] + vh[1] * vh[1] + vh[2] * vh[2], _EPS_NORM))
    s_out = (jnp.dot(s, wssT, preferred_element_type=F32)
             + jnp.dot(vn, wsvT, preferred_element_type=F32) + wsb)
    v_out = [jnp.dot(vc, wvT, preferred_element_type=F32) for vc in vh]
    return s_out, v_out


def _scalar_ln(s, gamma, beta):
    mu = jnp.mean(s, axis=-1, keepdims=True)
    var = jnp.mean((s - mu) * (s - mu), axis=-1, keepdims=True)
    return (s - mu) * jax.lax.rsqrt(var + _EPS_LN) * gamma + beta


def _vector_ln_parts(v_parts, vw):
    # TODO(synk): LayerNorm(learnable_vector_weight=True) source not provided; assumed
    # = GVP vector norm followed by a learnable per-channel scale.
    sq = jnp.maximum(v_parts[0] * v_parts[0] + v_parts[1] * v_parts[1]
                     + v_parts[2] * v_parts[2], _EPS_NORM)
    inv = jax.lax.rsqrt(jnp.mean(sq, axis=-1, keepdims=True))
    scale = vw * inv
    return [vc * scale for vc in v_parts]


# ---------------------------------------------------------------------------
# Generic row-tiled pallas_call helper
# ---------------------------------------------------------------------------

def _row_tiling(R):
    t = min(_ROW_TILE, _round_up(R, 8))
    return t, _round_up(R, t)


def _tiled_call(kernel, tiled_in, const_in, out_dims, R):
    """Row-tiled pallas_call.  `tiled_in` arrays carry a row axis (axis 0 for 2-D,
    axis 1 for (3, R, C)); `const_in` (weights) are pinned to the (0, ...) block.
    The row grid axis is "parallel" (megacore shardable on v7x)."""
    t, Rp = _row_tiling(R)
    grid = (Rp // t,)
    padded, in_specs = [], []
    for a in tiled_in:
        if a.ndim == 2:
            padded.append(jnp.pad(a, ((0, Rp - a.shape[0]), (0, 0))))
            in_specs.append(pl.BlockSpec((t, a.shape[1]), lambda i: (i, 0)))
        else:  # (3, R, C)
            padded.append(jnp.pad(a, ((0, 0), (0, Rp - a.shape[1]), (0, 0))))
            in_specs.append(pl.BlockSpec((3, t, a.shape[2]), lambda i: (0, i, 0)))
    for w in const_in:
        in_specs.append(pl.BlockSpec(w.shape, lambda i, nd=w.ndim: (0,) * nd))
    out_shapes, out_specs = [], []
    for kind, C in out_dims:
        if kind == '2d':
            out_shapes.append(jax.ShapeDtypeStruct((Rp, C), F32))
            out_specs.append(pl.BlockSpec((t, C), lambda i: (i, 0)))
        else:
            out_shapes.append(jax.ShapeDtypeStruct((3, Rp, C), F32))
            out_specs.append(pl.BlockSpec((3, t, C), lambda i: (0, i, 0)))
    outs = pl.pallas_call(
        kernel,
        out_shape=tuple(out_shapes),
        grid=grid,
        in_specs=in_specs,
        out_specs=tuple(out_specs),
        compiler_params=pltpu.CompilerParams(
            dimension_semantics=("parallel",), vmem_limit_bytes=_VMEM_LIMIT),
    )(*padded, *const_in)
    if not isinstance(outs, (list, tuple)):
        outs = (outs,)
    return [o[:R] if kind == '2d' else o[:, :R] for o, (kind, _) in zip(outs, out_dims)]


# ---------------------------------------------------------------------------
# Kernel 1a: node projections q|k|vx (+ node PNA slab, fused)
# ---------------------------------------------------------------------------

def _make_node_proj_kernel(ns, nv, hq0, hq1, pna_w):
    used = 2 * ns + 5 * nv + 1

    def kern(xs_ref, xv_ref, ws_ref, wv_ref,
             qs_ref, ks_ref, vxs_ref, qv_ref, kv_ref, vxv_ref, pna_ref):
        xs = xs_ref[...]
        sp = jnp.dot(xs, ws_ref[...], preferred_element_type=F32)
        qs_ref[...] = sp[:, :hq0]
        ks_ref[...] = sp[:, hq0:2 * hq0]
        vxs_ref[...] = sp[:, 2 * hq0:]
        comps = []
        for c in range(3):
            vc = xv_ref[c]
            comps.append(vc)
            vp = jnp.dot(vc, wv_ref[...], preferred_element_type=F32)
            qv_ref[c] = vp[:, :hq1]
            kv_ref[c] = vp[:, hq1:2 * hq1]
            vxv_ref[c] = vp[:, 2 * hq1:]
        sq = jnp.maximum(comps[0] * comps[0] + comps[1] * comps[1] + comps[2] * comps[2],
                         _EPS_NORM)
        vn = jnp.sqrt(sq)
        rows = xs.shape[0]
        pieces = [xs, xs * xs, vn, sq, comps[0], comps[1], comps[2],
                  jnp.ones((rows, 1), F32)]
        if pna_w > used:
            pieces.append(jnp.zeros((rows, pna_w - used), F32))
        pna_ref[...] = jnp.concatenate(pieces, axis=-1)
    return kern


def node_projection(proj, xs, xv3, cfg):
    ns, nv = cfg['node_dims']
    h, dk, dv = cfg['h'], cfg['dk'], cfg['dv']
    hq0, hq1, hv0, hv1 = h * dk[0], h * dk[1], h * dv[0], h * dv[1]
    pna_w = _round_up(2 * ns + 5 * nv + 1, 128)
    kern = _make_node_proj_kernel(ns, nv, hq0, hq1, pna_w)
    return _tiled_call(
        kern, tiled_in=[xs, xv3], const_in=[proj['ws'], proj['wv']],
        out_dims=[('2d', hq0), ('2d', hq0), ('2d', hv0),
                  ('3d', hq1), ('3d', hq1), ('3d', hv1), ('2d', pna_w)],
        R=xs.shape[0])


# ---------------------------------------------------------------------------
# Kernel 1b: edge projections ve|b (+ edge PNA slab, fused)
# ---------------------------------------------------------------------------

def _make_edge_proj_kernel(esd, evd, hde0, pna_w):
    used = 2 * esd + 5 * evd + 1

    def kern(es_ref, ev_ref, ws_ref, wv_ref, ves_ref, b_ref, vev_ref, pna_ref):
        es = es_ref[...]
        sp = jnp.dot(es, ws_ref[...], preferred_element_type=F32)
        ves_ref[...] = sp[:, :hde0]
        b_ref[...] = sp[:, hde0:]
        comps = []
        for c in range(3):
            vc = ev_ref[c]
            comps.append(vc)
            vev_ref[c] = jnp.dot(vc, wv_ref[...], preferred_element_type=F32)
        sq = jnp.maximum(comps[0] * comps[0] + comps[1] * comps[1] + comps[2] * comps[2],
                         _EPS_NORM)
        vn = jnp.sqrt(sq)
        rows = es.shape[0]
        pieces = [es, es * es, vn, sq, comps[0], comps[1], comps[2],
                  jnp.ones((rows, 1), F32)]
        if pna_w > used:
            pieces.append(jnp.zeros((rows, pna_w - used), F32))
        pna_ref[...] = jnp.concatenate(pieces, axis=-1)
    return kern


def edge_projection(proj, es, ev3, cfg):
    esd, evd = cfg['edge_dims']
    h, de, db = cfg['h'], cfg['de'], cfg['db']
    hde0, hde1, hdb = h * de[0], h * de[1], h * db
    pna_w = _round_up(2 * esd + 5 * evd + 1, 128)
    kern = _make_edge_proj_kernel(esd, evd, hde0, pna_w)
    return _tiled_call(
        kern, tiled_in=[es, ev3], const_in=[proj['wes'], proj['wev']],
        out_dims=[('2d', hde0), ('2d', hdb), ('3d', hde1), ('2d', pna_w)],
        R=es.shape[0])


# ---------------------------------------------------------------------------
# Kernel 2: attention scores via pooling-matrix dot -> lane-dense (E, 128) slab
#           columns: [a_s (h) | a_v (h) | a_e (h) | logits (h) | zero pad]
# ---------------------------------------------------------------------------

def _attn_kernel(qs_ref, ks_ref, b_ref, qv_ref, kv_ref, ps_ref, pv_ref, pe_ref, out_ref):
    sprod = qs_ref[...] * ks_ref[...]
    vprod = (qv_ref[0] * kv_ref[0] + qv_ref[1] * kv_ref[1] + qv_ref[2] * kv_ref[2])
    out_ref[...] = (jnp.dot(sprod, ps_ref[...], preferred_element_type=F32)
                    + jnp.dot(vprod, pv_ref[...], preferred_element_type=F32)
                    + jnp.dot(b_ref[...], pe_ref[...], preferred_element_type=F32))


def _pool_logit_matrix(h, d, out_w, block, inv):
    m = np.zeros((h * d, out_w), np.float32)
    for i in range(h):
        m[i * d:(i + 1) * d, block * h + i] = 1.0
        m[i * d:(i + 1) * d, 3 * h + i] = inv
    return jnp.asarray(m)


# ---------------------------------------------------------------------------
# Kernel 3: attention-weighted messages + msg GVP -> lane-dense 128-padded slab
#           columns: [ms | mv_x | mv_y | mv_z | 1 | zero pad]
# ---------------------------------------------------------------------------

def _expand_matrix(h, widths):
    cols = []
    for w in widths:
        m = np.zeros((h, h * w), np.float32)
        for i in range(h):
            m[i, i * w:(i + 1) * w] = 1.0
        cols.append(m)
    return jnp.asarray(np.concatenate(cols, axis=1))


def _make_msg_kernel(hv0, hde0, hv1, hde1, so_m, vo_m, msg_w):
    used = so_m + 3 * vo_m + 1

    def kern(attn_ref, vxs_ref, ves_ref, vxv_ref, vev_ref,
             exp_ref, whx_ref, whe_ref, wssx_ref, wsse_ref, wsv_ref, wsb_ref, wv_ref,
             out_ref):
        attn = attn_ref[...]
        coef = jnp.dot(attn, exp_ref[...], preferred_element_type=F32)
        c_sx = coef[:, :hv0]
        c_se = coef[:, hv0:hv0 + hde0]
        c_vx = coef[:, hv0 + hde0:hv0 + hde0 + hv1]
        c_ve = coef[:, hv0 + hde0 + hv1:]
        ms_x = vxs_ref[...] * c_sx
        ms_e = ves_ref[...] * c_se
        vh = []
        for c in range(3):
            vh.append(jnp.dot(vxv_ref[c] * c_vx, whx_ref[...], preferred_element_type=F32)
                      + jnp.dot(vev_ref[c] * c_ve, whe_ref[...], preferred_element_type=F32))
        vn = jnp.sqrt(jnp.maximum(vh[0] * vh[0] + vh[1] * vh[1] + vh[2] * vh[2], _EPS_NORM))
        ms = (jnp.dot(ms_x, wssx_ref[...], preferred_element_type=F32)
              + jnp.dot(ms_e, wsse_ref[...], preferred_element_type=F32)
              + jnp.dot(vn, wsv_ref[...], preferred_element_type=F32) + wsb_ref[...])
        mv = [jnp.dot(vh[c], wv_ref[...], preferred_element_type=F32) for c in range(3)]
        rows = ms.shape[0]
        pieces = [ms, mv[0], mv[1], mv[2], jnp.ones((rows, 1), F32)]
        if msg_w > used:
            pieces.append(jnp.zeros((rows, msg_w - used), F32))
        out_ref[...] = jnp.concatenate(pieces, axis=-1)
    return kern


# ---------------------------------------------------------------------------
# Kernel 4: segment sum (scatter-add) with IN-KERNEL one-hot generation
# ---------------------------------------------------------------------------

def _seg_sum_kernel(idx_ref, data_ref, out_ref, acc_ref):
    @pl.when(pl.program_id(1) == 0)
    def _():
        acc_ref[...] = jnp.zeros_like(acc_ref)

    tm = acc_ref.shape[0]
    tk = idx_ref.shape[1]
    seg_ids = jax.lax.broadcasted_iota(jnp.int32, (tm, tk), 0) + pl.program_id(0) * tm
    onehot = (seg_ids == idx_ref[...]).astype(F32)     # padded indices are -1: no match
    acc_ref[...] += jnp.dot(onehot, data_ref[...], preferred_element_type=F32)

    @pl.when(pl.program_id(1) == pl.num_programs(1) - 1)
    def _():
        out_ref[...] = acc_ref[...]


def seg_sum(idx, data, num_segments):
    """sum_{i: idx[i]==s} data[i]  ->  (num_segments, D) f32, no HBM one-hot."""
    E, D = data.shape
    tk = min(_SEG_TK, _round_up(E, 128))
    Ep = _round_up(E, tk)
    tm = min(_SEG_TM, _round_up(num_segments, 8))
    Mp = _round_up(num_segments, tm)
    idx_p = jnp.pad(idx.astype(jnp.int32), (0, Ep - E), constant_values=-1).reshape(1, Ep)
    data_p = jnp.pad(data.astype(F32), ((0, Ep - E), (0, 0)))
    out = pl.pallas_call(
        _seg_sum_kernel,
        out_shape=jax.ShapeDtypeStruct((Mp, D), F32),
        grid=(Mp // tm, Ep // tk),
        in_specs=[pl.BlockSpec((1, tk), lambda i, k: (0, k)),
                  pl.BlockSpec((tk, D), lambda i, k: (k, 0))],
        out_specs=pl.BlockSpec((tm, D), lambda i, k: (i, 0)),
        scratch_shapes=[pltpu.VMEM((tm, D), F32)],
        compiler_params=pltpu.CompilerParams(
            dimension_semantics=("parallel", "arbitrary"),
            vmem_limit_bytes=_VMEM_LIMIT),
    )(idx_p, data_p)
    return out[:num_segments]


# ---------------------------------------------------------------------------
# Kernel 5: node update (x_out GVP + residual + scalar/vector LayerNorm)
# ---------------------------------------------------------------------------

def _make_node_update_kernel(so_m, vo_m):
    cnt = so_m + 3 * vo_m

    def kern(msum_ref, gsn_ref, gvn_ref, xs_ref, xv_ref,
             whm_ref, whg_ref, wssm_ref, wssg_ref, wsv_ref, wsb_ref, wv_ref,
             g_ref, b_ref, vw_ref, so_ref, vo_ref):
        msum = msum_ref[...]
        counts = jnp.maximum(msum[:, cnt:cnt + 1], 1.0)
        rc = pl.reciprocal(counts, approx=True)
        m_s = msum[:, :so_m] * rc
        s_lin = (jnp.dot(m_s, wssm_ref[...], preferred_element_type=F32)
                 + jnp.dot(gsn_ref[...], wssg_ref[...], preferred_element_type=F32))
        vh = []
        for c in range(3):
            m_v = msum[:, so_m + c * vo_m: so_m + (c + 1) * vo_m] * rc
            vh.append(jnp.dot(m_v, whm_ref[...], preferred_element_type=F32)
                      + jnp.dot(gvn_ref[c], whg_ref[...], preferred_element_type=F32))
        vn = jnp.sqrt(jnp.maximum(vh[0] * vh[0] + vh[1] * vh[1] + vh[2] * vh[2], _EPS_NORM))
        ds = s_lin + jnp.dot(vn, wsv_ref[...], preferred_element_type=F32) + wsb_ref[...]
        so_ref[...] = _scalar_ln(xs_ref[...] + ds, g_ref[...], b_ref[...])
        res = [xv_ref[c] + jnp.dot(vh[c], wv_ref[...], preferred_element_type=F32)
               for c in range(3)]
        out = _vector_ln_parts(res, vw_ref[...])
        for c in range(3):
            vo_ref[c] = out[c]
    return kern


# ---------------------------------------------------------------------------
# Kernel 6: edge update (e_out GVP + residual + scalar/vector LayerNorm)
# ---------------------------------------------------------------------------

def _make_edge_update_kernel(h):
    def kern(xsr_ref, xsc_ref, es_ref, att_ref, gsr_ref,
             xvr_ref, xvc_ref, ev_ref, gvr_ref,
             wh_ref, wss_ref, wsv_ref, wsb_ref, wv_ref,
             g_ref, b_ref, vw_ref, so_ref, vo_ref):
        es = es_ref[...]
        s_in = jnp.concatenate(
            [xsr_ref[...], xsc_ref[...], es, att_ref[:, :3 * h], gsr_ref[...]], axis=-1)
        v_in = [jnp.concatenate([xvr_ref[c], xvc_ref[c], ev_ref[c], gvr_ref[c]], axis=-1)
                for c in range(3)]
        ds, dv = _gvp_parts(s_in, v_in, wh_ref[...], wss_ref[...], wsv_ref[...],
                            wsb_ref[...], wv_ref[...])
        so_ref[...] = _scalar_ln(es + ds, g_ref[...], b_ref[...])
        res = [ev_ref[c] + dv[c] for c in range(3)]
        out = _vector_ln_parts(res, vw_ref[...])
        for c in range(3):
            vo_ref[c] = out[c]
    return kern


# ---------------------------------------------------------------------------
# Kernel 7: global update (PNA finalize x2 + y GVP + y_out GVP + residual + LN)
# ---------------------------------------------------------------------------

def _make_global_kernel(node_dims, edge_dims):
    nsi, nvi = node_dims
    esi, evi = edge_dims

    def kern(*refs):
        sx_ref, mmx_ref, se_ref, mme_ref, gs_ref, gv_ref = refs[:6]
        pxw = [r[...] for r in refs[6:11]]
        pew = [r[...] for r in refs[11:16]]
        yw = [r[...] for r in refs[16:21]]
        ow = [r[...] for r in refs[21:26]]
        gamma, beta, vw = refs[26][...], refs[27][...], refs[28][...]
        so_ref, vo_ref = refs[29], refs[30]

        def pna(sums, mm, si, vi, w):
            cbase = 2 * si + 5 * vi
            counts = jnp.maximum(sums[:, cbase:cbase + 1], 1.0)
            denom = jnp.maximum(counts - 1.0, 1.0)       # unbiased scatter_std
            s_sum = sums[:, :si]
            s_sq = sums[:, si:2 * si]
            vn_sum = sums[:, 2 * si:2 * si + vi]
            vn_sq = sums[:, 2 * si + vi:2 * si + 2 * vi]
            sm = s_sum / counts
            sstd = jnp.sqrt(jnp.maximum(s_sq - counts * sm * sm, 0.0) / denom)
            vnm = vn_sum / counts
            vstd = jnp.sqrt(jnp.maximum(vn_sq - counts * vnm * vnm, 0.0) / denom)
            smi = mm[:, :si]
            sma = mm[:, si:2 * si]
            vmi = mm[:, 2 * si:2 * si + vi]
            vma = mm[:, 2 * si + vi:2 * si + 2 * vi]
            z = jnp.concatenate([sm, smi, sma, sstd, vmi, vma, vstd], axis=-1)
            vm = [sums[:, 2 * si + 2 * vi + c * vi: 2 * si + 2 * vi + (c + 1) * vi] / counts
                  for c in range(3)]
            return _gvp_parts(z, vm, *w)

        px_s, px_v = pna(sx_ref[...], mmx_ref[...], nsi, nvi, pxw)
        pe_s, pe_v = pna(se_ref[...], mme_ref[...], esi, evi, pew)
        gs = gs_ref[...]
        yg_s, yg_v = _gvp_parts(gs, [gv_ref[0], gv_ref[1], gv_ref[2]], *yw)
        y_in_s = jnp.concatenate([px_s, pe_s, yg_s], axis=-1)
        y_in_v = [jnp.concatenate([px_v[c], pe_v[c], yg_v[c]], axis=-1) for c in range(3)]
        dys, dyv = _gvp_parts(y_in_s, y_in_v, *ow)
        so_ref[...] = _scalar_ln(gs + dys, gamma, beta)
        res = [gv_ref[c] + dyv[c] for c in range(3)]
        out = _vector_ln_parts(res, vw)
        for c in range(3):
            vo_ref[c] = out[c]
    return kern


def global_update(params, cfg, sums_x, mm_x, sums_e, mm_e, gs, gv3):
    B = gs.shape[0]
    gsd, gvd = cfg['global_dims']
    kern = _make_global_kernel(cfg['node_dims'], cfg['edge_dims'])
    args = (sums_x, mm_x, sums_e, mm_e, gs, gv3,
            *_gvp_args(params['pna_x']), *_gvp_args(params['pna_e']),
            *_gvp_args(params['y']), *_gvp_args(params['y_out']),
            params['y_norm']['gamma'], params['y_norm']['beta'], params['y_norm']['vw'])
    vspec = pl.BlockSpec(memory_space=pltpu.MemorySpace.VMEM)
    return pl.pallas_call(
        kern,
        out_shape=(jax.ShapeDtypeStruct((B, gsd), F32),
                   jax.ShapeDtypeStruct((3, B, gvd), F32)),
        in_specs=[vspec] * len(args),
        out_specs=(pl.BlockSpec(memory_space=pltpu.MemorySpace.VMEM),
                   pl.BlockSpec(memory_space=pltpu.MemorySpace.VMEM)),
        compiler_params=pltpu.CompilerParams(vmem_limit_bytes=_VMEM_LIMIT),
    )(*args)


# ---------------------------------------------------------------------------
# Parameter initialization (deterministic, synthetic, torch-Linear-like uniform)
# ---------------------------------------------------------------------------

def _init_lin(key, in_dim, out_dim):
    scale = 1.0 / math.sqrt(in_dim)
    return jax.random.uniform(key, (in_dim, out_dim), minval=-scale, maxval=scale,
                              dtype=F32)


def init_gvp(key, in_dims, out_dims):
    (si, vi), (so, vo) = in_dims, out_dims
    h_dim = max(vi, vo)
    k1, k2, k3, k4 = jax.random.split(key, 4)
    ws = _init_lin(k1, si + h_dim, so)           # ws acts on cat([s, vn])
    scale = 1.0 / math.sqrt(si + h_dim)
    wsb = jax.random.uniform(k4, (1, so), minval=-scale, maxval=scale, dtype=F32)
    return {'wh': _init_lin(k2, vi, h_dim),
            'wss': ws[:si],
            'wsv': ws[si:],
            'wsb': wsb,
            'wv': _init_lin(k3, h_dim, vo)}


def init_layernorm(s_dim, v_dim):
    return {'gamma': jnp.ones((1, s_dim), F32),
            'beta': jnp.zeros((1, s_dim), F32),
            'vw': jnp.ones((1, v_dim), F32)}


def init_layer_params(key, node_dims, edge_dims, global_dims, dk, dv, de, db, h):
    ns, nv = node_dims
    esd, evd = edge_dims
    gsd, gvd = global_dims
    keys = iter(jax.random.split(key, 24))
    lin = lambda i, o: _init_lin(next(keys), i, o)
    proj = {
        'ws': jnp.concatenate([lin(ns, h * dk[0]), lin(ns, h * dk[0]),
                               lin(ns, h * dv[0])], axis=1),          # q | k | vx
        'wv': jnp.concatenate([lin(nv, h * dk[1]), lin(nv, h * dk[1]),
                               lin(nv, h * dv[1])], axis=1),
        'wes': jnp.concatenate([lin(esd, h * de[0]), lin(esd, h * db)], axis=1),  # ve | b
        'wev': lin(evd, h * de[1]),
    }
    m_dim = (h * (dv[0] + de[0]), h * (dv[1] + de[1]))
    mglob = (m_dim[0] + gsd, m_dim[1] + gvd)
    e_dim = (2 * ns + esd + 3 * h + gsd, 2 * nv + evd + gvd)
    y_dim = (ns + esd + gsd, nv + evd + gvd)
    return {
        'proj': proj,
        'msg': init_gvp(next(keys), m_dim, m_dim),
        'x_out': init_gvp(next(keys), mglob, node_dims),
        'x_norm': init_layernorm(ns, nv),
        'e_out': init_gvp(next(keys), e_dim, edge_dims),
        'e_norm': init_layernorm(esd, evd),
        'pna_x': init_gvp(next(keys), (4 * ns + 3 * nv, nv), node_dims),
        'pna_e': init_gvp(next(keys), (4 * esd + 3 * evd, evd), edge_dims),
        'y': init_gvp(next(keys), global_dims, global_dims),
        'y_out': init_gvp(next(keys), y_dim, global_dims),
        'y_norm': init_layernorm(gsd, gvd),
    }


# ---------------------------------------------------------------------------
# Full forward pass
# ---------------------------------------------------------------------------

def gvp_transformer_layer_forward(params, cfg, x, edge_index, batch_mask,
                                  edge_attr, global_attr):
    ns, nv = cfg['node_dims']
    esd, evd = cfg['edge_dims']
    dk, dv, de, db, h = cfg['dk'], cfg['dv'], cfg['de'], cfg['db'], cfg['h']
    B = cfg['batch_size']
    hv0, hv1 = h * dv[0], h * dv[1]
    hde0, hde1 = h * de[0], h * de[1]
    so_m = hv0 + hde0
    vo_m = hv1 + hde1

    xs, xv = x
    es, ev = edge_attr
    gs, gv = global_attr
    N = xs.shape[0]
    row, col = edge_index[0], edge_index[1]
    bm = batch_mask
    bm_row = bm[row]

    # vector features: torch (R, C, 3) -> component-leading (3, R, C)
    xv3 = jnp.transpose(xv, (2, 0, 1))
    ev3 = jnp.transpose(ev, (2, 0, 1))
    gv3 = jnp.transpose(gv, (2, 0, 1))

    # ---- projections (row-tiled; PNA slabs fused) ----
    qs, ks, vxs, qv3, kv3, vxv3, pna_x_slab = node_projection(params['proj'], xs, xv3, cfg)
    ves, b_s, vev3, pna_e_slab = edge_projection(params['proj'], es, ev3, cfg)

    # TODO(synk): data-dependent row/col/batch gathers stay in XLA (no rectangular BlockSpec).
    qs_r, ks_c = qs[row], ks[col]
    qv_r, kv_c = qv3[:, row], kv3[:, col]
    vxs_c, vxv_c = vxs[col], vxv3[:, col]

    # ---- attention scores (one slab: [a_s | a_v | a_e | logits | pad]) ----
    att_w = _round_up(4 * h, 128)
    p_s = _pool_logit_matrix(h, dk[0], att_w, 0, 1.0 / math.sqrt(3 * dk[0]))
    p_v = _pool_logit_matrix(h, dk[1], att_w, 1, 1.0 / math.sqrt(9 * dk[1]))
    p_e = _pool_logit_matrix(h, db, att_w, 2, 1.0 / math.sqrt(3 * db))
    attn_slab = _tiled_call(_attn_kernel,
                            tiled_in=[qs_r, ks_c, b_s, qv_r, kv_c],
                            const_in=[p_s, p_v, p_e],
                            out_dims=[('2d', att_w)], R=row.shape[0])[0]

    # TODO(synk): scatter_softmax (data-dependent segment max / sum) stays in XLA.
    logits = attn_slab[:, 3 * h:4 * h]
    seg_max = jax.ops.segment_max(logits, row, num_segments=N)
    zexp = jnp.exp(logits - seg_max[row])
    z_sum = jax.ops.segment_sum(zexp, row, num_segments=N)
    attn = zexp / z_sum[row]

    # ---- attention-weighted messages + msg GVP ----
    msg_w = _round_up(so_m + 3 * vo_m + 1, 128)
    expm = _expand_matrix(h, [dv[0], de[0], dv[1], de[1]])
    mp = params['msg']
    msg_consts = [expm, mp['wh'][:hv1], mp['wh'][hv1:], mp['wss'][:hv0], mp['wss'][hv0:],
                  mp['wsv'], mp['wsb'], mp['wv']]
    msg_kern = _make_msg_kernel(hv0, hde0, hv1, hde1, so_m, vo_m, msg_w)
    msg_slab = _tiled_call(msg_kern,
                           tiled_in=[attn, vxs_c, ves, vxv_c, vev3],
                           const_in=msg_consts,
                           out_dims=[('2d', msg_w)], R=row.shape[0])[0]

    # ---- scatter-mean over `row`: in-kernel one-hot segment matmul (f32) ----
    msum = seg_sum(row, msg_slab, N)

    # ---- node update (x_out GVP + residual + LayerNorm) ----
    gsn = gs[bm]
    gvn3 = gv3[:, bm]
    xp = params['x_out']
    node_consts = [xp['wh'][:vo_m], xp['wh'][vo_m:], xp['wss'][:so_m], xp['wss'][so_m:],
                   xp['wsv'], xp['wsb'], xp['wv'],
                   params['x_norm']['gamma'], params['x_norm']['beta'],
                   params['x_norm']['vw']]
    nu_kern = _make_node_update_kernel(so_m, vo_m)
    Xs, Xv3 = _tiled_call(nu_kern,
                          tiled_in=[msum, gsn, gvn3, xs, xv3],
                          const_in=node_consts,
                          out_dims=[('2d', ns), ('3d', nv)], R=N)

    # ---- edge update (e_out GVP + residual + LayerNorm) ----
    gs_re = gs[bm_row]
    gv_re3 = gv3[:, bm_row]
    edge_consts = [*_gvp_args(params['e_out']),
                   params['e_norm']['gamma'], params['e_norm']['beta'],
                   params['e_norm']['vw']]
    eu_kern = _make_edge_update_kernel(h)
    Es, Ev3 = _tiled_call(eu_kern,
                          tiled_in=[xs[row], xs[col], es, attn_slab, gs_re,
                                    xv3[:, row], xv3[:, col], ev3, gv_re3],
                          const_in=edge_consts,
                          out_dims=[('2d', esd), ('3d', evd)], R=row.shape[0])

    # ---- global update: PNA segment sums (f32) + min/max + GVPs + LN ----
    sums_x = seg_sum(bm, pna_x_slab, B)
    sums_e = seg_sum(bm_row, pna_e_slab, B)
    vnorm_x = pna_x_slab[:, 2 * ns:2 * ns + nv]
    vnorm_e = pna_e_slab[:, 2 * esd:2 * esd + evd]

    # TODO(synk): segment min / max (data-dependent extrema) stay in XLA.
    def _minmax(s, vn, seg):
        return jnp.concatenate([jax.ops.segment_min(s, seg, num_segments=B),
                                jax.ops.segment_max(s, seg, num_segments=B),
                                jax.ops.segment_min(vn, seg, num_segments=B),
                                jax.ops.segment_max(vn, seg, num_segments=B)], axis=-1)

    mm_x = _minmax(xs, vnorm_x, bm)
    mm_e = _minmax(es, vnorm_e, bm_row)
    Ys, Yv3 = global_update(params, cfg, sums_x, mm_x, sums_e, mm_e, gs, gv3)

    back = lambda v3: jnp.transpose(v3, (1, 2, 0))
    return ((Xs, back(Xv3)), (Es, back(Ev3)), (Ys, back(Yv3)))


# ---------------------------------------------------------------------------
if __name__ == "__main__":
    key = jax.random.PRNGKey(0)
    node_dims, edge_dims, global_dims = (8, 4), (6, 2), (5, 2)
    dk, dv, de, db, h = (4, 2), (4, 2), (3, 1), 3, 2
    n_per_graph, B = 8, 2
    N = n_per_graph * B

    kp, kx1, kx2, ke1, ke2, kg1, kg2 = jax.random.split(key, 7)
    params = init_layer_params(kp, node_dims, edge_dims, global_dims,
                               dk, dv, de, db, h)

    batch_mask = jnp.repeat(jnp.arange(B, dtype=jnp.int32), n_per_graph)
    rows, cols = [], []
    for g in range(B):
        for l in range(n_per_graph):
            i = g * n_per_graph + l
            rows += [i, i]
            cols += [g * n_per_graph + (l + 1) % n_per_graph,
                     g * n_per_graph + (l - 1) % n_per_graph]
    edge_index = jnp.array([rows, cols], dtype=jnp.int32)
    E = edge_index.shape[1]

    xs = jax.random.normal(kx1, (N, node_dims[0]), dtype=F32)
    xv = jax.random.normal(kx2, (N, node_dims[1], 3), dtype=F32)
    es = jax.random.normal(ke1, (E, edge_dims[0]), dtype=F32)
    ev = jax.random.normal(ke2, (E, edge_dims[1], 3), dtype=F32)
    gs = jax.random.normal(kg1, (B, global_dims[0]), dtype=F32)
    gv = jax.random.normal(kg2, (B, global_dims[1], 3), dtype=F32)

    cfg = dict(node_dims=node_dims, edge_dims=edge_dims, global_dims=global_dims,
               dk=dk, dv=dv, de=de, db=db, h=h, batch_size=B)

    @jax.jit
    def run(xs, xv, es, ev, gs, gv, edge_index, batch_mask):
        return gvp_transformer_layer_forward(
            params, cfg, (xs, xv), edge_index, batch_mask, (es, ev), (gs, gv))

    (X_out, E_out, y_out) = run(xs, xv, es, ev, gs, gv, edge_index, batch_mask)
    for t in (*X_out, *E_out, *y_out):
        jax.block_until_ready(t)
    print("KERNEL_OK")
</pallas_src>

<mosaic_0001>
module attributes {stable_mosaic.version = 11 : i64} {
  func.func @kern(%arg0: i32, %arg1: memref<16x8xf32, #tpu.memory_space<vmem>>, %arg2: memref<3x16x4xf32, #tpu.memory_space<vmem>>, %arg3: memref<8x24xf32, #tpu.memory_space<vmem>>, %arg4: memref<4x12xf32, #tpu.memory_space<vmem>>, %arg5: memref<16x8xf32, #tpu.memory_space<vmem>>, %arg6: memref<16x8xf32, #tpu.memory_space<vmem>>, %arg7: memref<16x8xf32, #tpu.memory_space<vmem>>, %arg8: memref<3x16x4xf32, #tpu.memory_space<vmem>>, %arg9: memref<3x16x4xf32, #tpu.memory_space<vmem>>, %arg10: memref<3x16x4xf32, #tpu.memory_space<vmem>>, %arg11: memref<16x128xf32, #tpu.memory_space<vmem>>) attributes {dimension_semantics = [#tpu.dimension_semantics<parallel>], iteration_bounds = array<i64: 1>, scalar_prefetch = 0 : i64, scratch_operands = 0 : i64, tpu.core_type = #tpu.core_type<tc>, window_params = [{transform_indices = @transform_0, window_bounds = array<i64: 16, 8>}, {transform_indices = @transform_1, window_bounds = array<i64: 3, 16, 4>}, {pipeline_mode = #tpu.pipeline_mode<synchronous>, transform_indices = @transform_2, window_bounds = array<i64: 8, 24>}, {pipeline_mode = #tpu.pipeline_mode<synchronous>, transform_indices = @transform_3, window_bounds = array<i64: 4, 12>}, {transform_indices = @transform_4, window_bounds = array<i64: 16, 8>}, {transform_indices = @transform_5, window_bounds = array<i64: 16, 8>}, {transform_indices = @transform_6, window_bounds = array<i64: 16, 8>}, {transform_indices = @transform_7, window_bounds = array<i64: 3, 16, 4>}, {transform_indices = @transform_8, window_bounds = array<i64: 3, 16, 4>}, {transform_indices = @transform_9, window_bounds = array<i64: 3, 16, 4>}, {transform_indices = @transform_10, window_bounds = array<i64: 16, 128>}]} {
    %c0 = arith.constant 0 : index
    %c0_0 = arith.constant 0 : index
    %0 = vector.load %arg1[%c0, %c0_0] : memref<16x8xf32, #tpu.memory_space<vmem>>, vector<16x8xf32>
    %c0_1 = arith.constant 0 : index
    %c0_2 = arith.constant 0 : index
    %1 = vector.load %arg3[%c0_1, %c0_2] : memref<8x24xf32, #tpu.memory_space<vmem>>, vector<8x24xf32>
    %cst = arith.constant dense<0.000000e+00> : vector<16x24xf32>
    %2 = tpu.matmul %0, %1, %cst {dimension_numbers = #tpu.dot_dimension_numbers<[1], [0], [0], [1], [0, 0, 1, 1], [], []>} : vector<16x8xf32>, vector<8x24xf32>, vector<16x24xf32> -> vector<16x24xf32>
    %3 = vector.extract_strided_slice %2 {offsets = [0, 0], sizes = [16, 8], strides = [1, 1]} : vector<16x24xf32> to vector<16x8xf32>
    %c0_3 = arith.constant 0 : index
    %c0_4 = arith.constant 0 : index
    %4 = vector.load %arg5[%c0_3, %c0_4] : memref<16x8xf32, #tpu.memory_space<vmem>>, vector<16x8xf32>
    tpu.vector_store %arg5[%c0_3, %c0_4], %3 {strides = array<i32>} : memref<16x8xf32, #tpu.memory_space<vmem>>, vector<16x8xf32>,
    %5 = vector.extract_strided_slice %2 {offsets = [0, 8], sizes = [16, 8], strides = [1, 1]} : vector<16x24xf32> to vector<16x8xf32>
    %c0_5 = arith.constant 0 : index
    %c0_6 = arith.constant 0 : index
    %6 = vector.load %arg6[%c0_5, %c0_6] : memref<16x8xf32, #tpu.memory_space<vmem>>, vector<16x8xf32>
    tpu.vector_store %arg6[%c0_5, %c0_6], %5 {strides = array<i32>} : memref<16x8xf32, #tpu.memory_space<vmem>>, vector<16x8xf32>,
    %7 = vector.extract_strided_slice %2 {offsets = [0, 16], sizes = [16, 8], strides = [1, 1]} : vector<16x24xf32> to vector<16x8xf32>
    %c0_7 = arith.constant 0 : index
    %c0_8 = arith.constant 0 : index
    %8 = vector.load %arg7[%c0_7, %c0_8] : memref<16x8xf32, #tpu.memory_space<vmem>>, vector<16x8xf32>
    tpu.vector_store %arg7[%c0_7, %c0_8], %7 {strides = array<i32>} : memref<16x8xf32, #tpu.memory_space<vmem>>, vector<16x8xf32>,
    %c0_9 = arith.constant 0 : index
    %c0_10 = arith.constant 0 : index
    %c0_11 = arith.constant 0 : index
    %9 = vector.load %arg2[%c0_9, %c0_10, %c0_11] : memref<3x16x4xf32, #tpu.memory_space<vmem>>, vector<1x16x4xf32>
    %10 = vector.shape_cast %9 : vector<1x16x4xf32> to vector<16x4xf32>
    %c0_12 = arith.constant 0 : index
    %c0_13 = arith.constant 0 : index
    %11 = vector.load %arg4[%c0_12, %c0_13] : memref<4x12xf32, #tpu.memory_space<vmem>>, vector<4x12xf32>
    %cst_14 = arith.constant dense<0.000000e+00> : vector<16x12xf32>
    %12 = tpu.matmul %10, %11, %cst_14 {dimension_numbers = #tpu.dot_dimension_numbers<[1], [0], [0], [1], [0, 0, 1, 1], [], []>} : vector<16x4xf32>, vector<4x12xf32>, vector<16x12xf32> -> vector<16x12xf32>
    %13 = vector.extract_strided_slice %12 {offsets = [0, 0], sizes = [16, 4], strides = [1, 1]} : vector<16x12xf32> to vector<16x4xf32>
    %c0_15 = arith.constant 0 : index
    %c0_16 = arith.constant 0 : index
    %c0_17 = arith.constant 0 : index
    %14 = vector.load %arg8[%c0_15, %c0_16, %c0_17] : memref<3x16x4xf32, #tpu.memory_space<vmem>>, vector<1x16x4xf32>
    %15 = vector.shape_cast %14 : vector<1x16x4xf32> to vector<16x4xf32>
    %16 = vector.shape_cast %13 : vector<16x4xf32> to vector<1x16x4xf32>
    tpu.vector_store %arg8[%c0_15, %c0_16, %c0_17], %16 {strides = array<i32>} : memref<3x16x4xf32, #tpu.memory_space<vmem>>, vector<1x16x4xf32>,
    %17 = vector.extract_strided_slice %12 {offsets = [0, 4], sizes = [16, 4], strides = [1, 1]} : vector<16x12xf32> to vector<16x4xf32>
    %c0_18 = arith.constant 0 : index
    %c0_19 = arith.constant 0 : index
    %c0_20 = arith.constant 0 : index
    %18 = vector.load %arg9[%c0_18, %c0_19, %c0_20] : memref<3x16x4xf32, #tpu.memory_space<vmem>>, vector<1x16x4xf32>
    %19 = vector.shape_cast %18 : vector<1x16x4xf32> to vector<16x4xf32>
    %20 = vector.shape_cast %17 : vector<16x4xf32> to vector<1x16x4xf32>
    tpu.vector_store %arg9[%c0_18, %c0_19, %c0_20], %20 {strides = array<i32>} : memref<3x16x4xf32, #tpu.memory_space<vmem>>, vector<1x16x4xf32>,
    %21 = vector.extract_strided_slice %12 {offsets = [0, 8], sizes = [16, 4], strides = [1, 1]} : vector<16x12xf32> to vector<16x4xf32>
    %c0_21 = arith.constant 0 : index
    %c0_22 = arith.constant 0 : index
    %c0_23 = arith.constant 0 : index
    %22 = vector.load %arg10[%c0_21, %c0_22, %c0_23] : memref<3x16x4xf32, #tpu.memory_space<vmem>>, vector<1x16x4xf32>
    %23 = vector.shape_cast %22 : vector<1x16x4xf32> to vector<16x4xf32>
    %24 = vector.shape_cast %21 : vector<16x4xf32> to vector<1x16x4xf32>
    tpu.vector_store %arg10[%c0_21, %c0_22, %c0_23], %24 {strides = array<i32>} : memref<3x16x4xf32, #tpu.memory_space<vmem>>, vector<1x16x4xf32>,
    %c1 = arith.constant 1 : index
    %c0_24 = arith.constant 0 : index
    %c0_25 = arith.constant 0 : index
    %25 = vector.load %arg2[%c1, %c0_24, %c0_25] : memref<3x16x4xf32, #tpu.memory_space<vmem>>, vector<1x16x4xf32>
    %26 = vector.shape_cast %25 : vector<1x16x4xf32> to vector<16x4xf32>
    %c0_26 = arith.constant 0 : index
    %c0_27 = arith.constant 0 : index
    %27 = vector.load %arg4[%c0_26, %c0_27] : memref<4x12xf32, #tpu.memory_space<vmem>>, vector<4x12xf32>
    %cst_28 = arith.constant dense<0.000000e+00> : vector<16x12xf32>
    %28 = tpu.matmul %26, %27, %cst_28 {dimension_numbers = #tpu.dot_dimension_numbers<[1], [0], [0], [1], [0, 0, 1, 1], [], []>} : vector<16x4xf32>, vector<4x12xf32>, vector<16x12xf32> -> vector<16x12xf32>
    %29 = vector.extract_strided_slice %28 {offsets = [0, 0], sizes = [16, 4], strides = [1, 1]} : vector<16x12xf32> to vector<16x4xf32>
    %c1_29 = arith.constant 1 : index
    %c0_30 = arith.constant 0 : index
    %c0_31 = arith.constant 0 : index
    %30 = vector.load %arg8[%c1_29, %c0_30, %c0_31] : memref<3x16x4xf32, #tpu.memory_space<vmem>>, vector<1x16x4xf32>
    %31 = vector.shape_cast %30 : vector<1x16x4xf32> to vector<16x4xf32>
    %32 = vector.shape_cast %29 : vector<16x4xf32> to vector<1x16x4xf32>
    tpu.vector_store %arg8[%c1_29, %c0_30, %c0_31], %32 {strides = array<i32>} : memref<3x16x4xf32, #tpu.memory_space<vmem>>, vector<1x16x4xf32>,
    %33 = vector.extract_strided_slice %28 {offsets = [0, 4], sizes = [16, 4], strides = [1, 1]} : vector<16x12xf32> to vector<16x4xf32>
    %c1_32 = arith.constant 1 : index
    %c0_33 = arith.constant 0 : index
    %c0_34 = arith.constant 0 : index
    %34 = vector.load %arg9[%c1_32, %c0_33, %c0_34] : memref<3x16x4xf32, #tpu.memory_space<vmem>>, vector<1x16x4xf32>
    %35 = vector.shape_cast %34 : vector<1x16x4xf32> to vector<16x4xf32>
    %36 = vector.shape_cast %33 : vector<16x4xf32> to vector<1x16x4xf32>
    tpu.vector_store %arg9[%c1_32, %c0_33, %c0_34], %36 {strides = array<i32>} : memref<3x16x4xf32, #tpu.memory_space<vmem>>, vector<1x16x4xf32>,
    %37 = vector.extract_strided_slice %28 {offsets = [0, 8], sizes = [16, 4], strides = [1, 1]} : vector<16x12xf32> to vector<16x4xf32>
    %c1_35 = arith.constant 1 : index
    %c0_36 = arith.constant 0 : index
    %c0_37 = arith.constant 0 : index
    %38 = vector.load %arg10[%c1_35, %c0_36, %c0_37] : memref<3x16x4xf32, #tpu.memory_space<vmem>>, vector<1x16x4xf32>
    %39 = vector.shape_cast %38 : vector<1x16x4xf32> to vector<16x4xf32>
    %40 = vector.shape_cast %37 : vector<16x4xf32> to vector<1x16x4xf32>
    tpu.vector_store %arg10[%c1_35, %c0_36, %c0_37], %40 {strides = array<i32>} : memref<3x16x4xf32, #tpu.memory_space<vmem>>, vector<1x16x4xf32>,
    %c2 = arith.constant 2 : index
    %c0_38 = arith.constant 0 : index
    %c0_39 = arith.constant 0 : index
    %41 = vector.load %arg2[%c2, %c0_38, %c0_39] : memref<3x16x4xf32, #tpu.memory_space<vmem>>, vector<1x16x4xf32>
    %42 = vector.shape_cast %41 : vector<1x16x4xf32> to vector<16x4xf32>
    %c0_40 = arith.constant 0 : index
    %c0_41 = arith.constant 0 : index
    %43 = vector.load %arg4[%c0_40, %c0_41] : memref<4x12xf32, #tpu.memory_space<vmem>>, vector<4x12xf32>
    %cst_42 = arith.constant dense<0.000000e+00> : vector<16x12xf32>
    %44 = tpu.matmul %42, %43, %cst_42 {dimension_numbers = #tpu.dot_dimension_numbers<[1], [0], [0], [1], [0, 0, 1, 1], [], []>} : vector<16x4xf32>, vector<4x12xf32>, vector<16x12xf32> -> vector<16x12xf32>
    %45 = vector.extract_strided_slice %44 {offsets = [0, 0], sizes = [16, 4], strides = [1, 1]} : vector<16x12xf32> to vector<16x4xf32>
    %c2_43 = arith.constant 2 : index
    %c0_44 = arith.constant 0 : index
    %c0_45 = arith.constant 0 : index
    %46 = vector.load %arg8[%c2_43, %c0_44, %c0_45] : memref<3x16x4xf32, #tpu.memory_space<vmem>>, vector<1x16x4xf32>
    %47 = vector.shape_cast %46 : vector<1x16x4xf32> to vector<16x4xf32>
    %48 = vector.shape_cast %45 : vector<16x4xf32> to vector<1x16x4xf32>
    tpu.vector_store %arg8[%c2_43, %c0_44, %c0_45], %48 {strides = array<i32>} : memref<3x16x4xf32, #tpu.memory_space<vmem>>, vector<1x16x4xf32>,
    %49 = vector.extract_strided_slice %44 {offsets = [0, 4], sizes = [16, 4], strides = [1, 1]} : vector<16x12xf32> to vector<16x4xf32>
    %c2_46 = arith.constant 2 : index
    %c0_47 = arith.constant 0 : index
    %c0_48 = arith.constant 0 : index
    %50 = vector.load %arg9[%c2_46, %c0_47, %c0_48] : memref<3x16x4xf32, #tpu.memory_space<vmem>>, vector<1x16x4xf32>
    %51 = vector.shape_cast %50 : vector<1x16x4xf32> to vector<16x4xf32>
    %52 = vector.shape_cast %49 : vector<16x4xf32> to vector<1x16x4xf32>
    tpu.vector_store %arg9[%c2_46, %c0_47, %c0_48], %52 {strides = array<i32>} : memref<3x16x4xf32, #tpu.memory_space<vmem>>, vector<1x16x4xf32>,
    %53 = vector.extract_strided_slice %44 {offsets = [0, 8], sizes = [16, 4], strides = [1, 1]} : vector<16x12xf32> to vector<16x4xf32>
    %c2_49 = arith.constant 2 : index
    %c0_50 = arith.constant 0 : index
    %c0_51 = arith.constant 0 : index
    %54 = vector.load %arg10[%c2_49, %c0_50, %c0_51] : memref<3x16x4xf32, #tpu.memory_space<vmem>>, vector<1x16x4xf32>
    %55 = vector.shape_cast %54 : vector<1x16x4xf32> to vector<16x4xf32>
    %56 = vector.shape_cast %53 : vector<16x4xf32> to vector<1x16x4xf32>
    tpu.vector_store %arg10[%c2_49, %c0_50, %c0_51], %56 {strides = array<i32>} : memref<3x16x4xf32, #tpu.memory_space<vmem>>, vector<1x16x4xf32>,
    %57 = arith.mulf %10, %10 : vector<16x4xf32>
    %58 = arith.mulf %26, %26 : vector<16x4xf32>
    %59 = arith.addf %57, %58 : vector<16x4xf32>
    %60 = arith.mulf %42, %42 : vector<16x4xf32>
    %61 = arith.addf %59, %60 : vector<16x4xf32>
    %cst_52 = arith.constant 9.99999993E-9 : f32
    %62 = vector.broadcast %cst_52 : f32 to vector<16x4xf32>
    %63 = arith.maximumf %61, %62 : vector<16x4xf32>
    %64 = math.sqrt %63 : vector<16x4xf32>
    %65 = arith.mulf %0, %0 : vector<16x8xf32>
    %cst_53 = arith.constant 1.000000e+00 : f32
    %66 = vector.broadcast %cst_53 : f32 to vector<16x1xf32>
    %cst_54 = arith.constant 0.000000e+00 : f32
    %67 = vector.broadcast %cst_54 : f32 to vector<16x91xf32>
    %68 = tpu.concatenate %0, %65, %64, %63, %10, %26, %42, %66, %67 in 1 : vector<16x8xf32>, vector<16x8xf32>, vector<16x4xf32>, vector<16x4xf32>, vector<16x4xf32>, vector<16x4xf32>, vector<16x4xf32>, vector<16x1xf32>, vector<16x91xf32> -> vector<16x128xf32>
    %c0_55 = arith.constant 0 : index
    %c0_56 = arith.constant 0 : index
    %69 = vector.load %arg11[%c0_55, %c0_56] : memref<16x128xf32, #tpu.memory_space<vmem>>, vector<16x128xf32>
    tpu.vector_store %arg11[%c0_55, %c0_56], %68 {strides = array<i32>} : memref<16x128xf32, #tpu.memory_space<vmem>>, vector<16x128xf32>,
    return
  }
  func.func @transform_0(%arg0: i32) -> (i32, i32) {
    %c0_i32 = arith.constant 0 : i32
    %c0_i32_0 = arith.constant 0 : i32
    return %arg0, %c0_i32 : i32, i32
  }
  func.func @transform_1(%arg0: i32) -> (i32, i32, i32) {
    %c0_i32 = arith.constant 0 : i32
    %c0_i32_0 = arith.constant 0 : i32
    %c0_i32_1 = arith.constant 0 : i32
    return %c0_i32, %arg0, %c0_i32_0 : i32, i32, i32
  }
  func.func @transform_2(%arg0: i32) -> (i32, i32) {
    %c0_i32 = arith.constant 0 : i32
    %c0_i32_0 = arith.constant 0 : i32
    %c0_i32_1 = arith.constant 0 : i32
    return %c0_i32, %c0_i32_0 : i32, i32
  }
  func.func @transform_3(%arg0: i32) -> (i32, i32) {
    %c0_i32 = arith.constant 0 : i32
    %c0_i32_0 = arith.constant 0 : i32
    %c0_i32_1 = arith.constant 0 : i32
    return %c0_i32, %c0_i32_0 : i32, i32
  }
  func.func @transform_4(%arg0: i32) -> (i32, i32) {
    %c0_i32 = arith.constant 0 : i32
    %c0_i32_0 = arith.constant 0 : i32
    return %arg0, %c0_i32 : i32, i32
  }
  func.func @transform_5(%arg0: i32) -> (i32, i32) {
    %c0_i32 = arith.constant 0 : i32
    %c0_i32_0 = arith.constant 0 : i32
    return %arg0, %c0_i32 : i32, i32
  }
  func.func @transform_6(%arg0: i32) -> (i32, i32) {
    %c0_i32 = arith.constant 0 : i32
    %c0_i32_0 = arith.constant 0 : i32
    return %arg0, %c0_i32 : i32, i32
  }
  func.func @transform_7(%arg0: i32) -> (i32, i32, i32) {
    %c0_i32 = arith.constant 0 : i32
    %c0_i32_0 = arith.constant 0 : i32
    %c0_i32_1 = arith.constant 0 : i32
    return %c0_i32, %arg0, %c0_i32_0 : i32, i32, i32
  }
  func.func @transform_8(%arg0: i32) -> (i32, i32, i32) {
    %c0_i32 = arith.constant 0 : i32
    %c0_i32_0 = arith.constant 0 : i32
    %c0_i32_1 = arith.constant 0 : i32
    return %c0_i32, %arg0, %c0_i32_0 : i32, i32, i32
  }
  func.func @transform_9(%arg0: i32) -> (i32, i32, i32) {
    %c0_i32 = arith.constant 0 : i32
    %c0_i32_0 = arith.constant 0 : i32
    %c0_i32_1 = arith.constant 0 : i32
    return %c0_i32, %arg0, %c0_i32_0 : i32, i32, i32
  }
  func.func @transform_10(%arg0: i32) -> (i32, i32) {
    %c0_i32 = arith.constant 0 : i32
    %c0_i32_0 = arith.constant 0 : i32
    return %arg0, %c0_i32 : i32, i32
  }
}

module attributes {stable_mosaic.version = 11 : i64} {
  func.func @kern(%arg0: i32, %arg1: memref<32x6xf32, #tpu.memory_space<vmem>>, %arg2: memref<3x32x2xf32, #tpu.memory_space<vmem>>, %arg3: memref<6x12xf32, #tpu.memory_space<vmem>>, %arg4: memref<2x2xf32, #tpu.memory_space<vmem>>, %arg5: memref<32x6xf32, #tpu.memory_space<vmem>>, %arg6: memref<32x6xf32, #tpu.memory_space<vmem>>, %arg7: memref<3x32x2xf32, #tpu.memory_space<vmem>>, %arg8: memref<32x128xf32, #tpu.memory_space<vmem>>) attributes {dimension_semantics = [#tpu.dimension_semantics<parallel>], iteration_bounds = array<i64: 1>, scalar_prefetch = 0 : i64, scratch_operands = 0 : i64, tpu.core_type = #tpu.core_type<tc>, window_params = [{transform_indices = @transform_0, window_bounds = array<i64: 32, 6>}, {transform_indices = @transform_1, window_bounds = array<i64: 3, 32, 2>}, {pipeline_mode = #tpu.pipeline_mode<synchronous>, transform_indices = @transform_2, window_bounds = array<i64: 6, 12>}, {pipeline_mode = #tpu.pipeline_mode<synchronous>, transform_indices = @transform_3, window_bounds = array<i64: 2, 2>}, {transform_indices = @transform_4, window_bounds = array<i64: 32, 6>}, {transform_indices = @transform_5, window_bounds = array<i64: 32, 6>}, {transform_indices = @transform_6, window_bounds = array<i64: 3, 32, 2>}, {transform_indices = @transform_7, window_bounds = array<i64: 32, 128>}]} {
    %c0 = arith.constant 0 : index
    %c0_0 = arith.constant 0 : index
    %0 = vector.load %arg1[%c0, %c0_0] : memref<32x6xf32, #tpu.memory_space<vmem>>, vector<32x6xf32>
    %c0_1 = arith.constant 0 : index
    %c0_2 = arith.constant 0 : index
    %1 = vector.load %arg3[%c0_1, %c0_2] : memref<6x12xf32, #tpu.memory_space<vmem>>, vector<6x12xf32>
    %cst = arith.constant dense<0.000000e+00> : vector<32x12xf32>
    %2 = tpu.matmul %0, %1, %cst {dimension_numbers = #tpu.dot_dimension_numbers<[1], [0], [0], [1], [0, 0, 1, 1], [], []>} : vector<32x6xf32>, vector<6x12xf32>, vector<32x12xf32> -> vector<32x12xf32>
    %3 = vector.extract_strided_slice %2 {offsets = [0, 0], sizes = [32, 6], strides = [1, 1]} : vector<32x12xf32> to vector<32x6xf32>
    %c0_3 = arith.constant 0 : index
    %c0_4 = arith.constant 0 : index
    %4 = vector.load %arg5[%c0_3, %c0_4] : memref<32x6xf32, #tpu.memory_space<vmem>>, vector<32x6xf32>
    tpu.vector_store %arg5[%c0_3, %c0_4], %3 {strides = array<i32>} : memref<32x6xf32, #tpu.memory_space<vmem>>, vector<32x6xf32>,
    %5 = vector.extract_strided_slice %2 {offsets = [0, 6], sizes = [32, 6], strides = [1, 1]} : vector<32x12xf32> to vector<32x6xf32>
    %c0_5 = arith.constant 0 : index
    %c0_6 = arith.constant 0 : index
    %6 = vector.load %arg6[%c0_5, %c0_6] : memref<32x6xf32, #tpu.memory_space<vmem>>, vector<32x6xf32>
    tpu.vector_store %arg6[%c0_5, %c0_6], %5 {strides = array<i32>} : memref<32x6xf32, #tpu.memory_space<vmem>>, vector<32x6xf32>,
    %c0_7 = arith.constant 0 : index
    %c0_8 = arith.constant 0 : index
    %c0_9 = arith.constant 0 : index
    %7 = vector.load %arg2[%c0_7, %c0_8, %c0_9] : memref<3x32x2xf32, #tpu.memory_space<vmem>>, vector<1x32x2xf32>
    %8 = vector.shape_cast %7 : vector<1x32x2xf32> to vector<32x2xf32>
    %c0_10 = arith.constant 0 : index
    %c0_11 = arith.constant 0 : index
    %9 = vector.load %arg4[%c0_10, %c0_11] : memref<2x2xf32, #tpu.memory_space<vmem>>, vector<2x2xf32>
    %cst_12 = arith.constant dense<0.000000e+00> : vector<32x2xf32>
    %10 = tpu.matmul %8, %9, %cst_12 {dimension_numbers = #tpu.dot_dimension_numbers<[1], [0], [0], [1], [0, 0, 1, 1], [], []>} : vector<32x2xf32>, vector<2x2xf32>, vector<32x2xf32> -> vector<32x2xf32>
    %c0_13 = arith.constant 0 : index
    %c0_14 = arith.constant 0 : index
    %c0_15 = arith.constant 0 : index
    %11 = vector.load %arg7[%c0_13, %c0_14, %c0_15] : memref<3x32x2xf32, #tpu.memory_space<vmem>>, vector<1x32x2xf32>
    %12 = vector.shape_cast %11 : vector<1x32x2xf32> to vector<32x2xf32>
    %13 = vector.shape_cast %10 : vector<32x2xf32> to vector<1x32x2xf32>
    tpu.vector_store %arg7[%c0_13, %c0_14, %c0_15], %13 {strides = array<i32>} : memref<3x32x2xf32, #tpu.memory_space<vmem>>, vector<1x32x2xf32>,
    %c1 = arith.constant 1 : index
    %c0_16 = arith.constant 0 : index
    %c0_17 = arith.constant 0 : index
    %14 = vector.load %arg2[%c1, %c0_16, %c0_17] : memref<3x32x2xf32, #tpu.memory_space<vmem>>, vector<1x32x2xf32>
    %15 = vector.shape_cast %14 : vector<1x32x2xf32> to vector<32x2xf32>
    %c0_18 = arith.constant 0 : index
    %c0_19 = arith.constant 0 : index
    %16 = vector.load %arg4[%c0_18, %c0_19] : memref<2x2xf32, #tpu.memory_space<vmem>>, vector<2x2xf32>
    %cst_20 = arith.constant dense<0.000000e+00> : vector<32x2xf32>
    %17 = tpu.matmul %15, %16, %cst_20 {dimension_numbers = #tpu.dot_dimension_numbers<[1], [0], [0], [1], [0, 0, 1, 1], [], []>} : vector<32x2xf32>, vector<2x2xf32>, vector<32x2xf32> -> vector<32x2xf32>
    %c1_21 = arith.constant 1 : index
    %c0_22 = arith.constant 0 : index
    %c0_23 = arith.constant 0 : index
    %18 = vector.load %arg7[%c1_21, %c0_22, %c0_23] : memref<3x32x2xf32, #tpu.memory_space<vmem>>, vector<1x32x2xf32>
    %19 = vector.shape_cast %18 : vector<1x32x2xf32> to vector<32x2xf32>
    %20 = vector.shape_cast %17 : vector<32x2xf32> to vector<1x32x2xf32>
    tpu.vector_store %arg7[%c1_21, %c0_22, %c0_23], %20 {strides = array<i32>} : memref<3x32x2xf32, #tpu.memory_space<vmem>>, vector<1x32x2xf32>,
    %c2 = arith.constant 2 : index
    %c0_24 = arith.constant 0 : index
    %c0_25 = arith.constant 0 : index
    %21 = vector.load %arg2[%c2, %c0_24, %c0_25] : memref<3x32x2xf32, #tpu.memory_space<vmem>>, vector<1x32x2xf32>
    %22 = vector.shape_cast %21 : vector<1x32x2xf32> to vector<32x2xf32>
    %c0_26 = arith.constant 0 : index
    %c0_27 = arith.constant 0 : index
    %23 = vector.load %arg4[%c0_26, %c0_27] : memref<2x2xf32, #tpu.memory_space<vmem>>, vector<2x2xf32>
    %cst_28 = arith.constant dense<0.000000e+00> : vector<32x2xf32>
    %24 = tpu.matmul %22, %23, %cst_28 {dimension_numbers = #tpu.dot_dimension_numbers<[1], [0], [0], [1], [0, 0, 1, 1], [], []>} : vector<32x2xf32>, vector<2x2xf32>, vector<32x2xf32> -> vector<32x2xf32>
    %c2_29 = arith.constant 2 : index
    %c0_30 = arith.constant 0 : index
    %c0_31 = arith.constant 0 : index
    %25 = vector.load %arg7[%c2_29, %c0_30, %c0_31] : memref<3x32x2xf32, #tpu.memory_space<vmem>>, vector<1x32x2xf32>
    %26 = vector.shape_cast %25 : vector<1x32x2xf32> to vector<32x2xf32>
    %27 = vector.shape_cast %24 : vector<32x2xf32> to vector<1x32x2xf32>
    tpu.vector_store %arg7[%c2_29, %c0_30, %c0_31], %27 {strides = array<i32>} : memref<3x32x2xf32, #tpu.memory_space<vmem>>, vector<1x32x2xf32>,
    %28 = arith.mulf %8, %8 : vector<32x2xf32>
    %29 = arith.mulf %15, %15 : vector<32x2xf32>
    %30 = arith.addf %28, %29 : vector<32x2xf32>
    %31 = arith.mulf %22, %22 : vector<32x2xf32>
    %32 = arith.addf %30, %31 : vector<32x2xf32>
    %cst_32 = arith.constant 9.99999993E-9 : f32
    %33 = vector.broadcast %cst_32 : f32 to vector<32x2xf32>
    %34 = arith.maximumf %32, %33 : vector<32x2xf32>
    %35 = math.sqrt %34 : vector<32x2xf32>
    %36 = arith.mulf %0, %0 : vector<32x6xf32>
    %cst_33 = arith.constant 1.000000e+00 : f32
    %37 = vector.broadcast %cst_33 : f32 to vector<32x1xf32>
    %cst_34 = arith.constant 0.000000e+00 : f32
    %38 = vector.broadcast %cst_34 : f32 to vector<32x105xf32>
    %39 = tpu.concatenate %0, %36, %35, %34, %8, %15, %22, %37, %38 in 1 : vector<32x6xf32>, vector<32x6xf32>, vector<32x2xf32>, vector<32x2xf32>, vector<32x2xf32>, vector<32x2xf32>, vector<32x2xf32>, vector<32x1xf32>, vector<32x105xf32> -> vector<32x128xf32>
    %c0_35 = arith.constant 0 : index
    %c0_36 = arith.constant 0 : index
    %40 = vector.load %arg8[%c0_35, %c0_36] : memref<32x128xf32, #tpu.memory_space<vmem>>, vector<32x128xf32>
    tpu.vector_store %arg8[%c0_35, %c0_36], %39 {strides = array<i32>} : memref<32x128xf32, #tpu.memory_space<vmem>>, vector<32x128xf32>,
    return
  }
  func.func @transform_0(%arg0: i32) -> (i32, i32) {
    %c0_i32 = arith.constant 0 : i32
    %c0_i32_0 = arith.constant 0 : i32
    return %arg0, %c0_i32 : i32, i32
  }
  func.func @transform_1(%arg0: i32) -> (i32, i32, i32) {
    %c0_i32 = arith.constant 0 : i32
    %c0_i32_0 = arith.constant 0 : i32
    %c0_i32_1 = arith.constant 0 : i32
    return %c0_i32, %arg0, %c0_i32_0 : i32, i32, i32
  }
  func.func @transform_2(%arg0: i32) -> (i32, i32) {
    %c0_i32 = arith.constant 0 : i32
    %c0_i32_0 = arith.constant 0 : i32
    %c0_i32_1 = arith.constant 0 : i32
    return %c0_i32, %c0_i32_0 : i32, i32
  }
  func.func @transform_3(%arg0: i32) -> (i32, i32) {
    %c0_i32 = arith.constant 0 : i32
    %c0_i32_0 = arith.constant 0 : i32
    %c0_i32_1 = arith.constant 0 : i32
    return %c0_i32, %c0_i32_0 : i32, i32
  }
  func.func @transform_4(%arg0: i32) -> (i32, i32) {
    %c0_i32 = arith.constant 0 : i32
    %c0_i32_0 = arith.constant 0 : i32
    return %arg0, %c0_i32 : i32, i32
  }
  func.func @transform_5(%arg0: i32) -> (i32, i32) {
    %c0_i32 = arith.constant 0 : i32
    %c0_i32_0 = arith.constant 0 : i32
    return %arg0, %c0_i32 : i32, i32
  }
  func.func @transform_6(%arg0: i32) -> (i32, i32, i32) {
    %c0_i32 = arith.constant 0 : i32
    %c0_i32_0 = arith.constant 0 : i32
    %c0_i32_1 = arith.constant 0 : i32
    return %c0_i32, %arg0, %c0_i32_0 : i32, i32, i32
  }
  func.func @transform_7(%arg0: i32) -> (i32, i32) {
    %c0_i32 = arith.constant 0 : i32
    %c0_i32_0 = arith.constant 0 : i32
    return %arg0, %c0_i32 : i32, i32
  }
}

module attributes {stable_mosaic.version = 11 : i64} {
  func.func @_attn_kernel(%arg0: i32, %arg1: memref<32x8xf32, #tpu.memory_space<vmem>>, %arg2: memref<32x8xf32, #tpu.memory_space<vmem>>, %arg3: memref<32x6xf32, #tpu.memory_space<vmem>>, %arg4: memref<3x32x4xf32, #tpu.memory_space<vmem>>, %arg5: memref<3x32x4xf32, #tpu.memory_space<vmem>>, %arg6: memref<8x128xf32, #tpu.memory_space<vmem>>, %arg7: memref<4x128xf32, #tpu.memory_space<vmem>>, %arg8: memref<6x128xf32, #tpu.memory_space<vmem>>, %arg9: memref<32x128xf32, #tpu.memory_space<vmem>>) attributes {dimension_semantics = [#tpu.dimension_semantics<parallel>], iteration_bounds = array<i64: 1>, scalar_prefetch = 0 : i64, scratch_operands = 0 : i64, tpu.core_type = #tpu.core_type<tc>, window_params = [{transform_indices = @transform_0, window_bounds = array<i64: 32, 8>}, {transform_indices = @transform_1, window_bounds = array<i64: 32, 8>}, {transform_indices = @transform_2, window_bounds = array<i64: 32, 6>}, {transform_indices = @transform_3, window_bounds = array<i64: 3, 32, 4>}, {transform_indices = @transform_4, window_bounds = array<i64: 3, 32, 4>}, {pipeline_mode = #tpu.pipeline_mode<synchronous>, transform_indices = @transform_5, window_bounds = array<i64: 8, 128>}, {pipeline_mode = #tpu.pipeline_mode<synchronous>, transform_indices = @transform_6, window_bounds = array<i64: 4, 128>}, {pipeline_mode = #tpu.pipeline_mode<synchronous>, transform_indices = @transform_7, window_bounds = array<i64: 6, 128>}, {transform_indices = @transform_8, window_bounds = array<i64: 32, 128>}]} {
    %c0 = arith.constant 0 : index
    %c0_0 = arith.constant 0 : index
    %0 = vector.load %arg1[%c0, %c0_0] : memref<32x8xf32, #tpu.memory_space<vmem>>, vector<32x8xf32>
    %c0_1 = arith.constant 0 : index
    %c0_2 = arith.constant 0 : index
    %1 = vector.load %arg2[%c0_1, %c0_2] : memref<32x8xf32, #tpu.memory_space<vmem>>, vector<32x8xf32>
    %2 = arith.mulf %0, %1 : vector<32x8xf32>
    %c0_3 = arith.constant 0 : index
    %c0_4 = arith.constant 0 : index
    %c0_5 = arith.constant 0 : index
    %3 = vector.load %arg4[%c0_3, %c0_4, %c0_5] : memref<3x32x4xf32, #tpu.memory_space<vmem>>, vector<1x32x4xf32>
    %4 = vector.shape_cast %3 : vector<1x32x4xf32> to vector<32x4xf32>
    %c0_6 = arith.constant 0 : index
    %c0_7 = arith.constant 0 : index
    %c0_8 = arith.constant 0 : index
    %5 = vector.load %arg5[%c0_6, %c0_7, %c0_8] : memref<3x32x4xf32, #tpu.memory_space<vmem>>, vector<1x32x4xf32>
    %6 = vector.shape_cast %5 : vector<1x32x4xf32> to vector<32x4xf32>
    %7 = arith.mulf %4, %6 : vector<32x4xf32>
    %c1 = arith.constant 1 : index
    %c0_9 = arith.constant 0 : index
    %c0_10 = arith.constant 0 : index
    %8 = vector.load %arg4[%c1, %c0_9, %c0_10] : memref<3x32x4xf32, #tpu.memory_space<vmem>>, vector<1x32x4xf32>
    %9 = vector.shape_cast %8 : vector<1x32x4xf32> to vector<32x4xf32>
    %c1_11 = arith.constant 1 : index
    %c0_12 = arith.constant 0 : index
    %c0_13 = arith.constant 0 : index
    %10 = vector.load %arg5[%c1_11, %c0_12, %c0_13] : memref<3x32x4xf32, #tpu.memory_space<vmem>>, vector<1x32x4xf32>
    %11 = vector.shape_cast %10 : vector<1x32x4xf32> to vector<32x4xf32>
    %12 = arith.mulf %9, %11 : vector<32x4xf32>
    %13 = arith.addf %7, %12 : vector<32x4xf32>
    %c2 = arith.constant 2 : index
    %c0_14 = arith.constant 0 : index
    %c0_15 = arith.constant 0 : index
    %14 = vector.load %arg4[%c2, %c0_14, %c0_15] : memref<3x32x4xf32, #tpu.memory_space<vmem>>, vector<1x32x4xf32>
    %15 = vector.shape_cast %14 : vector<1x32x4xf32> to vector<32x4xf32>
    %c2_16 = arith.constant 2 : index
    %c0_17 = arith.constant 0 : index
    %c0_18 = arith.constant 0 : index
    %16 = vector.load %arg5[%c2_16, %c0_17, %c0_18] : memref<3x32x4xf32, #tpu.memory_space<vmem>>, vector<1x32x4xf32>
    %17 = vector.shape_cast %16 : vector<1x32x4xf32> to vector<32x4xf32>
    %18 = arith.mulf %15, %17 : vector<32x4xf32>
    %19 = arith.addf %13, %18 : vector<32x4xf32>
    %c0_19 = arith.constant 0 : index
    %c0_20 = arith.constant 0 : index
    %20 = vector.load %arg6[%c0_19, %c0_20] : memref<8x128xf32, #tpu.memory_space<vmem>>, vector<8x128xf32>
    %cst = arith.constant dense<0.000000e+00> : vector<32x128xf32>
    %21 = tpu.matmul %2, %20, %cst {dimension_numbers = #tpu.dot_dimension_numbers<[1], [0], [0], [1], [0, 0, 1, 1], [], []>} : vector<32x8xf32>, vector<8x128xf32>, vector<32x128xf32> -> vector<32x128xf32>
    %c0_21 = arith.constant 0 : index
    %c0_22 = arith.constant 0 : index
    %22 = vector.load %arg7[%c0_21, %c0_22] : memref<4x128xf32, #tpu.memory_space<vmem>>, vector<4x128xf32>
    %cst_23 = arith.constant dense<0.000000e+00> : vector<32x128xf32>
    %23 = tpu.matmul %19, %22, %cst_23 {dimension_numbers = #tpu.dot_dimension_numbers<[1], [0], [0], [1], [0, 0, 1, 1], [], []>} : vector<32x4xf32>, vector<4x128xf32>, vector<32x128xf32> -> vector<32x128xf32>
    %24 = arith.addf %21, %23 : vector<32x128xf32>
    %c0_24 = arith.constant 0 : index
    %c0_25 = arith.constant 0 : index
    %25 = vector.load %arg3[%c0_24, %c0_25] : memref<32x6xf32, #tpu.memory_space<vmem>>, vector<32x6xf32>
    %c0_26 = arith.constant 0 : index
    %c0_27 = arith.constant 0 : index
    %26 = vector.load %arg8[%c0_26, %c0_27] : memref<6x128xf32, #tpu.memory_space<vmem>>, vector<6x128xf32>
    %cst_28 = arith.constant dense<0.000000e+00> : vector<32x128xf32>
    %27 = tpu.matmul %25, %26, %cst_28 {dimension_numbers = #tpu.dot_dimension_numbers<[1], [0], [0], [1], [0, 0, 1, 1], [], []>} : vector<32x6xf32>, vector<6x128xf32>, vector<32x128xf32> -> vector<32x128xf32>
    %28 = arith.addf %24, %27 : vector<32x128xf32>
    %c0_29 = arith.constant 0 : index
    %c0_30 = arith.constant 0 : index
    %29 = vector.load %arg9[%c0_29, %c0_30] : memref<32x128xf32, #tpu.memory_space<vmem>>, vector<32x128xf32>
    tpu.vector_store %arg9[%c0_29, %c0_30], %28 {strides = array<i32>} : memref<32x128xf32, #tpu.memory_space<vmem>>, vector<32x128xf32>,
    return
  }
  func.func @transform_0(%arg0: i32) -> (i32, i32) {
    %c0_i32 = arith.constant 0 : i32
    %c0_i32_0 = arith.constant 0 : i32
    return %arg0, %c0_i32 : i32, i32
  }
  func.func @transform_1(%arg0: i32) -> (i32, i32) {
    %c0_i32 = arith.constant 0 : i32
    %c0_i32_0 = arith.constant 0 : i32
    return %arg0, %c0_i32 : i32, i32
  }
  func.func @transform_2(%arg0: i32) -> (i32, i32) {
    %c0_i32 = arith.constant 0 : i32
    %c0_i32_0 = arith.constant 0 : i32
    return %arg0, %c0_i32 : i32, i32
  }
  func.func @transform_3(%arg0: i32) -> (i32, i32, i32) {
    %c0_i32 = arith.constant 0 : i32
    %c0_i32_0 = arith.constant 0 : i32
    %c0_i32_1 = arith.constant 0 : i32
    return %c0_i32, %arg0, %c0_i32_0 : i32, i32, i32
  }
  func.func @transform_4(%arg0: i32) -> (i32, i32, i32) {
    %c0_i32 = arith.constant 0 : i32
    %c0_i32_0 = arith.constant 0 : i32
    %c0_i32_1 = arith.constant 0 : i32
    return %c0_i32, %arg0, %c0_i32_0 : i32, i32, i32
  }
  func.func @transform_5(%arg0: i32) -> (i32, i32) {
    %c0_i32 = arith.constant 0 : i32
    %c0_i32_0 = arith.constant 0 : i32
    %c0_i32_1 = arith.constant 0 : i32
    return %c0_i32, %c0_i32_0 : i32, i32
  }
  func.func @transform_6(%arg0: i32) -> (i32, i32) {
    %c0_i32 = arith.constant 0 : i32
    %c0_i32_0 = arith.constant 0 : i32
    %c0_i32_1 = arith.constant 0 : i32
    return %c0_i32, %c0_i32_0 : i32, i32
  }
  func.func @transform_7(%arg0: i32) -> (i32, i32) {
    %c0_i32 = arith.constant 0 : i32
    %c0_i32_0 = arith.constant 0 : i32
    %c0_i32_1 = arith.constant 0 : i32
    return %c0_i32, %c0_i32_0 : i32, i32
  }
  func.func @transform_8(%arg0: i32) -> (i32, i32) {
    %c0_i32 = arith.constant 0 : i32
    %c0_i32_0 = arith.constant 0 : i32
    return %arg0, %c0_i32 : i32, i32
  }
}

module attributes {stable_mosaic.version = 11 : i64} {
  func.func @kern(%arg0: i32, %arg1: memref<32x2xf32, #tpu.memory_space<vmem>>, %arg2: memref<32x8xf32, #tpu.memory_space<vmem>>, %arg3: memref<32x6xf32, #tpu.memory_space<vmem>>, %arg4: memref<3x32x4xf32, #tpu.memory_space<vmem>>, %arg5: memref<3x32x2xf32, #tpu.memory_space<vmem>>, %arg6: memref<2x20xf32, #tpu.memory_space<vmem>>, %arg7: memref<4x6xf32, #tpu.memory_space<vmem>>, %arg8: memref<2x6xf32, #tpu.memory_space<vmem>>, %arg9: memref<8x14xf32, #tpu.memory_space<vmem>>, %arg10: memref<6x14xf32, #tpu.memory_space<vmem>>, %arg11: memref<6x14xf32, #tpu.memory_space<vmem>>, %arg12: memref<1x14xf32, #tpu.memory_space<vmem>>, %arg13: memref<6x6xf32, #tpu.memory_space<vmem>>, %arg14: memref<32x128xf32, #tpu.memory_space<vmem>>) attributes {dimension_semantics = [#tpu.dimension_semantics<parallel>], iteration_bounds = array<i64: 1>, scalar_prefetch = 0 : i64, scratch_operands = 0 : i64, tpu.core_type = #tpu.core_type<tc>, window_params = [{transform_indices = @transform_0, window_bounds = array<i64: 32, 2>}, {transform_indices = @transform_1, window_bounds = array<i64: 32, 8>}, {transform_indices = @transform_2, window_bounds = array<i64: 32, 6>}, {transform_indices = @transform_3, window_bounds = array<i64: 3, 32, 4>}, {transform_indices = @transform_4, window_bounds = array<i64: 3, 32, 2>}, {pipeline_mode = #tpu.pipeline_mode<synchronous>, transform_indices = @transform_5, window_bounds = array<i64: 2, 20>}, {pipeline_mode = #tpu.pipeline_mode<synchronous>, transform_indices = @transform_6, window_bounds = array<i64: 4, 6>}, {pipeline_mode = #tpu.pipeline_mode<synchronous>, transform_indices = @transform_7, window_bounds = array<i64: 2, 6>}, {pipeline_mode = #tpu.pipeline_mode<synchronous>, transform_indices = @transform_8, window_bounds = array<i64: 8, 14>}, {pipeline_mode = #tpu.pipeline_mode<synchronous>, transform_indices = @transform_9, window_bounds = array<i64: 6, 14>}, {pipeline_mode = #tpu.pipeline_mode<synchronous>, transform_indices = @transform_10, window_bounds = array<i64: 6, 14>}, {pipeline_mode = #tpu.pipeline_mode<synchronous>, transform_indices = @transform_11, window_bounds = array<i64: 1, 14>}, {pipeline_mode = #tpu.pipeline_mode<synchronous>, transform_indices = @transform_12, window_bounds = array<i64: 6, 6>}, {transform_indices = @transform_13, window_bounds = array<i64: 32, 128>}]} {
    %c0 = arith.constant 0 : index
    %c0_0 = arith.constant 0 : index
    %0 = vector.load %arg1[%c0, %c0_0] : memref<32x2xf32, #tpu.memory_space<vmem>>, vector<32x2xf32>
    %c0_1 = arith.constant 0 : index
    %c0_2 = arith.constant 0 : index
    %1 = vector.load %arg6[%c0_1, %c0_2] : memref<2x20xf32, #tpu.memory_space<vmem>>, vector<2x20xf32>
    %cst = arith.constant dense<0.000000e+00> : vector<32x20xf32>
    %2 = tpu.matmul %0, %1, %cst {dimension_numbers = #tpu.dot_dimension_numbers<[1], [0], [0], [1], [0, 0, 1, 1], [], []>} : vector<32x2xf32>, vector<2x20xf32>, vector<32x20xf32> -> vector<32x20xf32>
    %3 = vector.extract_strided_slice %2 {offsets = [0, 0], sizes = [32, 8], strides = [1, 1]} : vector<32x20xf32> to vector<32x8xf32>
    %4 = vector.extract_strided_slice %2 {offsets = [0, 8], sizes = [32, 6], strides = [1, 1]} : vector<32x20xf32> to vector<32x6xf32>
    %5 = vector.extract_strided_slice %2 {offsets = [0, 14], sizes = [32, 4], strides = [1, 1]} : vector<32x20xf32> to vector<32x4xf32>
    %6 = vector.extract_strided_slice %2 {offsets = [0, 18], sizes = [32, 2], strides = [1, 1]} : vector<32x20xf32> to vector<32x2xf32>
    %c0_3 = arith.constant 0 : index
    %c0_4 = arith.constant 0 : index
    %7 = vector.load %arg2[%c0_3, %c0_4] : memref<32x8xf32, #tpu.memory_space<vmem>>, vector<32x8xf32>
    %8 = arith.mulf %7, %3 : vector<32x8xf32>
    %c0_5 = arith.constant 0 : index
    %c0_6 = arith.constant 0 : index
    %9 = vector.load %arg3[%c0_5, %c0_6] : memref<32x6xf32, #tpu.memory_space<vmem>>, vector<32x6xf32>
    %10 = arith.mulf %9, %4 : vector<32x6xf32>
    %c0_7 = arith.constant 0 : index
    %c0_8 = arith.constant 0 : index
    %c0_9 = arith.constant 0 : index
    %11 = vector.load %arg4[%c0_7, %c0_8, %c0_9] : memref<3x32x4xf32, #tpu.memory_space<vmem>>, vector<1x32x4xf32>
    %12 = vector.shape_cast %11 : vector<1x32x4xf32> to vector<32x4xf32>
    %13 = arith.mulf %12, %5 : vector<32x4xf32>
    %c0_10 = arith.constant 0 : index
    %c0_11 = arith.constant 0 : index
    %14 = vector.load %arg7[%c0_10, %c0_11] : memref<4x6xf32, #tpu.memory_space<vmem>>, vector<4x6xf32>
    %cst_12 = arith.constant dense<0.000000e+00> : vector<32x6xf32>
    %15 = tpu.matmul %13, %14, %cst_12 {dimension_numbers = #tpu.dot_dimension_numbers<[1], [0], [0], [1], [0, 0, 1, 1], [], []>} : vector<32x4xf32>, vector<4x6xf32>, vector<32x6xf32> -> vector<32x6xf32>
    %c0_13 = arith.constant 0 : index
    %c0_14 = arith.constant 0 : index
    %c0_15 = arith.constant 0 : index
    %16 = vector.load %arg5[%c0_13, %c0_14, %c0_15] : memref<3x32x2xf32, #tpu.memory_space<vmem>>, vector<1x32x2xf32>
    %17 = vector.shape_cast %16 : vector<1x32x2xf32> to vector<32x2xf32>
    %18 = arith.mulf %17, %6 : vector<32x2xf32>
    %c0_16 = arith.constant 0 : index
    %c0_17 = arith.constant 0 : index
    %19 = vector.load %arg8[%c0_16, %c0_17] : memref<2x6xf32, #tpu.memory_space<vmem>>, vector<2x6xf32>
    %cst_18 = arith.constant dense<0.000000e+00> : vector<32x6xf32>
    %20 = tpu.matmul %18, %19, %cst_18 {dimension_numbers = #tpu.dot_dimension_numbers<[1], [0], [0], [1], [0, 0, 1, 1], [], []>} : vector<32x2xf32>, vector<2x6xf32>, vector<32x6xf32> -> vector<32x6xf32>
    %21 = arith.addf %15, %20 : vector<32x6xf32>
    %c1 = arith.constant 1 : index
    %c0_19 = arith.constant 0 : index
    %c0_20 = arith.constant 0 : index
    %22 = vector.load %arg4[%c1, %c0_19, %c0_20] : memref<3x32x4xf32, #tpu.memory_space<vmem>>, vector<1x32x4xf32>
    %23 = vector.shape_cast %22 : vector<1x32x4xf32> to vector<32x4xf32>
    %24 = arith.mulf %23, %5 : vector<32x4xf32>
    %c0_21 = arith.constant 0 : index
    %c0_22 = arith.constant 0 : index
    %25 = vector.load %arg7[%c0_21, %c0_22] : memref<4x6xf32, #tpu.memory_space<vmem>>, vector<4x6xf32>
    %cst_23 = arith.constant dense<0.000000e+00> : vector<32x6xf32>
    %26 = tpu.matmul %24, %25, %cst_23 {dimension_numbers = #tpu.dot_dimension_numbers<[1], [0], [0], [1], [0, 0, 1, 1], [], []>} : vector<32x4xf32>, vector<4x6xf32>, vector<32x6xf32> -> vector<32x6xf32>
    %c1_24 = arith.constant 1 : index
    %c0_25 = arith.constant 0 : index
    %c0_26 = arith.constant 0 : index
    %27 = vector.load %arg5[%c1_24, %c0_25, %c0_26] : memref<3x32x2xf32, #tpu.memory_space<vmem>>, vector<1x32x2xf32>
    %28 = vector.shape_cast %27 : vector<1x32x2xf32> to vector<32x2xf32>
    %29 = arith.mulf %28, %6 : vector<32x2xf32>
    %c0_27 = arith.constant 0 : index
    %c0_28 = arith.constant 0 : index
    %30 = vector.load %arg8[%c0_27, %c0_28] : memref<2x6xf32, #tpu.memory_space<vmem>>, vector<2x6xf32>
    %cst_29 = arith.constant dense<0.000000e+00> : vector<32x6xf32>
    %31 = tpu.matmul %29, %30, %cst_29 {dimension_numbers = #tpu.dot_dimension_numbers<[1], [0], [0], [1], [0, 0, 1, 1], [], []>} : vector<32x2xf32>, vector<2x6xf32>, vector<32x6xf32> -> vector<32x6xf32>
    %32 = arith.addf %26, %31 : vector<32x6xf32>
    %c2 = arith.constant 2 : index
    %c0_30 = arith.constant 0 : index
    %c0_31 = arith.constant 0 : index
    %33 = vector.load %arg4[%c2, %c0_30, %c0_31] : memref<3x32x4xf32, #tpu.memory_space<vmem>>, vector<1x32x4xf32>
    %34 = vector.shape_cast %33 : vector<1x32x4xf32> to vector<32x4xf32>
    %35 = arith.mulf %34, %5 : vector<32x4xf32>
    %c0_32 = arith.constant 0 : index
    %c0_33 = arith.constant 0 : index
    %36 = vector.load %arg7[%c0_32, %c0_33] : memref<4x6xf32, #tpu.memory_space<vmem>>, vector<4x6xf32>
    %cst_34 = arith.constant dense<0.000000e+00> : vector<32x6xf32>
    %37 = tpu.matmul %35, %36, %cst_34 {dimension_numbers = #tpu.dot_dimension_numbers<[1], [0], [0], [1], [0, 0, 1, 1], [], []>} : vector<32x4xf32>, vector<4x6xf32>, vector<32x6xf32> -> vector<32x6xf32>
    %c2_35 = arith.constant 2 : index
    %c0_36 = arith.constant 0 : index
    %c0_37 = arith.constant 0 : index
    %38 = vector.load %arg5[%c2_35, %c0_36, %c0_37] : memref<3x32x2xf32, #tpu.memory_space<vmem>>, vector<1x32x2xf32>
    %39 = vector.shape_cast %38 : vector<1x32x2xf32> to vector<32x2xf32>
    %40 = arith.mulf %39, %6 : vector<32x2xf32>
    %c0_38 = arith.constant 0 : index
    %c0_39 = arith.constant 0 : index
    %41 = vector.load %arg8[%c0_38, %c0_39] : memref<2x6xf32, #tpu.memory_space<vmem>>, vector<2x6xf32>
    %cst_40 = arith.constant dense<0.000000e+00> : vector<32x6xf32>
    %42 = tpu.matmul %40, %41, %cst_40 {dimension_numbers = #tpu.dot_dimension_numbers<[1], [0], [0], [1], [0, 0, 1, 1], [], []>} : vector<32x2xf32>, vector<2x6xf32>, vector<32x6xf32> -> vector<32x6xf32>
    %43 = arith.addf %37, %42 : vector<32x6xf32>
    %44 = arith.mulf %21, %21 : vector<32x6xf32>
    %45 = arith.mulf %32, %32 : vector<32x6xf32>
    %46 = arith.addf %44, %45 : vector<32x6xf32>
    %47 = arith.mulf %43, %43 : vector<32x6xf32>
    %48 = arith.addf %46, %47 : vector<32x6xf32>
    %cst_41 = arith.constant 9.99999993E-9 : f32
    %49 = vector.broadcast %cst_41 : f32 to vector<32x6xf32>
    %50 = arith.maximumf %48, %49 : vector<32x6xf32>
    %51 = math.sqrt %50 : vector<32x6xf32>
    %c0_42 = arith.constant 0 : index
    %c0_43 = arith.constant 0 : index
    %52 = vector.load %arg9[%c0_42, %c0_43] : memref<8x14xf32, #tpu.memory_space<vmem>>, vector<8x14xf32>
    %cst_44 = arith.constant dense<0.000000e+00> : vector<32x14xf32>
    %53 = tpu.matmul %8, %52, %cst_44 {dimension_numbers = #tpu.dot_dimension_numbers<[1], [0], [0], [1], [0, 0, 1, 1], [], []>} : vector<32x8xf32>, vector<8x14xf32>, vector<32x14xf32> -> vector<32x14xf32>
    %c0_45 = arith.constant 0 : index
    %c0_46 = arith.constant 0 : index
    %54 = vector.load %arg10[%c0_45, %c0_46] : memref<6x14xf32, #tpu.memory_space<vmem>>, vector<6x14xf32>
    %cst_47 = arith.constant dense<0.000000e+00> : vector<32x14xf32>
    %55 = tpu.matmul %10, %54, %cst_47 {dimension_numbers = #tpu.dot_dimension_numbers<[1], [0], [0], [1], [0, 0, 1, 1], [], []>} : vector<32x6xf32>, vector<6x14xf32>, vector<32x14xf32> -> vector<32x14xf32>
    %56 = arith.addf %53, %55 : vector<32x14xf32>
    %c0_48 = arith.constant 0 : index
    %c0_49 = arith.constant 0 : index
    %57 = vector.load %arg11[%c0_48, %c0_49] : memref<6x14xf32, #tpu.memory_space<vmem>>, vector<6x14xf32>
    %cst_50 = arith.constant dense<0.000000e+00> : vector<32x14xf32>
    %58 = tpu.matmul %51, %57, %cst_50 {dimension_numbers = #tpu.dot_dimension_numbers<[1], [0], [0], [1], [0, 0, 1, 1], [], []>} : vector<32x6xf32>, vector<6x14xf32>, vector<32x14xf32> -> vector<32x14xf32>
    %59 = arith.addf %56, %58 : vector<32x14xf32>
    %c0_51 = arith.constant 0 : index
    %c0_52 = arith.constant 0 : index
    %60 = vector.load %arg12[%c0_51, %c0_52] : memref<1x14xf32, #tpu.memory_space<vmem>>, vector<1x14xf32>
    %61 = vector.broadcast %60 : vector<1x14xf32> to vector<32x14xf32>
    %62 = arith.addf %59, %61 : vector<32x14xf32>
    %c0_53 = arith.constant 0 : index
    %c0_54 = arith.constant 0 : index
    %63 = vector.load %arg13[%c0_53, %c0_54] : memref<6x6xf32, #tpu.memory_space<vmem>>, vector<6x6xf32>
    %cst_55 = arith.constant dense<0.000000e+00> : vector<32x6xf32>
    %64 = tpu.matmul %21, %63, %cst_55 {dimension_numbers = #tpu.dot_dimension_numbers<[1], [0], [0], [1], [0, 0, 1, 1], [], []>} : vector<32x6xf32>, vector<6x6xf32>, vector<32x6xf32> -> vector<32x6xf32>
    %c0_56 = arith.constant 0 : index
    %c0_57 = arith.constant 0 : index
    %65 = vector.load %arg13[%c0_56, %c0_57] : memref<6x6xf32, #tpu.memory_space<vmem>>, vector<6x6xf32>
    %cst_58 = arith.constant dense<0.000000e+00> : vector<32x6xf32>
    %66 = tpu.matmul %32, %65, %cst_58 {dimension_numbers = #tpu.dot_dimension_numbers<[1], [0], [0], [1], [0, 0, 1, 1], [], []>} : vector<32x6xf32>, vector<6x6xf32>, vector<32x6xf32> -> vector<32x6xf32>
    %c0_59 = arith.constant 0 : index
    %c0_60 = arith.constant 0 : index
    %67 = vector.load %arg13[%c0_59, %c0_60] : memref<6x6xf32, #tpu.memory_space<vmem>>, vector<6x6xf32>
    %cst_61 = arith.constant dense<0.000000e+00> : vector<32x6xf32>
    %68 = tpu.matmul %43, %67, %cst_61 {dimension_numbers = #tpu.dot_dimension_numbers<[1], [0], [0], [1], [0, 0, 1, 1], [], []>} : vector<32x6xf32>, vector<6x6xf32>, vector<32x6xf32> -> vector<32x6xf32>
    %cst_62 = arith.constant 1.000000e+00 : f32
    %69 = vector.broadcast %cst_62 : f32 to vector<32x1xf32>
    %cst_63 = arith.constant 0.000000e+00 : f32
    %70 = vector.broadcast %cst_63 : f32 to vector<32x95xf32>
    %71 = tpu.concatenate %62, %64, %66, %68, %69, %70 in 1 : vector<32x14xf32>, vector<32x6xf32>, vector<32x6xf32>, vector<32x6xf32>, vector<32x1xf32>, vector<32x95xf32> -> vector<32x128xf32>
    %c0_64 = arith.constant 0 : index
    %c0_65 = arith.constant 0 : index
    %72 = vector.load %arg14[%c0_64, %c0_65] : memref<32x128xf32, #tpu.memory_space<vmem>>, vector<32x128xf32>
    tpu.vector_store %arg14[%c0_64, %c0_65], %71 {strides = array<i32>} : memref<32x128xf32, #tpu.memory_space<vmem>>, vector<32x128xf32>,
    return
  }
  func.func @transform_0(%arg0: i32) -> (i32, i32) {
    %c0_i32 = arith.constant 0 : i32
    %c0_i32_0 = arith.constant 0 : i32
    return %arg0, %c0_i32 : i32, i32
  }
  func.func @transform_1(%arg0: i32) -> (i32, i32) {
    %c0_i32 = arith.constant 0 : i32
    %c0_i32_0 = arith.constant 0 : i32
    return %arg0, %c0_i32 : i32, i32
  }
  func.func @transform_2(%arg0: i32) -> (i32, i32) {
    %c0_i32 = arith.constant 0 : i32
    %c0_i32_0 = arith.constant 0 : i32
    return %arg0, %c0_i32 : i32, i32
  }
  func.func @transform_3(%arg0: i32) -> (i32, i32, i32) {
    %c0_i32 = arith.constant 0 : i32
    %c0_i32_0 = arith.constant 0 : i32
    %c0_i32_1 = arith.constant 0 : i32
    return %c0_i32, %arg0, %c0_i32_0 : i32, i32, i32
  }
  func.func @transform_4(%arg0: i32) -> (i32, i32, i32) {
    %c0_i32 = arith.constant 0 : i32
    %c0_i32_0 = arith.constant 0 : i32
    %c0_i32_1 = arith.constant 0 : i32
    return %c0_i32, %arg0, %c0_i32_0 : i32, i32, i32
  }
  func.func @transform_5(%arg0: i32) -> (i32, i32) {
    %c0_i32 = arith.constant 0 : i32
    %c0_i32_0 = arith.constant 0 : i32
    %c0_i32_1 = arith.constant 0 : i32
    return %c0_i32, %c0_i32_0 : i32, i32
  }
  func.func @transform_6(%arg0: i32) -> (i32, i32) {
    %c0_i32 = arith.constant 0 : i32
    %c0_i32_0 = arith.constant 0 : i32
    %c0_i32_1 = arith.constant 0 : i32
    return %c0_i32, %c0_i32_0 : i32, i32
  }
  func.func @transform_7(%arg0: i32) -> (i32, i32) {
    %c0_i32 = arith.constant 0 : i32
    %c0_i32_0 = arith.constant 0 : i32
    %c0_i32_1 = arith.constant 0 : i32
    return %c0_i32, %c0_i32_0 : i32, i32
  }
  func.func @transform_8(%arg0: i32) -> (i32, i32) {
    %c0_i32 = arith.constant 0 : i32
    %c0_i32_0 = arith.constant 0 : i32
    %c0_i32_1 = arith.constant 0 : i32
    return %c0_i32, %c0_i32_0 : i32, i32
  }
  func.func @transform_9(%arg0: i32) -> (i32, i32) {
    %c0_i32 = arith.constant 0 : i32
    %c0_i32_0 = arith.constant 0 : i32
    %c0_i32_1 = arith.constant 0 : i32
    return %c0_i32, %c0_i32_0 : i32, i32
  }
  func.func @transform_10(%arg0: i32) -> (i32, i32) {
    %c0_i32 = arith.constant 0 : i32
    %c0_i32_0 = arith.constant 0 : i32
    %c0_i32_1 = arith.constant 0 : i32
    return %c0_i32, %c0_i32_0 : i32, i32
  }
  func.func @transform_11(%arg0: i32) -> (i32, i32) {
    %c0_i32 = arith.constant 0 : i32
    %c0_i32_0 = arith.constant 0 : i32
    %c0_i32_1 = arith.constant 0 : i32
    return %c0_i32, %c0_i32_0 : i32, i32
  }
  func.func @transform_12(%arg0: i32) -> (i32, i32) {
    %c0_i32 = arith.constant 0 : i32
    %c0_i32_0 = arith.constant 0 : i32
    %c0_i32_1 = arith.constant 0 : i32
    return %c0_i32, %c0_i32_0 : i32, i32
  }
  func.func @transform_13(%arg0: i32) -> (i32, i32) {
    %c0_i32 = arith.constant 0 : i32
    %c0_i32_0 = arith.constant 0 : i32
    return %arg0, %c0_i32 : i32, i32
  }
}

module attributes {stable_mosaic.version = 11 : i64} {
  func.func @_seg_sum_kernel(%arg0: i32, %arg1: i32, %arg2: memref<1x128xi32, #tpu.memory_space<vmem>>, %arg3: memref<128x128xf32, #tpu.memory_space<vmem>>, %arg4: memref<16x128xf32, #tpu.memory_space<vmem>>, %arg5: memref<16x128xf32, #tpu.memory_space<vmem>>) attributes {dimension_semantics = [#tpu.dimension_semantics<parallel>, #tpu.dimension_semantics<arbitrary>], iteration_bounds = array<i64: 1, 1>, scalar_prefetch = 0 : i64, scratch_operands = 1 : i64, tpu.core_type = #tpu.core_type<tc>, window_params = [{transform_indices = @transform_0, window_bounds = array<i64: 1, 128>}, {transform_indices = @transform_1, window_bounds = array<i64: 128, 128>}, {transform_indices = @transform_2, window_bounds = array<i64: 16, 128>}]} {
    %c0_i32 = arith.constant 0 : i32
    %0 = arith.cmpi eq, %arg1, %c0_i32 : i32
    %1 = arith.extui %0 : i1 to i32
    %c0_i32_0 = arith.constant 0 : i32
    %2 = arith.cmpi ne, %1, %c0_i32_0 : i32
    scf.if %2 {
      %cst_10 = arith.constant 0.000000e+00 : f32
      %20 = vector.broadcast %cst_10 : f32 to vector<16x128xf32>
      %c0_11 = arith.constant 0 : index
      %c0_12 = arith.constant 0 : index
      %21 = vector.load %arg5[%c0_11, %c0_12] : memref<16x128xf32, #tpu.memory_space<vmem>>, vector<16x128xf32>
      tpu.vector_store %arg5[%c0_11, %c0_12], %20 {strides = array<i32>} : memref<16x128xf32, #tpu.memory_space<vmem>>, vector<16x128xf32>,
    } else {
    }
    %3 = tpu.iota {dimensions = array<i32: 0>} : vector<16x128xi32>
    %c16_i32 = arith.constant 16 : i32
    %4 = arith.muli %arg0, %c16_i32 : i32
    %5 = vector.broadcast %4 : i32 to vector<16x128xi32>
    %6 = arith.addi %3, %5 : vector<16x128xi32>
    %c0 = arith.constant 0 : index
    %c0_1 = arith.constant 0 : index
    %7 = vector.load %arg2[%c0, %c0_1] : memref<1x128xi32, #tpu.memory_space<vmem>>, vector<1x128xi32>
    %8 = vector.broadcast %7 : vector<1x128xi32> to vector<16x128xi32>
    %9 = arith.cmpi eq, %6, %8 : vector<16x128xi32>
    %10 = arith.extui %9 : vector<16x128xi1> to vector<16x128xi32>
    %11 = arith.sitofp %10 : vector<16x128xi32> to vector<16x128xf32>
    %c0_2 = arith.constant 0 : index
    %c0_3 = arith.constant 0 : index
    %12 = vector.load %arg5[%c0_2, %c0_3] : memref<16x128xf32, #tpu.memory_space<vmem>>, vector<16x128xf32>
    %c0_4 = arith.constant 0 : index
    %c0_5 = arith.constant 0 : index
    %13 = vector.load %arg3[%c0_4, %c0_5] : memref<128x128xf32, #tpu.memory_space<vmem>>, vector<128x128xf32>
    %cst = arith.constant dense<0.000000e+00> : vector<16x128xf32>
    %14 = tpu.matmul %11, %13, %cst {dimension_numbers = #tpu.dot_dimension_numbers<[1], [0], [0], [1], [0, 0, 1, 1], [], []>} : vector<16x128xf32>, vector<128x128xf32>, vector<16x128xf32> -> vector<16x128xf32>
    %15 = arith.addf %12, %14 : vector<16x128xf32>
    %c0_6 = arith.constant 0 : index
    %c0_7 = arith.constant 0 : index
    %16 = vector.load %arg5[%c0_6, %c0_7] : memref<16x128xf32, #tpu.memory_space<vmem>>, vector<16x128xf32>
    tpu.vector_store %arg5[%c0_6, %c0_7], %15 {strides = array<i32>} : memref<16x128xf32, #tpu.memory_space<vmem>>, vector<16x128xf32>,
    %c0_i32_8 = arith.constant 0 : i32
    %17 = arith.cmpi eq, %arg1, %c0_i32_8 : i32
    %18 = arith.extui %17 : i1 to i32
    %c0_i32_9 = arith.constant 0 : i32
    %19 = arith.cmpi ne, %18, %c0_i32_9 : i32
    scf.if %19 {
      %c0_10 = arith.constant 0 : index
      %c0_11 = arith.constant 0 : index
      %20 = vector.load %arg5[%c0_10, %c0_11] : memref<16x128xf32, #tpu.memory_space<vmem>>, vector<16x128xf32>
      %c0_12 = arith.constant 0 : index
      %c0_13 = arith.constant 0 : index
      %21 = vector.load %arg4[%c0_12, %c0_13] : memref<16x128xf32, #tpu.memory_space<vmem>>, vector<16x128xf32>
      tpu.vector_store %arg4[%c0_12, %c0_13], %20 {strides = array<i32>} : memref<16x128xf32, #tpu.memory_space<vmem>>, vector<16x128xf32>,
    } else {
    }
    return
  }
  func.func @transform_0(%arg0: i32, %arg1: i32) -> (i32, i32) {
    %c0_i32 = arith.constant 0 : i32
    %c0_i32_0 = arith.constant 0 : i32
    return %c0_i32, %arg1 : i32, i32
  }
  func.func @transform_1(%arg0: i32, %arg1: i32) -> (i32, i32) {
    %c0_i32 = arith.constant 0 : i32
    %c0_i32_0 = arith.constant 0 : i32
    return %arg1, %c0_i32 : i32, i32
  }
  func.func @transform_2(%arg0: i32, %arg1: i32) -> (i32, i32) {
    %c0_i32 = arith.constant 0 : i32
    %c0_i32_0 = arith.constant 0 : i32
    return %arg0, %c0_i32 : i32, i32
  }
}

module attributes {stable_mosaic.version = 11 : i64} {
  func.func @kern(%arg0: i32, %arg1: memref<16x128xf32, #tpu.memory_space<vmem>>, %arg2: memref<16x5xf32, #tpu.memory_space<vmem>>, %arg3: memref<3x16x2xf32, #tpu.memory_space<vmem>>, %arg4: memref<16x8xf32, #tpu.memory_space<vmem>>, %arg5: memref<3x16x4xf32, #tpu.memory_space<vmem>>, %arg6: memref<6x8xf32, #tpu.memory_space<vmem>>, %arg7: memref<2x8xf32, #tpu.memory_space<vmem>>, %arg8: memref<14x8xf32, #tpu.memory_space<vmem>>, %arg9: memref<5x8xf32, #tpu.memory_space<vmem>>, %arg10: memref<8x8xf32, #tpu.memory_space<vmem>>, %arg11: memref<1x8xf32, #tpu.memory_space<vmem>>, %arg12: memref<8x4xf32, #tpu.memory_space<vmem>>, %arg13: memref<1x8xf32, #tpu.memory_space<vmem>>, %arg14: memref<1x8xf32, #tpu.memory_space<vmem>>, %arg15: memref<1x4xf32, #tpu.memory_space<vmem>>, %arg16: memref<16x8xf32, #tpu.memory_space<vmem>>, %arg17: memref<3x16x4xf32, #tpu.memory_space<vmem>>) attributes {dimension_semantics = [#tpu.dimension_semantics<parallel>], iteration_bounds = array<i64: 1>, scalar_prefetch = 0 : i64, scratch_operands = 0 : i64, tpu.core_type = #tpu.core_type<tc>, window_params = [{transform_indices = @transform_0, window_bounds = array<i64: 16, 128>}, {transform_indices = @transform_1, window_bounds = array<i64: 16, 5>}, {transform_indices = @transform_2, window_bounds = array<i64: 3, 16, 2>}, {transform_indices = @transform_3, window_bounds = array<i64: 16, 8>}, {transform_indices = @transform_4, window_bounds = array<i64: 3, 16, 4>}, {pipeline_mode = #tpu.pipeline_mode<synchronous>, transform_indices = @transform_5, window_bounds = array<i64: 6, 8>}, {pipeline_mode = #tpu.pipeline_mode<synchronous>, transform_indices = @transform_6, window_bounds = array<i64: 2, 8>}, {pipeline_mode = #tpu.pipeline_mode<synchronous>, transform_indices = @transform_7, window_bounds = array<i64: 14, 8>}, {pipeline_mode = #tpu.pipeline_mode<synchronous>, transform_indices = @transform_8, window_bounds = array<i64: 5, 8>}, {pipeline_mode = #tpu.pipeline_mode<synchronous>, transform_indices = @transform_9, window_bounds = array<i64: 8, 8>}, {pipeline_mode = #tpu.pipeline_mode<synchronous>, transform_indices = @transform_10, window_bounds = array<i64: 1, 8>}, {pipeline_mode = #tpu.pipeline_mode<synchronous>, transform_indices = @transform_11, window_bounds = array<i64: 8, 4>}, {pipeline_mode = #tpu.pipeline_mode<synchronous>, transform_indices = @transform_12, window_bounds = array<i64: 1, 8>}, {pipeline_mode = #tpu.pipeline_mode<synchronous>, transform_indices = @transform_13, window_bounds = array<i64: 1, 8>}, {pipeline_mode = #tpu.pipeline_mode<synchronous>, transform_indices = @transform_14, window_bounds = array<i64: 1, 4>}, {transform_indices = @transform_15, window_bounds = array<i64: 16, 8>}, {transform_indices = @transform_16, window_bounds = array<i64: 3, 16, 4>}]} {
    %c0 = arith.constant 0 : index
    %c0_0 = arith.constant 0 : index
    %0 = vector.load %arg1[%c0, %c0_0] : memref<16x128xf32, #tpu.memory_space<vmem>>, vector<16x128xf32>
    %1 = vector.extract_strided_slice %0 {offsets = [0, 32], sizes = [16, 1], strides = [1, 1]} : vector<16x128xf32> to vector<16x1xf32>
    %cst = arith.constant 1.000000e+00 : f32
    %2 = vector.broadcast %cst : f32 to vector<16x1xf32>
    %3 = arith.maximumf %1, %2 : vector<16x1xf32>
    %4 = tpu.reciprocal %3 {approx = true} : vector<16x1xf32> -> vector<16x1xf32>
    %5 = vector.extract_strided_slice %0 {offsets = [0, 0], sizes = [16, 14], strides = [1, 1]} : vector<16x128xf32> to vector<16x14xf32>
    %6 = vector.broadcast %4 : vector<16x1xf32> to vector<16x14xf32>
    %7 = arith.mulf %5, %6 : vector<16x14xf32>
    %c0_1 = arith.constant 0 : index
    %c0_2 = arith.constant 0 : index
    %8 = vector.load %arg8[%c0_1, %c0_2] : memref<14x8xf32, #tpu.memory_space<vmem>>, vector<14x8xf32>
    %cst_3 = arith.constant dense<0.000000e+00> : vector<16x8xf32>
    %9 = tpu.matmul %7, %8, %cst_3 {dimension_numbers = #tpu.dot_dimension_numbers<[1], [0], [0], [1], [0, 0, 1, 1], [], []>} : vector<16x14xf32>, vector<14x8xf32>, vector<16x8xf32> -> vector<16x8xf32>
    %c0_4 = arith.constant 0 : index
    %c0_5 = arith.constant 0 : index
    %10 = vector.load %arg2[%c0_4, %c0_5] : memref<16x5xf32, #tpu.memory_space<vmem>>, vector<16x5xf32>
    %c0_6 = arith.constant 0 : index
    %c0_7 = arith.constant 0 : index
    %11 = vector.load %arg9[%c0_6, %c0_7] : memref<5x8xf32, #tpu.memory_space<vmem>>, vector<5x8xf32>
    %cst_8 = arith.constant dense<0.000000e+00> : vector<16x8xf32>
    %12 = tpu.matmul %10, %11, %cst_8 {dimension_numbers = #tpu.dot_dimension_numbers<[1], [0], [0], [1], [0, 0, 1, 1], [], []>} : vector<16x5xf32>, vector<5x8xf32>, vector<16x8xf32> -> vector<16x8xf32>
    %13 = arith.addf %9, %12 : vector<16x8xf32>
    %14 = vector.extract_strided_slice %0 {offsets = [0, 14], sizes = [16, 6], strides = [1, 1]} : vector<16x128xf32> to vector<16x6xf32>
    %15 = vector.broadcast %4 : vector<16x1xf32> to vector<16x6xf32>
    %16 = arith.mulf %14, %15 : vector<16x6xf32>
    %c0_9 = arith.constant 0 : index
    %c0_10 = arith.constant 0 : index
    %17 = vector.load %arg6[%c0_9, %c0_10] : memref<6x8xf32, #tpu.memory_space<vmem>>, vector<6x8xf32>
    %cst_11 = arith.constant dense<0.000000e+00> : vector<16x8xf32>
    %18 = tpu.matmul %16, %17, %cst_11 {dimension_numbers = #tpu.dot_dimension_numbers<[1], [0], [0], [1], [0, 0, 1, 1], [], []>} : vector<16x6xf32>, vector<6x8xf32>, vector<16x8xf32> -> vector<16x8xf32>
    %c0_12 = arith.constant 0 : index
    %c0_13 = arith.constant 0 : index
    %c0_14 = arith.constant 0 : index
    %19 = vector.load %arg3[%c0_12, %c0_13, %c0_14] : memref<3x16x2xf32, #tpu.memory_space<vmem>>, vector<1x16x2xf32>
    %20 = vector.shape_cast %19 : vector<1x16x2xf32> to vector<16x2xf32>
    %c0_15 = arith.constant 0 : index
    %c0_16 = arith.constant 0 : index
    %21 = vector.load %arg7[%c0_15, %c0_16] : memref<2x8xf32, #tpu.memory_space<vmem>>, vector<2x8xf32>
    %cst_17 = arith.constant dense<0.000000e+00> : vector<16x8xf32>
    %22 = tpu.matmul %20, %21, %cst_17 {dimension_numbers = #tpu.dot_dimension_numbers<[1], [0], [0], [1], [0, 0, 1, 1], [], []>} : vector<16x2xf32>, vector<2x8xf32>, vector<16x8xf32> -> vector<16x8xf32>
    %23 = arith.addf %18, %22 : vector<16x8xf32>
    %24 = vector.extract_strided_slice %0 {offsets = [0, 20], sizes = [16, 6], strides = [1, 1]} : vector<16x128xf32> to vector<16x6xf32>
    %25 = vector.broadcast %4 : vector<16x1xf32> to vector<16x6xf32>
    %26 = arith.mulf %24, %25 : vector<16x6xf32>
    %c0_18 = arith.constant 0 : index
    %c0_19 = arith.constant 0 : index
    %27 = vector.load %arg6[%c0_18, %c0_19] : memref<6x8xf32, #tpu.memory_space<vmem>>, vector<6x8xf32>
    %cst_20 = arith.constant dense<0.000000e+00> : vector<16x8xf32>
    %28 = tpu.matmul %26, %27, %cst_20 {dimension_numbers = #tpu.dot_dimension_numbers<[1], [0], [0], [1], [0, 0, 1, 1], [], []>} : vector<16x6xf32>, vector<6x8xf32>, vector<16x8xf32> -> vector<16x8xf32>
    %c1 = arith.constant 1 : index
    %c0_21 = arith.constant 0 : index
    %c0_22 = arith.constant 0 : index
    %29 = vector.load %arg3[%c1, %c0_21, %c0_22] : memref<3x16x2xf32, #tpu.memory_space<vmem>>, vector<1x16x2xf32>
    %30 = vector.shape_cast %29 : vector<1x16x2xf32> to vector<16x2xf32>
    %c0_23 = arith.constant 0 : index
    %c0_24 = arith.constant 0 : index
    %31 = vector.load %arg7[%c0_23, %c0_24] : memref<2x8xf32, #tpu.memory_space<vmem>>, vector<2x8xf32>
    %cst_25 = arith.constant dense<0.000000e+00> : vector<16x8xf32>
    %32 = tpu.matmul %30, %31, %cst_25 {dimension_numbers = #tpu.dot_dimension_numbers<[1], [0], [0], [1], [0, 0, 1, 1], [], []>} : vector<16x2xf32>, vector<2x8xf32>, vector<16x8xf32> -> vector<16x8xf32>
    %33 = arith.addf %28, %32 : vector<16x8xf32>
    %34 = vector.extract_strided_slice %0 {offsets = [0, 26], sizes = [16, 6], strides = [1, 1]} : vector<16x128xf32> to vector<16x6xf32>
    %35 = vector.broadcast %4 : vector<16x1xf32> to vector<16x6xf32>
    %36 = arith.mulf %34, %35 : vector<16x6xf32>
    %c0_26 = arith.constant 0 : index
    %c0_27 = arith.constant 0 : index
    %37 = vector.load %arg6[%c0_26, %c0_27] : memref<6x8xf32, #tpu.memory_space<vmem>>, vector<6x8xf32>
    %cst_28 = arith.constant dense<0.000000e+00> : vector<16x8xf32>
    %38 = tpu.matmul %36, %37, %cst_28 {dimension_numbers = #tpu.dot_dimension_numbers<[1], [0], [0], [1], [0, 0, 1, 1], [], []>} : vector<16x6xf32>, vector<6x8xf32>, vector<16x8xf32> -> vector<16x8xf32>
    %c2 = arith.constant 2 : index
    %c0_29 = arith.constant 0 : index
    %c0_30 = arith.constant 0 : index
    %39 = vector.load %arg3[%c2, %c0_29, %c0_30] : memref<3x16x2xf32, #tpu.memory_space<vmem>>, vector<1x16x2xf32>
    %40 = vector.shape_cast %39 : vector<1x16x2xf32> to vector<16x2xf32>
    %c0_31 = arith.constant 0 : index
    %c0_32 = arith.constant 0 : index
    %41 = vector.load %arg7[%c0_31, %c0_32] : memref<2x8xf32, #tpu.memory_space<vmem>>, vector<2x8xf32>
    %cst_33 = arith.constant dense<0.000000e+00> : vector<16x8xf32>
    %42 = tpu.matmul %40, %41, %cst_33 {dimension_numbers = #tpu.dot_dimension_numbers<[1], [0], [0], [1], [0, 0, 1, 1], [], []>} : vector<16x2xf32>, vector<2x8xf32>, vector<16x8xf32> -> vector<16x8xf32>
    %43 = arith.addf %38, %42 : vector<16x8xf32>
    %44 = arith.mulf %23, %23 : vector<16x8xf32>
    %45 = arith.mulf %33, %33 : vector<16x8xf32>
    %46 = arith.addf %44, %45 : vector<16x8xf32>
    %47 = arith.mulf %43, %43 : vector<16x8xf32>
    %48 = arith.addf %46, %47 : vector<16x8xf32>
    %cst_34 = arith.constant 9.99999993E-9 : f32
    %49 = vector.broadcast %cst_34 : f32 to vector<16x8xf32>
    %50 = arith.maximumf %48, %49 : vector<16x8xf32>
    %51 = math.sqrt %50 : vector<16x8xf32>
    %c0_35 = arith.constant 0 : index
    %c0_36 = arith.constant 0 : index
    %52 = vector.load %arg10[%c0_35, %c0_36] : memref<8x8xf32, #tpu.memory_space<vmem>>, vector<8x8xf32>
    %cst_37 = arith.constant dense<0.000000e+00> : vector<16x8xf32>
    %53 = tpu.matmul %51, %52, %cst_37 {dimension_numbers = #tpu.dot_dimension_numbers<[1], [0], [0], [1], [0, 0, 1, 1], [], []>} : vector<16x8xf32>, vector<8x8xf32>, vector<16x8xf32> -> vector<16x8xf32>
    %54 = arith.addf %13, %53 : vector<16x8xf32>
    %c0_38 = arith.constant 0 : index
    %c0_39 = arith.constant 0 : index
    %55 = vector.load %arg11[%c0_38, %c0_39] : memref<1x8xf32, #tpu.memory_space<vmem>>, vector<1x8xf32>
    %56 = vector.broadcast %55 : vector<1x8xf32> to vector<16x8xf32>
    %57 = arith.addf %54, %56 : vector<16x8xf32>
    %c0_40 = arith.constant 0 : index
    %c0_41 = arith.constant 0 : index
    %58 = vector.load %arg4[%c0_40, %c0_41] : memref<16x8xf32, #tpu.memory_space<vmem>>, vector<16x8xf32>
    %59 = arith.addf %58, %57 : vector<16x8xf32>
    %c0_42 = arith.constant 0 : index
    %c0_43 = arith.constant 0 : index
    %60 = vector.load %arg13[%c0_42, %c0_43] : memref<1x8xf32, #tpu.memory_space<vmem>>, vector<1x8xf32>
    %c0_44 = arith.constant 0 : index
    %c0_45 = arith.constant 0 : index
    %61 = vector.load %arg14[%c0_44, %c0_45] : memref<1x8xf32, #tpu.memory_space<vmem>>, vector<1x8xf32>
    %cst_46 = arith.constant dense<0.000000e+00> : vector<16xf32>
    %62 = vector.multi_reduction <add>, %59, %cst_46 [1] : vector<16x8xf32> to vector<16xf32>
    %63 = vector.shape_cast %62 : vector<16xf32> to vector<16x1xf32>
    %cst_47 = arith.constant 8.000000e+00 : f32
    %64 = vector.broadcast %cst_47 : f32 to vector<16x1xf32>
    %65 = arith.divf %63, %64 : vector<16x1xf32>
    %66 = vector.broadcast %65 : vector<16x1xf32> to vector<16x8xf32>
    %67 = arith.subf %59, %66 : vector<16x8xf32>
    %68 = vector.broadcast %65 : vector<16x1xf32> to vector<16x8xf32>
    %69 = arith.subf %59, %68 : vector<16x8xf32>
    %70 = arith.mulf %67, %69 : vector<16x8xf32>
    %cst_48 = arith.constant dense<0.000000e+00> : vector<16xf32>
    %71 = vector.multi_reduction <add>, %70, %cst_48 [1] : vector<16x8xf32> to vector<16xf32>
    %72 = vector.shape_cast %71 : vector<16xf32> to vector<16x1xf32>
    %cst_49 = arith.constant 8.000000e+00 : f32
    %73 = vector.broadcast %cst_49 : f32 to vector<16x1xf32>
    %74 = arith.divf %72, %73 : vector<16x1xf32>
    %75 = vector.broadcast %65 : vector<16x1xf32> to vector<16x8xf32>
    %76 = arith.subf %59, %75 : vector<16x8xf32>
    %cst_50 = arith.constant 9.99999974E-6 : f32
    %77 = vector.broadcast %cst_50 : f32 to vector<16x1xf32>
    %78 = arith.addf %74, %77 : vector<16x1xf32>
    %79 = math.rsqrt %78 : vector<16x1xf32>
    %80 = vector.broadcast %79 : vector<16x1xf32> to vector<16x8xf32>
    %81 = arith.mulf %76, %80 : vector<16x8xf32>
    %82 = vector.broadcast %60 : vector<1x8xf32> to vector<16x8xf32>
    %83 = arith.mulf %81, %82 : vector<16x8xf32>
    %84 = vector.broadcast %61 : vector<1x8xf32> to vector<16x8xf32>
    %85 = arith.addf %83, %84 : vector<16x8xf32>
    %c0_51 = arith.constant 0 : index
    %c0_52 = arith.constant 0 : index
    %86 = vector.load %arg16[%c0_51, %c0_52] : memref<16x8xf32, #tpu.memory_space<vmem>>, vector<16x8xf32>
    tpu.vector_store %arg16[%c0_51, %c0_52], %85 {strides = array<i32>} : memref<16x8xf32, #tpu.memory_space<vmem>>, vector<16x8xf32>,
    %c0_53 = arith.constant 0 : index
    %c0_54 = arith.constant 0 : index
    %c0_55 = arith.constant 0 : index
    %87 = vector.load %arg5[%c0_53, %c0_54, %c0_55] : memref<3x16x4xf32, #tpu.memory_space<vmem>>, vector<1x16x4xf32>
    %88 = vector.shape_cast %87 : vector<1x16x4xf32> to vector<16x4xf32>
    %c0_56 = arith.constant 0 : index
    %c0_57 = arith.constant 0 : index
    %89 = vector.load %arg12[%c0_56, %c0_57] : memref<8x4xf32, #tpu.memory_space<vmem>>, vector<8x4xf32>
    %cst_58 = arith.constant dense<0.000000e+00> : vector<16x4xf32>
    %90 = tpu.matmul %23, %89, %cst_58 {dimension_numbers = #tpu.dot_dimension_numbers<[1], [0], [0], [1], [0, 0, 1, 1], [], []>} : vector<16x8xf32>, vector<8x4xf32>, vector<16x4xf32> -> vector<16x4xf32>
    %91 = arith.addf %88, %90 : vector<16x4xf32>
    %c1_59 = arith.constant 1 : index
    %c0_60 = arith.constant 0 : index
    %c0_61 = arith.constant 0 : index
    %92 = vector.load %arg5[%c1_59, %c0_60, %c0_61] : memref<3x16x4xf32, #tpu.memory_space<vmem>>, vector<1x16x4xf32>
    %93 = vector.shape_cast %92 : vector<1x16x4xf32> to vector<16x4xf32>
    %c0_62 = arith.constant 0 : index
    %c0_63 = arith.constant 0 : index
    %94 = vector.load %arg12[%c0_62, %c0_63] : memref<8x4xf32, #tpu.memory_space<vmem>>, vector<8x4xf32>
    %cst_64 = arith.constant dense<0.000000e+00> : vector<16x4xf32>
    %95 = tpu.matmul %33, %94, %cst_64 {dimension_numbers = #tpu.dot_dimension_numbers<[1], [0], [0], [1], [0, 0, 1, 1], [], []>} : vector<16x8xf32>, vector<8x4xf32>, vector<16x4xf32> -> vector<16x4xf32>
    %96 = arith.addf %93, %95 : vector<16x4xf32>
    %c2_65 = arith.constant 2 : index
    %c0_66 = arith.constant 0 : index
    %c0_67 = arith.constant 0 : index
    %97 = vector.load %arg5[%c2_65, %c0_66, %c0_67] : memref<3x16x4xf32, #tpu.memory_space<vmem>>, vector<1x16x4xf32>
    %98 = vector.shape_cast %97 : vector<1x16x4xf32> to vector<16x4xf32>
    %c0_68 = arith.constant 0 : index
    %c0_69 = arith.constant 0 : index
    %99 = vector.load %arg12[%c0_68, %c0_69] : memref<8x4xf32, #tpu.memory_space<vmem>>, vector<8x4xf32>
    %cst_70 = arith.constant dense<0.000000e+00> : vector<16x4xf32>
    %100 = tpu.matmul %43, %99, %cst_70 {dimension_numbers = #tpu.dot_dimension_numbers<[1], [0], [0], [1], [0, 0, 1, 1], [], []>} : vector<16x8xf32>, vector<8x4xf32>, vector<16x4xf32> -> vector<16x4xf32>
    %101 = arith.addf %98, %100 : vector<16x4xf32>
    %c0_71 = arith.constant 0 : index
    %c0_72 = arith.constant 0 : index
    %102 = vector.load %arg15[%c0_71, %c0_72] : memref<1x4xf32, #tpu.memory_space<vmem>>, vector<1x4xf32>
    %103 = arith.mulf %91, %91 : vector<16x4xf32>
    %104 = arith.mulf %96, %96 : vector<16x4xf32>
    %105 = arith.addf %103, %104 : vector<16x4xf32>
    %106 = arith.mulf %101, %101 : vector<16x4xf32>
    %107 = arith.addf %105, %106 : vector<16x4xf32>
    %cst_73 = arith.constant 9.99999993E-9 : f32
    %108 = vector.broadcast %cst_73 : f32 to vector<16x4xf32>
    %109 = arith.maximumf %107, %108 : vector<16x4xf32>
    %cst_74 = arith.constant dense<0.000000e+00> : vector<16xf32>
    %110 = vector.multi_reduction <add>, %109, %cst_74 [1] : vector<16x4xf32> to vector<16xf32>
    %111 = vector.shape_cast %110 : vector<16xf32> to vector<16x1xf32>
    %cst_75 = arith.constant 4.000000e+00 : f32
    %112 = vector.broadcast %cst_75 : f32 to vector<16x1xf32>
    %113 = arith.divf %111, %112 : vector<16x1xf32>
    %114 = math.rsqrt %113 : vector<16x1xf32>
    %115 = vector.broadcast %102 : vector<1x4xf32> to vector<16x4xf32>
    %116 = vector.broadcast %114 : vector<16x1xf32> to vector<16x4xf32>
    %117 = arith.mulf %115, %116 : vector<16x4xf32>
    %118 = arith.mulf %91, %117 : vector<16x4xf32>
    %119 = arith.mulf %96, %117 : vector<16x4xf32>
    %120 = arith.mulf %101, %117 : vector<16x4xf32>
    %c0_76 = arith.constant 0 : index
    %c0_77 = arith.constant 0 : index
    %c0_78 = arith.constant 0 : index
    %121 = vector.load %arg17[%c0_76, %c0_77, %c0_78] : memref<3x16x4xf32, #tpu.memory_space<vmem>>, vector<1x16x4xf32>
    %122 = vector.shape_cast %121 : vector<1x16x4xf32> to vector<16x4xf32>
    %123 = vector.shape_cast %118 : vector<16x4xf32> to vector<1x16x4xf32>
    tpu.vector_store %arg17[%c0_76, %c0_77, %c0_78], %123 {strides = array<i32>} : memref<3x16x4xf32, #tpu.memory_space<vmem>>, vector<1x16x4xf32>,
    %c1_79 = arith.constant 1 : index
    %c0_80 = arith.constant 0 : index
    %c0_81 = arith.constant 0 : index
    %124 = vector.load %arg17[%c1_79, %c0_80, %c0_81] : memref<3x16x4xf32, #tpu.memory_space<vmem>>, vector<1x16x4xf32>
    %125 = vector.shape_cast %124 : vector<1x16x4xf32> to vector<16x4xf32>
    %126 = vector.shape_cast %119 : vector<16x4xf32> to vector<1x16x4xf32>
    tpu.vector_store %arg17[%c1_79, %c0_80, %c0_81], %126 {strides = array<i32>} : memref<3x16x4xf32, #tpu.memory_space<vmem>>, vector<1x16x4xf32>,
    %c2_82 = arith.constant 2 : index
    %c0_83 = arith.constant 0 : index
    %c0_84 = arith.constant 0 : index
    %127 = vector.load %arg17[%c2_82, %c0_83, %c0_84] : memref<3x16x4xf32, #tpu.memory_space<vmem>>, vector<1x16x4xf32>
    %128 = vector.shape_cast %127 : vector<1x16x4xf32> to vector<16x4xf32>
    %129 = vector.shape_cast %120 : vector<16x4xf32> to vector<1x16x4xf32>
    tpu.vector_store %arg17[%c2_82, %c0_83, %c0_84], %129 {strides = array<i32>} : memref<3x16x4xf32, #tpu.memory_space<vmem>>, vector<1x16x4xf32>,
    return
  }
  func.func @transform_0(%arg0: i32) -> (i32, i32) {
    %c0_i32 = arith.constant 0 : i32
    %c0_i32_0 = arith.constant 0 : i32
    return %arg0, %c0_i32 : i32, i32
  }
  func.func @transform_1(%arg0: i32) -> (i32, i32) {
    %c0_i32 = arith.constant 0 : i32
    %c0_i32_0 = arith.constant 0 : i32
    return %arg0, %c0_i32 : i32, i32
  }
  func.func @transform_2(%arg0: i32) -> (i32, i32, i32) {
    %c0_i32 = arith.constant 0 : i32
    %c0_i32_0 = arith.constant 0 : i32
    %c0_i32_1 = arith.constant 0 : i32
    return %c0_i32, %arg0, %c0_i32_0 : i32, i32, i32
  }
  func.func @transform_3(%arg0: i32) -> (i32, i32) {
    %c0_i32 = arith.constant 0 : i32
    %c0_i32_0 = arith.constant 0 : i32
    return %arg0, %c0_i32 : i32, i32
  }
  func.func @transform_4(%arg0: i32) -> (i32, i32, i32) {
    %c0_i32 = arith.constant 0 : i32
    %c0_i32_0 = arith.constant 0 : i32
    %c0_i32_1 = arith.constant 0 : i32
    return %c0_i32, %arg0, %c0_i32_0 : i32, i32, i32
  }
  func.func @transform_5(%arg0: i32) -> (i32, i32) {
    %c0_i32 = arith.constant 0 : i32
    %c0_i32_0 = arith.constant 0 : i32
    %c0_i32_1 = arith.constant 0 : i32
    return %c0_i32, %c0_i32_0 : i32, i32
  }
  func.func @transform_6(%arg0: i32) -> (i32, i32) {
    %c0_i32 = arith.constant 0 : i32
    %c0_i32_0 = arith.constant 0 : i32
    %c0_i32_1 = arith.constant 0 : i32
    return %c0_i32, %c0_i32_0 : i32, i32
  }
  func.func @transform_7(%arg0: i32) -> (i32, i32) {
    %c0_i32 = arith.constant 0 : i32
    %c0_i32_0 = arith.constant 0 : i32
    %c0_i32_1 = arith.constant 0 : i32
    return %c0_i32, %c0_i32_0 : i32, i32
  }
  func.func @transform_8(%arg0: i32) -> (i32, i32) {
    %c0_i32 = arith.constant 0 : i32
    %c0_i32_0 = arith.constant 0 : i32
    %c0_i32_1 = arith.constant 0 : i32
    return %c0_i32, %c0_i32_0 : i32, i32
  }
  func.func @transform_9(%arg0: i32) -> (i32, i32) {
    %c0_i32 = arith.constant 0 : i32
    %c0_i32_0 = arith.constant 0 : i32
    %c0_i32_1 = arith.constant 0 : i32
    return %c0_i32, %c0_i32_0 : i32, i32
  }
  func.func @transform_10(%arg0: i32) -> (i32, i32) {
    %c0_i32 = arith.constant 0 : i32
    %c0_i32_0 = arith.constant 0 : i32
    %c0_i32_1 = arith.constant 0 : i32
    return %c0_i32, %c0_i32_0 : i32, i32
  }
  func.func @transform_11(%arg0: i32) -> (i32, i32) {
    %c0_i32 = arith.constant 0 : i32
    %c0_i32_0 = arith.constant 0 : i32
    %c0_i32_1 = arith.constant 0 : i32
    return %c0_i32, %c0_i32_0 : i32, i32
  }
  func.func @transform_12(%arg0: i32) -> (i32, i32) {
    %c0_i32 = arith.constant 0 : i32
    %c0_i32_0 = arith.constant 0 : i32
    %c0_i32_1 = arith.constant 0 : i32
    return %c0_i32, %c0_i32_0 : i32, i32
  }
  func.func @transform_13(%arg0: i32) -> (i32, i32) {
    %c0_i32 = arith.constant 0 : i32
    %c0_i32_0 = arith.constant 0 : i32
    %c0_i32_1 = arith.constant 0 : i32
    return %c0_i32, %c0_i32_0 : i32, i32
  }
  func.func @transform_14(%arg0: i32) -> (i32, i32) {
    %c0_i32 = arith.constant 0 : i32
    %c0_i32_0 = arith.constant 0 : i32
    %c0_i32_1 = arith.constant 0 : i32
    return %c0_i32, %c0_i32_0 : i32, i32
  }
  func.func @transform_15(%arg0: i32) -> (i32, i32) {
    %c0_i32 = arith.constant 0 : i32
    %c0_i32_0 = arith.constant 0 : i32
    return %arg0, %c0_i32 : i32, i32
  }
  func.func @transform_16(%arg0: i32) -> (i32, i32, i32) {
    %c0_i32 = arith.constant 0 : i32
    %c0_i32_0 = arith.constant 0 : i32
    %c0_i32_1 = arith.constant 0 : i32
    return %c0_i32, %arg0, %c0_i32_0 : i32, i32, i32
  }
}

module attributes {stable_mosaic.version = 11 : i64} {
  func.func @kern(%arg0: i32, %arg1: memref<32x8xf32, #tpu.memory_space<vmem>>, %arg2: memref<32x8xf32, #tpu.memory_space<vmem>>, %arg3: memref<32x6xf32, #tpu.memory_space<vmem>>, %arg4: memref<32x128xf32, #tpu.memory_space<vmem>>, %arg5: memref<32x5xf32, #tpu.memory_space<vmem>>, %arg6: memref<3x32x4xf32, #tpu.memory_space<vmem>>, %arg7: memref<3x32x4xf32, #tpu.memory_space<vmem>>, %arg8: memref<3x32x2xf32, #tpu.memory_space<vmem>>, %arg9: memref<3x32x2xf32, #tpu.memory_space<vmem>>, %arg10: memref<12x12xf32, #tpu.memory_space<vmem>>, %arg11: memref<33x6xf32, #tpu.memory_space<vmem>>, %arg12: memref<12x6xf32, #tpu.memory_space<vmem>>, %arg13: memref<1x6xf32, #tpu.memory_space<vmem>>, %arg14: memref<12x2xf32, #tpu.memory_space<vmem>>, %arg15: memref<1x6xf32, #tpu.memory_space<vmem>>, %arg16: memref<1x6xf32, #tpu.memory_space<vmem>>, %arg17: memref<1x2xf32, #tpu.memory_space<vmem>>, %arg18: memref<32x6xf32, #tpu.memory_space<vmem>>, %arg19: memref<3x32x2xf32, #tpu.memory_space<vmem>>) attributes {dimension_semantics = [#tpu.dimension_semantics<parallel>], iteration_bounds = array<i64: 1>, scalar_prefetch = 0 : i64, scratch_operands = 0 : i64, tpu.core_type = #tpu.core_type<tc>, window_params = [{transform_indices = @transform_0, window_bounds = array<i64: 32, 8>}, {transform_indices = @transform_1, window_bounds = array<i64: 32, 8>}, {transform_indices = @transform_2, window_bounds = array<i64: 32, 6>}, {transform_indices = @transform_3, window_bounds = array<i64: 32, 128>}, {transform_indices = @transform_4, window_bounds = array<i64: 32, 5>}, {transform_indices = @transform_5, window_bounds = array<i64: 3, 32, 4>}, {transform_indices = @transform_6, window_bounds = array<i64: 3, 32, 4>}, {transform_indices = @transform_7, window_bounds = array<i64: 3, 32, 2>}, {transform_indices = @transform_8, window_bounds = array<i64: 3, 32, 2>}, {pipeline_mode = #tpu.pipeline_mode<synchronous>, transform_indices = @transform_9, window_bounds = array<i64: 12, 12>}, {pipeline_mode = #tpu.pipeline_mode<synchronous>, transform_indices = @transform_10, window_bounds = array<i64: 33, 6>}, {pipeline_mode = #tpu.pipeline_mode<synchronous>, transform_indices = @transform_11, window_bounds = array<i64: 12, 6>}, {pipeline_mode = #tpu.pipeline_mode<synchronous>, transform_indices = @transform_12, window_bounds = array<i64: 1, 6>}, {pipeline_mode = #tpu.pipeline_mode<synchronous>, transform_indices = @transform_13, window_bounds = array<i64: 12, 2>}, {pipeline_mode = #tpu.pipeline_mode<synchronous>, transform_indices = @transform_14, window_bounds = array<i64: 1, 6>}, {pipeline_mode = #tpu.pipeline_mode<synchronous>, transform_indices = @transform_15, window_bounds = array<i64: 1, 6>}, {pipeline_mode = #tpu.pipeline_mode<synchronous>, transform_indices = @transform_16, window_bounds = array<i64: 1, 2>}, {transform_indices = @transform_17, window_bounds = array<i64: 32, 6>}, {transform_indices = @transform_18, window_bounds = array<i64: 3, 32, 2>}]} {
    %c0 = arith.constant 0 : index
    %c0_0 = arith.constant 0 : index
    %0 = vector.load %arg3[%c0, %c0_0] : memref<32x6xf32, #tpu.memory_space<vmem>>, vector<32x6xf32>
    %c0_1 = arith.constant 0 : index
    %c0_2 = arith.constant 0 : index
    %1 = vector.load %arg1[%c0_1, %c0_2] : memref<32x8xf32, #tpu.memory_space<vmem>>, vector<32x8xf32>
    %c0_3 = arith.constant 0 : index
    %c0_4 = arith.constant 0 : index
    %2 = vector.load %arg2[%c0_3, %c0_4] : memref<32x8xf32, #tpu.memory_space<vmem>>, vector<32x8xf32>
    %c0_5 = arith.constant 0 : index
    %c0_6 = arith.constant 0 : index
    %3 = vector.load %arg4[%c0_5, %c0_6] : memref<32x128xf32, #tpu.memory_space<vmem>>, vector<32x6xf32>
    %c0_7 = arith.constant 0 : index
    %c0_8 = arith.constant 0 : index
    %4 = vector.load %arg5[%c0_7, %c0_8] : memref<32x5xf32, #tpu.memory_space<vmem>>, vector<32x5xf32>
    %5 = tpu.concatenate %1, %2, %0, %3, %4 in 1 : vector<32x8xf32>, vector<32x8xf32>, vector<32x6xf32>, vector<32x6xf32>, vector<32x5xf32> -> vector<32x33xf32>
    %c0_9 = arith.constant 0 : index
    %c0_10 = arith.constant 0 : index
    %c0_11 = arith.constant 0 : index
    %6 = vector.load %arg6[%c0_9, %c0_10, %c0_11] : memref<3x32x4xf32, #tpu.memory_space<vmem>>, vector<1x32x4xf32>
    %7 = vector.shape_cast %6 : vector<1x32x4xf32> to vector<32x4xf32>
    %c0_12 = arith.constant 0 : index
    %c0_13 = arith.constant 0 : index
    %c0_14 = arith.constant 0 : index
    %8 = vector.load %arg7[%c0_12, %c0_13, %c0_14] : memref<3x32x4xf32, #tpu.memory_space<vmem>>, vector<1x32x4xf32>
    %9 = vector.shape_cast %8 : vector<1x32x4xf32> to vector<32x4xf32>
    %c0_15 = arith.constant 0 : index
    %c0_16 = arith.constant 0 : index
    %c0_17 = arith.constant 0 : index
    %10 = vector.load %arg8[%c0_15, %c0_16, %c0_17] : memref<3x32x2xf32, #tpu.memory_space<vmem>>, vector<1x32x2xf32>
    %11 = vector.shape_cast %10 : vector<1x32x2xf32> to vector<32x2xf32>
    %c0_18 = arith.constant 0 : index
    %c0_19 = arith.constant 0 : index
    %c0_20 = arith.constant 0 : index
    %12 = vector.load %arg9[%c0_18, %c0_19, %c0_20] : memref<3x32x2xf32, #tpu.memory_space<vmem>>, vector<1x32x2xf32>
    %13 = vector.shape_cast %12 : vector<1x32x2xf32> to vector<32x2xf32>
    %14 = tpu.concatenate %7, %9, %11, %13 in 1 : vector<32x4xf32>, vector<32x4xf32>, vector<32x2xf32>, vector<32x2xf32> -> vector<32x12xf32>
    %c1 = arith.constant 1 : index
    %c0_21 = arith.constant 0 : index
    %c0_22 = arith.constant 0 : index
    %15 = vector.load %arg6[%c1, %c0_21, %c0_22] : memref<3x32x4xf32, #tpu.memory_space<vmem>>, vector<1x32x4xf32>
    %16 = vector.shape_cast %15 : vector<1x32x4xf32> to vector<32x4xf32>
    %c1_23 = arith.constant 1 : index
    %c0_24 = arith.constant 0 : index
    %c0_25 = arith.constant 0 : index
    %17 = vector.load %arg7[%c1_23, %c0_24, %c0_25] : memref<3x32x4xf32, #tpu.memory_space<vmem>>, vector<1x32x4xf32>
    %18 = vector.shape_cast %17 : vector<1x32x4xf32> to vector<32x4xf32>
    %c1_26 = arith.constant 1 : index
    %c0_27 = arith.constant 0 : index
    %c0_28 = arith.constant 0 : index
    %19 = vector.load %arg8[%c1_26, %c0_27, %c0_28] : memref<3x32x2xf32, #tpu.memory_space<vmem>>, vector<1x32x2xf32>
    %20 = vector.shape_cast %19 : vector<1x32x2xf32> to vector<32x2xf32>
    %c1_29 = arith.constant 1 : index
    %c0_30 = arith.constant 0 : index
    %c0_31 = arith.constant 0 : index
    %21 = vector.load %arg9[%c1_29, %c0_30, %c0_31] : memref<3x32x2xf32, #tpu.memory_space<vmem>>, vector<1x32x2xf32>
    %22 = vector.shape_cast %21 : vector<1x32x2xf32> to vector<32x2xf32>
    %23 = tpu.concatenate %16, %18, %20, %22 in 1 : vector<32x4xf32>, vector<32x4xf32>, vector<32x2xf32>, vector<32x2xf32> -> vector<32x12xf32>
    %c2 = arith.constant 2 : index
    %c0_32 = arith.constant 0 : index
    %c0_33 = arith.constant 0 : index
    %24 = vector.load %arg6[%c2, %c0_32, %c0_33] : memref<3x32x4xf32, #tpu.memory_space<vmem>>, vector<1x32x4xf32>
    %25 = vector.shape_cast %24 : vector<1x32x4xf32> to vector<32x4xf32>
    %c2_34 = arith.constant 2 : index
    %c0_35 = arith.constant 0 : index
    %c0_36 = arith.constant 0 : index
    %26 = vector.load %arg7[%c2_34, %c0_35, %c0_36] : memref<3x32x4xf32, #tpu.memory_space<vmem>>, vector<1x32x4xf32>
    %27 = vector.shape_cast %26 : vector<1x32x4xf32> to vector<32x4xf32>
    %c2_37 = arith.constant 2 : index
    %c0_38 = arith.constant 0 : index
    %c0_39 = arith.constant 0 : index
    %28 = vector.load %arg8[%c2_37, %c0_38, %c0_39] : memref<3x32x2xf32, #tpu.memory_space<vmem>>, vector<1x32x2xf32>
    %29 = vector.shape_cast %28 : vector<1x32x2xf32> to vector<32x2xf32>
    %c2_40 = arith.constant 2 : index
    %c0_41 = arith.constant 0 : index
    %c0_42 = arith.constant 0 : index
    %30 = vector.load %arg9[%c2_40, %c0_41, %c0_42] : memref<3x32x2xf32, #tpu.memory_space<vmem>>, vector<1x32x2xf32>
    %31 = vector.shape_cast %30 : vector<1x32x2xf32> to vector<32x2xf32>
    %32 = tpu.concatenate %25, %27, %29, %31 in 1 : vector<32x4xf32>, vector<32x4xf32>, vector<32x2xf32>, vector<32x2xf32> -> vector<32x12xf32>
    %c0_43 = arith.constant 0 : index
    %c0_44 = arith.constant 0 : index
    %33 = vector.load %arg10[%c0_43, %c0_44] : memref<12x12xf32, #tpu.memory_space<vmem>>, vector<12x12xf32>
    %c0_45 = arith.constant 0 : index
    %c0_46 = arith.constant 0 : index
    %34 = vector.load %arg11[%c0_45, %c0_46] : memref<33x6xf32, #tpu.memory_space<vmem>>, vector<33x6xf32>
    %c0_47 = arith.constant 0 : index
    %c0_48 = arith.constant 0 : index
    %35 = vector.load %arg12[%c0_47, %c0_48] : memref<12x6xf32, #tpu.memory_space<vmem>>, vector<12x6xf32>
    %c0_49 = arith.constant 0 : index
    %c0_50 = arith.constant 0 : index
    %36 = vector.load %arg13[%c0_49, %c0_50] : memref<1x6xf32, #tpu.memory_space<vmem>>, vector<1x6xf32>
    %c0_51 = arith.constant 0 : index
    %c0_52 = arith.constant 0 : index
    %37 = vector.load %arg14[%c0_51, %c0_52] : memref<12x2xf32, #tpu.memory_space<vmem>>, vector<12x2xf32>
    %cst = arith.constant dense<0.000000e+00> : vector<32x12xf32>
    %38 = tpu.matmul %14, %33, %cst {dimension_numbers = #tpu.dot_dimension_numbers<[1], [0], [0], [1], [0, 0, 1, 1], [], []>} : vector<32x12xf32>, vector<12x12xf32>, vector<32x12xf32> -> vector<32x12xf32>
    %cst_53 = arith.constant dense<0.000000e+00> : vector<32x12xf32>
    %39 = tpu.matmul %23, %33, %cst_53 {dimension_numbers = #tpu.dot_dimension_numbers<[1], [0], [0], [1], [0, 0, 1, 1], [], []>} : vector<32x12xf32>, vector<12x12xf32>, vector<32x12xf32> -> vector<32x12xf32>
    %cst_54 = arith.constant dense<0.000000e+00> : vector<32x12xf32>
    %40 = tpu.matmul %32, %33, %cst_54 {dimension_numbers = #tpu.dot_dimension_numbers<[1], [0], [0], [1], [0, 0, 1, 1], [], []>} : vector<32x12xf32>, vector<12x12xf32>, vector<32x12xf32> -> vector<32x12xf32>
    %41 = arith.mulf %38, %38 : vector<32x12xf32>
    %42 = arith.mulf %39, %39 : vector<32x12xf32>
    %43 = arith.addf %41, %42 : vector<32x12xf32>
    %44 = arith.mulf %40, %40 : vector<32x12xf32>
    %45 = arith.addf %43, %44 : vector<32x12xf32>
    %cst_55 = arith.constant 9.99999993E-9 : f32
    %46 = vector.broadcast %cst_55 : f32 to vector<32x12xf32>
    %47 = arith.maximumf %45, %46 : vector<32x12xf32>
    %48 = math.sqrt %47 : vector<32x12xf32>
    %cst_56 = arith.constant dense<0.000000e+00> : vector<32x6xf32>
    %49 = tpu.matmul %5, %34, %cst_56 {dimension_numbers = #tpu.dot_dimension_numbers<[1], [0], [0], [1], [0, 0, 1, 1], [], []>} : vector<32x33xf32>, vector<33x6xf32>, vector<32x6xf32> -> vector<32x6xf32>
    %cst_57 = arith.constant dense<0.000000e+00> : vector<32x6xf32>
    %50 = tpu.matmul %48, %35, %cst_57 {dimension_numbers = #tpu.dot_dimension_numbers<[1], [0], [0], [1], [0, 0, 1, 1], [], []>} : vector<32x12xf32>, vector<12x6xf32>, vector<32x6xf32> -> vector<32x6xf32>
    %51 = arith.addf %49, %50 : vector<32x6xf32>
    %52 = vector.broadcast %36 : vector<1x6xf32> to vector<32x6xf32>
    %53 = arith.addf %51, %52 : vector<32x6xf32>
    %cst_58 = arith.constant dense<0.000000e+00> : vector<32x2xf32>
    %54 = tpu.matmul %38, %37, %cst_58 {dimension_numbers = #tpu.dot_dimension_numbers<[1], [0], [0], [1], [0, 0, 1, 1], [], []>} : vector<32x12xf32>, vector<12x2xf32>, vector<32x2xf32> -> vector<32x2xf32>
    %cst_59 = arith.constant dense<0.000000e+00> : vector<32x2xf32>
    %55 = tpu.matmul %39, %37, %cst_59 {dimension_numbers = #tpu.dot_dimension_numbers<[1], [0], [0], [1], [0, 0, 1, 1], [], []>} : vector<32x12xf32>, vector<12x2xf32>, vector<32x2xf32> -> vector<32x2xf32>
    %cst_60 = arith.constant dense<0.000000e+00> : vector<32x2xf32>
    %56 = tpu.matmul %40, %37, %cst_60 {dimension_numbers = #tpu.dot_dimension_numbers<[1], [0], [0], [1], [0, 0, 1, 1], [], []>} : vector<32x12xf32>, vector<12x2xf32>, vector<32x2xf32> -> vector<32x2xf32>
    %57 = arith.addf %0, %53 : vector<32x6xf32>
    %c0_61 = arith.constant 0 : index
    %c0_62 = arith.constant 0 : index
    %58 = vector.load %arg15[%c0_61, %c0_62] : memref<1x6xf32, #tpu.memory_space<vmem>>, vector<1x6xf32>
    %c0_63 = arith.constant 0 : index
    %c0_64 = arith.constant 0 : index
    %59 = vector.load %arg16[%c0_63, %c0_64] : memref<1x6xf32, #tpu.memory_space<vmem>>, vector<1x6xf32>
    %cst_65 = arith.constant dense<0.000000e+00> : vector<32xf32>
    %60 = vector.multi_reduction <add>, %57, %cst_65 [1] : vector<32x6xf32> to vector<32xf32>
    %61 = vector.shape_cast %60 : vector<32xf32> to vector<32x1xf32>
    %cst_66 = arith.constant 6.000000e+00 : f32
    %62 = vector.broadcast %cst_66 : f32 to vector<32x1xf32>
    %63 = arith.divf %61, %62 : vector<32x1xf32>
    %64 = vector.broadcast %63 : vector<32x1xf32> to vector<32x6xf32>
    %65 = arith.subf %57, %64 : vector<32x6xf32>
    %66 = vector.broadcast %63 : vector<32x1xf32> to vector<32x6xf32>
    %67 = arith.subf %57, %66 : vector<32x6xf32>
    %68 = arith.mulf %65, %67 : vector<32x6xf32>
    %cst_67 = arith.constant dense<0.000000e+00> : vector<32xf32>
    %69 = vector.multi_reduction <add>, %68, %cst_67 [1] : vector<32x6xf32> to vector<32xf32>
    %70 = vector.shape_cast %69 : vector<32xf32> to vector<32x1xf32>
    %cst_68 = arith.constant 6.000000e+00 : f32
    %71 = vector.broadcast %cst_68 : f32 to vector<32x1xf32>
    %72 = arith.divf %70, %71 : vector<32x1xf32>
    %73 = vector.broadcast %63 : vector<32x1xf32> to vector<32x6xf32>
    %74 = arith.subf %57, %73 : vector<32x6xf32>
    %cst_69 = arith.constant 9.99999974E-6 : f32
    %75 = vector.broadcast %cst_69 : f32 to vector<32x1xf32>
    %76 = arith.addf %72, %75 : vector<32x1xf32>
    %77 = math.rsqrt %76 : vector<32x1xf32>
    %78 = vector.broadcast %77 : vector<32x1xf32> to vector<32x6xf32>
    %79 = arith.mulf %74, %78 : vector<32x6xf32>
    %80 = vector.broadcast %58 : vector<1x6xf32> to vector<32x6xf32>
    %81 = arith.mulf %79, %80 : vector<32x6xf32>
    %82 = vector.broadcast %59 : vector<1x6xf32> to vector<32x6xf32>
    %83 = arith.addf %81, %82 : vector<32x6xf32>
    %c0_70 = arith.constant 0 : index
    %c0_71 = arith.constant 0 : index
    %84 = vector.load %arg18[%c0_70, %c0_71] : memref<32x6xf32, #tpu.memory_space<vmem>>, vector<32x6xf32>
    tpu.vector_store %arg18[%c0_70, %c0_71], %83 {strides = array<i32>} : memref<32x6xf32, #tpu.memory_space<vmem>>, vector<32x6xf32>,
    %c0_72 = arith.constant 0 : index
    %c0_73 = arith.constant 0 : index
    %c0_74 = arith.constant 0 : index
    %85 = vector.load %arg8[%c0_72, %c0_73, %c0_74] : memref<3x32x2xf32, #tpu.memory_space<vmem>>, vector<1x32x2xf32>
    %86 = vector.shape_cast %85 : vector<1x32x2xf32> to vector<32x2xf32>
    %87 = arith.addf %86, %54 : vector<32x2xf32>
    %c1_75 = arith.constant 1 : index
    %c0_76 = arith.constant 0 : index
    %c0_77 = arith.constant 0 : index
    %88 = vector.load %arg8[%c1_75, %c0_76, %c0_77] : memref<3x32x2xf32, #tpu.memory_space<vmem>>, vector<1x32x2xf32>
    %89 = vector.shape_cast %88 : vector<1x32x2xf32> to vector<32x2xf32>
    %90 = arith.addf %89, %55 : vector<32x2xf32>
    %c2_78 = arith.constant 2 : index
    %c0_79 = arith.constant 0 : index
    %c0_80 = arith.constant 0 : index
    %91 = vector.load %arg8[%c2_78, %c0_79, %c0_80] : memref<3x32x2xf32, #tpu.memory_space<vmem>>, vector<1x32x2xf32>
    %92 = vector.shape_cast %91 : vector<1x32x2xf32> to vector<32x2xf32>
    %93 = arith.addf %92, %56 : vector<32x2xf32>
    %c0_81 = arith.constant 0 : index
    %c0_82 = arith.constant 0 : index
    %94 = vector.load %arg17[%c0_81, %c0_82] : memref<1x2xf32, #tpu.memory_space<vmem>>, vector<1x2xf32>
    %95 = arith.mulf %87, %87 : vector<32x2xf32>
    %96 = arith.mulf %90, %90 : vector<32x2xf32>
    %97 = arith.addf %95, %96 : vector<32x2xf32>
    %98 = arith.mulf %93, %93 : vector<32x2xf32>
    %99 = arith.addf %97, %98 : vector<32x2xf32>
    %cst_83 = arith.constant 9.99999993E-9 : f32
    %100 = vector.broadcast %cst_83 : f32 to vector<32x2xf32>
    %101 = arith.maximumf %99, %100 : vector<32x2xf32>
    %cst_84 = arith.constant dense<0.000000e+00> : vector<32xf32>
    %102 = vector.multi_reduction <add>, %101, %cst_84 [1] : vector<32x2xf32> to vector<32xf32>
    %103 = vector.shape_cast %102 : vector<32xf32> to vector<32x1xf32>
    %cst_85 = arith.constant 2.000000e+00 : f32
    %104 = vector.broadcast %cst_85 : f32 to vector<32x1xf32>
    %105 = arith.divf %103, %104 : vector<32x1xf32>
    %106 = math.rsqrt %105 : vector<32x1xf32>
    %107 = vector.broadcast %94 : vector<1x2xf32> to vector<32x2xf32>
    %108 = vector.broadcast %106 : vector<32x1xf32> to vector<32x2xf32>
    %109 = arith.mulf %107, %108 : vector<32x2xf32>
    %110 = arith.mulf %87, %109 : vector<32x2xf32>
    %111 = arith.mulf %90, %109 : vector<32x2xf32>
    %112 = arith.mulf %93, %109 : vector<32x2xf32>
    %c0_86 = arith.constant 0 : index
    %c0_87 = arith.constant 0 : index
    %c0_88 = arith.constant 0 : index
    %113 = vector.load %arg19[%c0_86, %c0_87, %c0_88] : memref<3x32x2xf32, #tpu.memory_space<vmem>>, vector<1x32x2xf32>
    %114 = vector.shape_cast %113 : vector<1x32x2xf32> to vector<32x2xf32>
    %115 = vector.shape_cast %110 : vector<32x2xf32> to vector<1x32x2xf32>
    tpu.vector_store %arg19[%c0_86, %c0_87, %c0_88], %115 {strides = array<i32>} : memref<3x32x2xf32, #tpu.memory_space<vmem>>, vector<1x32x2xf32>,
    %c1_89 = arith.constant 1 : index
    %c0_90 = arith.constant 0 : index
    %c0_91 = arith.constant 0 : index
    %116 = vector.load %arg19[%c1_89, %c0_90, %c0_91] : memref<3x32x2xf32, #tpu.memory_space<vmem>>, vector<1x32x2xf32>
    %117 = vector.shape_cast %116 : vector<1x32x2xf32> to vector<32x2xf32>
    %118 = vector.shape_cast %111 : vector<32x2xf32> to vector<1x32x2xf32>
    tpu.vector_store %arg19[%c1_89, %c0_90, %c0_91], %118 {strides = array<i32>} : memref<3x32x2xf32, #tpu.memory_space<vmem>>, vector<1x32x2xf32>,
    %c2_92 = arith.constant 2 : index
    %c0_93 = arith.constant 0 : index
    %c0_94 = arith.constant 0 : index
    %119 = vector.load %arg19[%c2_92, %c0_93, %c0_94] : memref<3x32x2xf32, #tpu.memory_space<vmem>>, vector<1x32x2xf32>
    %120 = vector.shape_cast %119 : vector<1x32x2xf32> to vector<32x2xf32>
    %121 = vector.shape_cast %112 : vector<32x2xf32> to vector<1x32x2xf32>
    tpu.vector_store %arg19[%c2_92, %c0_93, %c0_94], %121 {strides = array<i32>} : memref<3x32x2xf32, #tpu.memory_space<vmem>>, vector<1x32x2xf32>,
    return
  }
  func.func @transform_0(%arg0: i32) -> (i32, i32) {
    %c0_i32 = arith.constant 0 : i32
    %c0_i32_0 = arith.constant 0 : i32
    return %arg0, %c0_i32 : i32, i32
  }
  func.func @transform_1(%arg0: i32) -> (i32, i32) {
    %c0_i32 = arith.constant 0 : i32
    %c0_i32_0 = arith.constant 0 : i32
    return %arg0, %c0_i32 : i32, i32
  }
  func.func @transform_2(%arg0: i32) -> (i32, i32) {
    %c0_i32 = arith.constant 0 : i32
    %c0_i32_0 = arith.constant 0 : i32
    return %arg0, %c0_i32 : i32, i32
  }
  func.func @transform_3(%arg0: i32) -> (i32, i32) {
    %c0_i32 = arith.constant 0 : i32
    %c0_i32_0 = arith.constant 0 : i32
    return %arg0, %c0_i32 : i32, i32
  }
  func.func @transform_4(%arg0: i32) -> (i32, i32) {
    %c0_i32 = arith.constant 0 : i32
    %c0_i32_0 = arith.constant 0 : i32
    return %arg0, %c0_i32 : i32, i32
  }
  func.func @transform_5(%arg0: i32) -> (i32, i32, i32) {
    %c0_i32 = arith.constant 0 : i32
    %c0_i32_0 = arith.constant 0 : i32
    %c0_i32_1 = arith.constant 0 : i32
    return %c0_i32, %arg0, %c0_i32_0 : i32, i32, i32
  }
  func.func @transform_6(%arg0: i32) -> (i32, i32, i32) {
    %c0_i32 = arith.constant 0 : i32
    %c0_i32_0 = arith.constant 0 : i32
    %c0_i32_1 = arith.constant 0 : i32
    return %c0_i32, %arg0, %c0_i32_0 : i32, i32, i32
  }
  func.func @transform_7(%arg0: i32) -> (i32, i32, i32) {
    %c0_i32 = arith.constant 0 : i32
    %c0_i32_0 = arith.constant 0 : i32
    %c0_i32_1 = arith.constant 0 : i32
    return %c0_i32, %arg0, %c0_i32_0 : i32, i32, i32
  }
  func.func @transform_8(%arg0: i32) -> (i32, i32, i32) {
    %c0_i32 = arith.constant 0 : i32
    %c0_i32_0 = arith.constant 0 : i32
    %c0_i32_1 = arith.constant 0 : i32
    return %c0_i32, %arg0, %c0_i32_0 : i32, i32, i32
  }
  func.func @transform_9(%arg0: i32) -> (i32, i32) {
    %c0_i32 = arith.constant 0 : i32
    %c0_i32_0 = arith.constant 0 : i32
    %c0_i32_1 = arith.constant 0 : i32
    return %c0_i32, %c0_i32_0 : i32, i32
  }
  func.func @transform_10(%arg0: i32) -> (i32, i32) {
    %c0_i32 = arith.constant 0 : i32
    %c0_i32_0 = arith.constant 0 : i32
    %c0_i32_1 = arith.constant 0 : i32
    return %c0_i32, %c0_i32_0 : i32, i32
  }
  func.func @transform_11(%arg0: i32) -> (i32, i32) {
    %c0_i32 = arith.constant 0 : i32
    %c0_i32_0 = arith.constant 0 : i32
    %c0_i32_1 = arith.constant 0 : i32
    return %c0_i32, %c0_i32_0 : i32, i32
  }
  func.func @transform_12(%arg0: i32) -> (i32, i32) {
    %c0_i32 = arith.constant 0 : i32
    %c0_i32_0 = arith.constant 0 : i32
    %c0_i32_1 = arith.constant 0 : i32
    return %c0_i32, %c0_i32_0 : i32, i32
  }
  func.func @transform_13(%arg0: i32) -> (i32, i32) {
    %c0_i32 = arith.constant 0 : i32
    %c0_i32_0 = arith.constant 0 : i32
    %c0_i32_1 = arith.constant 0 : i32
    return %c0_i32, %c0_i32_0 : i32, i32
  }
  func.func @transform_14(%arg0: i32) -> (i32, i32) {
    %c0_i32 = arith.constant 0 : i32
    %c0_i32_0 = arith.constant 0 : i32
    %c0_i32_1 = arith.constant 0 : i32
    return %c0_i32, %c0_i32_0 : i32, i32
  }
  func.func @transform_15(%arg0: i32) -> (i32, i32) {
    %c0_i32 = arith.constant 0 : i32
    %c0_i32_0 = arith.constant 0 : i32
    %c0_i32_1 = arith.constant 0 : i32
    return %c0_i32, %c0_i32_0 : i32, i32
  }
  func.func @transform_16(%arg0: i32) -> (i32, i32) {
    %c0_i32 = arith.constant 0 : i32
    %c0_i32_0 = arith.constant 0 : i32
    %c0_i32_1 = arith.constant 0 : i32
    return %c0_i32, %c0_i32_0 : i32, i32
  }
  func.func @transform_17(%arg0: i32) -> (i32, i32) {
    %c0_i32 = arith.constant 0 : i32
    %c0_i32_0 = arith.constant 0 : i32
    return %arg0, %c0_i32 : i32, i32
  }
  func.func @transform_18(%arg0: i32) -> (i32, i32, i32) {
    %c0_i32 = arith.constant 0 : i32
    %c0_i32_0 = arith.constant 0 : i32
    %c0_i32_1 = arith.constant 0 : i32
    return %c0_i32, %arg0, %c0_i32_0 : i32, i32, i32
  }
}

module attributes {stable_mosaic.version = 11 : i64} {
  func.func @_seg_sum_kernel(%arg0: i32, %arg1: i32, %arg2: memref<1x128xi32, #tpu.memory_space<vmem>>, %arg3: memref<128x128xf32, #tpu.memory_space<vmem>>, %arg4: memref<8x128xf32, #tpu.memory_space<vmem>>, %arg5: memref<8x128xf32, #tpu.memory_space<vmem>>) attributes {dimension_semantics = [#tpu.dimension_semantics<parallel>, #tpu.dimension_semantics<arbitrary>], iteration_bounds = array<i64: 1, 1>, scalar_prefetch = 0 : i64, scratch_operands = 1 : i64, tpu.core_type = #tpu.core_type<tc>, window_params = [{transform_indices = @transform_0, window_bounds = array<i64: 1, 128>}, {transform_indices = @transform_1, window_bounds = array<i64: 128, 128>}, {transform_indices = @transform_2, window_bounds = array<i64: 8, 128>}]} {
    %c0_i32 = arith.constant 0 : i32
    %0 = arith.cmpi eq, %arg1, %c0_i32 : i32
    %1 = arith.extui %0 : i1 to i32
    %c0_i32_0 = arith.constant 0 : i32
    %2 = arith.cmpi ne, %1, %c0_i32_0 : i32
    scf.if %2 {
      %cst_10 = arith.constant 0.000000e+00 : f32
      %20 = vector.broadcast %cst_10 : f32 to vector<8x128xf32>
      %c0_11 = arith.constant 0 : index
      %c0_12 = arith.constant 0 : index
      %21 = vector.load %arg5[%c0_11, %c0_12] : memref<8x128xf32, #tpu.memory_space<vmem>>, vector<8x128xf32>
      tpu.vector_store %arg5[%c0_11, %c0_12], %20 {strides = array<i32>} : memref<8x128xf32, #tpu.memory_space<vmem>>, vector<8x128xf32>,
    } else {
    }
    %3 = tpu.iota {dimensions = array<i32: 0>} : vector<8x128xi32>
    %c8_i32 = arith.constant 8 : i32
    %4 = arith.muli %arg0, %c8_i32 : i32
    %5 = vector.broadcast %4 : i32 to vector<8x128xi32>
    %6 = arith.addi %3, %5 : vector<8x128xi32>
    %c0 = arith.constant 0 : index
    %c0_1 = arith.constant 0 : index
    %7 = vector.load %arg2[%c0, %c0_1] : memref<1x128xi32, #tpu.memory_space<vmem>>, vector<1x128xi32>
    %8 = vector.broadcast %7 : vector<1x128xi32> to vector<8x128xi32>
    %9 = arith.cmpi eq, %6, %8 : vector<8x128xi32>
    %10 = arith.extui %9 : vector<8x128xi1> to vector<8x128xi32>
    %11 = arith.sitofp %10 : vector<8x128xi32> to vector<8x128xf32>
    %c0_2 = arith.constant 0 : index
    %c0_3 = arith.constant 0 : index
    %12 = vector.load %arg5[%c0_2, %c0_3] : memref<8x128xf32, #tpu.memory_space<vmem>>, vector<8x128xf32>
    %c0_4 = arith.constant 0 : index
    %c0_5 = arith.constant 0 : index
    %13 = vector.load %arg3[%c0_4, %c0_5] : memref<128x128xf32, #tpu.memory_space<vmem>>, vector<128x128xf32>
    %cst = arith.constant dense<0.000000e+00> : vector<8x128xf32>
    %14 = tpu.matmul %11, %13, %cst {dimension_numbers = #tpu.dot_dimension_numbers<[1], [0], [0], [1], [0, 0, 1, 1], [], []>} : vector<8x128xf32>, vector<128x128xf32>, vector<8x128xf32> -> vector<8x128xf32>
    %15 = arith.addf %12, %14 : vector<8x128xf32>
    %c0_6 = arith.constant 0 : index
    %c0_7 = arith.constant 0 : index
    %16 = vector.load %arg5[%c0_6, %c0_7] : memref<8x128xf32, #tpu.memory_space<vmem>>, vector<8x128xf32>
    tpu.vector_store %arg5[%c0_6, %c0_7], %15 {strides = array<i32>} : memref<8x128xf32, #tpu.memory_space<vmem>>, vector<8x128xf32>,
    %c0_i32_8 = arith.constant 0 : i32
    %17 = arith.cmpi eq, %arg1, %c0_i32_8 : i32
    %18 = arith.extui %17 : i1 to i32
    %c0_i32_9 = arith.constant 0 : i32
    %19 = arith.cmpi ne, %18, %c0_i32_9 : i32
    scf.if %19 {
      %c0_10 = arith.constant 0 : index
      %c0_11 = arith.constant 0 : index
      %20 = vector.load %arg5[%c0_10, %c0_11] : memref<8x128xf32, #tpu.memory_space<vmem>>, vector<8x128xf32>
      %c0_12 = arith.constant 0 : index
      %c0_13 = arith.constant 0 : index
      %21 = vector.load %arg4[%c0_12, %c0_13] : memref<8x128xf32, #tpu.memory_space<vmem>>, vector<8x128xf32>
      tpu.vector_store %arg4[%c0_12, %c0_13], %20 {strides = array<i32>} : memref<8x128xf32, #tpu.memory_space<vmem>>, vector<8x128xf32>,
    } else {
    }
    return
  }
  func.func @transform_0(%arg0: i32, %arg1: i32) -> (i32, i32) {
    %c0_i32 = arith.constant 0 : i32
    %c0_i32_0 = arith.constant 0 : i32
    return %c0_i32, %arg1 : i32, i32
  }
  func.func @transform_1(%arg0: i32, %arg1: i32) -> (i32, i32) {
    %c0_i32 = arith.constant 0 : i32
    %c0_i32_0 = arith.constant 0 : i32
    return %arg1, %c0_i32 : i32, i32
  }
  func.func @transform_2(%arg0: i32, %arg1: i32) -> (i32, i32) {
    %c0_i32 = arith.constant 0 : i32
    %c0_i32_0 = arith.constant 0 : i32
    return %arg0, %c0_i32 : i32, i32
  }
}

module attributes {stable_mosaic.version = 11 : i64} {
  func.func @kern(%arg0: memref<2x128xf32, #tpu.memory_space<vmem>>, %arg1: memref<2x24xf32, #tpu.memory_space<vmem>>, %arg2: memref<2x128xf32, #tpu.memory_space<vmem>>, %arg3: memref<2x16xf32, #tpu.memory_space<vmem>>, %arg4: memref<2x5xf32, #tpu.memory_space<vmem>>, %arg5: memref<3x2x2xf32, #tpu.memory_space<vmem>>, %arg6: memref<4x4xf32, #tpu.memory_space<vmem>>, %arg7: memref<44x8xf32, #tpu.memory_space<vmem>>, %arg8: memref<4x8xf32, #tpu.memory_space<vmem>>, %arg9: memref<1x8xf32, #tpu.memory_space<vmem>>, %arg10: memref<4x4xf32, #tpu.memory_space<vmem>>, %arg11: memref<2x2xf32, #tpu.memory_space<vmem>>, %arg12: memref<30x6xf32, #tpu.memory_space<vmem>>, %arg13: memref<2x6xf32, #tpu.memory_space<vmem>>, %arg14: memref<1x6xf32, #tpu.memory_space<vmem>>, %arg15: memref<2x2xf32, #tpu.memory_space<vmem>>, %arg16: memref<2x2xf32, #tpu.memory_space<vmem>>, %arg17: memref<5x5xf32, #tpu.memory_space<vmem>>, %arg18: memref<2x5xf32, #tpu.memory_space<vmem>>, %arg19: memref<1x5xf32, #tpu.memory_space<vmem>>, %arg20: memref<2x2xf32, #tpu.memory_space<vmem>>, %arg21: memref<8x8xf32, #tpu.memory_space<vmem>>, %arg22: memref<19x5xf32, #tpu.memory_space<vmem>>, %arg23: memref<8x5xf32, #tpu.memory_space<vmem>>, %arg24: memref<1x5xf32, #tpu.memory_space<vmem>>, %arg25: memref<8x2xf32, #tpu.memory_space<vmem>>, %arg26: memref<1x5xf32, #tpu.memory_space<vmem>>, %arg27: memref<1x5xf32, #tpu.memory_space<vmem>>, %arg28: memref<1x2xf32, #tpu.memory_space<vmem>>, %arg29: memref<2x5xf32, #tpu.memory_space<vmem>>, %arg30: memref<3x2x2xf32, #tpu.memory_space<vmem>>) attributes {dimension_semantics = [], scalar_prefetch = 0 : i64, scratch_operands = 0 : i64, tpu.core_type = #tpu.core_type<tc>} {
    %c0 = arith.constant 0 : index
    %c0_0 = arith.constant 0 : index
    %0 = vector.load %arg6[%c0, %c0_0] : memref<4x4xf32, #tpu.memory_space<vmem>>, vector<4x4xf32>
    %c0_1 = arith.constant 0 : index
    %c0_2 = arith.constant 0 : index
    %1 = vector.load %arg7[%c0_1, %c0_2] : memref<44x8xf32, #tpu.memory_space<vmem>>, vector<44x8xf32>
    %c0_3 = arith.constant 0 : index
    %c0_4 = arith.constant 0 : index
    %2 = vector.load %arg8[%c0_3, %c0_4] : memref<4x8xf32, #tpu.memory_space<vmem>>, vector<4x8xf32>
    %c0_5 = arith.constant 0 : index
    %c0_6 = arith.constant 0 : index
    %3 = vector.load %arg9[%c0_5, %c0_6] : memref<1x8xf32, #tpu.memory_space<vmem>>, vector<1x8xf32>
    %c0_7 = arith.constant 0 : index
    %c0_8 = arith.constant 0 : index
    %4 = vector.load %arg10[%c0_7, %c0_8] : memref<4x4xf32, #tpu.memory_space<vmem>>, vector<4x4xf32>
    %c0_9 = arith.constant 0 : index
    %c0_10 = arith.constant 0 : index
    %5 = vector.load %arg11[%c0_9, %c0_10] : memref<2x2xf32, #tpu.memory_space<vmem>>, vector<2x2xf32>
    %c0_11 = arith.constant 0 : index
    %c0_12 = arith.constant 0 : index
    %6 = vector.load %arg12[%c0_11, %c0_12] : memref<30x6xf32, #tpu.memory_space<vmem>>, vector<30x6xf32>
    %c0_13 = arith.constant 0 : index
    %c0_14 = arith.constant 0 : index
    %7 = vector.load %arg13[%c0_13, %c0_14] : memref<2x6xf32, #tpu.memory_space<vmem>>, vector<2x6xf32>
    %c0_15 = arith.constant 0 : index
    %c0_16 = arith.constant 0 : index
    %8 = vector.load %arg14[%c0_15, %c0_16] : memref<1x6xf32, #tpu.memory_space<vmem>>, vector<1x6xf32>
    %c0_17 = arith.constant 0 : index
    %c0_18 = arith.constant 0 : index
    %9 = vector.load %arg15[%c0_17, %c0_18] : memref<2x2xf32, #tpu.memory_space<vmem>>, vector<2x2xf32>
    %c0_19 = arith.constant 0 : index
    %c0_20 = arith.constant 0 : index
    %10 = vector.load %arg16[%c0_19, %c0_20] : memref<2x2xf32, #tpu.memory_space<vmem>>, vector<2x2xf32>
    %c0_21 = arith.constant 0 : index
    %c0_22 = arith.constant 0 : index
    %11 = vector.load %arg17[%c0_21, %c0_22] : memref<5x5xf32, #tpu.memory_space<vmem>>, vector<5x5xf32>
    %c0_23 = arith.constant 0 : index
    %c0_24 = arith.constant 0 : index
    %12 = vector.load %arg18[%c0_23, %c0_24] : memref<2x5xf32, #tpu.memory_space<vmem>>, vector<2x5xf32>
    %c0_25 = arith.constant 0 : index
    %c0_26 = arith.constant 0 : index
    %13 = vector.load %arg19[%c0_25, %c0_26] : memref<1x5xf32, #tpu.memory_space<vmem>>, vector<1x5xf32>
    %c0_27 = arith.constant 0 : index
    %c0_28 = arith.constant 0 : index
    %14 = vector.load %arg20[%c0_27, %c0_28] : memref<2x2xf32, #tpu.memory_space<vmem>>, vector<2x2xf32>
    %c0_29 = arith.constant 0 : index
    %c0_30 = arith.constant 0 : index
    %15 = vector.load %arg21[%c0_29, %c0_30] : memref<8x8xf32, #tpu.memory_space<vmem>>, vector<8x8xf32>
    %c0_31 = arith.constant 0 : index
    %c0_32 = arith.constant 0 : index
    %16 = vector.load %arg22[%c0_31, %c0_32] : memref<19x5xf32, #tpu.memory_space<vmem>>, vector<19x5xf32>
    %c0_33 = arith.constant 0 : index
    %c0_34 = arith.constant 0 : index
    %17 = vector.load %arg23[%c0_33, %c0_34] : memref<8x5xf32, #tpu.memory_space<vmem>>, vector<8x5xf32>
    %c0_35 = arith.constant 0 : index
    %c0_36 = arith.constant 0 : index
    %18 = vector.load %arg24[%c0_35, %c0_36] : memref<1x5xf32, #tpu.memory_space<vmem>>, vector<1x5xf32>
    %c0_37 = arith.constant 0 : index
    %c0_38 = arith.constant 0 : index
    %19 = vector.load %arg25[%c0_37, %c0_38] : memref<8x2xf32, #tpu.memory_space<vmem>>, vector<8x2xf32>
    %c0_39 = arith.constant 0 : index
    %c0_40 = arith.constant 0 : index
    %20 = vector.load %arg26[%c0_39, %c0_40] : memref<1x5xf32, #tpu.memory_space<vmem>>, vector<1x5xf32>
    %c0_41 = arith.constant 0 : index
    %c0_42 = arith.constant 0 : index
    %21 = vector.load %arg27[%c0_41, %c0_42] : memref<1x5xf32, #tpu.memory_space<vmem>>, vector<1x5xf32>
    %c0_43 = arith.constant 0 : index
    %c0_44 = arith.constant 0 : index
    %22 = vector.load %arg28[%c0_43, %c0_44] : memref<1x2xf32, #tpu.memory_space<vmem>>, vector<1x2xf32>
    %c0_45 = arith.constant 0 : index
    %c0_46 = arith.constant 0 : index
    %23 = vector.load %arg0[%c0_45, %c0_46] : memref<2x128xf32, #tpu.memory_space<vmem>>, vector<2x128xf32>
    %c0_47 = arith.constant 0 : index
    %c0_48 = arith.constant 0 : index
    %24 = vector.load %arg1[%c0_47, %c0_48] : memref<2x24xf32, #tpu.memory_space<vmem>>, vector<2x24xf32>
    %25 = vector.extract_strided_slice %23 {offsets = [0, 36], sizes = [2, 1], strides = [1, 1]} : vector<2x128xf32> to vector<2x1xf32>
    %cst = arith.constant 1.000000e+00 : f32
    %26 = vector.broadcast %cst : f32 to vector<2x1xf32>
    %27 = arith.maximumf %25, %26 : vector<2x1xf32>
    %cst_49 = arith.constant 1.000000e+00 : f32
    %28 = vector.broadcast %cst_49 : f32 to vector<2x1xf32>
    %29 = arith.subf %27, %28 : vector<2x1xf32>
    %cst_50 = arith.constant 1.000000e+00 : f32
    %30 = vector.broadcast %cst_50 : f32 to vector<2x1xf32>
    %31 = arith.maximumf %29, %30 : vector<2x1xf32>
    %32 = vector.extract_strided_slice %23 {offsets = [0, 0], sizes = [2, 8], strides = [1, 1]} : vector<2x128xf32> to vector<2x8xf32>
    %33 = vector.extract_strided_slice %23 {offsets = [0, 8], sizes = [2, 8], strides = [1, 1]} : vector<2x128xf32> to vector<2x8xf32>
    %34 = vector.extract_strided_slice %23 {offsets = [0, 16], sizes = [2, 4], strides = [1, 1]} : vector<2x128xf32> to vector<2x4xf32>
    %35 = vector.extract_strided_slice %23 {offsets = [0, 20], sizes = [2, 4], strides = [1, 1]} : vector<2x128xf32> to vector<2x4xf32>
    %36 = vector.broadcast %27 : vector<2x1xf32> to vector<2x8xf32>
    %37 = arith.divf %32, %36 : vector<2x8xf32>
    %38 = vector.broadcast %27 : vector<2x1xf32> to vector<2x8xf32>
    %39 = arith.mulf %38, %37 : vector<2x8xf32>
    %40 = arith.mulf %39, %37 : vector<2x8xf32>
    %41 = arith.subf %33, %40 : vector<2x8xf32>
    %cst_51 = arith.constant 0.000000e+00 : f32
    %42 = vector.broadcast %cst_51 : f32 to vector<2x8xf32>
    %43 = arith.maximumf %41, %42 : vector<2x8xf32>
    %44 = vector.broadcast %31 : vector<2x1xf32> to vector<2x8xf32>
    %45 = arith.divf %43, %44 : vector<2x8xf32>
    %46 = math.sqrt %45 : vector<2x8xf32>
    %47 = vector.broadcast %27 : vector<2x1xf32> to vector<2x4xf32>
    %48 = arith.divf %34, %47 : vector<2x4xf32>
    %49 = vector.broadcast %27 : vector<2x1xf32> to vector<2x4xf32>
    %50 = arith.mulf %49, %48 : vector<2x4xf32>
    %51 = arith.mulf %50, %48 : vector<2x4xf32>
    %52 = arith.subf %35, %51 : vector<2x4xf32>
    %cst_52 = arith.constant 0.000000e+00 : f32
    %53 = vector.broadcast %cst_52 : f32 to vector<2x4xf32>
    %54 = arith.maximumf %52, %53 : vector<2x4xf32>
    %55 = vector.broadcast %31 : vector<2x1xf32> to vector<2x4xf32>
    %56 = arith.divf %54, %55 : vector<2x4xf32>
    %57 = math.sqrt %56 : vector<2x4xf32>
    %58 = vector.extract_strided_slice %24 {offsets = [0, 0], sizes = [2, 8], strides = [1, 1]} : vector<2x24xf32> to vector<2x8xf32>
    %59 = vector.extract_strided_slice %24 {offsets = [0, 8], sizes = [2, 8], strides = [1, 1]} : vector<2x24xf32> to vector<2x8xf32>
    %60 = vector.extract_strided_slice %24 {offsets = [0, 16], sizes = [2, 4], strides = [1, 1]} : vector<2x24xf32> to vector<2x4xf32>
    %61 = vector.extract_strided_slice %24 {offsets = [0, 20], sizes = [2, 4], strides = [1, 1]} : vector<2x24xf32> to vector<2x4xf32>
    %62 = tpu.concatenate %37, %58, %59, %46, %60, %61, %57 in 1 : vector<2x8xf32>, vector<2x8xf32>, vector<2x8xf32>, vector<2x8xf32>, vector<2x4xf32>, vector<2x4xf32>, vector<2x4xf32> -> vector<2x44xf32>
    %63 = vector.extract_strided_slice %23 {offsets = [0, 24], sizes = [2, 4], strides = [1, 1]} : vector<2x128xf32> to vector<2x4xf32>
    %64 = vector.broadcast %27 : vector<2x1xf32> to vector<2x4xf32>
    %65 = arith.divf %63, %64 : vector<2x4xf32>
    %66 = vector.extract_strided_slice %23 {offsets = [0, 28], sizes = [2, 4], strides = [1, 1]} : vector<2x128xf32> to vector<2x4xf32>
    %67 = vector.broadcast %27 : vector<2x1xf32> to vector<2x4xf32>
    %68 = arith.divf %66, %67 : vector<2x4xf32>
    %69 = vector.extract_strided_slice %23 {offsets = [0, 32], sizes = [2, 4], strides = [1, 1]} : vector<2x128xf32> to vector<2x4xf32>
    %70 = vector.broadcast %27 : vector<2x1xf32> to vector<2x4xf32>
    %71 = arith.divf %69, %70 : vector<2x4xf32>
    %cst_53 = arith.constant dense<0.000000e+00> : vector<2x4xf32>
    %72 = tpu.matmul %65, %0, %cst_53 {dimension_numbers = #tpu.dot_dimension_numbers<[1], [0], [0], [1], [0, 0, 1, 1], [], []>} : vector<2x4xf32>, vector<4x4xf32>, vector<2x4xf32> -> vector<2x4xf32>
    %cst_54 = arith.constant dense<0.000000e+00> : vector<2x4xf32>
    %73 = tpu.matmul %68, %0, %cst_54 {dimension_numbers = #tpu.dot_dimension_numbers<[1], [0], [0], [1], [0, 0, 1, 1], [], []>} : vector<2x4xf32>, vector<4x4xf32>, vector<2x4xf32> -> vector<2x4xf32>
    %cst_55 = arith.constant dense<0.000000e+00> : vector<2x4xf32>
    %74 = tpu.matmul %71, %0, %cst_55 {dimension_numbers = #tpu.dot_dimension_numbers<[1], [0], [0], [1], [0, 0, 1, 1], [], []>} : vector<2x4xf32>, vector<4x4xf32>, vector<2x4xf32> -> vector<2x4xf32>
    %75 = arith.mulf %72, %72 : vector<2x4xf32>
    %76 = arith.mulf %73, %73 : vector<2x4xf32>
    %77 = arith.addf %75, %76 : vector<2x4xf32>
    %78 = arith.mulf %74, %74 : vector<2x4xf32>
    %79 = arith.addf %77, %78 : vector<2x4xf32>
    %cst_56 = arith.constant 9.99999993E-9 : f32
    %80 = vector.broadcast %cst_56 : f32 to vector<2x4xf32>
    %81 = arith.maximumf %79, %80 : vector<2x4xf32>
    %82 = math.sqrt %81 : vector<2x4xf32>
    %cst_57 = arith.constant dense<0.000000e+00> : vector<2x8xf32>
    %83 = tpu.matmul %62, %1, %cst_57 {dimension_numbers = #tpu.dot_dimension_numbers<[1], [0], [0], [1], [0, 0, 1, 1], [], []>} : vector<2x44xf32>, vector<44x8xf32>, vector<2x8xf32> -> vector<2x8xf32>
    %cst_58 = arith.constant dense<0.000000e+00> : vector<2x8xf32>
    %84 = tpu.matmul %82, %2, %cst_58 {dimension_numbers = #tpu.dot_dimension_numbers<[1], [0], [0], [1], [0, 0, 1, 1], [], []>} : vector<2x4xf32>, vector<4x8xf32>, vector<2x8xf32> -> vector<2x8xf32>
    %85 = arith.addf %83, %84 : vector<2x8xf32>
    %86 = vector.broadcast %3 : vector<1x8xf32> to vector<2x8xf32>
    %87 = arith.addf %85, %86 : vector<2x8xf32>
    %cst_59 = arith.constant dense<0.000000e+00> : vector<2x4xf32>
    %88 = tpu.matmul %72, %4, %cst_59 {dimension_numbers = #tpu.dot_dimension_numbers<[1], [0], [0], [1], [0, 0, 1, 1], [], []>} : vector<2x4xf32>, vector<4x4xf32>, vector<2x4xf32> -> vector<2x4xf32>
    %cst_60 = arith.constant dense<0.000000e+00> : vector<2x4xf32>
    %89 = tpu.matmul %73, %4, %cst_60 {dimension_numbers = #tpu.dot_dimension_numbers<[1], [0], [0], [1], [0, 0, 1, 1], [], []>} : vector<2x4xf32>, vector<4x4xf32>, vector<2x4xf32> -> vector<2x4xf32>
    %cst_61 = arith.constant dense<0.000000e+00> : vector<2x4xf32>
    %90 = tpu.matmul %74, %4, %cst_61 {dimension_numbers = #tpu.dot_dimension_numbers<[1], [0], [0], [1], [0, 0, 1, 1], [], []>} : vector<2x4xf32>, vector<4x4xf32>, vector<2x4xf32> -> vector<2x4xf32>
    %c0_62 = arith.constant 0 : index
    %c0_63 = arith.constant 0 : index
    %91 = vector.load %arg2[%c0_62, %c0_63] : memref<2x128xf32, #tpu.memory_space<vmem>>, vector<2x128xf32>
    %c0_64 = arith.constant 0 : index
    %c0_65 = arith.constant 0 : index
    %92 = vector.load %arg3[%c0_64, %c0_65] : memref<2x16xf32, #tpu.memory_space<vmem>>, vector<2x16xf32>
    %93 = vector.extract_strided_slice %91 {offsets = [0, 22], sizes = [2, 1], strides = [1, 1]} : vector<2x128xf32> to vector<2x1xf32>
    %cst_66 = arith.constant 1.000000e+00 : f32
    %94 = vector.broadcast %cst_66 : f32 to vector<2x1xf32>
    %95 = arith.maximumf %93, %94 : vector<2x1xf32>
    %cst_67 = arith.constant 1.000000e+00 : f32
    %96 = vector.broadcast %cst_67 : f32 to vector<2x1xf32>
    %97 = arith.subf %95, %96 : vector<2x1xf32>
    %cst_68 = arith.constant 1.000000e+00 : f32
    %98 = vector.broadcast %cst_68 : f32 to vector<2x1xf32>
    %99 = arith.maximumf %97, %98 : vector<2x1xf32>
    %100 = vector.extract_strided_slice %91 {offsets = [0, 0], sizes = [2, 6], strides = [1, 1]} : vector<2x128xf32> to vector<2x6xf32>
    %101 = vector.extract_strided_slice %91 {offsets = [0, 6], sizes = [2, 6], strides = [1, 1]} : vector<2x128xf32> to vector<2x6xf32>
    %102 = vector.extract_strided_slice %91 {offsets = [0, 12], sizes = [2, 2], strides = [1, 1]} : vector<2x128xf32> to vector<2x2xf32>
    %103 = vector.extract_strided_slice %91 {offsets = [0, 14], sizes = [2, 2], strides = [1, 1]} : vector<2x128xf32> to vector<2x2xf32>
    %104 = vector.broadcast %95 : vector<2x1xf32> to vector<2x6xf32>
    %105 = arith.divf %100, %104 : vector<2x6xf32>
    %106 = vector.broadcast %95 : vector<2x1xf32> to vector<2x6xf32>
    %107 = arith.mulf %106, %105 : vector<2x6xf32>
    %108 = arith.mulf %107, %105 : vector<2x6xf32>
    %109 = arith.subf %101, %108 : vector<2x6xf32>
    %cst_69 = arith.constant 0.000000e+00 : f32
    %110 = vector.broadcast %cst_69 : f32 to vector<2x6xf32>
    %111 = arith.maximumf %109, %110 : vector<2x6xf32>
    %112 = vector.broadcast %99 : vector<2x1xf32> to vector<2x6xf32>
    %113 = arith.divf %111, %112 : vector<2x6xf32>
    %114 = math.sqrt %113 : vector<2x6xf32>
    %115 = vector.broadcast %95 : vector<2x1xf32> to vector<2x2xf32>
    %116 = arith.divf %102, %115 : vector<2x2xf32>
    %117 = vector.broadcast %95 : vector<2x1xf32> to vector<2x2xf32>
    %118 = arith.mulf %117, %116 : vector<2x2xf32>
    %119 = arith.mulf %118, %116 : vector<2x2xf32>
    %120 = arith.subf %103, %119 : vector<2x2xf32>
    %cst_70 = arith.constant 0.000000e+00 : f32
    %121 = vector.broadcast %cst_70 : f32 to vector<2x2xf32>
    %122 = arith.maximumf %120, %121 : vector<2x2xf32>
    %123 = vector.broadcast %99 : vector<2x1xf32> to vector<2x2xf32>
    %124 = arith.divf %122, %123 : vector<2x2xf32>
    %125 = math.sqrt %124 : vector<2x2xf32>
    %126 = vector.extract_strided_slice %92 {offsets = [0, 0], sizes = [2, 6], strides = [1, 1]} : vector<2x16xf32> to vector<2x6xf32>
    %127 = vector.extract_strided_slice %92 {offsets = [0, 6], sizes = [2, 6], strides = [1, 1]} : vector<2x16xf32> to vector<2x6xf32>
    %128 = vector.extract_strided_slice %92 {offsets = [0, 12], sizes = [2, 2], strides = [1, 1]} : vector<2x16xf32> to vector<2x2xf32>
    %129 = vector.extract_strided_slice %92 {offsets = [0, 14], sizes = [2, 2], strides = [1, 1]} : vector<2x16xf32> to vector<2x2xf32>
    %130 = tpu.concatenate %105, %126, %127, %114, %128, %129, %125 in 1 : vector<2x6xf32>, vector<2x6xf32>, vector<2x6xf32>, vector<2x6xf32>, vector<2x2xf32>, vector<2x2xf32>, vector<2x2xf32> -> vector<2x30xf32>
    %131 = vector.extract_strided_slice %91 {offsets = [0, 16], sizes = [2, 2], strides = [1, 1]} : vector<2x128xf32> to vector<2x2xf32>
    %132 = vector.broadcast %95 : vector<2x1xf32> to vector<2x2xf32>
    %133 = arith.divf %131, %132 : vector<2x2xf32>
    %134 = vector.extract_strided_slice %91 {offsets = [0, 18], sizes = [2, 2], strides = [1, 1]} : vector<2x128xf32> to vector<2x2xf32>
    %135 = vector.broadcast %95 : vector<2x1xf32> to vector<2x2xf32>
    %136 = arith.divf %134, %135 : vector<2x2xf32>
    %137 = vector.extract_strided_slice %91 {offsets = [0, 20], sizes = [2, 2], strides = [1, 1]} : vector<2x128xf32> to vector<2x2xf32>
    %138 = vector.broadcast %95 : vector<2x1xf32> to vector<2x2xf32>
    %139 = arith.divf %137, %138 : vector<2x2xf32>
    %cst_71 = arith.constant dense<0.000000e+00> : vector<2x2xf32>
    %140 = tpu.matmul %133, %5, %cst_71 {dimension_numbers = #tpu.dot_dimension_numbers<[1], [0], [0], [1], [0, 0, 1, 1], [], []>} : vector<2x2xf32>, vector<2x2xf32>, vector<2x2xf32> -> vector<2x2xf32>
    %cst_72 = arith.constant dense<0.000000e+00> : vector<2x2xf32>
    %141 = tpu.matmul %136, %5, %cst_72 {dimension_numbers = #tpu.dot_dimension_numbers<[1], [0], [0], [1], [0, 0, 1, 1], [], []>} : vector<2x2xf32>, vector<2x2xf32>, vector<2x2xf32> -> vector<2x2xf32>
    %cst_73 = arith.constant dense<0.000000e+00> : vector<2x2xf32>
    %142 = tpu.matmul %139, %5, %cst_73 {dimension_numbers = #tpu.dot_dimension_numbers<[1], [0], [0], [1], [0, 0, 1, 1], [], []>} : vector<2x2xf32>, vector<2x2xf32>, vector<2x2xf32> -> vector<2x2xf32>
    %143 = arith.mulf %140, %140 : vector<2x2xf32>
    %144 = arith.mulf %141, %141 : vector<2x2xf32>
    %145 = arith.addf %143, %144 : vector<2x2xf32>
    %146 = arith.mulf %142, %142 : vector<2x2xf32>
    %147 = arith.addf %145, %146 : vector<2x2xf32>
    %cst_74 = arith.constant 9.99999993E-9 : f32
    %148 = vector.broadcast %cst_74 : f32 to vector<2x2xf32>
    %149 = arith.maximumf %147, %148 : vector<2x2xf32>
    %150 = math.sqrt %149 : vector<2x2xf32>
    %cst_75 = arith.constant dense<0.000000e+00> : vector<2x6xf32>
    %151 = tpu.matmul %130, %6, %cst_75 {dimension_numbers = #tpu.dot_dimension_numbers<[1], [0], [0], [1], [0, 0, 1, 1], [], []>} : vector<2x30xf32>, vector<30x6xf32>, vector<2x6xf32> -> vector<2x6xf32>
    %cst_76 = arith.constant dense<0.000000e+00> : vector<2x6xf32>
    %152 = tpu.matmul %150, %7, %cst_76 {dimension_numbers = #tpu.dot_dimension_numbers<[1], [0], [0], [1], [0, 0, 1, 1], [], []>} : vector<2x2xf32>, vector<2x6xf32>, vector<2x6xf32> -> vector<2x6xf32>
    %153 = arith.addf %151, %152 : vector<2x6xf32>
    %154 = vector.broadcast %8 : vector<1x6xf32> to vector<2x6xf32>
    %155 = arith.addf %153, %154 : vector<2x6xf32>
    %cst_77 = arith.constant dense<0.000000e+00> : vector<2x2xf32>
    %156 = tpu.matmul %140, %9, %cst_77 {dimension_numbers = #tpu.dot_dimension_numbers<[1], [0], [0], [1], [0, 0, 1, 1], [], []>} : vector<2x2xf32>, vector<2x2xf32>, vector<2x2xf32> -> vector<2x2xf32>
    %cst_78 = arith.constant dense<0.000000e+00> : vector<2x2xf32>
    %157 = tpu.matmul %141, %9, %cst_78 {dimension_numbers = #tpu.dot_dimension_numbers<[1], [0], [0], [1], [0, 0, 1, 1], [], []>} : vector<2x2xf32>, vector<2x2xf32>, vector<2x2xf32> -> vector<2x2xf32>
    %cst_79 = arith.constant dense<0.000000e+00> : vector<2x2xf32>
    %158 = tpu.matmul %142, %9, %cst_79 {dimension_numbers = #tpu.dot_dimension_numbers<[1], [0], [0], [1], [0, 0, 1, 1], [], []>} : vector<2x2xf32>, vector<2x2xf32>, vector<2x2xf32> -> vector<2x2xf32>
    %c0_80 = arith.constant 0 : index
    %c0_81 = arith.constant 0 : index
    %159 = vector.load %arg4[%c0_80, %c0_81] : memref<2x5xf32, #tpu.memory_space<vmem>>, vector<2x5xf32>
    %c0_82 = arith.constant 0 : index
    %c0_83 = arith.constant 0 : index
    %c0_84 = arith.constant 0 : index
    %160 = vector.load %arg5[%c0_82, %c0_83, %c0_84] : memref<3x2x2xf32, #tpu.memory_space<vmem>>, vector<1x2x2xf32>
    %161 = vector.shape_cast %160 : vector<1x2x2xf32> to vector<2x2xf32>
    %c1 = arith.constant 1 : index
    %c0_85 = arith.constant 0 : index
    %c0_86 = arith.constant 0 : index
    %162 = vector.load %arg5[%c1, %c0_85, %c0_86] : memref<3x2x2xf32, #tpu.memory_space<vmem>>, vector<1x2x2xf32>
    %163 = vector.shape_cast %162 : vector<1x2x2xf32> to vector<2x2xf32>
    %c2 = arith.constant 2 : index
    %c0_87 = arith.constant 0 : index
    %c0_88 = arith.constant 0 : index
    %164 = vector.load %arg5[%c2, %c0_87, %c0_88] : memref<3x2x2xf32, #tpu.memory_space<vmem>>, vector<1x2x2xf32>
    %165 = vector.shape_cast %164 : vector<1x2x2xf32> to vector<2x2xf32>
    %cst_89 = arith.constant dense<0.000000e+00> : vector<2x2xf32>
    %166 = tpu.matmul %161, %10, %cst_89 {dimension_numbers = #tpu.dot_dimension_numbers<[1], [0], [0], [1], [0, 0, 1, 1], [], []>} : vector<2x2xf32>, vector<2x2xf32>, vector<2x2xf32> -> vector<2x2xf32>
    %cst_90 = arith.constant dense<0.000000e+00> : vector<2x2xf32>
    %167 = tpu.matmul %163, %10, %cst_90 {dimension_numbers = #tpu.dot_dimension_numbers<[1], [0], [0], [1], [0, 0, 1, 1], [], []>} : vector<2x2xf32>, vector<2x2xf32>, vector<2x2xf32> -> vector<2x2xf32>
    %cst_91 = arith.constant dense<0.000000e+00> : vector<2x2xf32>
    %168 = tpu.matmul %165, %10, %cst_91 {dimension_numbers = #tpu.dot_dimension_numbers<[1], [0], [0], [1], [0, 0, 1, 1], [], []>} : vector<2x2xf32>, vector<2x2xf32>, vector<2x2xf32> -> vector<2x2xf32>
    %169 = arith.mulf %166, %166 : vector<2x2xf32>
    %170 = arith.mulf %167, %167 : vector<2x2xf32>
    %171 = arith.addf %169, %170 : vector<2x2xf32>
    %172 = arith.mulf %168, %168 : vector<2x2xf32>
    %173 = arith.addf %171, %172 : vector<2x2xf32>
    %cst_92 = arith.constant 9.99999993E-9 : f32
    %174 = vector.broadcast %cst_92 : f32 to vector<2x2xf32>
    %175 = arith.maximumf %173, %174 : vector<2x2xf32>
    %176 = math.sqrt %175 : vector<2x2xf32>
    %cst_93 = arith.constant dense<0.000000e+00> : vector<2x5xf32>
    %177 = tpu.matmul %159, %11, %cst_93 {dimension_numbers = #tpu.dot_dimension_numbers<[1], [0], [0], [1], [0, 0, 1, 1], [], []>} : vector<2x5xf32>, vector<5x5xf32>, vector<2x5xf32> -> vector<2x5xf32>
    %cst_94 = arith.constant dense<0.000000e+00> : vector<2x5xf32>
    %178 = tpu.matmul %176, %12, %cst_94 {dimension_numbers = #tpu.dot_dimension_numbers<[1], [0], [0], [1], [0, 0, 1, 1], [], []>} : vector<2x2xf32>, vector<2x5xf32>, vector<2x5xf32> -> vector<2x5xf32>
    %179 = arith.addf %177, %178 : vector<2x5xf32>
    %180 = vector.broadcast %13 : vector<1x5xf32> to vector<2x5xf32>
    %181 = arith.addf %179, %180 : vector<2x5xf32>
    %cst_95 = arith.constant dense<0.000000e+00> : vector<2x2xf32>
    %182 = tpu.matmul %166, %14, %cst_95 {dimension_numbers = #tpu.dot_dimension_numbers<[1], [0], [0], [1], [0, 0, 1, 1], [], []>} : vector<2x2xf32>, vector<2x2xf32>, vector<2x2xf32> -> vector<2x2xf32>
    %cst_96 = arith.constant dense<0.000000e+00> : vector<2x2xf32>
    %183 = tpu.matmul %167, %14, %cst_96 {dimension_numbers = #tpu.dot_dimension_numbers<[1], [0], [0], [1], [0, 0, 1, 1], [], []>} : vector<2x2xf32>, vector<2x2xf32>, vector<2x2xf32> -> vector<2x2xf32>
    %cst_97 = arith.constant dense<0.000000e+00> : vector<2x2xf32>
    %184 = tpu.matmul %168, %14, %cst_97 {dimension_numbers = #tpu.dot_dimension_numbers<[1], [0], [0], [1], [0, 0, 1, 1], [], []>} : vector<2x2xf32>, vector<2x2xf32>, vector<2x2xf32> -> vector<2x2xf32>
    %185 = tpu.concatenate %87, %155, %181 in 1 : vector<2x8xf32>, vector<2x6xf32>, vector<2x5xf32> -> vector<2x19xf32>
    %186 = tpu.concatenate %88, %156, %182 in 1 : vector<2x4xf32>, vector<2x2xf32>, vector<2x2xf32> -> vector<2x8xf32>
    %187 = tpu.concatenate %89, %157, %183 in 1 : vector<2x4xf32>, vector<2x2xf32>, vector<2x2xf32> -> vector<2x8xf32>
    %188 = tpu.concatenate %90, %158, %184 in 1 : vector<2x4xf32>, vector<2x2xf32>, vector<2x2xf32> -> vector<2x8xf32>
    %cst_98 = arith.constant dense<0.000000e+00> : vector<2x8xf32>
    %189 = tpu.matmul %186, %15, %cst_98 {dimension_numbers = #tpu.dot_dimension_numbers<[1], [0], [0], [1], [0, 0, 1, 1], [], []>} : vector<2x8xf32>, vector<8x8xf32>, vector<2x8xf32> -> vector<2x8xf32>
    %cst_99 = arith.constant dense<0.000000e+00> : vector<2x8xf32>
    %190 = tpu.matmul %187, %15, %cst_99 {dimension_numbers = #tpu.dot_dimension_numbers<[1], [0], [0], [1], [0, 0, 1, 1], [], []>} : vector<2x8xf32>, vector<8x8xf32>, vector<2x8xf32> -> vector<2x8xf32>
    %cst_100 = arith.constant dense<0.000000e+00> : vector<2x8xf32>
    %191 = tpu.matmul %188, %15, %cst_100 {dimension_numbers = #tpu.dot_dimension_numbers<[1], [0], [0], [1], [0, 0, 1, 1], [], []>} : vector<2x8xf32>, vector<8x8xf32>, vector<2x8xf32> -> vector<2x8xf32>
    %192 = arith.mulf %189, %189 : vector<2x8xf32>
    %193 = arith.mulf %190, %190 : vector<2x8xf32>
    %194 = arith.addf %192, %193 : vector<2x8xf32>
    %195 = arith.mulf %191, %191 : vector<2x8xf32>
    %196 = arith.addf %194, %195 : vector<2x8xf32>
    %cst_101 = arith.constant 9.99999993E-9 : f32
    %197 = vector.broadcast %cst_101 : f32 to vector<2x8xf32>
    %198 = arith.maximumf %196, %197 : vector<2x8xf32>
    %199 = math.sqrt %198 : vector<2x8xf32>
    %cst_102 = arith.constant dense<0.000000e+00> : vector<2x5xf32>
    %200 = tpu.matmul %185, %16, %cst_102 {dimension_numbers = #tpu.dot_dimension_numbers<[1], [0], [0], [1], [0, 0, 1, 1], [], []>} : vector<2x19xf32>, vector<19x5xf32>, vector<2x5xf32> -> vector<2x5xf32>
    %cst_103 = arith.constant dense<0.000000e+00> : vector<2x5xf32>
    %201 = tpu.matmul %199, %17, %cst_103 {dimension_numbers = #tpu.dot_dimension_numbers<[1], [0], [0], [1], [0, 0, 1, 1], [], []>} : vector<2x8xf32>, vector<8x5xf32>, vector<2x5xf32> -> vector<2x5xf32>
    %202 = arith.addf %200, %201 : vector<2x5xf32>
    %203 = vector.broadcast %18 : vector<1x5xf32> to vector<2x5xf32>
    %204 = arith.addf %202, %203 : vector<2x5xf32>
    %cst_104 = arith.constant dense<0.000000e+00> : vector<2x2xf32>
    %205 = tpu.matmul %189, %19, %cst_104 {dimension_numbers = #tpu.dot_dimension_numbers<[1], [0], [0], [1], [0, 0, 1, 1], [], []>} : vector<2x8xf32>, vector<8x2xf32>, vector<2x2xf32> -> vector<2x2xf32>
    %cst_105 = arith.constant dense<0.000000e+00> : vector<2x2xf32>
    %206 = tpu.matmul %190, %19, %cst_105 {dimension_numbers = #tpu.dot_dimension_numbers<[1], [0], [0], [1], [0, 0, 1, 1], [], []>} : vector<2x8xf32>, vector<8x2xf32>, vector<2x2xf32> -> vector<2x2xf32>
    %cst_106 = arith.constant dense<0.000000e+00> : vector<2x2xf32>
    %207 = tpu.matmul %191, %19, %cst_106 {dimension_numbers = #tpu.dot_dimension_numbers<[1], [0], [0], [1], [0, 0, 1, 1], [], []>} : vector<2x8xf32>, vector<8x2xf32>, vector<2x2xf32> -> vector<2x2xf32>
    %208 = arith.addf %159, %204 : vector<2x5xf32>
    %cst_107 = arith.constant dense<0.000000e+00> : vector<2xf32>
    %209 = vector.multi_reduction <add>, %208, %cst_107 [1] : vector<2x5xf32> to vector<2xf32>
    %210 = vector.shape_cast %209 : vector<2xf32> to vector<2x1xf32>
    %cst_108 = arith.constant 5.000000e+00 : f32
    %211 = vector.broadcast %cst_108 : f32 to vector<2x1xf32>
    %212 = arith.divf %210, %211 : vector<2x1xf32>
    %213 = vector.broadcast %212 : vector<2x1xf32> to vector<2x5xf32>
    %214 = arith.subf %208, %213 : vector<2x5xf32>
    %215 = vector.broadcast %212 : vector<2x1xf32> to vector<2x5xf32>
    %216 = arith.subf %208, %215 : vector<2x5xf32>
    %217 = arith.mulf %214, %216 : vector<2x5xf32>
    %cst_109 = arith.constant dense<0.000000e+00> : vector<2xf32>
    %218 = vector.multi_reduction <add>, %217, %cst_109 [1] : vector<2x5xf32> to vector<2xf32>
    %219 = vector.shape_cast %218 : vector<2xf32> to vector<2x1xf32>
    %cst_110 = arith.constant 5.000000e+00 : f32
    %220 = vector.broadcast %cst_110 : f32 to vector<2x1xf32>
    %221 = arith.divf %219, %220 : vector<2x1xf32>
    %222 = vector.broadcast %212 : vector<2x1xf32> to vector<2x5xf32>
    %223 = arith.subf %208, %222 : vector<2x5xf32>
    %cst_111 = arith.constant 9.99999974E-6 : f32
    %224 = vector.broadcast %cst_111 : f32 to vector<2x1xf32>
    %225 = arith.addf %221, %224 : vector<2x1xf32>
    %226 = math.rsqrt %225 : vector<2x1xf32>
    %227 = vector.broadcast %226 : vector<2x1xf32> to vector<2x5xf32>
    %228 = arith.mulf %223, %227 : vector<2x5xf32>
    %229 = vector.broadcast %20 : vector<1x5xf32> to vector<2x5xf32>
    %230 = arith.mulf %228, %229 : vector<2x5xf32>
    %231 = vector.broadcast %21 : vector<1x5xf32> to vector<2x5xf32>
    %232 = arith.addf %230, %231 : vector<2x5xf32>
    %c0_112 = arith.constant 0 : index
    %c0_113 = arith.constant 0 : index
    %233 = vector.load %arg29[%c0_112, %c0_113] : memref<2x5xf32, #tpu.memory_space<vmem>>, vector<2x5xf32>
    tpu.vector_store %arg29[%c0_112, %c0_113], %232 {strides = array<i32>} : memref<2x5xf32, #tpu.memory_space<vmem>>, vector<2x5xf32>,
    %c0_114 = arith.constant 0 : index
    %c0_115 = arith.constant 0 : index
    %c0_116 = arith.constant 0 : index
    %234 = vector.load %arg5[%c0_114, %c0_115, %c0_116] : memref<3x2x2xf32, #tpu.memory_space<vmem>>, vector<1x2x2xf32>
    %235 = vector.shape_cast %234 : vector<1x2x2xf32> to vector<2x2xf32>
    %236 = arith.addf %235, %205 : vector<2x2xf32>
    %c1_117 = arith.constant 1 : index
    %c0_118 = arith.constant 0 : index
    %c0_119 = arith.constant 0 : index
    %237 = vector.load %arg5[%c1_117, %c0_118, %c0_119] : memref<3x2x2xf32, #tpu.memory_space<vmem>>, vector<1x2x2xf32>
    %238 = vector.shape_cast %237 : vector<1x2x2xf32> to vector<2x2xf32>
    %239 = arith.addf %238, %206 : vector<2x2xf32>
    %c2_120 = arith.constant 2 : index
    %c0_121 = arith.constant 0 : index
    %c0_122 = arith.constant 0 : index
    %240 = vector.load %arg5[%c2_120, %c0_121, %c0_122] : memref<3x2x2xf32, #tpu.memory_space<vmem>>, vector<1x2x2xf32>
    %241 = vector.shape_cast %240 : vector<1x2x2xf32> to vector<2x2xf32>
    %242 = arith.addf %241, %207 : vector<2x2xf32>
    %243 = arith.mulf %236, %236 : vector<2x2xf32>
    %244 = arith.mulf %239, %239 : vector<2x2xf32>
    %245 = arith.addf %243, %244 : vector<2x2xf32>
    %246 = arith.mulf %242, %242 : vector<2x2xf32>
    %247 = arith.addf %245, %246 : vector<2x2xf32>
    %cst_123 = arith.constant 9.99999993E-9 : f32
    %248 = vector.broadcast %cst_123 : f32 to vector<2x2xf32>
    %249 = arith.maximumf %247, %248 : vector<2x2xf32>
    %cst_124 = arith.constant dense<0.000000e+00> : vector<2xf32>
    %250 = vector.multi_reduction <add>, %249, %cst_124 [1] : vector<2x2xf32> to vector<2xf32>
    %251 = vector.shape_cast %250 : vector<2xf32> to vector<2x1xf32>
    %cst_125 = arith.constant 2.000000e+00 : f32
    %252 = vector.broadcast %cst_125 : f32 to vector<2x1xf32>
    %253 = arith.divf %251, %252 : vector<2x1xf32>
    %254 = math.rsqrt %253 : vector<2x1xf32>
    %255 = vector.broadcast %22 : vector<1x2xf32> to vector<2x2xf32>
    %256 = vector.broadcast %254 : vector<2x1xf32> to vector<2x2xf32>
    %257 = arith.mulf %255, %256 : vector<2x2xf32>
    %258 = arith.mulf %236, %257 : vector<2x2xf32>
    %259 = arith.mulf %239, %257 : vector<2x2xf32>
    %260 = arith.mulf %242, %257 : vector<2x2xf32>
    %c0_126 = arith.constant 0 : index
    %c0_127 = arith.constant 0 : index
    %c0_128 = arith.constant 0 : index
    %261 = vector.load %arg30[%c0_126, %c0_127, %c0_128] : memref<3x2x2xf32, #tpu.memory_space<vmem>>, vector<1x2x2xf32>
    %262 = vector.shape_cast %261 : vector<1x2x2xf32> to vector<2x2xf32>
    %263 = vector.shape_cast %258 : vector<2x2xf32> to vector<1x2x2xf32>
    tpu.vector_store %arg30[%c0_126, %c0_127, %c0_128], %263 {strides = array<i32>} : memref<3x2x2xf32, #tpu.memory_space<vmem>>, vector<1x2x2xf32>,
    %c1_129 = arith.constant 1 : index
    %c0_130 = arith.constant 0 : index
    %c0_131 = arith.constant 0 : index
    %264 = vector.load %arg30[%c1_129, %c0_130, %c0_131] : memref<3x2x2xf32, #tpu.memory_space<vmem>>, vector<1x2x2xf32>
    %265 = vector.shape_cast %264 : vector<1x2x2xf32> to vector<2x2xf32>
    %266 = vector.shape_cast %259 : vector<2x2xf32> to vector<1x2x2xf32>
    tpu.vector_store %arg30[%c1_129, %c0_130, %c0_131], %266 {strides = array<i32>} : memref<3x2x2xf32, #tpu.memory_space<vmem>>, vector<1x2x2xf32>,
    %c2_132 = arith.constant 2 : index
    %c0_133 = arith.constant 0 : index
    %c0_134 = arith.constant 0 : index
    %267 = vector.load %arg30[%c2_132, %c0_133, %c0_134] : memref<3x2x2xf32, #tpu.memory_space<vmem>>, vector<1x2x2xf32>
    %268 = vector.shape_cast %267 : vector<1x2x2xf32> to vector<2x2xf32>
    %269 = vector.shape_cast %260 : vector<2x2xf32> to vector<1x2x2xf32>
    tpu.vector_store %arg30[%c2_132, %c0_133, %c0_134], %269 {strides = array<i32>} : memref<3x2x2xf32, #tpu.memory_space<vmem>>, vector<1x2x2xf32>,
    return
  }
}

</mosaic_0001>

<bundles_post_ra>
// kernel: run.10
= control target key start
LH: loop header
LB: loop body
LE: loop exit
PB: predicated region body
PF: predicated region fallthrough
CT: control target
= control target key end

     0   :  { %vm87_vm0 = vcmask 1043456   ;;  %vm27_vm1 = vcmask 64512   ;;  %vm80_vm2 = vcmask 31744   ;;  %s425_s15 = smov 8   ;;  %s428_s16 = smov 28   ;;  %vm334_vm7 = vcmask 130048   ;;  %s666_s2 = inlined_call_operand.vmem [shape: f32[8,24], index: 2, kind: input, shape index: {}]   ;;  %s667_s3 = inlined_call_operand.vmem [shape: f32[4,12], index: 3, kind: input, shape index: {}]   ;;  %s668_s0 = inlined_call_operand.vmem [shape: f32[16,8], index: 0, kind: input, shape index: {}]   ;;  %s669_s1 = inlined_call_operand.vmem [shape: f32[3,16,4], index: 1, kind: input, shape index: {}]   ;;  %s670_s4 = inlined_call_operand.vmem [shape: f32[16,8], index: 4, kind: output, shape index: {0}]   ;;  %s671_s7 = inlined_call_operand.vmem [shape: f32[3,16,4], index: 7, kind: output, shape index: {3}]   ;;  %s672_s10 = inlined_call_operand.vmem [shape: f32[16,128], index: 10, kind: output, shape index: {6}]   ;;  %s673_s8 = inlined_call_operand.vmem [shape: f32[3,16,4], index: 8, kind: output, shape index: {4}]   ;;  %s674_s9 = inlined_call_operand.vmem [shape: f32[3,16,4], index: 9, kind: output, shape index: {5}]   ;;  %s675_s6 = inlined_call_operand.vmem [shape: f32[16,8], index: 6, kind: output, shape index: {2}]   ;;  %s676_s5 = inlined_call_operand.vmem [shape: f32[16,8], index: 5, kind: output, shape index: {1}]  }
   0x1   :  { %v26_v0 = vld [vmem:[%s666_s2] sm:$0xff]  ;;  %v390_v5 = vld [vmem:[%s669_s1 + $0x10] sm:$0xff]  ;;  %v78_v11 = vld [vmem:[%s669_s1 + $0x8] sm:$0xff]  ;;  %s429_s17 = smov 16   ;;  %s430_s18 = smov 32   ;;  %vm337_vm8 = vcmask 162816  }
   0x2   :  { %v79_v1 = vld [vmem:[%s667_s3] sm:$0xf]  ;;  %49 = vmatpush.msra.mxu0 %v26_v0  ;;  %v254_v8 = vmul.f32 %v390_v5, %v390_v5  ;;  %v253_v13 = vmul.f32 %v78_v11, %v78_v11  ;;  %v391_v14 = vld [vmem:[%s669_s1 + $0x18] sm:$0xff]  ;;  %v402_v15 = vld [vmem:[%s669_s1 + $0x28] sm:$0xff]  ;;  %s431_s21 = smov 124   ;;  %s432_s22 = smov 112  }
   0x3   :  { %v498_v2 = vld [vmem:[%s668_s0] sm:$0xff]  ;;  %387 = vmatpush.msk.msra.mxu1 %vm87_vm0, %v79_v1  ;;  %v255_v17 = vmul.f32 %v391_v14, %v391_v14  ;;  %v537_v18 = vld [vmem:[%s668_s0 + $0x8] sm:$0xff]  ;;  %v259_v19 = vmul.f32 %v402_v15, %v402_v15  ;;  %s426_s0 = smov 20   ;;  %s433_s24 = smov 120   ;;  %vm340_vm9 = vcmask 195584   ;;  %vm343_vm10 = vcmask 228352  }
   0x4   :  { %v77_v3 = vld [vmem:[%s669_s1] sm:$0xff]  ;;  %v288_v6 = vmul.f32 %v498_v2, %v498_v2  ;;  %385 = vmatmul.msk.f32.vlgmr.msra.gmra.mxu0 %vm27_vm1, %v498_v2  ;;  %v289_v20 = vmul.f32 %v537_v18, %v537_v18  ;;  %vm346_vm11 = vcmask 261120   ;;  %vm349_vm12 = vcmask 293888  }
   0x5   :  { %v137_v4 = vld [vmem:[%s667_s3] sm:$0xf]  ;;  %388 = vmatmul.msk.f32.vlgmr.msra.gmra.mxu1 %vm80_vm2, %v77_v3  ;;  %v252_v7 = vmul.f32 %v77_v3, %v77_v3  ;;  %v257_v22 = vadd.f32 %v255_v17, %v253_v13  ;;  %vm352_vm13 = vcmask 302080  }
   0x6   :  { %v196_v9 = vld [vmem:[%s667_s3] sm:$0xf]  ;;  %392 = vmatpush.msk.msra.mxu2 %vm87_vm0, %v137_v4  ;;  %292 = vrot.lane.b32.xlu1 %v288_v6, %s425_s15 }
   0x7   :  { %v401_v10 = vld [vmem:[%s669_s1 + $0x20] sm:$0xff]  ;;  %403 = vmatpush.msk.msra.mxu3 %vm87_vm0, %v196_v9  ;;  %393 = vmatmul.msk.f32.vlgmr.msra.gmra.mxu2 %vm80_vm2, %v390_v5  ;;  %v256_v16 = vadd.f32 %v254_v8, %v252_v7  ;;  %v261_v24 = vadd.f32 %v259_v19, %v257_v22  ;;  %s427_s1 = smov 24  }
   0x8   :  { %v258_v12 = vmul.f32 %v401_v10, %v401_v10  ;;  %404 = vmatmul.msk.f32.vlgmr.msra.gmra.mxu3 %vm80_vm2, %v401_v10  ;;  %294 = vrot.lane.b32.xlu2 %v289_v20, %s425_s15 }
   0x9   :  { %v263_v25 = vmax.f32 %v261_v24, 1e-08 }
   0xa   :  { %v260_v21 = vadd.f32 %v258_v12, %v256_v16 }
   0xb   :  { %310 = vrot.lane.b32.xlu0 %v263_v25, %s426_s0  ;;  %vm283_vm5 = vcmp.eq.f32.partialorder %v263_v25, inf  ;;  %v286_v40 = vand.u32 2147483648, %v263_v25  ;;  %vm285_vm6 = vcmp.eq.f32.partialorder %v263_v25, 0.0 }
   0xc   :  { %v262_v23 = vmax.f32 %v260_v21, 1e-08  ;;  %386 = vmatmul.msk.f32.gmra.mxu0 %vm27_vm1, %v537_v18 }
   0xd   :  { %389 = vmatmul.msk.f32.gmra.mxu1 %vm80_vm2, %v78_v11 }
   0xe   :  { %421 = vrsqrt.f32 %v262_v23  ;;  %314 = vrot.lane.b32.xlu1 %v77_v3, %s427_s1  ;;  %vm271_vm3 = vcmp.eq.f32.partialorder %v262_v23, inf  ;;  %v274_v37 = vand.u32 2147483648, %v262_v23  ;;  %vm273_vm4 = vcmp.eq.f32.partialorder %v262_v23, 0.0 }
   0xf   :  { %394 = vmatmul.msk.f32.gmra.mxu2 %vm80_vm2, %v391_v14  ;;  %423 = vrsqrt.f32 %v263_v25 }
  0x10   :  { %405 = vmatmul.msk.f32.gmra.mxu3 %vm80_vm2, %v402_v15  ;;  %308 = vrot.lane.b32.xlu2 %v262_v23, %s426_s0 }
  0x13   :  { %320 = vrot.lane.b32.xlu0 %v390_v5, %s428_s16 }
  0x14   :  { %v422_v26 = vpop.eup %421 }
  0x15   :  { %v265_v27 = vmul.f32 %v422_v26, %v262_v23  ;;  %v424_v28 = vpop.eup %423 }
  0x16   :  { %v277_v29 = vmul.f32 %v424_v28, %v263_v25 }
  0x17   :  { %v266_v30 = vmul.f32 %v422_v26, %v265_v27 }
  0x18   :  { %v278_v31 = vmul.f32 %v424_v28, %v277_v29  ;;  %316 = vrot.lane.b32.xlu2 %v78_v11, %s427_s1 }
  0x19   :  { %v267_v32 = vmul.f32 0.5, %v266_v30 }
  0x1a   :  { %v279_v33 = vmul.f32 0.5, %v278_v31 }
  0x1b   :  { %v268_v34 = vsub.f32 1.5, %v267_v32 }
  0x1c   :  { %v280_v35 = vsub.f32 1.5, %v279_v33 }
  0x1d   :  { %v269_v36 = vmul.f32 %v422_v26, %v268_v34 }
  0x1e   :  { %v281_v38 = vmul.f32 %v424_v28, %v280_v35 }
  0x1f   :  { %v270_v39 = vmul.f32 %v269_v36, %v262_v23 }
  0x20   :  { %v282_v41 = vmul.f32 %v281_v38, %v263_v25  ;;  %326 = vrot.lane.b32.xlu2 %v401_v10, %s430_s18 }
  0x21   :  { %v272_v42 = vsel %vm271_vm3, %v262_v23, %v270_v39 }
  0x22   :  { %v275_v43 = vsel %vm273_vm4, %v274_v37, %v272_v42  ;;  %v284_v44 = vsel %vm283_vm5, %v263_v25, %v282_v41 }
  0x23   :  { %300 = vrot.lane.b32.xlu0 %v275_v43, %s429_s17  ;;  %v287_v45 = vsel %vm285_vm6, %v286_v40, %v284_v44 }
  0x24   :  { %302 = vrot.lane.b32.xlu1 %v287_v45, %s429_s17 }
  0x2b   :  { %328 = vrot.lane.b32.xlu0 %v402_v15, %s430_s18 }
  0x2c   :  { %322 = vrot.lane.b32.xlu1 %v391_v14, %s428_s16 }
  0x62   :  { %v295_v52 = vpop.permute.xlu2 %294 }
  0x63   :  { %v333_v60 = vsel %vm27_vm1, %v537_v18, %v295_v52 }
  0x6a   :  { %v309_v57 = vpop.permute.xlu2 %308 }
  0x72   :  { %v317_v62 = vpop.permute.xlu2 %316 }
  0x78   :  { %v293_v53 = vpop.permute.xlu1 %292 }
  0x79   :  { %v332_v61 = vsel %vm27_vm1, %v498_v2, %v293_v53 }
  0x7a   :  { %v327_v2 = vpop.permute.xlu2 %326 }
  0x7d   :  { %v311_v54 = vpop.permute.xlu0 %310 }
  0x80   :  { %v315_v58 = vpop.permute.xlu1 %314 }
  0x81   :  { %v51_v46 = vpop.f32.mrf.mxu0 }
  0x82   :  { %v108_v47 = vpop.f32.mrf.mxu1  ;;  %57 = vst.msk [vmem:[%s670_s4] sm:$0xff] %vm27_vm1, %v51_v46  ;;  %69 = vrot.lane.b32.xlu1 %v51_v46, %s432_s22  ;;  %61 = vrot.lane.b32.xlu0 %v51_v46, %s433_s24 }
  0x83   :  { %118 = vrot.lane.b32.xlu2 %v108_v47, %s431_s21  ;;  %114 = vst.msk [vmem:[%s671_s7] sm:$0xff] %vm80_vm2, %v108_v47 }
  0x85   :  { %v321_v59 = vpop.permute.xlu0 %320 }
  0x89   :  { %v54_v51 = vpop.f32.mrf.mxu0 }
  0x8a   :  { %v164_v48 = vpop.f32.mrf.mxu2  ;;  %v111_v49 = vpop.f32.mrf.mxu1  ;;  %126 = vrot.lane.b32.xlu0 %v108_v47, %s433_s24  ;;  %58 = vst.msk [vmem:[%s670_s4 + $0x8] sm:$0xff] %vm27_vm1, %v54_v51 }
  0x8b   :  { %395 = vst.msk [vmem:[%s671_s7 + $0x10] sm:$0xff] %vm80_vm2, %v164_v48  ;;  %175 = vrot.lane.b32.xlu2 %v164_v48, %s431_s21  ;;  %v223_v50 = vpop.f32.mrf.mxu3  ;;  %184 = vrot.lane.b32.xlu1 %v164_v48, %s433_s24 }
  0x8c   :  { %115 = vst.msk [vmem:[%s671_s7 + $0x8] sm:$0xff] %vm80_vm2, %v111_v49 }
  0x8d   :  { %406 = vst.msk [vmem:[%s671_s7 + $0x20] sm:$0xff] %vm80_vm2, %v223_v50 }
  0x92   :  { %v167_v55 = vpop.f32.mrf.mxu2  ;;  %234 = vrot.lane.b32.xlu0 %v223_v50, %s431_s21 }
  0x93   :  { %120 = vrot.lane.b32.xlu2 %v111_v49, %s431_s21  ;;  %396 = vst.msk [vmem:[%s671_s7 + $0x18] sm:$0xff] %vm80_vm2, %v167_v55  ;;  %71 = vrot.lane.b32.xlu1 %v54_v51, %s432_s22  ;;  %v226_v56 = vpop.f32.mrf.mxu3 }
  0x94   :  { %407 = vst.msk [vmem:[%s671_s7 + $0x28] sm:$0xff] %vm80_vm2, %v226_v56 }
  0x95   :  { %v301_v1 = vpop.permute.xlu0 %300 }
  0x96   :  { %v303_v63 = vpop.permute.xlu1 %302  ;;  %v335_v3 = vsel %vm334_vm7, %v332_v61, %v301_v1 }
  0x97   :  { %v336_v0 = vsel %vm334_vm7, %v333_v60, %v303_v63  ;;  %v338_v5 = vsel %vm337_vm8, %v335_v3, %v309_v57 }
  0x98   :  { %v339_v4 = vsel %vm337_vm8, %v336_v0, %v311_v54  ;;  %v341_v6 = vsel %vm340_vm9, %v338_v5, %v315_v58 }
  0x99   :  { %v344_v7 = vsel %vm343_vm10, %v341_v6, %v321_v59  ;;  %v342_v8 = vsel %vm340_vm9, %v339_v4, %v317_v62 }
  0x9a   :  { %63 = vrot.lane.b32.xlu0 %v54_v51, %s433_s24  ;;  %v347_v10 = vsel %vm346_vm11, %v344_v7, %v327_v2 }
  0x9b   :  { %186 = vrot.lane.b32.xlu2 %v167_v55, %s433_s24  ;;  %128 = vrot.lane.b32.xlu1 %v111_v49, %s433_s24  ;;  %v350_v13 = vsel %vm349_vm12, %v347_v10, 1.0 }
  0x9c   :  { %v353_v15 = vsel %vm352_vm13, %v350_v13, 0.0 }
  0x9d   :  { %v329_v12 = vpop.permute.xlu0 %328  ;;  %355 = vst [vmem:[%s672_s10] sm:$0xff] %v353_v15 }
  0x9e   :  { %v323_v9 = vpop.permute.xlu1 %322 }
  0x9f   :  { %v345_v11 = vsel %vm343_vm10, %v342_v8, %v323_v9 }
  0xa0   :  { %v348_v14 = vsel %vm346_vm11, %v345_v11, %v329_v12 }
  0xa1   :  { %v351_v16 = vsel %vm349_vm12, %v348_v14, 1.0 }
  0xa2   :  { %177 = vrot.lane.b32.xlu0 %v167_v55, %s431_s21  ;;  %v354_v17 = vsel %vm352_vm13, %v351_v16, 0.0 }
  0xa3   :  { %243 = vrot.lane.b32.xlu2 %v223_v50, %s433_s24  ;;  %236 = vrot.lane.b32.xlu1 %v226_v56, %s431_s21  ;;  %356 = vst [vmem:[%s672_s10 + $0x8] sm:$0xff] %v354_v17 }
  0xaa   :  { %245 = vrot.lane.b32.xlu0 %v226_v56, %s433_s24 }
  0xdd   :  { %v119_v18 = vpop.permute.xlu2 %118 }
  0xde   :  { %124 = vst.msk [vmem:[%s673_s8] sm:$0xff] %vm80_vm2, %v119_v18 }
  0xe5   :  { %v176_v19 = vpop.permute.xlu2 %175 }
  0xe6   :  { %397 = vst.msk [vmem:[%s673_s8 + $0x10] sm:$0xff] %vm80_vm2, %v176_v19 }
  0xed   :  { %v121_v20 = vpop.permute.xlu2 %120 }
  0xee   :  { %125 = vst.msk [vmem:[%s673_s8 + $0x8] sm:$0xff] %vm80_vm2, %v121_v20 }
  0xf4   :  { %v70_v22 = vpop.permute.xlu1 %69  ;;  %v62_v23 = vpop.permute.xlu0 %61 }
  0xf5   :  { %v187_v21 = vpop.permute.xlu2 %186  ;;  %75 = vst.msk [vmem:[%s675_s6] sm:$0xff] %vm27_vm1, %v70_v22 }
  0xf6   :  { %400 = vst.msk [vmem:[%s674_s9 + $0x18] sm:$0xff] %vm80_vm2, %v187_v21 }
  0xf7   :  { %67 = vst.msk [vmem:[%s676_s5] sm:$0xff] %vm27_vm1, %v62_v23 }
  0xfc   :  { %v127_v26 = vpop.permute.xlu0 %126 }
  0xfd   :  { %v244_v24 = vpop.permute.xlu2 %243  ;;  %v185_v25 = vpop.permute.xlu1 %184  ;;  %132 = vst.msk [vmem:[%s674_s9] sm:$0xff] %vm80_vm2, %v127_v26 }
  0xfe   :  { %410 = vst.msk [vmem:[%s674_s9 + $0x20] sm:$0xff] %vm80_vm2, %v244_v24 }
  0xff   :  { %399 = vst.msk [vmem:[%s674_s9 + $0x10] sm:$0xff] %vm80_vm2, %v185_v25 }
 0x104   :  { %v235_v28 = vpop.permute.xlu0 %234 }
 0x105   :  { %v72_v27 = vpop.permute.xlu1 %71  ;;  %408 = vst.msk [vmem:[%s673_s8 + $0x20] sm:$0xff] %vm80_vm2, %v235_v28 }
 0x106   :  { %76 = vst.msk [vmem:[%s675_s6 + $0x8] sm:$0xff] %vm27_vm1, %v72_v27 }
 0x10c   :  { %v64_v30 = vpop.permute.xlu0 %63 }
 0x10d   :  { %v129_v29 = vpop.permute.xlu1 %128  ;;  %68 = vst.msk [vmem:[%s676_s5 + $0x8] sm:$0xff] %vm27_vm1, %v64_v30 }
 0x10e   :  { %133 = vst.msk [vmem:[%s674_s9 + $0x8] sm:$0xff] %vm80_vm2, %v129_v29 }
 0x114   :  { %v178_v32 = vpop.permute.xlu0 %177 }
 0x115   :  { %v237_v31 = vpop.permute.xlu1 %236  ;;  %398 = vst.msk [vmem:[%s673_s8 + $0x18] sm:$0xff] %vm80_vm2, %v178_v32 }
 0x116   :  { %409 = vst.msk [vmem:[%s673_s8 + $0x28] sm:$0xff] %vm80_vm2, %v237_v31 }
 0x11c   :  { %v246_v33 = vpop.permute.xlu0 %245 }
 0x11d   :  { %411 = vst.msk [vmem:[%s674_s9 + $0x28] sm:$0xff] %vm80_vm2, %v246_v33 }

// kernel: run.11
= control target key start
LH: loop header
LB: loop body
LE: loop exit
PB: predicated region body
PF: predicated region fallthrough
CT: control target
= control target key end

     0   :  { %vm39_vm0 = vcmask 1045504   ;;  %vm26_vm1 = vcmask 48128   ;;  %s531_s16 = smov 6   ;;  %s534_s11 = smov 16   ;;  %vm114_vm10 = vcmask 1041408   ;;  %vm101_vm11 = vcmask 15360   ;;  %s901_s2 = inlined_call_operand.vmem [shape: f32[6,12], index: 2, kind: input, shape index: {}]   ;;  %s902_s0 = inlined_call_operand.vmem [shape: f32[32,6], index: 0, kind: input, shape index: {}]   ;;  %s903_s1 = inlined_call_operand.vmem [shape: f32[3,32,2], index: 1, kind: input, shape index: {}]   ;;  %s904_s3 = inlined_call_operand.vmem [shape: f32[2,2], index: 3, kind: input, shape index: {}]   ;;  %s905_s4 = inlined_call_operand.vmem [shape: f32[32,6], index: 4, kind: output, shape index: {0}]   ;;  %s906_s7 = inlined_call_operand.vmem [shape: f32[32,128], index: 7, kind: output, shape index: {3}]   ;;  %s907_s6 = inlined_call_operand.vmem [shape: f32[3,32,2], index: 6, kind: output, shape index: {2}]   ;;  %s908_s5 = inlined_call_operand.vmem [shape: f32[32,6], index: 5, kind: output, shape index: {1}]  }
   0x1   :  { %v25_v0 = vld [vmem:[%s901_s2] sm:$0x3f]  ;;  %v589_v2 = vld [vmem:[%s902_s0 + $0x10] sm:$0xff]  ;;  %v594_v3 = vld [vmem:[%s902_s0 + $0x18] sm:$0xff]  ;;  %s536_s17 = smov 20   ;;  %s537_s21 = smov 122  }
   0x2   :  { %v584_v1 = vld [vmem:[%s902_s0] sm:$0xff]  ;;  %480 = vmatpush.msk.msra.mxu0 %vm39_vm0, %v25_v0  ;;  %v335_v6 = vmul.f32 %v589_v2, %v589_v2  ;;  %v336_v7 = vmul.f32 %v594_v3, %v594_v3  ;;  %v624_v11 = vld [vmem:[%s903_s1 + $0x8] sm:$0xff]  ;;  %v646_v17 = vld [vmem:[%s903_s1 + $0x10] sm:$0xff]  ;;  %vm425_vm12 = vcmask 97280   ;;  %vm430_vm13 = vcmask 113664  }
   0x3   :  { %v333_v4 = vmul.f32 %v584_v1, %v584_v1  ;;  %v601_v5 = vld [vmem:[%s903_s1] sm:$0xff]  ;;  %481 = vmatmul.msk.f32.vlgmr.msra.gmra.mxu0 %vm26_vm1, %v584_v1  ;;  %v634_v14 = vld [vmem:[%s903_s1 + $0x28] sm:$0xff]  ;;  %v262_v16 = vmul.f32 %v624_v11, %v624_v11  ;;  %v657_v20 = vld [vmem:[%s903_s1 + $0x30] sm:$0xff]  ;;  %v263_v22 = vmul.f32 %v646_v17, %v646_v17  ;;  %vm435_vm14 = vcmask 130048  }
   0x4   :  { %v612_v8 = vld [vmem:[%s903_s1 + $0x20] sm:$0xff]  ;;  %v261_v10 = vmul.f32 %v601_v5, %v601_v5  ;;  %v639_v15 = vld [vmem:[%s903_s1 + $0x48] sm:$0xff]  ;;  %345 = vrot.lane.b32.xlu0 %v335_v6, %s531_s16  ;;  %347 = vrot.lane.b32.xlu1 %v336_v7, %s531_s16  ;;  %v266_v18 = vmul.f32 %v634_v14, %v634_v14  ;;  %v267_v24 = vmul.f32 %v657_v20, %v657_v20  ;;  %vm440_vm15 = vcmask 146432  }
   0x5   :  { %v617_v9 = vld [vmem:[%s903_s1 + $0x40] sm:$0xff]  ;;  %341 = vrot.lane.b32.xlu2 %v333_v4, %s531_s16  ;;  %v265_v12 = vmul.f32 %v612_v8, %v612_v8  ;;  %v274_v19 = vmul.f32 %v639_v15, %v639_v15  ;;  %v662_v21 = vld [vmem:[%s903_s1 + $0x50] sm:$0xff]  ;;  %v673_v26 = vld [vmem:[%s903_s1 + $0x18] sm:$0xff]  ;;  %vm445_vm0 = vcmask 162816  }
   0x6   :  { %v273_v13 = vmul.f32 %v617_v9, %v617_v9  ;;  %v275_v25 = vmul.f32 %v662_v21, %v662_v21  ;;  %v678_v27 = vld [vmem:[%s903_s1 + $0x38] sm:$0xff]  ;;  %v688_v29 = vld [vmem:[%s902_s0 + $0x8] sm:$0xff]  ;;  %v270_v30 = vadd.f32 %v266_v18, %v262_v16  ;;  %v264_v31 = vmul.f32 %v673_v26, %v673_v26  ;;  %s532_s0 = smov 14  }
   0x7   :  { %v269_v23 = vadd.f32 %v265_v12, %v261_v10  ;;  %v683_v28 = vld [vmem:[%s903_s1 + $0x58] sm:$0xff]  ;;  %v268_v32 = vmul.f32 %v678_v27, %v678_v27  ;;  %v334_v35 = vmul.f32 %v688_v29, %v688_v29  ;;  %v271_v36 = vadd.f32 %v267_v24, %v263_v22  ;;  %s533_s1 = smov 12  }
   0x8   :  { %v276_v33 = vmul.f32 %v683_v28, %v683_v28  ;;  %v278_v37 = vadd.f32 %v274_v19, %v270_v30 }
   0x9   :  { %v277_v34 = vadd.f32 %v273_v13, %v269_v23  ;;  %v272_v38 = vadd.f32 %v268_v32, %v264_v31  ;;  %v279_v40 = vadd.f32 %v275_v25, %v271_v36 }
   0xa   :  { %v282_v41 = vmax.f32 %v278_v37, 1e-08  ;;  %v156_v37 = vld [vmem:[%s904_s3] sm:$0x3] }
   0xb   :  { %v281_v39 = vmax.f32 %v277_v34, 1e-08  ;;  %482 = vmatmul.msk.f32.gmra.mxu0 %vm26_vm1, %v688_v29  ;;  %v280_v42 = vadd.f32 %v276_v33, %v272_v38  ;;  %v701_v43 = vmax.f32 %v279_v40, 1e-08  ;;  %v211_v38 = vld [vmem:[%s904_s3] sm:$0x3]  ;;  %494 = vmatpush.msk.msra.mxu2 %vm114_vm10, %v156_v37 }
   0xc   :  { %375 = vrot.lane.b32.xlu1 %v282_v41, %s532_s0  ;;  %vm304_vm4 = vcmp.eq.f32.partialorder %v282_v41, inf  ;;  %vm306_vm5 = vcmp.eq.f32.partialorder %v282_v41, 0.0  ;;  %v307_v7 = vand.u32 2147483648, %v282_v41  ;;  %507 = vmatpush.msk.msra.mxu3 %vm114_vm10, %v211_v38 }
   0xd   :  { %343 = vrot.lane.b32.xlu2 %v334_v35, %s531_s16  ;;  %523 = vrsqrt.f32 %v281_v39  ;;  %373 = vrot.lane.b32.xlu0 %v281_v39, %s532_s0  ;;  %v284_v44 = vmax.f32 %v280_v42, 1e-08  ;;  %vm292_vm2 = vcmp.eq.f32.partialorder %v281_v39, inf  ;;  %vm294_vm3 = vcmp.eq.f32.partialorder %v281_v39, 0.0  ;;  %s535_s16 = smov 18  }
   0xe   :  { %525 = vrsqrt.f32 %v282_v41  ;;  %v295_v4 = vand.u32 2147483648, %v281_v39  ;;  %vm316_vm6 = vcmp.eq.f32.partialorder %v701_v43, inf  ;;  %v319_v16 = vand.u32 2147483648, %v701_v43  ;;  %495 = vmatmul.msk.f32.vlgmr.msra.gmra.mxu2 %vm101_vm11, %v612_v8  ;;  %508 = vmatmul.msk.f32.vlgmr.msra.gmra.mxu3 %vm101_vm11, %v617_v9 }
   0xf   :  { %527 = vrsqrt.f32 %v701_v43  ;;  %vm318_vm7 = vcmp.eq.f32.partialorder %v701_v43, 0.0  ;;  %vm328_vm8 = vcmp.eq.f32.partialorder %v284_v44, inf  ;;  %v331_v34 = vand.u32 2147483648, %v284_v44 }
  0x10   :  { %529 = vrsqrt.f32 %v284_v44  ;;  %vm330_vm9 = vcmp.eq.f32.partialorder %v284_v44, 0.0 }
  0x13   :  { %v524_v45 = vpop.eup %523  ;;  %483 = vmatmul.msk.f32.gmra.mxu0 %vm26_vm1, %v589_v2 }
  0x14   :  { %v526_v46 = vpop.eup %525  ;;  %v286_v47 = vmul.f32 %v524_v45, %v281_v39 }
  0x15   :  { %v528_v48 = vpop.eup %527  ;;  %v298_v49 = vmul.f32 %v526_v46, %v282_v41 }
  0x16   :  { %v310_v50 = vmul.f32 %v528_v48, %v701_v43  ;;  %v287_v51 = vmul.f32 %v524_v45, %v286_v47  ;;  %v530_v53 = vpop.eup %529  ;;  %496 = vmatmul.msk.f32.gmra.mxu2 %vm101_vm11, %v634_v14  ;;  %509 = vmatmul.msk.f32.gmra.mxu3 %vm101_vm11, %v639_v15 }
  0x17   :  { %v299_v52 = vmul.f32 %v526_v46, %v298_v49  ;;  %v322_v57 = vmul.f32 %v530_v53, %v284_v44 }
  0x18   :  { %v311_v54 = vmul.f32 %v528_v48, %v310_v50  ;;  %v288_v55 = vmul.f32 0.5, %v287_v51 }
  0x19   :  { %v300_v56 = vmul.f32 0.5, %v299_v52  ;;  %v323_v61 = vmul.f32 %v530_v53, %v322_v57 }
  0x1a   :  { %v312_v58 = vmul.f32 0.5, %v311_v54  ;;  %v289_v59 = vsub.f32 1.5, %v288_v55 }
  0x1b   :  { %v301_v60 = vsub.f32 1.5, %v300_v56  ;;  %484 = vmatmul.msk.f32.gmra.mxu0 %vm26_vm1, %v594_v3  ;;  %v324_v6 = vmul.f32 0.5, %v323_v61 }
  0x1c   :  { %v313_v62 = vsub.f32 1.5, %v312_v58  ;;  %v290_v63 = vmul.f32 %v524_v45, %v289_v59 }
  0x1d   :  { %v302_v0 = vmul.f32 %v526_v46, %v301_v60  ;;  %v325_v18 = vsub.f32 1.5, %v324_v6 }
  0x1e   :  { %v314_v10 = vmul.f32 %v528_v48, %v313_v62  ;;  %v291_v12 = vmul.f32 %v290_v63, %v281_v39  ;;  %497 = vmatmul.msk.f32.gmra.mxu2 %vm101_vm11, %v657_v20  ;;  %510 = vmatmul.msk.f32.gmra.mxu3 %vm101_vm11, %v662_v21 }
  0x1f   :  { %v303_v13 = vmul.f32 %v302_v0, %v282_v41  ;;  %v326_v25 = vmul.f32 %v530_v53, %v325_v18 }
  0x20   :  { %v315_v19 = vmul.f32 %v314_v10, %v701_v43  ;;  %v293_v22 = vsel %vm292_vm2, %v281_v39, %v291_v12  ;;  %vm450_vm2 = vcmask 179200  }
  0x21   :  { %v305_v23 = vsel %vm304_vm4, %v282_v41, %v303_v13  ;;  %v296_v24 = vsel %vm294_vm3, %v295_v4, %v293_v22  ;;  %v327_v33 = vmul.f32 %v326_v25, %v284_v44  ;;  %vm455_vm3 = vcmask 187392  }
  0x22   :  { %v308_v30 = vsel %vm306_vm5, %v307_v7, %v305_v23  ;;  %v317_v31 = vsel %vm316_vm6, %v701_v43, %v315_v19  ;;  %357 = vrot.lane.b32.xlu2 %v296_v24, %s533_s1 }
  0x23   :  { %359 = vrot.lane.b32.xlu0 %v308_v30, %s533_s1  ;;  %v320_v32 = vsel %vm318_vm7, %v319_v16, %v317_v31  ;;  %v329_v35 = vsel %vm328_vm8, %v284_v44, %v327_v33 }
  0x24   :  { %361 = vrot.lane.b32.xlu1 %v320_v32, %s533_s1  ;;  %v332_v36 = vsel %vm330_vm9, %v331_v34, %v329_v35 }
  0x26   :  { %498 = vmatmul.msk.f32.gmra.mxu2 %vm101_vm11, %v678_v27  ;;  %511 = vmatmul.msk.f32.gmra.mxu3 %vm101_vm11, %v683_v28 }
  0x2a   :  { %363 = vrot.lane.b32.xlu2 %v332_v36, %s533_s1 }
  0x2b   :  { %379 = vrot.lane.b32.xlu0 %v284_v44, %s532_s0 }
  0x2c   :  { %385 = vrot.lane.b32.xlu1 %v601_v5, %s534_s11 }
  0x32   :  { %377 = vrot.lane.b32.xlu2 %v701_v43, %s532_s0 }
  0x33   :  { %389 = vrot.lane.b32.xlu0 %v646_v17, %s534_s11 }
  0x34   :  { %391 = vrot.lane.b32.xlu1 %v673_v26, %s534_s11 }
  0x3a   :  { %387 = vrot.lane.b32.xlu2 %v624_v11, %s534_s11 }
  0x3b   :  { %399 = vrot.lane.b32.xlu0 %v634_v14, %s535_s16 }
  0x3c   :  { %401 = vrot.lane.b32.xlu1 %v657_v20, %s535_s16 }
  0x42   :  { %397 = vrot.lane.b32.xlu2 %v612_v8, %s535_s16  ;;  %v100_v8 = vld [vmem:[%s904_s3] sm:$0x3] }
  0x43   :  { %409 = vrot.lane.b32.xlu0 %v617_v9, %s536_s17  ;;  %485 = vmatpush.msk.msra.mxu1 %vm114_vm10, %v100_v8 }
  0x44   :  { %486 = vmatmul.msk.f32.vlgmr.msra.gmra.mxu1 %vm101_vm11, %v601_v5 }
  0x4a   :  { %403 = vrot.lane.b32.xlu2 %v678_v27, %s535_s16 }
  0x4c   :  { %487 = vmatmul.msk.f32.gmra.mxu1 %vm101_vm11, %v624_v11 }
  0x52   :  { %413 = vrot.lane.b32.xlu2 %v662_v21, %s536_s17 }
  0x54   :  { %488 = vmatmul.msk.f32.gmra.mxu1 %vm101_vm11, %v646_v17 }
  0x5c   :  { %489 = vmatmul.msk.f32.gmra.mxu1 %vm101_vm11, %v673_v26 }
  0x5f   :  { %v342_v9 = vpop.permute.xlu2 %341 }
  0x60   :  { %v421_v58 = vsel %vm26_vm1, %v584_v1, %v342_v9 }
  0x67   :  { %v344_v14 = vpop.permute.xlu2 %343 }
  0x76   :  { %v346_v5 = vpop.permute.xlu0 %345  ;;  %v348_v27 = vpop.permute.xlu1 %347 }
  0x77   :  { %v424_v11 = vsel %vm26_vm1, %v594_v3, %v348_v27  ;;  %v422_v3 = vsel %vm26_vm1, %v688_v29, %v344_v14  ;;  %v423_v53 = vsel %vm26_vm1, %v589_v2, %v346_v5 }
  0x7c   :  { %v358_v20 = vpop.permute.xlu2 %357 }
  0x7e   :  { %v376_v41 = vpop.permute.xlu1 %375 }
  0x7f   :  { %v374_v26 = vpop.permute.xlu0 %373 }
  0x80   :  { %v60_v21 = vpop.f32.mrf.mxu0 }
  0x81   :  { %72 = vst.msk [vmem:[%s905_s4] sm:$0xff] %vm26_vm1, %v60_v21  ;;  %80 = vrot.lane.b32.xlu0 %v60_v21, %s537_s21 }
  0x84   :  { %v364_v17 = vpop.permute.xlu2 %363 }
  0x85   :  { %v429_v39 = vsel %vm425_vm12, %v424_v11, %v364_v17 }
  0x88   :  { %v63_v40 = vpop.f32.mrf.mxu0 }
  0x89   :  { %73 = vst.msk [vmem:[%s905_s4 + $0x8] sm:$0xff] %vm26_vm1, %v63_v40  ;;  %82 = vrot.lane.b32.xlu0 %v63_v40, %s537_s21 }
  0x8c   :  { %v378_v42 = vpop.permute.xlu2 %377 }
  0x90   :  { %v66_v43 = vpop.f32.mrf.mxu0 }
  0x91   :  { %74 = vst.msk [vmem:[%s905_s4 + $0x10] sm:$0xff] %vm26_vm1, %v66_v43  ;;  %415 = vrot.lane.b32.xlu0 %v683_v28, %s536_s17  ;;  %84 = vrot.lane.b32.xlu1 %v66_v43, %s537_s21  ;;  %v189_v24 = vpop.f32.mrf.mxu2  ;;  %v244_v25 = vpop.f32.mrf.mxu3 }
  0x92   :  { %499 = vst.msk [vmem:[%s907_s6 + $0x20] sm:$0xff] %vm101_vm11, %v189_v24 }
  0x93   :  { %512 = vst.msk [vmem:[%s907_s6 + $0x40] sm:$0xff] %vm101_vm11, %v244_v25 }
  0x94   :  { %v388_v44 = vpop.permute.xlu2 %387 }
  0x95   :  { %v360_v45 = vpop.permute.xlu0 %359 }
  0x96   :  { %v427_v46 = vsel %vm425_vm12, %v422_v3, %v360_v45  ;;  %v362_v47 = vpop.permute.xlu1 %361 }
  0x97   :  { %v432_v48 = vsel %vm430_vm13, %v427_v46, %v376_v41  ;;  %v428_v56 = vsel %vm425_vm12, %v423_v53, %v362_v47 }
  0x98   :  { %v437_v49 = vsel %vm435_vm14, %v432_v48, %v388_v44  ;;  %v69_v50 = vpop.f32.mrf.mxu0  ;;  %v433_v61 = vsel %vm430_vm13, %v428_v56, %v378_v42 }
  0x99   :  { %75 = vst.msk [vmem:[%s905_s4 + $0x18] sm:$0xff] %vm26_vm1, %v69_v50  ;;  %86 = vrot.lane.b32.xlu1 %v69_v50, %s537_s21  ;;  %v192_v32 = vpop.f32.mrf.mxu2  ;;  %v247_v33 = vpop.f32.mrf.mxu3 }
  0x9a   :  { %500 = vst.msk [vmem:[%s907_s6 + $0x28] sm:$0xff] %vm101_vm11, %v192_v32 }
  0x9b   :  { %513 = vst.msk [vmem:[%s907_s6 + $0x48] sm:$0xff] %vm101_vm11, %v247_v33 }
  0x9c   :  { %v398_v28 = vpop.permute.xlu2 %397 }
  0x9d   :  { %v380_v29 = vpop.permute.xlu0 %379 }
  0x9e   :  { %v434_v51 = vsel %vm430_vm13, %v429_v39, %v380_v29  ;;  %v386_v52 = vpop.permute.xlu1 %385 }
  0xa1   :  { %411 = vrot.lane.b32.xlu1 %v639_v15, %s536_s17  ;;  %v426_v15 = vsel %vm425_vm12, %v421_v58, %v358_v20  ;;  %v195_v35 = vpop.f32.mrf.mxu2  ;;  %v250_v36 = vpop.f32.mrf.mxu3 }
  0xa2   :  { %v431_v2 = vsel %vm430_vm13, %v426_v15, %v374_v26  ;;  %501 = vst.msk [vmem:[%s907_s6 + $0x30] sm:$0xff] %vm101_vm11, %v195_v35 }
  0xa3   :  { %v436_v7 = vsel %vm435_vm14, %v431_v2, %v386_v52  ;;  %514 = vst.msk [vmem:[%s907_s6 + $0x50] sm:$0xff] %vm101_vm11, %v250_v36 }
  0xa4   :  { %v404_v54 = vpop.permute.xlu2 %403  ;;  %v441_v16 = vsel %vm440_vm15, %v436_v7, %v398_v28 }
  0xa5   :  { %v390_v55 = vpop.permute.xlu0 %389 }
  0xa6   :  { %v392_v57 = vpop.permute.xlu1 %391  ;;  %v438_v62 = vsel %vm435_vm14, %v433_v61, %v390_v55 }
  0xa7   :  { %v439_v59 = vsel %vm435_vm14, %v434_v51, %v392_v57 }
  0xa8   :  { %v444_v60 = vsel %vm440_vm15, %v439_v59, %v404_v54 }
  0xa9   :  { %v198_v8 = vpop.f32.mrf.mxu2  ;;  %v253_v9 = vpop.f32.mrf.mxu3 }
  0xaa   :  { %502 = vst.msk [vmem:[%s907_s6 + $0x38] sm:$0xff] %vm101_vm11, %v198_v8 }
  0xab   :  { %515 = vst.msk [vmem:[%s907_s6 + $0x58] sm:$0xff] %vm101_vm11, %v253_v9 }
  0xac   :  { %v414_v0 = vpop.permute.xlu2 %413 }
  0xad   :  { %v400_v63 = vpop.permute.xlu0 %399 }
  0xae   :  { %v442_v4 = vsel %vm440_vm15, %v437_v49, %v400_v63  ;;  %v402_v6 = vpop.permute.xlu1 %401 }
  0xaf   :  { %v443_v1 = vsel %vm440_vm15, %v438_v62, %v402_v6 }
  0xb0   :  { %v448_v10 = vsel %vm445_vm0, %v443_v1, %v414_v0 }
  0xb1   :  { %v453_v12 = vsel %vm450_vm2, %v448_v10, 1.0 }
  0xb2   :  { %v458_v13 = vsel %vm455_vm3, %v453_v12, 0.0 }
  0xb3   :  { %462 = vst [vmem:[%s906_s7 + $0x10] sm:$0xff] %v458_v13 }
  0xb5   :  { %v410_v18 = vpop.permute.xlu0 %409 }
  0xb6   :  { %v446_v19 = vsel %vm445_vm0, %v441_v16, %v410_v18 }
  0xb7   :  { %v451_v22 = vsel %vm450_vm2, %v446_v19, 1.0 }
  0xb8   :  { %v456_v23 = vsel %vm455_vm3, %v451_v22, 0.0 }
  0xb9   :  { %460 = vst [vmem:[%s906_s7] sm:$0xff] %v456_v23 }
  0xc1   :  { %v135_v30 = vpop.f32.mrf.mxu1 }
  0xc2   :  { %147 = vst.msk [vmem:[%s907_s6] sm:$0xff] %vm101_vm11, %v135_v30 }
  0xc9   :  { %v138_v31 = vpop.f32.mrf.mxu1 }
  0xca   :  { %148 = vst.msk [vmem:[%s907_s6 + $0x8] sm:$0xff] %vm101_vm11, %v138_v31 }
  0xd1   :  { %v141_v34 = vpop.f32.mrf.mxu1 }
  0xd2   :  { %149 = vst.msk [vmem:[%s907_s6 + $0x10] sm:$0xff] %vm101_vm11, %v141_v34 }
  0xd9   :  { %v144_v38 = vpop.f32.mrf.mxu1 }
  0xda   :  { %150 = vst.msk [vmem:[%s907_s6 + $0x18] sm:$0xff] %vm101_vm11, %v144_v38 }
  0xf3   :  { %v81_v37 = vpop.permute.xlu0 %80 }
  0xf4   :  { %92 = vst.msk [vmem:[%s908_s5] sm:$0xff] %vm26_vm1, %v81_v37 }
  0xfb   :  { %v83_v14 = vpop.permute.xlu0 %82 }
  0xfc   :  { %93 = vst.msk [vmem:[%s908_s5 + $0x8] sm:$0xff] %vm26_vm1, %v83_v14 }
 0x103   :  { %v416_v20 = vpop.permute.xlu0 %415  ;;  %v85_v21 = vpop.permute.xlu1 %84 }
 0x104   :  { %v449_v5 = vsel %vm445_vm0, %v444_v60, %v416_v20  ;;  %94 = vst.msk [vmem:[%s908_s5 + $0x10] sm:$0xff] %vm26_vm1, %v85_v21 }
 0x105   :  { %v454_v27 = vsel %vm450_vm2, %v449_v5, 1.0 }
 0x106   :  { %v459_v11 = vsel %vm455_vm3, %v454_v27, 0.0 }
 0x107   :  { %463 = vst [vmem:[%s906_s7 + $0x18] sm:$0xff] %v459_v11 }
 0x10b   :  { %v87_v17 = vpop.permute.xlu1 %86 }
 0x10c   :  { %95 = vst.msk [vmem:[%s908_s5 + $0x18] sm:$0xff] %vm26_vm1, %v87_v17 }
 0x113   :  { %v412_v39 = vpop.permute.xlu1 %411 }
 0x114   :  { %v447_v40 = vsel %vm445_vm0, %v442_v4, %v412_v39 }
 0x115   :  { %v452_v26 = vsel %vm450_vm2, %v447_v40, 1.0 }
 0x116   :  { %v457_v41 = vsel %vm455_vm3, %v452_v26, 0.0 }
 0x117   :  { %461 = vst [vmem:[%s906_s7 + $0x8] sm:$0xff] %v457_v41 }

// kernel: run.12
= control target key start
LH: loop header
LB: loop body
LE: loop exit
PB: predicated region body
PF: predicated region fallthrough
CT: control target
= control target key end

     0   :  { %vm104_vm0 = vcmask 1043456   ;;  %vm197_vm1 = vcmask 1045504   ;;  %vm184_vm2 = vcmask 48128   ;;  %vm91_vm3 = vcmask 31744   ;;  %s463_s6 = inlined_call_operand.vmem [shape: f32[4,128], index: 6, kind: input, shape index: {}]   ;;  %s464_s3 = inlined_call_operand.vmem [shape: f32[3,32,4], index: 3, kind: input, shape index: {}]   ;;  %s465_s4 = inlined_call_operand.vmem [shape: f32[3,32,4], index: 4, kind: input, shape index: {}]   ;;  %s466_s7 = inlined_call_operand.vmem [shape: f32[6,128], index: 7, kind: input, shape index: {}]   ;;  %s467_s2 = inlined_call_operand.vmem [shape: f32[32,6], index: 2, kind: input, shape index: {}]   ;;  %s468_s5 = inlined_call_operand.vmem [shape: f32[8,128], index: 5, kind: input, shape index: {}]   ;;  %s469_s0 = inlined_call_operand.vmem [shape: f32[32,8], index: 0, kind: input, shape index: {}]   ;;  %s470_s1 = inlined_call_operand.vmem [shape: f32[32,8], index: 1, kind: input, shape index: {}]   ;;  %s471_s8 = inlined_call_operand.vmem [shape: f32[32,128], index: 8, kind: output, shape index: {}]  }
   0x1   :  { %v90_v0 = vld [vmem:[%s463_s6] sm:$0xf]  ;;  %v42_v9 = vld [vmem:[%s464_s3 + $0x8] sm:$0xff]  ;;  %vm137_vm4 = vcmask 64512   ;;  %v43_v28 = vld [vmem:[%s464_s3 + $0x10] sm:$0xff] }
   0x2   :  { %v41_v1 = vld [vmem:[%s464_s3] sm:$0xff]  ;;  %258 = vmatpush.msk.msra.mxu0 %vm104_vm0, %v90_v0  ;;  %272 = vmatpush.msk.msra.mxu3 %vm104_vm0, %v90_v0  ;;  %v46_v10 = vld [vmem:[%s465_s4 + $0x8] sm:$0xff]  ;;  %v47_v29 = vld [vmem:[%s465_s4 + $0x10] sm:$0xff] }
   0x3   :  { %v45_v2 = vld [vmem:[%s465_s4] sm:$0xff]  ;;  %v50_v12 = vmul.f32 %v46_v10, %v42_v9  ;;  %v243_v13 = vld [vmem:[%s464_s3 + $0x28] sm:$0xff]  ;;  %v244_v30 = vld [vmem:[%s464_s3 + $0x30] sm:$0xff]  ;;  %v51_v31 = vmul.f32 %v47_v29, %v43_v28 }
   0x4   :  { %v49_v3 = vmul.f32 %v45_v2, %v41_v1  ;;  %v242_v4 = vld [vmem:[%s464_s3 + $0x20] sm:$0xff]  ;;  %v247_v14 = vld [vmem:[%s465_s4 + $0x28] sm:$0xff]  ;;  %v248_v32 = vld [vmem:[%s465_s4 + $0x30] sm:$0xff] }
   0x5   :  { %v246_v5 = vld [vmem:[%s465_s4 + $0x20] sm:$0xff]  ;;  %v251_v15 = vld [vmem:[%s464_s3 + $0x48] sm:$0xff]  ;;  %v64_v17 = vmul.f32 %v247_v14, %v243_v13  ;;  %v252_v33 = vld [vmem:[%s464_s3 + $0x50] sm:$0xff]  ;;  %v65_v36 = vmul.f32 %v248_v32, %v244_v30 }
   0x6   :  { %v250_v6 = vld [vmem:[%s464_s3 + $0x40] sm:$0xff]  ;;  %v63_v7 = vmul.f32 %v246_v5, %v242_v4  ;;  %v255_v18 = vld [vmem:[%s465_s4 + $0x48] sm:$0xff]  ;;  %v256_v34 = vld [vmem:[%s465_s4 + $0x50] sm:$0xff] }
   0x7   :  { %v254_v8 = vld [vmem:[%s465_s4 + $0x40] sm:$0xff]  ;;  %v180_v20 = vld [vmem:[%s467_s2 + $0x8] sm:$0xff]  ;;  %v82_v21 = vmul.f32 %v255_v18, %v251_v15  ;;  %v68_v26 = vadd.f32 %v64_v17, %v50_v12  ;;  %v31_v39 = vld [vmem:[%s469_s0 + $0x10] sm:$0xff]  ;;  %v69_v41 = vadd.f32 %v65_v36, %v51_v31  ;;  %v83_v42 = vmul.f32 %v256_v34, %v252_v33 }
   0x8   :  { %v81_v11 = vmul.f32 %v254_v8, %v250_v6  ;;  %v67_v16 = vadd.f32 %v63_v7, %v49_v3  ;;  %v183_v19 = vld [vmem:[%s466_s7] sm:$0x3f]  ;;  %v30_v23 = vld [vmem:[%s469_s0 + $0x8] sm:$0xff]  ;;  %v35_v40 = vld [vmem:[%s470_s1 + $0x10] sm:$0xff] }
   0x9   :  { %274 = vmatpush.msk.msra.mxu2 %vm197_vm1, %v183_v19  ;;  %v89_v22 = vld [vmem:[%s468_s5] sm:$0xff]  ;;  %v34_v24 = vld [vmem:[%s470_s1 + $0x8] sm:$0xff]  ;;  %v86_v35 = vadd.f32 %v82_v21, %v68_v26  ;;  %v181_v43 = vld [vmem:[%s467_s2 + $0x10] sm:$0xff]  ;;  %v39_v49 = vmul.f32 %v35_v40, %v31_v39  ;;  %v87_v50 = vadd.f32 %v83_v42, %v69_v41 }
   0xa   :  { %v85_v25 = vadd.f32 %v81_v11, %v67_v16  ;;  %269 = vmatmul.msk.f32.vlgmr.msra.gmra.mxu2 %vm184_vm2, %v180_v20  ;;  %273 = vmatpush.msra.mxu1 %v89_v22  ;;  %v38_v27 = vmul.f32 %v34_v24, %v30_v23  ;;  %v29_v37 = vld [vmem:[%s469_s0] sm:$0xff]  ;;  %v44_v44 = vld [vmem:[%s464_s3 + $0x18] sm:$0xff] }
   0xb   :  { %165 = vmatpush.msrb.mxu0 %v89_v22  ;;  %v33_v38 = vld [vmem:[%s470_s1] sm:$0xff]  ;;  %260 = vmatmul.msk.f32.vlgmr.msra.gmra.mxu3 %vm91_vm3, %v86_v35  ;;  %v48_v45 = vld [vmem:[%s465_s4 + $0x18] sm:$0xff] }
   0xc   :  { %259 = vmatmul.msk.f32.vlgmr.msra.gmra.mxu0 %vm91_vm3, %v85_v25  ;;  %264 = vmatmul.msk.f32.vlgmr.msra.gmra.mxu1 %vm137_vm4, %v38_v27  ;;  %v245_v46 = vld [vmem:[%s464_s3 + $0x38] sm:$0xff]  ;;  %v37_v48 = vmul.f32 %v33_v38, %v29_v37  ;;  %v52_v51 = vmul.f32 %v48_v45, %v44_v44  ;;  %v179_v61 = vld [vmem:[%s467_s2] sm:$0xff] }
   0xd   :  { %267 = vmatpush.msk.msra.mxu0 %vm197_vm1, %v183_v19  ;;  %v249_v47 = vld [vmem:[%s465_s4 + $0x38] sm:$0xff] }
   0xe   :  { %v66_v52 = vmul.f32 %v249_v47, %v245_v46  ;;  %v253_v53 = vld [vmem:[%s464_s3 + $0x58] sm:$0xff] }
   0xf   :  { %v257_v54 = vld [vmem:[%s465_s4 + $0x58] sm:$0xff] }
  0x10   :  { %v32_v55 = vld [vmem:[%s469_s0 + $0x18] sm:$0xff]  ;;  %v70_v57 = vadd.f32 %v66_v52, %v52_v51  ;;  %v84_v58 = vmul.f32 %v257_v54, %v253_v53 }
  0x11   :  { %v36_v56 = vld [vmem:[%s470_s1 + $0x18] sm:$0xff] }
  0x12   :  { %270 = vmatmul.msk.f32.gmra.mxu2 %vm184_vm2, %v181_v43  ;;  %v182_v59 = vld [vmem:[%s467_s2 + $0x18] sm:$0xff]  ;;  %v40_v60 = vmul.f32 %v36_v56, %v32_v55  ;;  %v88_v62 = vadd.f32 %v84_v58, %v70_v57 }
  0x13   :  { %261 = vmatmul.msk.f32.gmra.mxu3 %vm91_vm3, %v87_v50 }
  0x14   :  { %263 = vmatmul.msk.f32.vlgmr.msrb.gmra.mxu0 %vm137_vm4, %v37_v48  ;;  %265 = vmatmul.msk.f32.gmra.mxu1 %vm137_vm4, %v39_v49 }
  0x1a   :  { %271 = vmatmul.msk.f32.gmra.mxu2 %vm184_vm2, %v182_v59 }
  0x1b   :  { %262 = vmatmul.msk.f32.gmra.mxu3 %vm91_vm3, %v88_v62 }
  0x1c   :  { %268 = vmatmul.msk.f32.vlgmr.msra.gmra.mxu0 %vm184_vm2, %v179_v61  ;;  %266 = vmatmul.msk.f32.gmra.mxu1 %vm137_vm4, %v40_v60 }
  0x89   :  { %v125_v63 = vpop.f32.mrf.mxu0  ;;  %v170_v0 = vpop.f32.mrf.mxu1 }
  0x8d   :  { %v221_v1 = vpop.f32.mrf.mxu2 }
  0x8e   :  { %v128_v2 = vpop.f32.mrf.mxu3 }
  0x8f   :  { %v171_v4 = vadd.f32 %v170_v0, %v128_v2 }
  0x91   :  { %v167_v3 = vpop.f32.mrf.mxu0  ;;  %v231_v5 = vadd.f32 %v221_v1, %v171_v4  ;;  %v173_v6 = vpop.f32.mrf.mxu1 }
  0x92   :  { %v168_v8 = vadd.f32 %v167_v3, %v125_v63 }
  0x93   :  { %235 = vst [vmem:[%s471_s8 + $0x8] sm:$0xff] %v231_v5 }
  0x95   :  { %v224_v7 = vpop.f32.mrf.mxu2 }
  0x96   :  { %v131_v9 = vpop.f32.mrf.mxu3 }
  0x97   :  { %v174_v11 = vadd.f32 %v173_v6, %v131_v9 }
  0x99   :  { %v218_v10 = vpop.f32.mrf.mxu0  ;;  %v232_v13 = vadd.f32 %v224_v7, %v174_v11  ;;  %v176_v14 = vpop.f32.mrf.mxu1 }
  0x9a   :  { %v230_v12 = vadd.f32 %v218_v10, %v168_v8 }
  0x9b   :  { %236 = vst [vmem:[%s471_s8 + $0x10] sm:$0xff] %v232_v13 }
  0x9c   :  { %234 = vst [vmem:[%s471_s8] sm:$0xff] %v230_v12 }
  0x9d   :  { %v227_v16 = vpop.f32.mrf.mxu2 }
  0x9e   :  { %v134_v15 = vpop.f32.mrf.mxu3 }
  0x9f   :  { %v177_v17 = vadd.f32 %v176_v14, %v134_v15 }
  0xa1   :  { %v233_v18 = vadd.f32 %v227_v16, %v177_v17 }
  0xa3   :  { %237 = vst [vmem:[%s471_s8 + $0x18] sm:$0xff] %v233_v18 }

// kernel: run.14
= control target key start
LH: loop header
LB: loop body
LE: loop exit
PB: predicated region body
PF: predicated region fallthrough
CT: control target
= control target key end

     0   :  { %v17_v10 = vlaneseq  ;;  %v110_v20 = vmov 1.0   ;;  %s183_s1 = inlined_call_operand.vmem [shape: f32[128,128], index: 1, kind: input, shape index: {}]   ;;  %s184_s0 = inlined_call_operand.vmem [shape: s32[1,128], index: 0, kind: input, shape index: {}]   ;;  %s185_s2 = inlined_call_operand.vmem [shape: f32[16,128], index: 2, kind: output, shape index: {}]  }
   0x1   :  { %v49_v0 = vld [vmem:[%s183_s1 + $0x78] sm:$0xff]  ;;  %v48_v1 = vld [vmem:[%s183_s1 + $0x70] sm:$0xff]  ;;  %v47_v2 = vld [vmem:[%s183_s1 + $0x68] sm:$0xff] }
   0x2   :  { %50 = vmatpush.msra.mxu0 %v49_v0  ;;  %92 = vmatpush.msra.mxu1 %v49_v0  ;;  %v46_v3 = vld [vmem:[%s183_s1 + $0x60] sm:$0xff]  ;;  %v45_v4 = vld [vmem:[%s183_s1 + $0x58] sm:$0xff]  ;;  %v44_v5 = vld [vmem:[%s183_s1 + $0x50] sm:$0xff]  ;;  %v18_v13 = vshrl.u32 %v17_v10, 7 }
   0x3   :  { %v43_v6 = vld [vmem:[%s183_s1 + $0x48] sm:$0xff]  ;;  %v42_v7 = vld [vmem:[%s183_s1 + $0x40] sm:$0xff]  ;;  %v41_v8 = vld [vmem:[%s183_s1 + $0x38] sm:$0xff] }
   0x4   :  { %51 = vmatpush.msra.mxu0 %v48_v1  ;;  %93 = vmatpush.msra.mxu1 %v48_v1  ;;  %v40_v9 = vld [vmem:[%s183_s1 + $0x30] sm:$0xff]  ;;  %v39_v11 = vld [vmem:[%s183_s1 + $0x28] sm:$0xff]  ;;  %v38_v12 = vld [vmem:[%s183_s1 + $0x20] sm:$0xff]  ;;  %v19_v17 = vadd.s32 8, %v18_v13 }
   0x5   :  { %v37_v14 = vld [vmem:[%s183_s1 + $0x18] sm:$0xff]  ;;  %v36_v15 = vld [vmem:[%s183_s1 + $0x10] sm:$0xff]  ;;  %v109_v16 = vld [vmem:[%s184_s0] ss:$0 sm:$0xff] }
   0x6   :  { %52 = vmatpush.msra.mxu0 %v47_v2  ;;  %94 = vmatpush.msra.mxu1 %v47_v2  ;;  %v35_v18 = vld [vmem:[%s183_s1 + $0x8] sm:$0xff]  ;;  %v34_v19 = vld [vmem:[%s183_s1] sm:$0xff]  ;;  %vm26_vm0 = vcmp.eq.s32.totalorder %v18_v13, %v109_v16  ;;  %vm27_vm1 = vcmp.eq.s32.totalorder %v19_v17, %v109_v16 }
   0x8   :  { %53 = vmatpush.msra.mxu0 %v46_v3  ;;  %95 = vmatpush.msra.mxu1 %v46_v3 }
   0xa   :  { %54 = vmatpush.msra.mxu0 %v45_v4  ;;  %96 = vmatpush.msra.mxu1 %v45_v4 }
   0xc   :  { %55 = vmatpush.msra.mxu0 %v44_v5  ;;  %97 = vmatpush.msra.mxu1 %v44_v5 }
   0xe   :  { %56 = vmatpush.msra.mxu0 %v43_v6  ;;  %98 = vmatpush.msra.mxu1 %v43_v6 }
  0x10   :  { %57 = vmatpush.msra.mxu0 %v42_v7  ;;  %99 = vmatpush.msra.mxu1 %v42_v7 }
  0x12   :  { %58 = vmatpush.msra.mxu0 %v41_v8  ;;  %100 = vmatpush.msra.mxu1 %v41_v8 }
  0x14   :  { %59 = vmatpush.msra.mxu0 %v40_v9  ;;  %101 = vmatpush.msra.mxu1 %v40_v9 }
  0x16   :  { %60 = vmatpush.msra.mxu0 %v39_v11  ;;  %102 = vmatpush.msra.mxu1 %v39_v11 }
  0x18   :  { %61 = vmatpush.msra.mxu0 %v38_v12  ;;  %103 = vmatpush.msra.mxu1 %v38_v12 }
  0x1a   :  { %62 = vmatpush.msra.mxu0 %v37_v14  ;;  %104 = vmatpush.msra.mxu1 %v37_v14 }
  0x1c   :  { %63 = vmatpush.msra.mxu0 %v36_v15  ;;  %105 = vmatpush.msra.mxu1 %v36_v15 }
  0x1e   :  { %64 = vmatpush.msra.mxu0 %v35_v18  ;;  %106 = vmatpush.msra.mxu1 %v35_v18 }
  0x20   :  { %65 = vmatpush.msra.mxu0 %v34_v19  ;;  %107 = vmatpush.msra.mxu1 %v34_v19 }
  0x21   :  { %90 = vmatmul.msk.f32.vlgmr.msra.gmra.mxu0 %vm26_vm0, %v110_v20  ;;  %91 = vmatmul.msk.f32.vlgmr.msra.gmra.mxu1 %vm27_vm1, %v110_v20 }
  0x9e   :  { %v67_v21 = vpop.f32.mrf.mxu0  ;;  %v70_v22 = vpop.f32.mrf.mxu1 }
  0x9f   :  { %82 = vst [vmem:[%s185_s2] sm:$0xff] %v67_v21 }
  0xa0   :  { %83 = vst [vmem:[%s185_s2 + $0x8] sm:$0xff] %v70_v22 }

// kernel: run.13
= control target key start
LH: loop header
LB: loop body
LE: loop exit
PB: predicated region body
PF: predicated region fallthrough
CT: control target
= control target key end

     0   :  { %vm62_vm0 = vcmask 1041408   ;;  %vm49_vm1 = vcmask 15360   ;;  %s984_s17 = smov 114   ;;  %s986_s18 = smov 120   ;;  %vm226_vm2 = vcmask 1043456   ;;  %vm213_vm3 = vcmask 31744   ;;  %s1341_s5 = inlined_call_operand.vmem [shape: f32[2,20], index: 5, kind: input, shape index: {}]   ;;  %s1342_s0 = inlined_call_operand.vmem [shape: f32[32,2], index: 0, kind: input, shape index: {}]   ;;  %s1343_s6 = inlined_call_operand.vmem [shape: f32[4,6], index: 6, kind: input, shape index: {}]   ;;  %s1344_s7 = inlined_call_operand.vmem [shape: f32[2,6], index: 7, kind: input, shape index: {}]   ;;  %s1345_s8 = inlined_call_operand.vmem [shape: f32[8,14], index: 8, kind: input, shape index: {}]   ;;  %s1346_s3 = inlined_call_operand.vmem [shape: f32[3,32,4], index: 3, kind: input, shape index: {}]   ;;  %s1347_s9 = inlined_call_operand.vmem [shape: f32[6,14], index: 9, kind: input, shape index: {}]   ;;  %s1348_s4 = inlined_call_operand.vmem [shape: f32[3,32,2], index: 4, kind: input, shape index: {}]   ;;  %s1349_s1 = inlined_call_operand.vmem [shape: f32[32,8], index: 1, kind: input, shape index: {}]   ;;  %s1350_s12 = inlined_call_operand.vmem [shape: f32[6,6], index: 12, kind: input, shape index: {}]   ;;  %s1351_s2 = inlined_call_operand.vmem [shape: f32[32,6], index: 2, kind: input, shape index: {}]   ;;  %s1352_s10 = inlined_call_operand.vmem [shape: f32[6,14], index: 10, kind: input, shape index: {}]   ;;  %s1353_s11 = inlined_call_operand.vmem [shape: f32[1,14], index: 11, kind: input, shape index: {}]   ;;  %s1354_s13 = inlined_call_operand.vmem [shape: f32[32,128], index: 13, kind: output, shape index: {}]  }
   0x1   :  { %v48_v0 = vld [vmem:[%s1341_s5] sm:$0x3]  ;;  %v45_v2 = vld [vmem:[%s1342_s0 + $0x8] sm:$0xff]  ;;  %v46_v3 = vld [vmem:[%s1342_s0 + $0x10] sm:$0xff]  ;;  %vm546_vm4 = vcmask 1045504   ;;  %vm579_vm5 = vcmask 64512  }
   0x2   :  { %v44_v1 = vld [vmem:[%s1342_s0] sm:$0xff]  ;;  %886 = vmatpush.msk.msra.mxu0 %vm62_vm0, %v48_v0  ;;  %966 = vmatpush.msk.msra.mxu1 %vm62_vm0, %v48_v0  ;;  %v47_v4 = vld [vmem:[%s1342_s0 + $0x18] sm:$0xff]  ;;  %s985_s0 = smov 110   ;;  %v128_v17 = vld [vmem:[%s1346_s3 + $0x8] sm:$0xff]  ;;  %vm533_vm6 = vcmask 48128   ;;  %s988_s21 = smov 20  }
   0x3   :  { %967 = vmatpush.msk.msra.mxu2 %vm62_vm0, %v48_v0  ;;  %887 = vmatmul.msk.f32.vlgmr.msra.gmra.mxu0 %vm49_vm1, %v44_v1  ;;  %v147_v9 = vld [vmem:[%s1343_s6] sm:$0xf]  ;;  %v902_v20 = vld [vmem:[%s1346_s3 + $0x28] sm:$0xff]  ;;  %v129_v28 = vld [vmem:[%s1346_s3 + $0x10] sm:$0xff]  ;;  %s989_s22 = smov 26   ;;  %vm858_vm15 = vcmask 162816  }
   0x4   :  { %888 = vmatmul.msk.f32.vlgmr.msra.gmra.mxu1 %vm49_vm1, %v45_v2  ;;  %889 = vmatmul.msk.f32.vlgmr.msra.gmra.mxu2 %vm49_vm1, %v46_v3  ;;  %v168_v10 = vld [vmem:[%s1344_s7] sm:$0x3]  ;;  %v903_v29 = vld [vmem:[%s1346_s3 + $0x30] sm:$0xff]  ;;  %v149_v31 = vld [vmem:[%s1348_s4 + $0x8] sm:$0xff] }
   0x5   :  { %968 = vmatpush.msk.msra.mxu3 %vm62_vm0, %v48_v0  ;;  %896 = vmatpush.msk.msrb.mxu2 %vm226_vm2, %v147_v9  ;;  %v531_v11 = vld [vmem:[%s1345_s8] sm:$0xff]  ;;  %v906_v34 = vld [vmem:[%s1348_s4 + $0x28] sm:$0xff]  ;;  %v130_v38 = vld [vmem:[%s1346_s3 + $0x18] sm:$0xff] }
   0x6   :  { %890 = vmatmul.msk.f32.vlgmr.msra.gmra.mxu3 %vm49_vm1, %v47_v4  ;;  %914 = vmatpush.msk.msrb.mxu0 %vm226_vm2, %v147_v9  ;;  %v127_v12 = vld [vmem:[%s1346_s3] sm:$0xff]  ;;  %v904_v39 = vld [vmem:[%s1346_s3 + $0x38] sm:$0xff]  ;;  %v150_v40 = vld [vmem:[%s1348_s4 + $0x10] sm:$0xff] }
   0x7   :  { %932 = vmatpush.msk.msra.mxu2 %vm226_vm2, %v147_v9  ;;  %891 = vmatpush.msk.msrb.mxu1 %vm62_vm0, %v168_v10  ;;  %v901_v13 = vld [vmem:[%s1346_s3 + $0x20] sm:$0xff]  ;;  %v907_v42 = vld [vmem:[%s1348_s4 + $0x30] sm:$0xff]  ;;  %v151_v49 = vld [vmem:[%s1348_s4 + $0x18] sm:$0xff]  ;;  %vm868_vm2 = vcmask 261120  }
   0x8   :  { %909 = vmatpush.msk.msrb.mxu3 %vm62_vm0, %v168_v10  ;;  %607 = vmatpush.msra.mxu0 %v531_v11  ;;  %v532_v19 = vld [vmem:[%s1347_s9] sm:$0x3f]  ;;  %v908_v52 = vld [vmem:[%s1348_s4 + $0x38] sm:$0xff]  ;;  %v920_v58 = vld [vmem:[%s1346_s3 + $0x48] sm:$0xff] }
   0x9   :  { %927 = vmatpush.msk.msra.mxu1 %vm62_vm0, %v168_v10  ;;  %v148_v21 = vld [vmem:[%s1348_s4] sm:$0xff]  ;;  %v96_v62 = vld [vmem:[%s1349_s1 + $0x8] sm:$0xff]  ;;  %v921_v3 = vld [vmem:[%s1346_s3 + $0x50] sm:$0xff]  ;;  %vm853_vm0 = vcmask 113664  }
   0xa   :  { %937 = vmatpush.msk.msra.mxu3 %vm546_vm4, %v532_v19  ;;  %v905_v22 = vld [vmem:[%s1348_s4 + $0x20] sm:$0xff]  ;;  %v924_v4 = vld [vmem:[%s1348_s4 + $0x48] sm:$0xff]  ;;  %v97_v9 = vld [vmem:[%s1349_s1 + $0x10] sm:$0xff] }
   0xb   :  { %v919_v48 = vld [vmem:[%s1346_s3 + $0x40] sm:$0xff] }
   0xc   :  { %v95_v51 = vld [vmem:[%s1349_s1] sm:$0xff] }
   0xd   :  { %v678_v57 = vld [vmem:[%s1350_s12] sm:$0x3f] }
   0xe   :  { %v923_v59 = vld [vmem:[%s1348_s4 + $0x40] sm:$0xff] }
   0xf   :  { %v103_v60 = vld [vmem:[%s1351_s2] sm:$0xff] }
  0x80   :  { %v1083_v5 = vpop.f32.mrf.mxu0 }
  0x81   :  { %v1085_v6 = vpop.f32.mrf.mxu1  ;;  %131 = vrot.lane.b32.xlu0 %v1083_v5, %s984_s17  ;;  %v99_v55 = vmul.f32 %v95_v51, %v1083_v5 }
  0x82   :  { %133 = vrot.lane.b32.xlu1 %v1085_v6, %s984_s17  ;;  %v100_v2 = vmul.f32 %v96_v62, %v1085_v6 }
  0x87   :  { %v1089_v7 = vpop.f32.mrf.mxu2 }
  0x88   :  { %135 = vrot.lane.b32.xlu2 %v1089_v7, %s984_s17 }
  0x89   :  { %152 = vrot.lane.b32.xlu0 %v1083_v5, %s985_s0  ;;  %v1094_v8 = vpop.f32.mrf.mxu3 }
  0x8a   :  { %154 = vrot.lane.b32.xlu1 %v1085_v6, %s985_s0 }
  0x90   :  { %156 = vrot.lane.b32.xlu2 %v1089_v7, %s985_s0 }
  0x91   :  { %137 = vrot.lane.b32.xlu0 %v1094_v8, %s984_s17 }
  0x92   :  { %158 = vrot.lane.b32.xlu1 %v1094_v8, %s985_s0 }
  0x98   :  { %111 = vrot.lane.b32.xlu2 %v1083_v5, %s986_s18  ;;  %v104_v5 = vld [vmem:[%s1351_s2 + $0x8] sm:$0xff] }
  0x99   :  { %113 = vrot.lane.b32.xlu0 %v1085_v6, %s986_s18 }
  0x9a   :  { %115 = vrot.lane.b32.xlu1 %v1089_v7, %s986_s18 }
  0xa0   :  { %117 = vrot.lane.b32.xlu2 %v1094_v8, %s986_s18 }
  0xe2   :  { %v1153_v30 = vpop.permute.xlu2 %135 }
  0xe3   :  { %v145_v33 = vmul.f32 %v1153_v30, %v129_v28  ;;  %v266_v35 = vmul.f32 %v903_v29, %v1153_v30  ;;  %v366_v10 = vmul.f32 %v921_v3, %v1153_v30 }
  0xea   :  { %v157_v44 = vpop.permute.xlu2 %156 }
  0xeb   :  { %v166_v46 = vmul.f32 %v157_v44, %v150_v40  ;;  %v275_v47 = vmul.f32 %v907_v42, %v157_v44 }
  0xf2   :  { %v112_v61 = vpop.permute.xlu2 %111 }
  0xf3   :  { %v132_v14 = vpop.permute.xlu0 %131  ;;  %v123_v1 = vmul.f32 %v112_v61, %v103_v60 }
  0xf4   :  { %v143_v15 = vmul.f32 %v132_v14, %v127_v12  ;;  %v264_v16 = vmul.f32 %v901_v13, %v132_v14  ;;  %v1126_v18 = vpop.permute.xlu1 %133  ;;  %v364_v53 = vmul.f32 %v919_v48, %v132_v14  ;;  %v101_v13 = vmul.f32 %v97_v9, %v1089_v7  ;;  %v925_v14 = vld [vmem:[%s1348_s4 + $0x50] sm:$0xff]  ;;  %v621_v48 = vld [vmem:[%s1352_s10] sm:$0x3f]  ;;  %s987_s10 = smov 14  }
  0xf5   :  { %v144_v23 = vmul.f32 %v1126_v18, %v128_v17  ;;  %v265_v24 = vmul.f32 %v902_v20, %v1126_v18  ;;  %v365_v63 = vmul.f32 %v920_v58, %v1126_v18  ;;  %v105_v7 = vld [vmem:[%s1351_s2 + $0x10] sm:$0xff]  ;;  %v98_v17 = vld [vmem:[%s1349_s1 + $0x18] sm:$0xff]  ;;  %v375_v18 = vmul.f32 %v925_v14, %v157_v44 }
  0xf6   :  { %897 = vmatmul.msk.f32.vlgmr.msrb.gmra.mxu2 %vm213_vm3, %v143_v15  ;;  %915 = vmatmul.msk.f32.vlgmr.msrb.gmra.mxu0 %vm213_vm3, %v264_v16  ;;  %v922_v15 = vld [vmem:[%s1346_s3 + $0x58] sm:$0xff] }
  0xf7   :  { %951 = vmatpush.msk.msrb.mxu2 %vm546_vm4, %v678_v57  ;;  %961 = vmatpush.msk.msrb.mxu0 %vm546_vm4, %v678_v57 }
  0xfb   :  { %v153_v25 = vpop.permute.xlu0 %152 }
  0xfc   :  { %v164_v26 = vmul.f32 %v153_v25, %v148_v21  ;;  %v273_v27 = vmul.f32 %v905_v22, %v153_v25  ;;  %v1158_v32 = vpop.permute.xlu1 %154  ;;  %v373_v0 = vmul.f32 %v923_v59, %v153_v25  ;;  %v102_v21 = vmul.f32 %v98_v17, %v1094_v8  ;;  %v926_v22 = vld [vmem:[%s1348_s4 + $0x58] sm:$0xff] }
  0xfd   :  { %v165_v36 = vmul.f32 %v1158_v32, %v149_v31  ;;  %v274_v37 = vmul.f32 %v906_v34, %v1158_v32  ;;  %v374_v11 = vmul.f32 %v924_v4, %v1158_v32 }
  0xfe   :  { %892 = vmatmul.msk.f32.vlgmr.msrb.gmra.mxu1 %vm49_vm1, %v164_v26  ;;  %898 = vmatmul.msk.f32.gmra.mxu2 %vm213_vm3, %v144_v23  ;;  %v106_v23 = vld [vmem:[%s1351_s2 + $0x18] sm:$0xff] }
  0xff   :  { %910 = vmatmul.msk.f32.vlgmr.msrb.gmra.mxu3 %vm49_vm1, %v273_v27  ;;  %916 = vmatmul.msk.f32.gmra.mxu0 %vm213_vm3, %v265_v24  ;;  %v118_v24 = vpop.permute.xlu2 %117 }
 0x100   :  { %956 = vmatpush.msk.msrb.mxu3 %vm546_vm4, %v678_v57  ;;  %v126_v26 = vmul.f32 %v118_v24, %v106_v23  ;;  %946 = vmatpush.msk.msrb.mxu1 %vm546_vm4, %v621_v48 }
 0x103   :  { %v1180_v41 = vpop.permute.xlu0 %137 }
 0x104   :  { %v146_v43 = vmul.f32 %v1180_v41, %v130_v38  ;;  %v267_v45 = vmul.f32 %v904_v39, %v1180_v41  ;;  %v159_v50 = vpop.permute.xlu1 %158  ;;  %v367_v19 = vmul.f32 %v922_v15, %v1180_v41 }
 0x105   :  { %v167_v54 = vmul.f32 %v159_v50, %v151_v49  ;;  %v276_v56 = vmul.f32 %v908_v52, %v159_v50  ;;  %v376_v25 = vmul.f32 %v926_v22, %v159_v50 }
 0x106   :  { %893 = vmatmul.msk.f32.gmra.mxu1 %vm49_vm1, %v165_v36  ;;  %899 = vmatmul.msk.f32.gmra.mxu2 %vm213_vm3, %v145_v33 }
 0x107   :  { %911 = vmatmul.msk.f32.gmra.mxu3 %vm49_vm1, %v274_v37  ;;  %917 = vmatmul.msk.f32.gmra.mxu0 %vm213_vm3, %v266_v35 }
 0x10b   :  { %v114_v6 = vpop.permute.xlu0 %113 }
 0x10c   :  { %v124_v12 = vmul.f32 %v114_v6, %v104_v5  ;;  %v116_v16 = vpop.permute.xlu1 %115 }
 0x10d   :  { %v125_v20 = vmul.f32 %v116_v16, %v105_v7 }
 0x10e   :  { %894 = vmatmul.msk.f32.gmra.mxu1 %vm49_vm1, %v166_v46  ;;  %900 = vmatmul.msk.f32.gmra.mxu2 %vm213_vm3, %v146_v43 }
 0x10f   :  { %912 = vmatmul.msk.f32.gmra.mxu3 %vm49_vm1, %v275_v47  ;;  %918 = vmatmul.msk.f32.gmra.mxu0 %vm213_vm3, %v267_v45 }
 0x116   :  { %895 = vmatmul.msk.f32.gmra.mxu1 %vm49_vm1, %v167_v54  ;;  %933 = vmatmul.msk.f32.vlgmr.msra.gmra.mxu2 %vm213_vm3, %v364_v53 }
 0x117   :  { %913 = vmatmul.msk.f32.gmra.mxu3 %vm49_vm1, %v276_v56  ;;  %942 = vmatmul.msk.f32.vlgmr.msra.gmra.mxu0 %vm579_vm5, %v99_v55 }
 0x11e   :  { %928 = vmatmul.msk.f32.vlgmr.msra.gmra.mxu1 %vm49_vm1, %v373_v0  ;;  %934 = vmatmul.msk.f32.gmra.mxu2 %vm213_vm3, %v365_v63 }
 0x11f   :  { %938 = vmatmul.msk.f32.vlgmr.msra.gmra.mxu3 %vm533_vm6, %v123_v1  ;;  %943 = vmatmul.msk.f32.gmra.mxu0 %vm579_vm5, %v100_v2 }
 0x126   :  { %929 = vmatmul.msk.f32.gmra.mxu1 %vm49_vm1, %v374_v11  ;;  %935 = vmatmul.msk.f32.gmra.mxu2 %vm213_vm3, %v366_v10 }
 0x127   :  { %939 = vmatmul.msk.f32.gmra.mxu3 %vm533_vm6, %v124_v12  ;;  %944 = vmatmul.msk.f32.gmra.mxu0 %vm579_vm5, %v101_v13 }
 0x12e   :  { %930 = vmatmul.msk.f32.gmra.mxu1 %vm49_vm1, %v375_v18  ;;  %936 = vmatmul.msk.f32.gmra.mxu2 %vm213_vm3, %v367_v19  ;;  %vm873_vm3 = vcmask 269312  }
 0x12f   :  { %940 = vmatmul.msk.f32.gmra.mxu3 %vm533_vm6, %v125_v20  ;;  %945 = vmatmul.msk.f32.gmra.mxu0 %vm579_vm5, %v102_v21 }
 0x136   :  { %931 = vmatmul.msk.f32.gmra.mxu1 %vm49_vm1, %v376_v25  ;;  %vm863_vm1 = vcmask 211968  }
 0x137   :  { %941 = vmatmul.msk.f32.gmra.mxu3 %vm533_vm6, %v126_v26 }
 0x173   :  { %v347_v8 = vpop.f32.mrf.mxu0 }
 0x179   :  { %v247_v27 = vpop.f32.mrf.mxu2 }
 0x17b   :  { %v201_v28 = vpop.f32.mrf.mxu1 }
 0x17c   :  { %v248_v29 = vadd.f32 %v247_v27, %v201_v28  ;;  %v350_v30 = vpop.f32.mrf.mxu0 }
 0x17e   :  { %952 = vmatmul.msk.f32.vlgmr.msrb.gmra.mxu2 %vm533_vm6, %v248_v29  ;;  %v459_v54 = vmul.f32 %v248_v29, %v248_v29 }
 0x181   :  { %v250_v31 = vpop.f32.mrf.mxu2 }
 0x182   :  { %v306_v32 = vpop.f32.mrf.mxu3 }
 0x183   :  { %v348_v33 = vadd.f32 %v347_v8, %v306_v32  ;;  %v204_v34 = vpop.f32.mrf.mxu1 }
 0x184   :  { %v251_v35 = vadd.f32 %v250_v31, %v204_v34  ;;  %v353_v37 = vpop.f32.mrf.mxu0 }
 0x185   :  { %957 = vmatmul.msk.f32.vlgmr.msrb.gmra.mxu3 %vm533_vm6, %v348_v33  ;;  %v463_v50 = vmul.f32 %v348_v33, %v348_v33 }
 0x186   :  { %953 = vmatmul.msk.f32.gmra.mxu2 %vm533_vm6, %v251_v35  ;;  %v460_v2 = vmul.f32 %v251_v35, %v251_v35 }
 0x187   :  { %v467_v56 = vadd.f32 %v463_v50, %v459_v54 }
 0x189   :  { %v253_v36 = vpop.f32.mrf.mxu2 }
 0x18a   :  { %v309_v38 = vpop.f32.mrf.mxu3 }
 0x18b   :  { %v351_v39 = vadd.f32 %v350_v30, %v309_v38  ;;  %v207_v40 = vpop.f32.mrf.mxu1 }
 0x18c   :  { %v254_v41 = vadd.f32 %v253_v36, %v207_v40  ;;  %v356_v46 = vpop.f32.mrf.mxu0 }
 0x18d   :  { %958 = vmatmul.msk.f32.gmra.mxu3 %vm533_vm6, %v351_v39  ;;  %v464_v61 = vmul.f32 %v351_v39, %v351_v39 }
 0x18e   :  { %954 = vmatmul.msk.f32.gmra.mxu2 %vm533_vm6, %v254_v41  ;;  %v461_v17 = vmul.f32 %v254_v41, %v254_v41 }
 0x18f   :  { %v468_v4 = vadd.f32 %v464_v61, %v460_v2 }
 0x191   :  { %v256_v42 = vpop.f32.mrf.mxu2 }
 0x192   :  { %v312_v43 = vpop.f32.mrf.mxu3 }
 0x193   :  { %v354_v44 = vadd.f32 %v353_v37, %v312_v43  ;;  %v210_v45 = vpop.f32.mrf.mxu1 }
 0x194   :  { %v257_v47 = vadd.f32 %v256_v42, %v210_v45  ;;  %v609_v57 = vpop.f32.mrf.mxu0 }
 0x195   :  { %959 = vmatmul.msk.f32.gmra.mxu3 %vm533_vm6, %v354_v44  ;;  %v465_v12 = vmul.f32 %v354_v44, %v354_v44 }
 0x196   :  { %955 = vmatmul.msk.f32.gmra.mxu2 %vm533_vm6, %v257_v47  ;;  %v462_v34 = vmul.f32 %v257_v47, %v257_v47 }
 0x197   :  { %v469_v20 = vadd.f32 %v465_v12, %v461_v17 }
 0x199   :  { %v447_v49 = vpop.f32.mrf.mxu2 }
 0x19a   :  { %v315_v51 = vpop.f32.mrf.mxu3 }
 0x19b   :  { %v357_v52 = vadd.f32 %v356_v46, %v315_v51  ;;  %v406_v53 = vpop.f32.mrf.mxu1 }
 0x19c   :  { %v448_v55 = vadd.f32 %v447_v49, %v406_v53  ;;  %v612_v6 = vpop.f32.mrf.mxu0 }
 0x19d   :  { %960 = vmatmul.msk.f32.gmra.mxu3 %vm533_vm6, %v357_v52  ;;  %v466_v26 = vmul.f32 %v357_v52, %v357_v52 }
 0x19e   :  { %v471_v58 = vmul.f32 %v448_v55, %v448_v55  ;;  %962 = vmatmul.msk.f32.vlgmr.msrb.gmra.mxu0 %vm533_vm6, %v448_v55 }
 0x19f   :  { %v470_v38 = vadd.f32 %v466_v26, %v462_v34 }
 0x1a0   :  { %v475_v59 = vadd.f32 %v471_v58, %v467_v56 }
 0x1a1   :  { %v450_v60 = vpop.f32.mrf.mxu2 }
 0x1a2   :  { %v479_v62 = vmax.f32 %v475_v59, 1e-08  ;;  %v567_v63 = vpop.f32.mrf.mxu3 }
 0x1a3   :  { %v1290_v0 = vadd.f32 %v609_v57, %v567_v63  ;;  %v409_v1 = vpop.f32.mrf.mxu1 }
 0x1a4   :  { %976 = vrsqrt.f32 %v479_v62  ;;  %v451_v3 = vadd.f32 %v450_v60, %v409_v1  ;;  %v615_v8 = vpop.f32.mrf.mxu0  ;;  %vm490_vm7 = vcmp.eq.f32.partialorder %v479_v62, inf  ;;  %v493_v40 = vand.u32 2147483648, %v479_v62 }
 0x1a5   :  { %vm492_vm8 = vcmp.eq.f32.partialorder %v479_v62, 0.0 }
 0x1a6   :  { %v472_v5 = vmul.f32 %v451_v3, %v451_v3  ;;  %963 = vmatmul.msk.f32.gmra.mxu0 %vm533_vm6, %v451_v3 }
 0x1a8   :  { %v476_v9 = vadd.f32 %v472_v5, %v468_v4 }
 0x1a9   :  { %v453_v10 = vpop.f32.mrf.mxu2 }
 0x1aa   :  { %v977_v11 = vpop.eup %976  ;;  %v480_v13 = vmax.f32 %v476_v9, 1e-08  ;;  %v570_v14 = vpop.f32.mrf.mxu3 }
 0x1ab   :  { %v1293_v15 = vadd.f32 %v612_v6, %v570_v14  ;;  %v412_v7 = vpop.f32.mrf.mxu1  ;;  %v484_v16 = vmul.f32 %v977_v11, %v479_v62 }
 0x1ac   :  { %v454_v18 = vadd.f32 %v453_v10, %v412_v7  ;;  %978 = vrsqrt.f32 %v480_v13  ;;  %vm502_vm9 = vcmp.eq.f32.partialorder %v480_v13, inf  ;;  %v505_v52 = vand.u32 2147483648, %v480_v13 }
 0x1ad   :  { %v485_v19 = vmul.f32 %v977_v11, %v484_v16  ;;  %vm504_vm10 = vcmp.eq.f32.partialorder %v480_v13, 0.0  ;;  %v618_v16 = vpop.f32.mrf.mxu0 }
 0x1ae   :  { %v473_v21 = vmul.f32 %v454_v18, %v454_v18  ;;  %964 = vmatmul.msk.f32.gmra.mxu0 %vm533_vm6, %v454_v18 }
 0x1af   :  { %v486_v22 = vmul.f32 0.5, %v485_v19 }
 0x1b0   :  { %v477_v23 = vadd.f32 %v473_v21, %v469_v20 }
 0x1b1   :  { %v487_v24 = vsub.f32 1.5, %v486_v22  ;;  %v456_v29 = vpop.f32.mrf.mxu2 }
 0x1b2   :  { %v979_v25 = vpop.eup %978  ;;  %v481_v27 = vmax.f32 %v477_v23, 1e-08  ;;  %v573_v28 = vpop.f32.mrf.mxu3 }
 0x1b3   :  { %v1296_v30 = vadd.f32 %v615_v8, %v573_v28  ;;  %v415_v31 = vpop.f32.mrf.mxu1  ;;  %v488_v32 = vmul.f32 %v977_v11, %v487_v24  ;;  %v496_v33 = vmul.f32 %v979_v25, %v480_v13  ;;  %v975_v28 = vld [vmem:[%s1353_s11] ss:$0 sm:$0xff] }
 0x1b4   :  { %v457_v35 = vadd.f32 %v456_v29, %v415_v31  ;;  %980 = vrsqrt.f32 %v481_v27  ;;  %vm514_vm11 = vcmp.eq.f32.partialorder %v481_v27, inf  ;;  %vm516_vm12 = vcmp.eq.f32.partialorder %v481_v27, 0.0 }
 0x1b5   :  { %v489_v36 = vmul.f32 %v488_v32, %v479_v62  ;;  %v497_v37 = vmul.f32 %v979_v25, %v496_v33 }
 0x1b6   :  { %v474_v39 = vmul.f32 %v457_v35, %v457_v35  ;;  %965 = vmatmul.msk.f32.gmra.mxu0 %vm533_vm6, %v457_v35 }
 0x1b7   :  { %v491_v41 = vsel %vm490_vm7, %v479_v62, %v489_v36  ;;  %v498_v42 = vmul.f32 0.5, %v497_v37  ;;  %v517_v62 = vand.u32 2147483648, %v481_v27 }
 0x1b8   :  { %v478_v43 = vadd.f32 %v474_v39, %v470_v38  ;;  %v494_v44 = vsel %vm492_vm8, %v493_v40, %v491_v41 }
 0x1b9   :  { %947 = vmatmul.msk.f32.vlgmr.msrb.gmra.mxu1 %vm533_vm6, %v494_v44  ;;  %v499_v45 = vsub.f32 1.5, %v498_v42 }
 0x1ba   :  { %v981_v46 = vpop.eup %980  ;;  %v482_v47 = vmax.f32 %v478_v43, 1e-08  ;;  %v576_v11 = vpop.f32.mrf.mxu3 }
 0x1bb   :  { %v500_v48 = vmul.f32 %v979_v25, %v499_v45  ;;  %v508_v49 = vmul.f32 %v981_v46, %v481_v27  ;;  %v619_v43 = vadd.f32 %v618_v16, %v576_v11 }
 0x1bc   :  { %982 = vrsqrt.f32 %v482_v47  ;;  %vm526_vm13 = vcmp.eq.f32.partialorder %v482_v47, inf  ;;  %v529_v6 = vand.u32 2147483648, %v482_v47  ;;  %vm528_vm14 = vcmp.eq.f32.partialorder %v482_v47, 0.0 }
 0x1bd   :  { %v501_v50 = vmul.f32 %v500_v48, %v480_v13  ;;  %v509_v51 = vmul.f32 %v981_v46, %v508_v49 }
 0x1bf   :  { %v503_v53 = vsel %vm502_vm9, %v480_v13, %v501_v50  ;;  %v510_v54 = vmul.f32 0.5, %v509_v51 }
 0x1c0   :  { %v506_v55 = vsel %vm504_vm10, %v505_v52, %v503_v53 }
 0x1c1   :  { %948 = vmatmul.msk.f32.gmra.mxu1 %vm533_vm6, %v506_v55  ;;  %v511_v56 = vsub.f32 1.5, %v510_v54 }
 0x1c2   :  { %v983_v57 = vpop.eup %982 }
 0x1c3   :  { %v512_v58 = vmul.f32 %v981_v46, %v511_v56  ;;  %v520_v59 = vmul.f32 %v983_v57, %v482_v47 }
 0x1c5   :  { %v513_v60 = vmul.f32 %v512_v58, %v481_v27  ;;  %v521_v61 = vmul.f32 %v983_v57, %v520_v59 }
 0x1c7   :  { %v515_v63 = vsel %vm514_vm11, %v481_v27, %v513_v60  ;;  %v522_v1 = vmul.f32 0.5, %v521_v61 }
 0x1c8   :  { %v518_v2 = vsel %vm516_vm12, %v517_v62, %v515_v63 }
 0x1c9   :  { %949 = vmatmul.msk.f32.gmra.mxu1 %vm533_vm6, %v518_v2  ;;  %v523_v3 = vsub.f32 1.5, %v522_v1 }
 0x1cb   :  { %v524_v4 = vmul.f32 %v983_v57, %v523_v3 }
 0x1cd   :  { %v525_v5 = vmul.f32 %v524_v4, %v482_v47 }
 0x1cf   :  { %v527_v9 = vsel %vm526_vm13, %v482_v47, %v525_v5 }
 0x1d0   :  { %v530_v10 = vsel %vm528_vm14, %v529_v6, %v527_v9 }
 0x1d1   :  { %950 = vmatmul.msk.f32.gmra.mxu1 %vm533_vm6, %v530_v10 }
 0x201   :  { %v711_v12 = vpop.f32.mrf.mxu2 }
 0x202   :  { %809 = vrot.lane.b32.xlu0 %v711_v12, %s987_s10 }
 0x208   :  { %v752_v13 = vpop.f32.mrf.mxu3 }
 0x209   :  { %825 = vrot.lane.b32.xlu1 %v752_v13, %s988_s21  ;;  %v714_v14 = vpop.f32.mrf.mxu2 }
 0x210   :  { %v755_v7 = vpop.f32.mrf.mxu3 }
 0x211   :  { %811 = vrot.lane.b32.xlu1 %v714_v14, %s987_s10  ;;  %827 = vrot.lane.b32.xlu2 %v755_v7, %s988_s21  ;;  %v717_v17 = vpop.f32.mrf.mxu2 }
 0x218   :  { %v758_v18 = vpop.f32.mrf.mxu3 }
 0x219   :  { %813 = vrot.lane.b32.xlu2 %v717_v17, %s987_s10  ;;  %829 = vrot.lane.b32.xlu0 %v758_v18, %s988_s21  ;;  %v720_v20 = vpop.f32.mrf.mxu2 }
 0x21b   :  { %v793_v19 = vpop.f32.mrf.mxu0 }
 0x220   :  { %v761_v21 = vpop.f32.mrf.mxu3 }
 0x221   :  { %815 = vrot.lane.b32.xlu0 %v720_v20, %s987_s10  ;;  %831 = vrot.lane.b32.xlu1 %v761_v21, %s988_s21 }
 0x222   :  { %841 = vrot.lane.b32.xlu2 %v793_v19, %s989_s22 }
 0x223   :  { %v796_v22 = vpop.f32.mrf.mxu0 }
 0x229   :  { %843 = vrot.lane.b32.xlu0 %v796_v22, %s989_s22 }
 0x22b   :  { %v799_v23 = vpop.f32.mrf.mxu0 }
 0x22c   :  { %845 = vrot.lane.b32.xlu1 %v799_v23, %s989_s22 }
 0x233   :  { %v802_v24 = vpop.f32.mrf.mxu0 }
 0x234   :  { %847 = vrot.lane.b32.xlu2 %v802_v24, %s989_s22 }
 0x236   :  { %v654_v26 = vpop.f32.mrf.mxu1 }
 0x237   :  { %v666_v27 = vadd.f32 %v654_v26, %v1290_v0 }
 0x239   :  { %v674_v32 = vadd.f32 %v975_v28, %v666_v27 }
 0x23e   :  { %v657_v29 = vpop.f32.mrf.mxu1 }
 0x23f   :  { %v667_v45 = vadd.f32 %v657_v29, %v1293_v15 }
 0x241   :  { %v675_v52 = vadd.f32 %v975_v28, %v667_v45 }
 0x246   :  { %v660_v39 = vpop.f32.mrf.mxu1 }
 0x247   :  { %v668_v54 = vadd.f32 %v660_v39, %v1296_v30 }
 0x249   :  { %v676_v15 = vadd.f32 %v975_v28, %v668_v54 }
 0x24e   :  { %v663_v40 = vpop.f32.mrf.mxu1 }
 0x24f   :  { %v669_v44 = vadd.f32 %v663_v40, %v619_v43 }
 0x251   :  { %v677_v46 = vadd.f32 %v975_v28, %v669_v44 }
 0x26b   :  { %v828_v25 = vpop.permute.xlu2 %827 }
 0x273   :  { %v814_v8 = vpop.permute.xlu2 %813 }
 0x274   :  { %v810_v31 = vpop.permute.xlu0 %809  ;;  %v856_v61 = vsel %vm853_vm0, %v676_v15, %v814_v8 }
 0x275   :  { %v854_v33 = vsel %vm853_vm0, %v674_v32, %v810_v31 }
 0x27b   :  { %v826_v34 = vpop.permute.xlu1 %825 }
 0x27c   :  { %v859_v35 = vsel %vm858_vm15, %v854_v33, %v826_v34  ;;  %v842_v36 = vpop.permute.xlu2 %841 }
 0x27d   :  { %v864_v0 = vsel %vm863_vm1, %v859_v35, %v842_v36 }
 0x27e   :  { %v869_v37 = vsel %vm868_vm2, %v864_v0, 1.0 }
 0x27f   :  { %v874_v38 = vsel %vm873_vm3, %v869_v37, 0.0 }
 0x280   :  { %878 = vst [vmem:[%s1354_s13] sm:$0xff] %v874_v38 }
 0x283   :  { %v812_v41 = vpop.permute.xlu1 %811 }
 0x284   :  { %v855_v56 = vsel %vm853_vm0, %v675_v52, %v812_v41 }
 0x285   :  { %v860_v59 = vsel %vm858_vm15, %v855_v56, %v828_v25 }
 0x28b   :  { %v830_v42 = vpop.permute.xlu0 %829 }
 0x28c   :  { %v861_v62 = vsel %vm858_vm15, %v856_v61, %v830_v42 }
 0x28e   :  { %v848_v50 = vpop.permute.xlu2 %847 }
 0x293   :  { %v832_v47 = vpop.permute.xlu1 %831  ;;  %v816_v48 = vpop.permute.xlu0 %815 }
 0x294   :  { %v857_v49 = vsel %vm853_vm0, %v677_v46, %v816_v48 }
 0x295   :  { %v862_v51 = vsel %vm858_vm15, %v857_v49, %v832_v47 }
 0x296   :  { %v867_v53 = vsel %vm863_vm1, %v862_v51, %v848_v50 }
 0x297   :  { %v872_v55 = vsel %vm868_vm2, %v867_v53, 1.0 }
 0x298   :  { %v877_v57 = vsel %vm873_vm3, %v872_v55, 0.0 }
 0x299   :  { %881 = vst [vmem:[%s1354_s13 + $0x18] sm:$0xff] %v877_v57 }
 0x29b   :  { %v844_v58 = vpop.permute.xlu0 %843 }
 0x29c   :  { %v865_v60 = vsel %vm863_vm1, %v860_v59, %v844_v58 }
 0x29d   :  { %v870_v30 = vsel %vm868_vm2, %v865_v60, 1.0 }
 0x29e   :  { %v875_v63 = vsel %vm873_vm3, %v870_v30, 0.0  ;;  %v846_v1 = vpop.permute.xlu1 %845 }
 0x29f   :  { %879 = vst [vmem:[%s1354_s13 + $0x8] sm:$0xff] %v875_v63  ;;  %v866_v2 = vsel %vm863_vm1, %v861_v62, %v846_v1 }
 0x2a0   :  { %v871_v3 = vsel %vm868_vm2, %v866_v2, 1.0 }
 0x2a1   :  { %v876_v4 = vsel %vm873_vm3, %v871_v3, 0.0 }
 0x2a2   :  { %880 = vst [vmem:[%s1354_s13 + $0x10] sm:$0xff] %v876_v4 }

// kernel: run.15
= control target key start
LH: loop header
LB: loop body
LE: loop exit
PB: predicated region body
PF: predicated region fallthrough
CT: control target
= control target key end

     0   :  { %vm116_vm0 = vcmask 1045504   ;;  %v739_v0 = vmov 32   ;;  %vm82_vm1 = vcmask 1044480   ;;  %vm75_vm2 = vcmask 39936   ;;  %s741_s25 = smov 108   ;;  %s742_s26 = smov 114   ;;  %s1038_s0 = inlined_call_operand.vmem [shape: f32[16,128], index: 0, kind: input, shape index: {}]   ;;  %s1039_s7 = inlined_call_operand.vmem [shape: f32[14,8], index: 7, kind: input, shape index: {}]   ;;  %s1040_s8 = inlined_call_operand.vmem [shape: f32[5,8], index: 8, kind: input, shape index: {}]   ;;  %s1041_s1 = inlined_call_operand.vmem [shape: f32[16,5], index: 1, kind: input, shape index: {}]   ;;  %s1042_s6 = inlined_call_operand.vmem [shape: f32[2,8], index: 6, kind: input, shape index: {}]   ;;  %s1043_s2 = inlined_call_operand.vmem [shape: f32[3,16,2], index: 2, kind: input, shape index: {}]   ;;  %s1044_s5 = inlined_call_operand.vmem [shape: f32[6,8], index: 5, kind: input, shape index: {}]   ;;  %s1045_s11 = inlined_call_operand.vmem [shape: f32[8,4], index: 11, kind: input, shape index: {}]   ;;  %s1046_s9 = inlined_call_operand.vmem [shape: f32[8,8], index: 9, kind: input, shape index: {}]   ;;  %s1047_s10 = inlined_call_operand.vmem [shape: f32[1,8], index: 10, kind: input, shape index: {}]   ;;  %s1048_s3 = inlined_call_operand.vmem [shape: f32[16,8], index: 3, kind: input, shape index: {}]   ;;  %s1049_s4 = inlined_call_operand.vmem [shape: f32[3,16,4], index: 4, kind: input, shape index: {}]   ;;  %s1050_s14 = inlined_call_operand.vmem [shape: f32[1,4], index: 14, kind: input, shape index: {}]   ;;  %s1051_s12 = inlined_call_operand.vmem [shape: f32[1,8], index: 12, kind: input, shape index: {}]   ;;  %s1052_s13 = inlined_call_operand.vmem [shape: f32[1,8], index: 13, kind: input, shape index: {}]   ;;  %s1053_s16 = inlined_call_operand.vmem [shape: f32[3,16,4], index: 16, kind: output, shape index: {1}]   ;;  %s1054_s15 = inlined_call_operand.vmem [shape: f32[16,8], index: 15, kind: output, shape index: {0}]  }
   0x1   :  { %1056 = sst [smem:[#allocation2_spill]] %s1038_s0  ;;  %714 = vset.pattern.permute.xlu0 %v739_v0  ;;  %v71_v2 = vld [vmem:[%s1039_s7 + $0x8] sm:$0x3f]  ;;  %v74_v8 = vld [vmem:[%s1040_s8] sm:$0x1f]  ;;  %vm154_vm3 = vcmask 1041408  }
   0x2   :  { %s1057_s23 = sld [smem:[#allocation2_spill]]  ;;  %667 = vmatpush.msk.msra.mxu1 %vm116_vm0, %v71_v2  ;;  %v70_v9 = vld [vmem:[%s1039_s7] sm:$0xff]  ;;  %664 = vmatpush.msk.msra.mxu0 %vm82_vm1, %v74_v8  ;;  %v73_v11 = vld [vmem:[%s1041_s1 + $0x8] sm:$0xff]  ;;  %vm147_vm4 = vcmask 15360   ;;  %vm109_vm5 = vcmask 113664   ;;  %v676_v20 = vld [vmem:[%s1043_s2 + $0x10] sm:$0xff] }
   0x3   :  { %v72_v10 = vld [vmem:[%s1041_s1] sm:$0xff]  ;;  %v145_v15 = vld [vmem:[%s1043_s2 + $0x8] sm:$0xff]  ;;  %v677_v21 = vld [vmem:[%s1043_s2 + $0x18] sm:$0xff]  ;;  %vm185_vm6 = vcmask 48128   ;;  %vm379_vm7 = vcmask 64512   ;;  %vm601_vm12 = vcmask 31744  }
   0x4   :  { %135 = vmatpush.msra.mxu1 %v70_v9  ;;  %665 = vmatmul.msk.f32.vlgmr.msra.gmra.mxu0 %vm75_vm2, %v72_v10  ;;  %v146_v12 = vld [vmem:[%s1042_s6] sm:$0x3]  ;;  %v685_v32 = vld [vmem:[%s1043_s2 + $0x28] sm:$0xff] }
   0x5   :  { %v144_v13 = vld [vmem:[%s1043_s2] sm:$0xff]  ;;  %670 = vmatpush.msk.msra.mxu2 %vm154_vm3, %v146_v12  ;;  %678 = vmatpush.msk.msrb.mxu0 %vm154_vm3, %v146_v12 }
   0x6   :  { %v143_v14 = vld [vmem:[%s1044_s5] sm:$0x3f]  ;;  %671 = vmatmul.msk.f32.vlgmr.msra.gmra.mxu2 %vm147_vm4, %v144_v13  ;;  %s740_s5 = smov 102  }
   0x7   :  { %673 = vmatpush.msk.msra.mxu3 %vm116_vm0, %v143_v14  ;;  %681 = vmatpush.msk.msrb.mxu2 %vm116_vm0, %v143_v14  ;;  %v684_v30 = vld [vmem:[%s1043_s2 + $0x20] sm:$0xff] }
   0x8   :  { %v52_v1 = vld [vmem:[%s1057_s23] sm:$0xff]  ;;  %v53_v4 = vld [vmem:[%s1057_s23 + $0x8] sm:$0xff]  ;;  %689 = vmatpush.msk.msrb.mxu1 %vm116_vm0, %v143_v14 }
   0x9   :  { %v54_v3 = vmax.f32 %v52_v1, 1.0  ;;  %v55_v5 = vmax.f32 %v53_v4, 1.0  ;;  %686 = vmatpush.msk.msrb.mxu3 %vm154_vm3, %v146_v12  ;;  %v488_v33 = vld [vmem:[%s1045_s11] sm:$0xff] }
   0xa   :  { %510 = vmatpush.msra.mxu2 %v488_v33  ;;  %v378_v43 = vld [vmem:[%s1046_s9] sm:$0xff] }
   0xb   :  { %719 = vrcp.f32 %v54_v3  ;;  %401 = vmatpush.msra.mxu0 %v378_v43 }
   0xc   :  { %721 = vrcp.f32 %v55_v5  ;;  %666 = vmatmul.msk.f32.gmra.mxu0 %vm75_vm2, %v73_v11 }
   0xe   :  { %672 = vmatmul.msk.f32.gmra.mxu2 %vm147_vm4, %v145_v15 }
  0x11   :  { %v720_v6 = vpop.eup %719 }
  0x12   :  { %60 = vperm.xlu0 %714, %v720_v6   ;;  %v722_v7 = vpop.eup %721 }
  0x14   :  { %679 = vmatmul.msk.f32.vlgmr.msrb.gmra.mxu0 %vm147_vm4, %v676_v20 }
  0x1a   :  { %65 = vperm.xlu0 %714, %v722_v7  }
  0x1c   :  { %680 = vmatmul.msk.f32.gmra.mxu0 %vm147_vm4, %v677_v21 }
  0x81   :  { %v103_v27 = vpop.f32.mrf.mxu0 }
  0x84   :  { %v61_v16 = vpop.permute.xlu0 %60 }
  0x85   :  { %v68_v17 = vmul.f32 %v61_v16, %v52_v1 }
  0x87   :  { %311 = vrot.lane.b32.xlu0 %v68_v17, %s740_s5  ;;  %248 = vrot.lane.b32.xlu2 %v68_v17, %s741_s25 }
  0x88   :  { %181 = vrot.lane.b32.xlu1 %v68_v17, %s742_s26  ;;  %668 = vmatmul.msk.f32.vlgmr.msra.gmra.mxu1 %vm109_vm5, %v68_v17 }
  0x89   :  { %578 = vmatpush.msra.mxu1 %v488_v33  ;;  %v175_v34 = vpop.f32.mrf.mxu2  ;;  %v896_v35 = vpop.f32.mrf.mxu0 }
  0x8c   :  { %v66_v18 = vpop.permute.xlu0 %65 }
  0x8d   :  { %v69_v19 = vmul.f32 %v66_v18, %v53_v4 }
  0x8f   :  { %250 = vrot.lane.b32.xlu2 %v69_v19, %s741_s25 }
  0x90   :  { %183 = vrot.lane.b32.xlu1 %v69_v19, %s742_s26  ;;  %669 = vmatmul.msk.f32.gmra.mxu1 %vm109_vm5, %v69_v19 }
  0x91   :  { %v178_v36 = vpop.f32.mrf.mxu2  ;;  %v242_v37 = vpop.f32.mrf.mxu0 }
  0x98   :  { %313 = vrot.lane.b32.xlu1 %v69_v19, %s740_s5 }
  0x99   :  { %v245_v40 = vpop.f32.mrf.mxu0 }
  0xe1   :  { %v249_v22 = vpop.permute.xlu2 %248 }
  0xe2   :  { %682 = vmatmul.msk.f32.vlgmr.msrb.gmra.mxu2 %vm185_vm6, %v249_v22 }
  0xe9   :  { %v251_v23 = vpop.permute.xlu2 %250 }
  0xea   :  { %683 = vmatmul.msk.f32.gmra.mxu2 %vm185_vm6, %v251_v23 }
  0xf9   :  { %v312_v24 = vpop.permute.xlu0 %311 }
  0xfa   :  { %v182_v25 = vpop.permute.xlu1 %181  ;;  %690 = vmatmul.msk.f32.vlgmr.msrb.gmra.mxu1 %vm185_vm6, %v312_v24 }
  0xfb   :  { %674 = vmatmul.msk.f32.vlgmr.msra.gmra.mxu3 %vm185_vm6, %v182_v25 }
  0xfc   :  { %544 = vmatpush.msra.mxu3 %v488_v33 }
 0x102   :  { %v184_v26 = vpop.permute.xlu1 %183 }
 0x103   :  { %675 = vmatmul.msk.f32.gmra.mxu3 %vm185_vm6, %v184_v26  ;;  %v715_v26 = vld [vmem:[%s1047_s10] ss:$0 sm:$0xff] }
 0x105   :  { %v137_v28 = vpop.f32.mrf.mxu1 }
 0x106   :  { %v882_v29 = vadd.f32 %v137_v28, %v103_v27 }
 0x10a   :  { %v314_v31 = vpop.permute.xlu1 %313 }
 0x10b   :  { %687 = vmatmul.msk.f32.vlgmr.msrb.gmra.mxu3 %vm147_vm4, %v684_v30  ;;  %691 = vmatmul.msk.f32.gmra.mxu1 %vm185_vm6, %v314_v31  ;;  %v487_v30 = vld [vmem:[%s1049_s4 + $0x8] sm:$0xff] }
 0x10d   :  { %v904_v46 = vpop.f32.mrf.mxu1 }
 0x113   :  { %688 = vmatmul.msk.f32.gmra.mxu3 %vm147_vm4, %v685_v32  ;;  %v417_v32 = vld [vmem:[%s1048_s3] sm:$0xff] }
 0x165   :  { %v273_v38 = vpop.f32.mrf.mxu2 }
 0x166   :  { %v274_v39 = vadd.f32 %v273_v38, %v242_v37  ;;  %v701_v37 = vld [vmem:[%s1049_s4 + $0x28] sm:$0xff] }
 0x168   :  { %698 = vmatmul.msk.f32.vlgmr.msra.gmra.mxu3 %vm379_vm7, %v274_v39  ;;  %v344_v52 = vmul.f32 %v274_v39, %v274_v39 }
 0x16d   :  { %v276_v41 = vpop.f32.mrf.mxu2 }
 0x16e   :  { %v277_v42 = vadd.f32 %v276_v41, %v245_v40  ;;  %v141_v40 = vadd.f32 %v904_v46, %v896_v35 }
 0x170   :  { %699 = vmatmul.msk.f32.gmra.mxu3 %vm379_vm7, %v277_v42  ;;  %v345_v61 = vmul.f32 %v277_v42, %v277_v42 }
 0x177   :  { %v336_v50 = vpop.f32.mrf.mxu1 }
 0x17e   :  { %v210_v44 = vpop.f32.mrf.mxu3 }
 0x17f   :  { %v211_v45 = vadd.f32 %v210_v44, %v175_v34  ;;  %v697_v34 = vld [vmem:[%s1049_s4 + $0x18] sm:$0xff] }
 0x181   :  { %694 = vmatmul.msk.f32.vlgmr.msra.gmra.mxu2 %vm379_vm7, %v211_v45  ;;  %v342_v49 = vmul.f32 %v211_v45, %v211_v45 }
 0x183   :  { %v346_v54 = vadd.f32 %v344_v52, %v342_v49 }
 0x186   :  { %v213_v47 = vpop.f32.mrf.mxu3 }
 0x187   :  { %v214_v48 = vadd.f32 %v213_v47, %v178_v36 }
 0x188   :  { %v339_v59 = vpop.f32.mrf.mxu1 }
 0x189   :  { %695 = vmatmul.msk.f32.gmra.mxu2 %vm379_vm7, %v214_v48  ;;  %v343_v57 = vmul.f32 %v214_v48, %v214_v48  ;;  %v418_v48 = vld [vmem:[%s1048_s3 + $0x8] sm:$0xff] }
 0x18b   :  { %v347_v63 = vadd.f32 %v345_v61, %v343_v57 }
 0x18e   :  { %v305_v51 = vpop.f32.mrf.mxu3 }
 0x18f   :  { %v337_v53 = vadd.f32 %v336_v50, %v305_v51 }
 0x191   :  { %v348_v55 = vmul.f32 %v337_v53, %v337_v53  ;;  %702 = vmatmul.msk.f32.vlgmr.msra.gmra.mxu1 %vm379_vm7, %v337_v53 }
 0x193   :  { %v350_v56 = vadd.f32 %v348_v55, %v346_v54 }
 0x195   :  { %v352_v58 = vmax.f32 %v350_v56, 1e-08  ;;  %v743_v56 = vmov 8.0  }
 0x196   :  { %v308_v60 = vpop.f32.mrf.mxu3 }
 0x197   :  { %723 = vrsqrt.f32 %v352_v58  ;;  %v340_v62 = vadd.f32 %v339_v59, %v308_v60  ;;  %vm361_vm8 = vcmp.eq.f32.partialorder %v352_v58, inf  ;;  %v364_v13 = vand.u32 2147483648, %v352_v58 }
 0x198   :  { %vm363_vm9 = vcmp.eq.f32.partialorder %v352_v58, 0.0  ;;  %v744_v60 = vmov 4.0  }
 0x199   :  { %v349_v0 = vmul.f32 %v340_v62, %v340_v62  ;;  %703 = vmatmul.msk.f32.gmra.mxu1 %vm379_vm7, %v340_v62 }
 0x19b   :  { %v351_v1 = vadd.f32 %v349_v0, %v347_v63 }
 0x19d   :  { %v724_v2 = vpop.eup %723  ;;  %v353_v3 = vmax.f32 %v351_v1, 1e-08 }
 0x19e   :  { %v355_v4 = vmul.f32 %v724_v2, %v352_v58 }
 0x19f   :  { %725 = vrsqrt.f32 %v353_v3  ;;  %vm373_vm10 = vcmp.eq.f32.partialorder %v353_v3, inf  ;;  %v376_v20 = vand.u32 2147483648, %v353_v3  ;;  %vm375_vm11 = vcmp.eq.f32.partialorder %v353_v3, 0.0 }
 0x1a0   :  { %v356_v5 = vmul.f32 %v724_v2, %v355_v4  ;;  %727 = vrcp.f32 %v743_v56  ;;  %v486_v4 = vld [vmem:[%s1049_s4] sm:$0xff] }
 0x1a1   :  { %729 = vrcp.f32 %v744_v60 }
 0x1a2   :  { %v357_v6 = vmul.f32 0.5, %v356_v5 }
 0x1a4   :  { %v358_v7 = vsub.f32 1.5, %v357_v6 }
 0x1a5   :  { %v726_v8 = vpop.eup %725 }
 0x1a6   :  { %v359_v9 = vmul.f32 %v724_v2, %v358_v7  ;;  %v367_v10 = vmul.f32 %v726_v8, %v353_v3  ;;  %v728_v57 = vpop.eup %727  ;;  %v696_v7 = vld [vmem:[%s1049_s4 + $0x10] sm:$0xff] }
 0x1a7   :  { %v730_v63 = vpop.eup %729  ;;  %vm434_vm13 = vweird.f32 %v728_v57 }
 0x1a8   :  { %v360_v11 = vmul.f32 %v359_v9, %v352_v58  ;;  %v368_v12 = vmul.f32 %v726_v8, %v367_v10  ;;  %v609_v1 = vmul.f32 4.0, %v730_v63  ;;  %vm613_vm14 = vweird.f32 %v730_v63 }
 0x1aa   :  { %v362_v14 = vsel %vm361_vm8, %v352_v58, %v360_v11  ;;  %v369_v15 = vmul.f32 0.5, %v368_v12  ;;  %v430_v58 = vmul.f32 8.0, %v728_v57  ;;  %v610_v5 = vsub.f32 1.0, %v609_v1 }
 0x1ab   :  { %v365_v16 = vsel %vm363_vm9, %v364_v13, %v362_v14 }
 0x1ac   :  { %692 = vmatmul.msk.f32.vlgmr.msra.gmra.mxu0 %vm379_vm7, %v365_v16  ;;  %v370_v17 = vsub.f32 1.5, %v369_v15  ;;  %v431_v59 = vsub.f32 1.0, %v430_v58  ;;  %v611_v11 = vmul.f32 %v730_v63, %v610_v5 }
 0x1ae   :  { %v371_v18 = vmul.f32 %v726_v8, %v370_v17  ;;  %v432_v61 = vmul.f32 %v728_v57, %v431_v59  ;;  %v700_v8 = vld [vmem:[%s1049_s4 + $0x20] sm:$0xff] }
 0x1af   :  { %v717_v59 = vld [vmem:[%s1051_s12] ss:$0 sm:$0xff] }
 0x1b0   :  { %v372_v19 = vmul.f32 %v371_v18, %v353_v3  ;;  %v433_v62 = vadd.f32 %v728_v57, %v432_v61  ;;  %v612_v18 = vadd.f32 %v730_v63, %v611_v11 }
 0x1b2   :  { %v374_v21 = vsel %vm373_vm10, %v353_v3, %v372_v19  ;;  %v435_v0 = vsel %vm434_vm13, %v728_v57, %v433_v62  ;;  %v718_v62 = vld [vmem:[%s1052_s13] ss:$0 sm:$0xff] }
 0x1b3   :  { %v377_v22 = vsel %vm375_vm11, %v376_v20, %v374_v21 }
 0x1b4   :  { %693 = vmatmul.msk.f32.gmra.mxu0 %vm379_vm7, %v377_v22 }
 0x1eb   :  { %v911_v24 = vpop.f32.mrf.mxu3 }
 0x1ec   :  { %v967_v12 = vadd.f32 %v696_v7, %v911_v24  ;;  %v614_v24 = vsel %vm613_vm14, %v730_v63, %v612_v18 }
 0x1ee   :  { %v591_v19 = vmul.f32 %v967_v12, %v967_v12 }
 0x1f3   :  { %v549_v36 = vpop.f32.mrf.mxu3 }
 0x1f4   :  { %v935_v41 = vadd.f32 %v697_v34, %v549_v36 }
 0x1f6   :  { %v592_v49 = vmul.f32 %v935_v41, %v935_v41 }
 0x204   :  { %v512_v23 = vpop.f32.mrf.mxu2 }
 0x205   :  { %v962_v9 = vadd.f32 %v512_v23, %v486_v4 }
 0x207   :  { %v589_v16 = vmul.f32 %v962_v9, %v962_v9 }
 0x209   :  { %v593_v22 = vadd.f32 %v591_v19, %v589_v16 }
 0x20c   :  { %v515_v31 = vpop.f32.mrf.mxu2 }
 0x20d   :  { %v931_v38 = vadd.f32 %v515_v31, %v487_v30 }
 0x20e   :  { %v913_v25 = vpop.f32.mrf.mxu1 }
 0x20f   :  { %v590_v45 = vmul.f32 %v931_v38, %v931_v38  ;;  %v970_v13 = vadd.f32 %v700_v8, %v913_v25 }
 0x211   :  { %v594_v50 = vadd.f32 %v592_v49, %v590_v45  ;;  %v595_v20 = vmul.f32 %v970_v13, %v970_v13 }
 0x229   :  { %v403_v27 = vpop.f32.mrf.mxu0 }
 0x22a   :  { %v409_v28 = vadd.f32 %v403_v27, %v882_v29  ;;  %v583_v29 = vpop.f32.mrf.mxu1 }
 0x22b   :  { %v937_v42 = vadd.f32 %v701_v37, %v583_v29  ;;  %v988_v29 = vld [vmem:[%s1050_s14] ss:$0 sm:$0xff] }
 0x22c   :  { %v415_v33 = vadd.f32 %v715_v26, %v409_v28 }
 0x22d   :  { %v596_v35 = vmul.f32 %v937_v42, %v937_v42 }
 0x22e   :  { %v419_v39 = vadd.f32 %v417_v32, %v415_v33 }
 0x22f   :  { %v598_v53 = vadd.f32 %v596_v35, %v594_v50 }
 0x230   :  { %v423_v43 = vsel %vm379_vm7, %v419_v39, 0.0 }
 0x231   :  { %424 = vadd.xlane.f32.xlu2 %v423_v43  ;;  %v406_v44 = vpop.f32.mrf.mxu0  ;;  %v600_v54 = vmax.f32 %v598_v53, 1e-08 }
 0x232   :  { %v410_v47 = vadd.f32 %v406_v44, %v141_v40 }
 0x233   :  { %v605_v55 = vsel %vm601_vm12, %v600_v54, 0.0 }
 0x234   :  { %v416_v46 = vadd.f32 %v715_v26, %v410_v47  ;;  %v597_v26 = vadd.f32 %v595_v20, %v593_v22 }
 0x236   :  { %v420_v51 = vadd.f32 %v418_v48, %v416_v46  ;;  %v599_v30 = vmax.f32 %v597_v26, 1e-08 }
 0x238   :  { %v426_v52 = vsel %vm379_vm7, %v420_v51, 0.0  ;;  %v602_v31 = vsel %vm601_vm12, %v599_v30, 0.0 }
 0x239   :  { %427 = vadd.xlane.f32.xlu0 %v426_v52 }
 0x241   :  { %606 = vadd.xlane.f32.xlu0 %v605_v55 }
 0x2a4   :  { %v425_v2 = vpop.xlane.xlu2 %424 }
 0x2a5   :  { %v436_v3 = vmul.f32 %v435_v0, %v425_v2 }
 0x2a7   :  { %v954_v6 = vsub.f32 %v419_v39, %v436_v3 }
 0x2a9   :  { %v440_v10 = vmul.f32 %v954_v6, %v954_v6 }
 0x2ab   :  { %v442_v14 = vsel %vm379_vm7, %v440_v10, 0.0 }
 0x2ac   :  { %443 = vadd.xlane.f32.xlu1 %v442_v14  ;;  %v428_v15 = vpop.xlane.xlu0 %427 }
 0x2ad   :  { %v437_v17 = vmul.f32 %v435_v0, %v428_v15 }
 0x2af   :  { %v979_v21 = vsub.f32 %v420_v51, %v437_v17 }
 0x2b1   :  { %v441_v23 = vmul.f32 %v979_v21, %v979_v21 }
 0x2b3   :  { %v445_v25 = vsel %vm379_vm7, %v441_v23, 0.0 }
 0x2b4   :  { %446 = vadd.xlane.f32.xlu2 %v445_v25  ;;  %v607_v27 = vpop.xlane.xlu0 %606 }
 0x2b5   :  { %v616_v28 = vmul.f32 %v614_v24, %v607_v27 }
 0x2b7   :  { %731 = vrsqrt.f32 %v616_v28  ;;  %vm633_vm0 = vweird.f32 %v616_v28 }
 0x2bc   :  { %603 = vadd.xlane.f32.xlu2 %v602_v31 }
 0x2bd   :  { %v732_v32 = vpop.eup %731 }
 0x2be   :  { %v628_v33 = vmul.f32 %v732_v32, %v616_v28  ;;  %vm634_vm15 = vweird.f32 %v732_v32 }
 0x2bf   :  { %vm635_vm1 = vmor %vm633_vm0, %vm634_vm15 }
 0x2c0   :  { %v629_v34 = vmul.f32 %v732_v32, %v628_v33 }
 0x2c2   :  { %v630_v36 = vmul.f32 0.5, %v629_v34 }
 0x2c4   :  { %v631_v37 = vsub.f32 1.5, %v630_v36 }
 0x2c6   :  { %v632_v39 = vmul.f32 %v732_v32, %v631_v37 }
 0x2c8   :  { %v636_v40 = vsel %vm635_vm1, %v732_v32, %v632_v39 }
 0x2c9   :  { %v641_v43 = vmul.f32 %v988_v29, %v636_v40 }
 0x2cb   :  { %v643_v44 = vmul.f32 %v641_v43, %v931_v38  ;;  %v645_v45 = vmul.f32 %v641_v43, %v935_v41  ;;  %v647_v47 = vmul.f32 %v641_v43, %v937_v42 }
 0x2cd   :  { %649 = vst.msk [vmem:[%s1053_s16 + $0x8] sm:$0xff] %vm601_vm12, %v643_v44 }
 0x2ce   :  { %705 = vst.msk [vmem:[%s1053_s16 + $0x18] sm:$0xff] %vm601_vm12, %v645_v45 }
 0x2cf   :  { %707 = vst.msk [vmem:[%s1053_s16 + $0x28] sm:$0xff] %vm601_vm12, %v647_v47 }
 0x31f   :  { %v444_v38 = vpop.xlane.xlu1 %443 }
 0x320   :  { %v448_v48 = vmul.f32 %v444_v38, %v435_v0 }
 0x322   :  { %v450_v41 = vadd.f32 1e-05, %v448_v48 }
 0x324   :  { %733 = vrsqrt.f32 %v450_v41  ;;  %vm458_vm3 = vweird.f32 %v450_v41 }
 0x327   :  { %v447_v42 = vpop.xlane.xlu2 %446 }
 0x328   :  { %v449_v49 = vmul.f32 %v447_v42, %v435_v0 }
 0x32a   :  { %v734_v35 = vpop.eup %733  ;;  %v451_v46 = vadd.f32 1e-05, %v449_v49 }
 0x32b   :  { %v453_v50 = vmul.f32 %v734_v35, %v450_v41  ;;  %vm459_vm2 = vweird.f32 %v734_v35 }
 0x32c   :  { %735 = vrsqrt.f32 %v451_v46  ;;  %vm460_vm4 = vmor %vm458_vm3, %vm459_vm2  ;;  %vm468_vm6 = vweird.f32 %v451_v46 }
 0x32d   :  { %v454_v51 = vmul.f32 %v734_v35, %v453_v50 }
 0x32f   :  { %v455_v52 = vmul.f32 0.5, %v454_v51  ;;  %v604_v53 = vpop.xlane.xlu2 %603 }
 0x330   :  { %v615_v54 = vmul.f32 %v614_v24, %v604_v53 }
 0x331   :  { %v456_v55 = vsub.f32 1.5, %v455_v52 }
 0x332   :  { %v736_v56 = vpop.eup %735  ;;  %737 = vrsqrt.f32 %v615_v54  ;;  %vm623_vm10 = vweird.f32 %v615_v54 }
 0x333   :  { %v457_v57 = vmul.f32 %v734_v35, %v456_v55  ;;  %v463_v58 = vmul.f32 %v736_v56, %v451_v46  ;;  %vm469_vm5 = vweird.f32 %v736_v56 }
 0x334   :  { %vm470_vm8 = vmor %vm468_vm6, %vm469_vm5 }
 0x335   :  { %v461_v60 = vsel %vm460_vm4, %v734_v35, %v457_v57  ;;  %v464_v61 = vmul.f32 %v736_v56, %v463_v58 }
 0x336   :  { %v472_v63 = vmul.f32 %v461_v60, %v954_v6 }
 0x337   :  { %v465_v0 = vmul.f32 0.5, %v464_v61 }
 0x338   :  { %v738_v1 = vpop.eup %737  ;;  %v477_v2 = vmul.f32 %v717_v59, %v472_v63 }
 0x339   :  { %v466_v3 = vsub.f32 1.5, %v465_v0  ;;  %v618_v4 = vmul.f32 %v738_v1, %v615_v54  ;;  %vm624_vm9 = vweird.f32 %v738_v1 }
 0x33a   :  { %v482_v5 = vadd.f32 %v718_v62, %v477_v2  ;;  %vm625_vm11 = vmor %vm623_vm10, %vm624_vm9 }
 0x33b   :  { %v467_v7 = vmul.f32 %v736_v56, %v466_v3  ;;  %v619_v8 = vmul.f32 %v738_v1, %v618_v4 }
 0x33c   :  { %484 = vst.msk [vmem:[%s1054_s15] sm:$0xff] %vm379_vm7, %v482_v5 }
 0x33d   :  { %v471_v10 = vsel %vm470_vm8, %v736_v56, %v467_v7  ;;  %v620_v11 = vmul.f32 0.5, %v619_v8 }
 0x33e   :  { %v473_v6 = vmul.f32 %v471_v10, %v979_v21 }
 0x33f   :  { %v621_v14 = vsub.f32 1.5, %v620_v11 }
 0x340   :  { %v478_v15 = vmul.f32 %v717_v59, %v473_v6 }
 0x341   :  { %v622_v16 = vmul.f32 %v738_v1, %v621_v14 }
 0x342   :  { %v483_v17 = vadd.f32 %v718_v62, %v478_v15 }
 0x343   :  { %v626_v18 = vsel %vm625_vm11, %v738_v1, %v622_v16 }
 0x344   :  { %485 = vst.msk [vmem:[%s1054_s15 + $0x8] sm:$0xff] %vm379_vm7, %v483_v17  ;;  %v640_v19 = vmul.f32 %v988_v29, %v626_v18 }
 0x346   :  { %v642_v20 = vmul.f32 %v640_v19, %v962_v9  ;;  %v644_v22 = vmul.f32 %v640_v19, %v967_v12  ;;  %v646_v21 = vmul.f32 %v640_v19, %v970_v13 }
 0x348   :  { %648 = vst.msk [vmem:[%s1053_s16] sm:$0xff] %vm601_vm12, %v642_v20 }
 0x349   :  { %704 = vst.msk [vmem:[%s1053_s16 + $0x10] sm:$0xff] %vm601_vm12, %v644_v22 }
 0x34a   :  { %706 = vst.msk [vmem:[%s1053_s16 + $0x20] sm:$0xff] %vm601_vm12, %v646_v21 }

// kernel: run.16
= control target key start
LH: loop header
LB: loop body
LE: loop exit
PB: predicated region body
PF: predicated region fallthrough
CT: control target
= control target key end

     0   :  { %s1237_s19 = smov 10   ;;  %s1239_s26 = smov 8   ;;  %vm425_vm0 = vcmask 1043456   ;;  %vm226_vm1 = vcmask 31744   ;;  %vm142_vm2 = vcmask 64512   ;;  %vm235_vm3 = vcmask 80896   ;;  %s2018_s8 = inlined_call_operand.vmem [shape: f32[3,32,2], index: 8, kind: input, shape index: {}]   ;;  %s2019_s6 = inlined_call_operand.vmem [shape: f32[3,32,4], index: 6, kind: input, shape index: {}]   ;;  %s2020_s7 = inlined_call_operand.vmem [shape: f32[3,32,2], index: 7, kind: input, shape index: {}]   ;;  %s2021_s9 = inlined_call_operand.vmem [shape: f32[12,12], index: 9, kind: input, shape index: {}]   ;;  %s2022_s5 = inlined_call_operand.vmem [shape: f32[3,32,4], index: 5, kind: input, shape index: {}]   ;;  %s2023_s1 = inlined_call_operand.vmem [shape: f32[32,8], index: 1, kind: input, shape index: {}]   ;;  %s2024_s2 = inlined_call_operand.vmem [shape: f32[32,6], index: 2, kind: input, shape index: {}]   ;;  %s2025_s4 = inlined_call_operand.vmem [shape: f32[32,5], index: 4, kind: input, shape index: {}]   ;;  %s2026_s3 = inlined_call_operand.vmem [shape: f32[32,128], index: 3, kind: input, shape index: {}]   ;;  %s2027_s13 = inlined_call_operand.vmem [shape: f32[12,2], index: 13, kind: input, shape index: {}]   ;;  %s2028_s11 = inlined_call_operand.vmem [shape: f32[12,6], index: 11, kind: input, shape index: {}]   ;;  %s2029_s10 = inlined_call_operand.vmem [shape: f32[33,6], index: 10, kind: input, shape index: {}]   ;;  %s2030_s0 = inlined_call_operand.vmem [shape: f32[32,8], index: 0, kind: input, shape index: {}]   ;;  %s2031_s12 = inlined_call_operand.vmem [shape: f32[1,6], index: 12, kind: input, shape index: {}]   ;;  %s2032_s16 = inlined_call_operand.vmem [shape: f32[1,2], index: 16, kind: input, shape index: {}]   ;;  %s2033_s14 = inlined_call_operand.vmem [shape: f32[1,6], index: 14, kind: input, shape index: {}]   ;;  %s2034_s15 = inlined_call_operand.vmem [shape: f32[1,6], index: 15, kind: input, shape index: {}]   ;;  %s2035_s18 = inlined_call_operand.vmem [shape: f32[3,32,2], index: 18, kind: output, shape index: {1}]   ;;  %s2036_s17 = inlined_call_operand.vmem [shape: f32[32,6], index: 17, kind: output, shape index: {0}]  }
   0x1   :  { %2040 = sst [smem:[#allocation2_spill]] %s2018_s8  ;;  %v401_v33 = vld [vmem:[%s2021_s9 + $0x8] sm:$0xf]  ;;  %v400_v37 = vld [vmem:[%s2021_s9] sm:$0xff]  ;;  %vm412_vm4 = vcmask 97280   ;;  %s1240_s27 = smov 16  }
   0x2   :  { %2041 = sst [smem:[#allocation3_spill]] %s2019_s6  ;;  %s1238_s6 = smov 4   ;;  %1151 = vmatpush.msk.msra.mxu2 %vm425_vm0, %v401_v33  ;;  %1141 = vmatpush.msk.msra.mxu0 %vm425_vm0, %v401_v33  ;;  %v1125_v43 = vld [vmem:[%s2022_s5 + $0x40] sm:$0xff]  ;;  %v1126_v61 = vld [vmem:[%s2022_s5 + $0x48] sm:$0xff]  ;;  %vm669_vm5 = vcmask 1040384   ;;  %vm147_vm6 = vcmask 130048  }
   0x3   :  { %2042 = sst [smem:[#allocation4_spill]] %s2020_s7  ;;  %1146 = vmatpush.msk.msra.mxu1 %vm425_vm0, %v401_v33  ;;  %v162_v49 = vld [vmem:[%s2022_s5] sm:$0xff]  ;;  %v67_v33 = vld [vmem:[%s2023_s1 + $0x8] sm:$0xff]  ;;  %s1242_s28 = smov 22   ;;  %vm152_vm7 = vcmask 179200   ;;  %vm157_vm8 = vcmask 228352  }
   0x4   :  { %2043 = sst [smem:[#allocation5_spill]] %s2031_s12  ;;  %526 = vmatpush.msra.mxu2 %v400_v37  ;;  %444 = vmatpush.msra.mxu0 %v400_v37  ;;  %v1109_v51 = vld [vmem:[%s2022_s5 + $0x20] sm:$0xff]  ;;  %vm656_vm9 = vcmask 269312  }
   0x5   :  { %s2044_s29 = sld [smem:[#allocation2_spill]]  ;;  %485 = vmatpush.msra.mxu1 %v400_v37  ;;  %v66_v62 = vld [vmem:[%s2023_s1] sm:$0xff] }
   0x6   :  { %s2045_s12 = sld [smem:[#allocation3_spill]] }
   0x7   :  { %s2046_s23 = sld [smem:[#allocation4_spill]] }
   0xb   :  { %v1137_v0 = vld [vmem:[%s2044_s29 + $0x40] sm:$0xff]  ;;  %v1138_v11 = vld [vmem:[%s2044_s29 + $0x48] sm:$0xff]  ;;  %v1139_v20 = vld [vmem:[%s2044_s29 + $0x50] sm:$0xff] }
   0xc   :  { %v1129_v1 = vld [vmem:[%s2045_s12 + $0x40] sm:$0xff]  ;;  %376 = vrot.lane.b32.xlu1 %v1137_v0, %s1237_s19  ;;  %v1130_v9 = vld [vmem:[%s2045_s12 + $0x48] sm:$0xff]  ;;  %v1131_v18 = vld [vmem:[%s2045_s12 + $0x50] sm:$0xff] }
   0xd   :  { %344 = vrot.lane.b32.xlu0 %v1129_v1, %s1238_s6  ;;  %v1113_v2 = vld [vmem:[%s2045_s12 + $0x20] sm:$0xff]  ;;  %v1391_v10 = vld [vmem:[%s2046_s23 + $0x48] sm:$0xff]  ;;  %v1436_v19 = vld [vmem:[%s2046_s23 + $0x50] sm:$0xff] }
   0xe   :  { %264 = vrot.lane.b32.xlu2 %v1113_v2, %s1238_s6  ;;  %v1355_v3 = vld [vmem:[%s2046_s23 + $0x40] sm:$0xff]  ;;  %v167_v12 = vld [vmem:[%s2045_s12 + $0x8] sm:$0xff]  ;;  %v168_v21 = vld [vmem:[%s2045_s12 + $0x10] sm:$0xff] }
   0xf   :  { %v166_v4 = vld [vmem:[%s2045_s12] sm:$0xff]  ;;  %v1114_v13 = vld [vmem:[%s2045_s12 + $0x28] sm:$0xff]  ;;  %v1115_v22 = vld [vmem:[%s2045_s12 + $0x30] sm:$0xff] }
  0x10   :  { %v1366_v5 = vld [vmem:[%s2046_s23] sm:$0xff]  ;;  %v1411_v14 = vld [vmem:[%s2046_s23 + $0x8] sm:$0xff]  ;;  %v1456_v23 = vld [vmem:[%s2046_s23 + $0x10] sm:$0xff] }
  0x11   :  { %v1373_v6 = vld [vmem:[%s2046_s23 + $0x20] sm:$0xff]  ;;  %v1418_v15 = vld [vmem:[%s2046_s23 + $0x28] sm:$0xff]  ;;  %v1463_v24 = vld [vmem:[%s2046_s23 + $0x30] sm:$0xff] }
  0x12   :  { %v174_v7 = vld [vmem:[%s2044_s29] sm:$0xff]  ;;  %v175_v16 = vld [vmem:[%s2044_s29 + $0x8] sm:$0xff]  ;;  %v176_v25 = vld [vmem:[%s2044_s29 + $0x10] sm:$0xff] }
  0x13   :  { %v1121_v8 = vld [vmem:[%s2044_s29 + $0x20] sm:$0xff]  ;;  %v1122_v17 = vld [vmem:[%s2044_s29 + $0x28] sm:$0xff]  ;;  %v1123_v26 = vld [vmem:[%s2044_s29 + $0x30] sm:$0xff] }
  0x14   :  { %182 = vrot.lane.b32.xlu1 %v166_v4, %s1238_s6  ;;  %v1132_v27 = vld [vmem:[%s2045_s12 + $0x58] sm:$0xff]  ;;  %v1562_v4 = vld [vmem:[%s2024_s2] sm:$0xff] }
  0x15   :  { %360 = vrot.lane.b32.xlu0 %v1355_v3, %s1239_s26  ;;  %v1481_v28 = vld [vmem:[%s2046_s23 + $0x58] sm:$0xff] }
  0x16   :  { %198 = vrot.lane.b32.xlu2 %v1366_v5, %s1239_s26  ;;  %v1140_v29 = vld [vmem:[%s2044_s29 + $0x58] sm:$0xff] }
  0x17   :  { %v169_v30 = vld [vmem:[%s2045_s12 + $0x18] sm:$0xff] }
  0x18   :  { %v1116_v31 = vld [vmem:[%s2045_s12 + $0x38] sm:$0xff] }
  0x19   :  { %v1501_v32 = vld [vmem:[%s2046_s23 + $0x18] sm:$0xff] }
  0x1a   :  { %v1513_v34 = vld [vmem:[%s2046_s23 + $0x38] sm:$0xff]  ;;  %s1241_s23 = smov 28  }
  0x1b   :  { %v177_v35 = vld [vmem:[%s2044_s29 + $0x18] sm:$0xff] }
  0x1c   :  { %214 = vrot.lane.b32.xlu1 %v174_v7, %s1237_s19  ;;  %v1124_v36 = vld [vmem:[%s2044_s29 + $0x38] sm:$0xff] }
  0x1d   :  { %280 = vrot.lane.b32.xlu0 %v1373_v6, %s1239_s26 }
  0x1e   :  { %296 = vrot.lane.b32.xlu2 %v1121_v8, %s1237_s19 }
  0x24   :  { %362 = vrot.lane.b32.xlu1 %v1391_v10, %s1239_s26 }
  0x25   :  { %346 = vrot.lane.b32.xlu0 %v1130_v9, %s1238_s6  ;;  %v74_v9 = vld [vmem:[%s2025_s4] sm:$0xff] }
  0x26   :  { %378 = vrot.lane.b32.xlu2 %v1138_v11, %s1237_s19 }
  0x2c   :  { %266 = vrot.lane.b32.xlu1 %v1114_v13, %s1238_s6  ;;  %v163_v13 = vld [vmem:[%s2022_s5 + $0x8] sm:$0xff] }
  0x2d   :  { %184 = vrot.lane.b32.xlu0 %v167_v12, %s1238_s6 }
  0x2e   :  { %200 = vrot.lane.b32.xlu2 %v1411_v14, %s1239_s26 }
  0x34   :  { %216 = vrot.lane.b32.xlu1 %v175_v16, %s1237_s19 }
  0x35   :  { %282 = vrot.lane.b32.xlu0 %v1418_v15, %s1239_s26 }
  0x36   :  { %298 = vrot.lane.b32.xlu2 %v1122_v17, %s1237_s19  ;;  %v1110_v17 = vld [vmem:[%s2022_s5 + $0x28] sm:$0xff] }
  0x3c   :  { %364 = vrot.lane.b32.xlu1 %v1436_v19, %s1239_s26 }
  0x3d   :  { %348 = vrot.lane.b32.xlu0 %v1131_v18, %s1238_s6 }
  0x3e   :  { %380 = vrot.lane.b32.xlu2 %v1139_v20, %s1237_s19 }
  0x44   :  { %268 = vrot.lane.b32.xlu1 %v1115_v22, %s1238_s6 }
  0x45   :  { %186 = vrot.lane.b32.xlu0 %v168_v21, %s1238_s6 }
  0x46   :  { %202 = vrot.lane.b32.xlu2 %v1456_v23, %s1239_s26 }
  0x4c   :  { %218 = vrot.lane.b32.xlu1 %v176_v25, %s1237_s19 }
  0x4d   :  { %284 = vrot.lane.b32.xlu0 %v1463_v24, %s1239_s26 }
  0x4e   :  { %300 = vrot.lane.b32.xlu2 %v1123_v26, %s1237_s19 }
  0x54   :  { %366 = vrot.lane.b32.xlu1 %v1481_v28, %s1239_s26 }
  0x55   :  { %350 = vrot.lane.b32.xlu0 %v1132_v27, %s1238_s6 }
  0x56   :  { %382 = vrot.lane.b32.xlu2 %v1140_v29, %s1237_s19 }
  0x5c   :  { %270 = vrot.lane.b32.xlu1 %v1116_v31, %s1238_s6 }
  0x5d   :  { %188 = vrot.lane.b32.xlu0 %v169_v30, %s1238_s6  ;;  %v1127_v30 = vld [vmem:[%s2022_s5 + $0x50] sm:$0xff] }
  0x5e   :  { %204 = vrot.lane.b32.xlu2 %v1501_v32, %s1239_s26 }
  0x64   :  { %220 = vrot.lane.b32.xlu1 %v177_v35, %s1237_s19 }
  0x65   :  { %286 = vrot.lane.b32.xlu0 %v1513_v34, %s1239_s26 }
  0x66   :  { %302 = vrot.lane.b32.xlu2 %v1124_v36, %s1237_s19 }
  0x68   :  { %v265_v38 = vpop.permute.xlu2 %264 }
  0x69   :  { %v308_v53 = vsel %vm226_vm1, %v1109_v51, %v265_v38  ;;  %v72_v51 = vld [vmem:[%s2026_s3 + $0x10] sm:$0xff] }
  0x6c   :  { %98 = vrot.lane.b32.xlu1 %v1562_v4, %s1240_s27 }
  0x6d   :  { %82 = vrot.lane.b32.xlu0 %v66_v62, %s1239_s26 }
  0x70   :  { %v199_v39 = vpop.permute.xlu2 %198 }
  0x74   :  { %84 = vrot.lane.b32.xlu1 %v67_v33, %s1239_s26 }
  0x75   :  { %130 = vrot.lane.b32.xlu0 %v74_v9, %s1241_s23 }
  0x78   :  { %v297_v40 = vpop.permute.xlu2 %296 }
  0x7e   :  { %v377_v41 = vpop.permute.xlu1 %376 }
  0x7f   :  { %v345_v42 = vpop.permute.xlu0 %344 }
  0x80   :  { %v379_v44 = vpop.permute.xlu2 %378  ;;  %v388_v45 = vsel %vm226_vm1, %v1125_v43, %v345_v42  ;;  %v75_v42 = vld [vmem:[%s2025_s4 + $0x8] sm:$0xff] }
  0x81   :  { %132 = vrot.lane.b32.xlu1 %v75_v42, %s1241_s23 }
  0x86   :  { %v183_v47 = vpop.permute.xlu1 %182 }
  0x87   :  { %v361_v46 = vpop.permute.xlu0 %360  ;;  %v227_v52 = vsel %vm226_vm1, %v162_v49, %v183_v47  ;;  %v1615_v47 = vld [vmem:[%s2024_s2 + $0x8] sm:$0xff] }
  0x88   :  { %v392_v48 = vsel %vm142_vm2, %v388_v45, %v361_v46  ;;  %v231_v54 = vsel %vm142_vm2, %v227_v52, %v199_v39  ;;  %v201_v59 = vpop.permute.xlu2 %200  ;;  %v70_v39 = vld [vmem:[%s2026_s3] sm:$0xff]  ;;  %v164_v46 = vld [vmem:[%s2022_s5 + $0x10] sm:$0xff]  ;;  %v1636_v52 = vld [vmem:[%s2027_s13 + $0x8] sm:$0xf] }
  0x89   :  { %v396_v50 = vsel %vm235_vm3, %v392_v48, %v377_v41  ;;  %114 = vrot.lane.b32.xlu2 %v70_v39, %s1242_s28  ;;  %v1620_v48 = vld [vmem:[%s2024_s2 + $0x10] sm:$0xff]  ;;  %1166 = vmatpush.msk.msrb.mxu1 %vm425_vm0, %v1636_v52  ;;  %v406_v39 = vld [vmem:[%s2029_s10 + $0x20] sm:$0x1] }
  0x8a   :  { %1152 = vmatmul.msk.f32.vlgmr.msra.gmra.mxu2 %vm412_vm4, %v396_v50  ;;  %v1111_v50 = vld [vmem:[%s2022_s5 + $0x30] sm:$0xff]  ;;  %118 = vrot.lane.b32.xlu1 %v72_v51, %s1242_s28 }
  0x8b   :  { %1171 = vmatpush.msk.msrb.mxu2 %vm425_vm0, %v1636_v52  ;;  %1161 = vmatpush.msk.msrb.mxu0 %vm669_vm5, %v406_v39 }
  0x8e   :  { %v215_v56 = vpop.permute.xlu1 %214 }
  0x8f   :  { %v281_v55 = vpop.permute.xlu0 %280  ;;  %v236_v58 = vsel %vm235_vm3, %v231_v54, %v215_v56 }
  0x90   :  { %v312_v57 = vsel %vm142_vm2, %v308_v53, %v281_v55  ;;  %1142 = vmatmul.msk.f32.vlgmr.msra.gmra.mxu0 %vm412_vm4, %v236_v58  ;;  %v299_v8 = vpop.permute.xlu2 %298 }
  0x91   :  { %v316_v60 = vsel %vm235_vm3, %v312_v57, %v297_v40  ;;  %v71_v40 = vld [vmem:[%s2026_s3 + $0x8] sm:$0xff]  ;;  %100 = vrot.lane.b32.xlu2 %v1615_v47, %s1240_s27 }
  0x92   :  { %1147 = vmatmul.msk.f32.vlgmr.msra.gmra.mxu1 %vm412_vm4, %v316_v60  ;;  %116 = vrot.lane.b32.xlu0 %v71_v40, %s1242_s28  ;;  %v68_v60 = vld [vmem:[%s2023_s1 + $0x10] sm:$0xff]  ;;  %v407_v40 = vld [vmem:[%s2028_s11] sm:$0xff] }
  0x96   :  { %v363_v0 = vpop.permute.xlu1 %362 }
  0x97   :  { %v347_v63 = vpop.permute.xlu0 %346 }
  0x98   :  { %v389_v1 = vsel %vm226_vm1, %v1126_v61, %v347_v63  ;;  %v381_v18 = vpop.permute.xlu2 %380  ;;  %v1661_v63 = vld [vmem:[%s2024_s2 + $0x18] sm:$0xff] }
  0x99   :  { %v393_v2 = vsel %vm142_vm2, %v389_v1, %v363_v0  ;;  %86 = vrot.lane.b32.xlu2 %v68_v60, %s1239_s26  ;;  %v1128_v0 = vld [vmem:[%s2022_s5 + $0x58] sm:$0xff]  ;;  %104 = vrot.lane.b32.xlu1 %v1661_v63, %s1240_s27 }
  0x9a   :  { %v397_v7 = vsel %vm235_vm3, %v393_v2, %v379_v44  ;;  %102 = vrot.lane.b32.xlu0 %v1620_v48, %s1240_s27 }
  0x9b   :  { %1153 = vmatmul.msk.f32.gmra.mxu2 %vm412_vm4, %v397_v7 }
  0x9e   :  { %v267_v12 = vpop.permute.xlu1 %266 }
  0x9f   :  { %v185_v11 = vpop.permute.xlu0 %184  ;;  %v309_v20 = vsel %vm226_vm1, %v1110_v17, %v267_v12 }
  0xa0   :  { %v228_v16 = vsel %vm226_vm1, %v163_v13, %v185_v11  ;;  %v203_v31 = vpop.permute.xlu2 %202  ;;  %v76_v11 = vld [vmem:[%s2025_s4 + $0x10] sm:$0xff] }
  0xa1   :  { %v232_v21 = vsel %vm142_vm2, %v228_v16, %v201_v59  ;;  %v69_v59 = vld [vmem:[%s2023_s1 + $0x18] sm:$0xff]  ;;  %134 = vrot.lane.b32.xlu2 %v76_v11, %s1241_s23 }
  0xa2   :  { %88 = vrot.lane.b32.xlu0 %v69_v59, %s1239_s26 }
  0xa6   :  { %v217_v25 = vpop.permute.xlu1 %216 }
  0xa7   :  { %v283_v22 = vpop.permute.xlu0 %282  ;;  %v237_v27 = vsel %vm235_vm3, %v232_v21, %v217_v25  ;;  %v1112_v21 = vld [vmem:[%s2022_s5 + $0x38] sm:$0xff] }
  0xa8   :  { %v313_v26 = vsel %vm142_vm2, %v309_v20, %v283_v22  ;;  %1143 = vmatmul.msk.f32.gmra.mxu0 %vm412_vm4, %v237_v27  ;;  %v301_v45 = vpop.permute.xlu2 %300 }
  0xa9   :  { %v317_v29 = vsel %vm235_vm3, %v313_v26, %v299_v8  ;;  %v77_v8 = vld [vmem:[%s2025_s4 + $0x18] sm:$0xff] }
  0xaa   :  { %1148 = vmatmul.msk.f32.gmra.mxu1 %vm412_vm4, %v317_v29  ;;  %136 = vrot.lane.b32.xlu0 %v77_v8, %s1241_s23 }
  0xae   :  { %v365_v36 = vpop.permute.xlu1 %364 }
  0xaf   :  { %v349_v35 = vpop.permute.xlu0 %348 }
  0xb0   :  { %v390_v37 = vsel %vm226_vm1, %v1127_v30, %v349_v35  ;;  %v383_v62 = vpop.permute.xlu2 %382  ;;  %v410_v35 = vld [vmem:[%s2027_s13] sm:$0xff] }
  0xb1   :  { %v394_v38 = vsel %vm142_vm2, %v390_v37, %v365_v36  ;;  %739 = vmatpush.msrb.mxu1 %v410_v35  ;;  %780 = vmatpush.msrb.mxu2 %v410_v35  ;;  %v73_v36 = vld [vmem:[%s2026_s3 + $0x18] sm:$0xff] }
  0xb2   :  { %v398_v41 = vsel %vm235_vm3, %v394_v38, %v381_v18  ;;  %v165_v18 = vld [vmem:[%s2022_s5 + $0x18] sm:$0xff]  ;;  %120 = vrot.lane.b32.xlu2 %v73_v36, %s1242_s28  ;;  %v408_v38 = vld [vmem:[%s2028_s11 + $0x8] sm:$0xf]  ;;  %s2047_s5 = sld [smem:[#allocation5_spill]] }
  0xb3   :  { %1154 = vmatmul.msk.f32.gmra.mxu2 %vm412_vm4, %v398_v41  ;;  %1156 = vmatpush.msk.msra.mxu3 %vm425_vm0, %v408_v38  ;;  %v405_v41 = vld [vmem:[%s2029_s10 + $0x18] sm:$0xff] }
  0xb4   :  { %685 = vmatpush.msrb.mxu0 %v405_v41 }
  0xb5   :  { %642 = vmatpush.msra.mxu3 %v407_v40 }
  0xb6   :  { %v269_v44 = vpop.permute.xlu1 %268 }
  0xb7   :  { %v187_v43 = vpop.permute.xlu0 %186  ;;  %v310_v53 = vsel %vm226_vm1, %v1111_v50, %v269_v44  ;;  %1176 = vmatpush.msk.msrb.mxu3 %vm425_vm0, %v1636_v52 }
  0xb8   :  { %v229_v49 = vsel %vm226_vm1, %v164_v46, %v187_v43  ;;  %v205_v13 = vpop.permute.xlu2 %204  ;;  %v404_v43 = vld [vmem:[%s2029_s10 + $0x10] sm:$0xff] }
  0xb9   :  { %v233_v54 = vsel %vm142_vm2, %v229_v49, %v203_v31  ;;  %686 = vmatpush.msrb.mxu0 %v404_v43  ;;  %v403_v49 = vld [vmem:[%s2029_s10 + $0x8] sm:$0xff]  ;;  %821 = vmatpush.msrb.mxu3 %v410_v35 }
  0xbb   :  { %687 = vmatpush.msrb.mxu0 %v403_v49 }
  0xbe   :  { %v219_v56 = vpop.permute.xlu1 %218 }
  0xbf   :  { %v285_v55 = vpop.permute.xlu0 %284  ;;  %v238_v58 = vsel %vm235_vm3, %v233_v54, %v219_v56  ;;  %v402_v54 = vld [vmem:[%s2029_s10] sm:$0xff] }
  0xc0   :  { %v314_v57 = vsel %vm142_vm2, %v310_v53, %v285_v55  ;;  %1144 = vmatmul.msk.f32.gmra.mxu0 %vm412_vm4, %v238_v58  ;;  %v303_v22 = vpop.permute.xlu2 %302 }
  0xc1   :  { %v318_v61 = vsel %vm235_vm3, %v314_v57, %v301_v45  ;;  %v62_v45 = vld [vmem:[%s2030_s0] sm:$0xff]  ;;  %688 = vmatpush.msrb.mxu0 %v402_v54 }
  0xc2   :  { %1149 = vmatmul.msk.f32.gmra.mxu1 %vm412_vm4, %v318_v61 }
  0xc6   :  { %v367_v2 = vpop.permute.xlu1 %366 }
  0xc7   :  { %v351_v1 = vpop.permute.xlu0 %350 }
  0xc8   :  { %v391_v7 = vsel %vm226_vm1, %v1128_v0, %v351_v1 }
  0xc9   :  { %v395_v9 = vsel %vm142_vm2, %v391_v7, %v367_v2 }
  0xca   :  { %v399_v12 = vsel %vm235_vm3, %v395_v9, %v383_v62 }
  0xcb   :  { %1155 = vmatmul.msk.f32.gmra.mxu2 %vm412_vm4, %v399_v12 }
  0xce   :  { %v271_v17 = vpop.permute.xlu1 %270 }
  0xcf   :  { %v189_v16 = vpop.permute.xlu0 %188  ;;  %v311_v25 = vsel %vm226_vm1, %v1112_v21, %v271_v17 }
  0xd0   :  { %v230_v20 = vsel %vm226_vm1, %v165_v18, %v189_v16  ;;  %v63_v16 = vld [vmem:[%s2030_s0 + $0x8] sm:$0xff] }
  0xd1   :  { %v234_v26 = vsel %vm142_vm2, %v230_v20, %v205_v13 }
  0xd6   :  { %v221_v29 = vpop.permute.xlu1 %220 }
  0xd7   :  { %v287_v27 = vpop.permute.xlu0 %286  ;;  %v239_v31 = vsel %vm235_vm3, %v234_v26, %v221_v29 }
  0xd8   :  { %v315_v30 = vsel %vm142_vm2, %v311_v25, %v287_v27  ;;  %1145 = vmatmul.msk.f32.gmra.mxu0 %vm412_vm4, %v239_v31 }
  0xd9   :  { %v319_v33 = vsel %vm235_vm3, %v315_v30, %v303_v22  ;;  %vm1004_vm3 = vcmask 15360  }
  0xda   :  { %1150 = vmatmul.msk.f32.gmra.mxu1 %vm412_vm4, %v319_v33 }
  0xde   :  { %v99_v46 = vpop.permute.xlu1 %98 }
  0xdf   :  { %v83_v37 = vpop.permute.xlu0 %82 }
  0xe0   :  { %v143_v53 = vsel %vm142_vm2, %v62_v45, %v83_v37 }
  0xe1   :  { %v148_v56 = vsel %vm147_vm6, %v143_v53, %v99_v46 }
  0xe3   :  { %v115_v52 = vpop.permute.xlu2 %114 }
  0xe4   :  { %v153_v57 = vsel %vm152_vm7, %v148_v56, %v115_v52  ;;  %v64_v52 = vld [vmem:[%s2030_s0 + $0x10] sm:$0xff] }
  0xe6   :  { %v85_v8 = vpop.permute.xlu1 %84 }
  0xe7   :  { %v131_v58 = vpop.permute.xlu0 %130  ;;  %v144_v22 = vsel %vm142_vm2, %v63_v16, %v85_v8 }
  0xe8   :  { %v158_v61 = vsel %vm157_vm8, %v153_v57, %v131_v58 }
  0xe9   :  { %1162 = vmatmul.msk.f32.vlgmr.msrb.gmra.mxu0 %vm656_vm9, %v158_v61 }
  0xeb   :  { %v101_v17 = vpop.permute.xlu2 %100 }
  0xec   :  { %v149_v27 = vsel %vm147_vm6, %v144_v22, %v101_v17  ;;  %v65_v17 = vld [vmem:[%s2030_s0 + $0x18] sm:$0xff] }
  0xf3   :  { %v133_v31 = vpop.permute.xlu1 %132  ;;  %v87_v46 = vpop.permute.xlu2 %86 }
  0xf4   :  { %v145_v58 = vsel %vm142_vm2, %v64_v52, %v87_v46 }
 0x104   :  { %v117_v25 = vpop.permute.xlu0 %116 }
 0x105   :  { %v154_v30 = vsel %vm152_vm7, %v149_v27, %v117_v25 }
 0x106   :  { %v159_v37 = vsel %vm157_vm8, %v154_v30, %v133_v31 }
 0x107   :  { %1163 = vmatmul.msk.f32.gmra.mxu0 %vm656_vm9, %v159_v37 }
 0x10c   :  { %v103_v54 = vpop.permute.xlu0 %102 }
 0x10d   :  { %v1714_v42 = vpop.f32.mrf.mxu2  ;;  %v446_v44 = vpop.f32.mrf.mxu0  ;;  %v150_v61 = vsel %vm147_vm6, %v145_v58, %v103_v54 }
 0x10e   :  { %v540_v50 = vmul.f32 %v446_v44, %v446_v44  ;;  %1167 = vmatmul.msk.f32.vlgmr.msrb.gmra.mxu1 %vm412_vm4, %v446_v44  ;;  %v552_v59 = vmul.f32 %v1714_v42, %v1714_v42 }
 0x10f   :  { %v487_v51 = vpop.f32.mrf.mxu1 }
 0x110   :  { %v544_v55 = vmul.f32 %v487_v51, %v487_v51  ;;  %1172 = vmatmul.msk.f32.vlgmr.msrb.gmra.mxu2 %vm412_vm4, %v487_v51 }
 0x112   :  { %v548_v60 = vadd.f32 %v544_v55, %v540_v50 }
 0x114   :  { %v556_v62 = vadd.f32 %v552_v59, %v548_v60  ;;  %v119_v59 = vpop.permute.xlu1 %118 }
 0x116   :  { %v560_v0 = vmax.f32 %v556_v62, 1e-08 }
 0x118   :  { %1209 = vrsqrt.f32 %v560_v0  ;;  %vm571_vm10 = vcmp.eq.f32.partialorder %v560_v0, inf  ;;  %v574_v36 = vand.u32 2147483648, %v560_v0  ;;  %vm573_vm11 = vcmp.eq.f32.partialorder %v560_v0, 0.0 }
 0x11c   :  { %v105_v22 = vpop.permute.xlu1 %104 }
 0x11e   :  { %v1210_v1 = vpop.eup %1209  ;;  %v1739_v11 = vpop.f32.mrf.mxu2 }
 0x11f   :  { %v565_v2 = vmul.f32 %v1210_v1, %v560_v0  ;;  %v553_v33 = vmul.f32 %v1739_v11, %v1739_v11 }
 0x121   :  { %v566_v7 = vmul.f32 %v1210_v1, %v565_v2 }
 0x123   :  { %v567_v9 = vmul.f32 0.5, %v566_v7 }
 0x125   :  { %v568_v12 = vsub.f32 1.5, %v567_v9  ;;  %v449_v13 = vpop.f32.mrf.mxu0 }
 0x126   :  { %v541_v18 = vmul.f32 %v449_v13, %v449_v13  ;;  %1168 = vmatmul.msk.f32.gmra.mxu1 %vm412_vm4, %v449_v13 }
 0x127   :  { %v490_v20 = vpop.f32.mrf.mxu1  ;;  %v569_v21 = vmul.f32 %v1210_v1, %v568_v12  ;;  %v135_v1 = vpop.permute.xlu2 %134 }
 0x128   :  { %v545_v26 = vmul.f32 %v490_v20, %v490_v20  ;;  %1173 = vmatmul.msk.f32.gmra.mxu2 %vm412_vm4, %v490_v20  ;;  %v89_v20 = vpop.permute.xlu0 %88 }
 0x129   :  { %v570_v29 = vmul.f32 %v569_v21, %v560_v0  ;;  %v146_v21 = vsel %vm142_vm2, %v65_v17, %v89_v20  ;;  %vm841_vm2 = vcmask 48128  }
 0x12a   :  { %v549_v35 = vadd.f32 %v545_v26, %v541_v18  ;;  %v151_v25 = vsel %vm147_vm6, %v146_v21, %v105_v22 }
 0x12b   :  { %v572_v38 = vsel %vm571_vm10, %v560_v0, %v570_v29  ;;  %v155_v0 = vsel %vm152_vm7, %v150_v61, %v119_v59 }
 0x12c   :  { %v557_v39 = vadd.f32 %v553_v33, %v549_v35  ;;  %v575_v40 = vsel %vm573_vm11, %v574_v36, %v572_v38  ;;  %v160_v9 = vsel %vm157_vm8, %v155_v0, %v135_v1 }
 0x12d   :  { %1157 = vmatmul.msk.f32.vlgmr.msra.gmra.mxu3 %vm412_vm4, %v575_v40  ;;  %1164 = vmatmul.msk.f32.gmra.mxu0 %vm656_vm9, %v160_v9 }
 0x12e   :  { %v561_v41 = vmax.f32 %v557_v39, 1e-08 }
 0x12f   :  { %v121_v30 = vpop.permute.xlu2 %120 }
 0x130   :  { %1211 = vrsqrt.f32 %v561_v41  ;;  %vm583_vm12 = vcmp.eq.f32.partialorder %v561_v41, inf  ;;  %v586_v8 = vand.u32 2147483648, %v561_v41  ;;  %vm585_vm13 = vcmp.eq.f32.partialorder %v561_v41, 0.0  ;;  %v137_v33 = vpop.permute.xlu0 %136 }
 0x131   :  { %v156_v31 = vsel %vm152_vm7, %v151_v25, %v121_v30 }
 0x132   :  { %v161_v37 = vsel %vm157_vm8, %v156_v31, %v137_v33 }
 0x135   :  { %1165 = vmatmul.msk.f32.gmra.mxu0 %vm656_vm9, %v161_v37 }
 0x136   :  { %v1212_v43 = vpop.eup %1211  ;;  %v1754_v50 = vpop.f32.mrf.mxu2 }
 0x137   :  { %v577_v44 = vmul.f32 %v1212_v43, %v561_v41  ;;  %v554_v2 = vmul.f32 %v1754_v50, %v1754_v50 }
 0x139   :  { %v578_v45 = vmul.f32 %v1212_v43, %v577_v44 }
 0x13b   :  { %v579_v49 = vmul.f32 0.5, %v578_v45 }
 0x13d   :  { %v580_v51 = vsub.f32 1.5, %v579_v49  ;;  %v452_v53 = vpop.f32.mrf.mxu0 }
 0x13e   :  { %v542_v55 = vmul.f32 %v452_v53, %v452_v53  ;;  %1169 = vmatmul.msk.f32.gmra.mxu1 %vm412_vm4, %v452_v53 }
 0x13f   :  { %v493_v56 = vpop.f32.mrf.mxu1  ;;  %v581_v57 = vmul.f32 %v1212_v43, %v580_v51 }
 0x140   :  { %v546_v60 = vmul.f32 %v493_v56, %v493_v56  ;;  %1174 = vmatmul.msk.f32.gmra.mxu2 %vm412_vm4, %v493_v56 }
 0x141   :  { %v582_v62 = vmul.f32 %v581_v57, %v561_v41 }
 0x142   :  { %v550_v7 = vadd.f32 %v546_v60, %v542_v55 }
 0x143   :  { %v584_v12 = vsel %vm583_vm12, %v561_v41, %v582_v62 }
 0x144   :  { %v558_v13 = vadd.f32 %v554_v2, %v550_v7  ;;  %v587_v16 = vsel %vm585_vm13, %v586_v8, %v584_v12  ;;  %v1205_v8 = vld [vmem:[%s2047_s5] ss:$0 sm:$0xff] }
 0x145   :  { %1158 = vmatmul.msk.f32.gmra.mxu3 %vm412_vm4, %v587_v16 }
 0x146   :  { %v562_v18 = vmax.f32 %v558_v13, 1e-08 }
 0x148   :  { %1213 = vrsqrt.f32 %v562_v18  ;;  %vm595_vm14 = vcmp.eq.f32.partialorder %v562_v18, inf  ;;  %v598_v51 = vand.u32 2147483648, %v562_v18  ;;  %vm597_vm15 = vcmp.eq.f32.partialorder %v562_v18, 0.0 }
 0x14e   :  { %v1214_v26 = vpop.eup %1213  ;;  %v537_v39 = vpop.f32.mrf.mxu2 }
 0x14f   :  { %v589_v27 = vmul.f32 %v1214_v26, %v562_v18  ;;  %v555_v46 = vmul.f32 %v537_v39, %v537_v39 }
 0x151   :  { %v590_v29 = vmul.f32 %v1214_v26, %v589_v27 }
 0x153   :  { %v591_v35 = vmul.f32 0.5, %v590_v29 }
 0x155   :  { %v592_v36 = vsub.f32 1.5, %v591_v35  ;;  %v455_v38 = vpop.f32.mrf.mxu0 }
 0x156   :  { %v543_v40 = vmul.f32 %v455_v38, %v455_v38  ;;  %1170 = vmatmul.msk.f32.gmra.mxu1 %vm412_vm4, %v455_v38 }
 0x157   :  { %v496_v41 = vpop.f32.mrf.mxu1  ;;  %v593_v43 = vmul.f32 %v1214_v26, %v592_v36 }
 0x158   :  { %v547_v44 = vmul.f32 %v496_v41, %v496_v41  ;;  %1175 = vmatmul.msk.f32.gmra.mxu2 %vm412_vm4, %v496_v41 }
 0x159   :  { %v594_v45 = vmul.f32 %v593_v43, %v562_v18 }
 0x15a   :  { %v551_v49 = vadd.f32 %v547_v44, %v543_v40 }
 0x15b   :  { %v596_v53 = vsel %vm595_vm14, %v562_v18, %v594_v45 }
 0x15c   :  { %v559_v52 = vadd.f32 %v555_v46, %v551_v49  ;;  %v599_v54 = vsel %vm597_vm15, %v598_v51, %v596_v53  ;;  %v1243_v49 = vmov 6.0  }
 0x15d   :  { %1159 = vmatmul.msk.f32.gmra.mxu3 %vm412_vm4, %v599_v54 }
 0x15e   :  { %v563_v55 = vmax.f32 %v559_v52, 1e-08 }
 0x160   :  { %1215 = vrsqrt.f32 %v563_v55  ;;  %vm607_vm0 = vcmp.eq.f32.partialorder %v563_v55, inf  ;;  %v610_v0 = vand.u32 2147483648, %v563_v55  ;;  %vm609_vm1 = vcmp.eq.f32.partialorder %v563_v55, 0.0 }
 0x161   :  { %1217 = vrcp.f32 %v1243_v49 }
 0x166   :  { %v1216_v56 = vpop.eup %1215  ;;  %v690_v7 = vpop.f32.mrf.mxu0 }
 0x167   :  { %v601_v57 = vmul.f32 %v1216_v56, %v563_v55  ;;  %v1218_v51 = vpop.eup %1217 }
 0x168   :  { %v855_v53 = vmul.f32 6.0, %v1218_v51 }
 0x169   :  { %v602_v58 = vmul.f32 %v1216_v56, %v601_v57 }
 0x16a   :  { %v856_v52 = vsub.f32 1.0, %v855_v53 }
 0x16b   :  { %v603_v59 = vmul.f32 0.5, %v602_v58 }
 0x16c   :  { %v857_v54 = vmul.f32 %v1218_v51, %v856_v52 }
 0x16d   :  { %v604_v60 = vsub.f32 1.5, %v603_v59 }
 0x16f   :  { %v605_v61 = vmul.f32 %v1216_v56, %v604_v60 }
 0x171   :  { %v606_v62 = vmul.f32 %v605_v61, %v563_v55 }
 0x173   :  { %v608_v1 = vsel %vm607_vm0, %v563_v55, %v606_v62  ;;  %v858_v55 = vadd.f32 %v1218_v51, %v857_v54 }
 0x174   :  { %v611_v2 = vsel %vm609_vm1, %v610_v0, %v608_v1 }
 0x175   :  { %1160 = vmatmul.msk.f32.gmra.mxu3 %vm412_vm4, %v611_v2 }
 0x17d   :  { %1177 = vmatmul.msk.f32.vlgmr.msrb.gmra.mxu3 %vm412_vm4, %v1714_v42 }
 0x185   :  { %1178 = vmatmul.msk.f32.gmra.mxu3 %vm412_vm4, %v1739_v11  ;;  %v693_v11 = vpop.f32.mrf.mxu0 }
 0x18b   :  { %v741_v35 = vpop.f32.mrf.mxu1 }
 0x18c   :  { %v1807_v38 = vadd.f32 %v741_v35, %v1366_v5 }
 0x18d   :  { %1179 = vmatmul.msk.f32.gmra.mxu3 %vm412_vm4, %v1754_v50 }
 0x18e   :  { %v980_v43 = vmul.f32 %v1807_v38, %v1807_v38 }
 0x193   :  { %v782_v30 = vpop.f32.mrf.mxu2 }
 0x194   :  { %v1804_v36 = vadd.f32 %v1373_v6, %v782_v30 }
 0x195   :  { %1180 = vmatmul.msk.f32.gmra.mxu3 %vm412_vm4, %v537_v39  ;;  %vm859_vm4 = vweird.f32 %v1218_v51 }
 0x1a3   :  { %v744_v61 = vpop.f32.mrf.mxu1 }
 0x1a4   :  { %v1859_v30 = vadd.f32 %v744_v61, %v1411_v14 }
 0x1a6   :  { %v981_v35 = vmul.f32 %v1859_v30, %v1859_v30 }
 0x1aa   :  { %v696_v22 = vpop.f32.mrf.mxu0 }
 0x1ab   :  { %v785_v59 = vpop.f32.mrf.mxu2 }
 0x1b0   :  { %v644_v9 = vpop.f32.mrf.mxu3 }
 0x1b1   :  { %v691_v12 = vadd.f32 %v690_v7, %v644_v9 }
 0x1b2   :  { %v699_v31 = vpop.f32.mrf.mxu0 }
 0x1b3   :  { %v705_v13 = vadd.f32 %v1205_v8, %v691_v12 }
 0x1b5   :  { %v835_v16 = vadd.f32 %v705_v13, %v1562_v4 }
 0x1b7   :  { %v842_v42 = vsel %vm841_vm2, %v835_v16, 0.0 }
 0x1b8   :  { %843 = vadd.xlane.f32.xlu1 %v842_v42 }
 0x1bb   :  { %v747_v7 = vpop.f32.mrf.mxu1 }
 0x1c3   :  { %v788_v1 = vpop.f32.mrf.mxu2 }
 0x1c8   :  { %v647_v17 = vpop.f32.mrf.mxu3 }
 0x1c9   :  { %v694_v18 = vadd.f32 %v693_v11, %v647_v17 }
 0x1cb   :  { %v706_v50 = vadd.f32 %v1205_v8, %v694_v18 }
 0x1cd   :  { %v1794_v20 = vadd.f32 %v706_v50, %v1615_v47 }
 0x1cf   :  { %v845_v21 = vsel %vm841_vm2, %v1794_v20, 0.0 }
 0x1d0   :  { %846 = vadd.xlane.f32.xlu2 %v845_v21 }
 0x1d3   :  { %v750_v9 = vpop.f32.mrf.mxu1 }
 0x1d4   :  { %v1836_v42 = vadd.f32 %v750_v9, %v1501_v32 }
 0x1d6   :  { %v983_v50 = vmul.f32 %v1836_v42, %v1836_v42 }
 0x1e0   :  { %v650_v25 = vpop.f32.mrf.mxu3 }
 0x1e1   :  { %v697_v26 = vadd.f32 %v696_v22, %v650_v25 }
 0x1e3   :  { %v707_v27 = vadd.f32 %v1205_v8, %v697_v26 }
 0x1e5   :  { %v1799_v4 = vadd.f32 %v707_v27, %v1620_v48  ;;  %v984_v48 = vmul.f32 %v1804_v36, %v1804_v36 }
 0x1e7   :  { %v848_v29 = vsel %vm841_vm2, %v1799_v4, 0.0  ;;  %v988_v44 = vadd.f32 %v984_v48, %v980_v43 }
 0x1e8   :  { %849 = vadd.xlane.f32.xlu0 %v848_v29  ;;  %v1856_v29 = vadd.f32 %v1418_v15, %v785_v59 }
 0x1f8   :  { %v653_v33 = vpop.f32.mrf.mxu3 }
 0x1f9   :  { %v700_v47 = vadd.f32 %v699_v31, %v653_v33  ;;  %v985_v33 = vmul.f32 %v1856_v29, %v1856_v29 }
 0x1fb   :  { %v708_v37 = vadd.f32 %v1205_v8, %v700_v47  ;;  %v791_v8 = vpop.f32.mrf.mxu2  ;;  %v989_v14 = vadd.f32 %v985_v33, %v981_v35 }
 0x1fc   :  { %v1833_v13 = vadd.f32 %v1513_v34, %v791_v8 }
 0x1fd   :  { %v1810_v39 = vadd.f32 %v708_v37, %v1661_v63 }
 0x1fe   :  { %v987_v17 = vmul.f32 %v1833_v13, %v1833_v13 }
 0x1ff   :  { %v851_v40 = vsel %vm841_vm2, %v1810_v39, 0.0 }
 0x200   :  { %v823_v41 = vpop.f32.mrf.mxu3  ;;  %852 = vadd.xlane.f32.xlu2 %v851_v40  ;;  %v991_v32 = vadd.f32 %v987_v17, %v983_v50 }
 0x201   :  { %v1819_v6 = vadd.f32 %v1355_v3, %v823_v41  ;;  %v1824_v3 = vsel %vm859_vm4, %v1218_v51, %v858_v55  ;;  %v1244_v41 = vmov 2.0  }
 0x202   :  { %1219 = vrcp.f32 %v1244_v41 }
 0x203   :  { %v992_v5 = vmul.f32 %v1819_v6, %v1819_v6 }
 0x205   :  { %v996_v63 = vadd.f32 %v992_v5, %v988_v44 }
 0x207   :  { %v1000_v45 = vmax.f32 %v996_v63, 1e-08 }
 0x208   :  { %v826_v56 = vpop.f32.mrf.mxu3  ;;  %v1220_v44 = vpop.eup %1219 }
 0x209   :  { %v1005_v46 = vsel %vm1004_vm3, %v1000_v45, 0.0  ;;  %v1018_v63 = vmul.f32 2.0, %v1220_v44  ;;  %vm1022_vm5 = vweird.f32 %v1220_v44 }
 0x20a   :  { %1006 = vadd.xlane.f32.xlu2 %v1005_v46  ;;  %v1882_v46 = vadd.f32 %v747_v7, %v1456_v23 }
 0x20b   :  { %v1019_v45 = vsub.f32 1.0, %v1018_v63 }
 0x20c   :  { %v982_v55 = vmul.f32 %v1882_v46, %v1882_v46 }
 0x20d   :  { %v1020_v53 = vmul.f32 %v1220_v44, %v1019_v45 }
 0x20f   :  { %v1021_v23 = vadd.f32 %v1220_v44, %v1020_v53 }
 0x210   :  { %v829_v2 = vpop.f32.mrf.mxu3 }
 0x211   :  { %v1885_v49 = vadd.f32 %v1436_v19, %v829_v2  ;;  %v1900_v61 = vsel %vm1022_vm5, %v1220_v44, %v1021_v23 }
 0x218   :  { %v832_v12 = vpop.f32.mrf.mxu3 }
 0x22b   :  { %v844_v57 = vpop.xlane.xlu1 %843 }
 0x22c   :  { %v861_v58 = vmul.f32 %v1824_v3, %v844_v57 }
 0x22e   :  { %v1827_v60 = vsub.f32 %v835_v16, %v861_v58  ;;  %v1839_v16 = vadd.f32 %v1481_v28, %v832_v12 }
 0x230   :  { %v869_v62 = vmul.f32 %v1827_v60, %v1827_v60  ;;  %v995_v21 = vmul.f32 %v1839_v16, %v1839_v16 }
 0x232   :  { %v873_v0 = vsel %vm841_vm2, %v869_v62, 0.0  ;;  %v999_v25 = vadd.f32 %v995_v21, %v991_v32 }
 0x233   :  { %874 = vadd.xlane.f32.xlu1 %v873_v0 }
 0x234   :  { %v1003_v26 = vmax.f32 %v999_v25, 1e-08 }
 0x236   :  { %v1014_v27 = vsel %vm1004_vm3, %v1003_v26, 0.0 }
 0x243   :  { %v847_v11 = vpop.xlane.xlu2 %846 }
 0x244   :  { %v862_v18 = vmul.f32 %v1824_v3, %v847_v11  ;;  %v1907_v11 = vld [vmem:[%s2032_s16] ss:$0 sm:$0xff] }
 0x246   :  { %v1849_v34 = vsub.f32 %v1794_v20, %v862_v18  ;;  %v1862_v20 = vadd.f32 %v1391_v10, %v826_v56 }
 0x248   :  { %v870_v28 = vmul.f32 %v1849_v34, %v1849_v34  ;;  %v993_v37 = vmul.f32 %v1862_v20, %v1862_v20 }
 0x24a   :  { %v876_v22 = vsel %vm841_vm2, %v870_v28, 0.0  ;;  %v997_v40 = vadd.f32 %v993_v37, %v989_v14  ;;  %v1934_v37 = vld [vmem:[%s2034_s15] ss:$0 sm:$0xff] }
 0x24b   :  { %877 = vadd.xlane.f32.xlu2 %v876_v22 }
 0x24c   :  { %v1001_v43 = vmax.f32 %v997_v40, 1e-08 }
 0x24e   :  { %v1008_v5 = vsel %vm1004_vm3, %v1001_v43, 0.0 }
 0x253   :  { %1015 = vadd.xlane.f32.xlu2 %v1014_v27 }
 0x25b   :  { %v850_v31 = vpop.xlane.xlu0 %849 }
 0x25c   :  { %v863_v47 = vmul.f32 %v1824_v3, %v850_v31 }
 0x25e   :  { %v1872_v15 = vsub.f32 %v1799_v4, %v863_v47  ;;  %v1879_v4 = vadd.f32 %v1463_v24, %v788_v1  ;;  %v994_v24 = vmul.f32 %v1885_v49, %v1885_v49  ;;  %v1929_v47 = vld [vmem:[%s2033_s14] ss:$0 sm:$0xff] }
 0x260   :  { %v871_v10 = vmul.f32 %v1872_v15, %v1872_v15  ;;  %v986_v52 = vmul.f32 %v1879_v4, %v1879_v4 }
 0x262   :  { %v879_v48 = vsel %vm841_vm2, %v871_v10, 0.0  ;;  %v990_v57 = vadd.f32 %v986_v52, %v982_v55 }
 0x263   :  { %880 = vadd.xlane.f32.xlu0 %v879_v48 }
 0x264   :  { %v998_v59 = vadd.f32 %v994_v24, %v990_v57 }
 0x266   :  { %v1002_v1 = vmax.f32 %v998_v59, 1e-08 }
 0x26b   :  { %1009 = vadd.xlane.f32.xlu0 %v1008_v5 }
 0x273   :  { %v853_v51 = vpop.xlane.xlu2 %852 }
 0x274   :  { %v864_v54 = vmul.f32 %v1824_v3, %v853_v51 }
 0x276   :  { %v1895_v56 = vsub.f32 %v1810_v39, %v864_v54  ;;  %v1011_v39 = vsel %vm1004_vm3, %v1002_v1, 0.0 }
 0x278   :  { %v872_v19 = vmul.f32 %v1895_v56, %v1895_v56 }
 0x27a   :  { %v882_v58 = vsel %vm841_vm2, %v872_v19, 0.0 }
 0x27b   :  { %883 = vadd.xlane.f32.xlu1 %v882_v58 }
 0x27d   :  { %v1007_v62 = vpop.xlane.xlu2 %1006 }
 0x27e   :  { %v1024_v0 = vmul.f32 %v1900_v61, %v1007_v62 }
 0x280   :  { %1221 = vrsqrt.f32 %v1024_v0  ;;  %vm1034_vm7 = vweird.f32 %v1024_v0 }
 0x283   :  { %1012 = vadd.xlane.f32.xlu1 %v1011_v39 }
 0x286   :  { %v1222_v2 = vpop.eup %1221 }
 0x287   :  { %v1029_v7 = vmul.f32 %v1222_v2, %v1024_v0  ;;  %vm1035_vm6 = vweird.f32 %v1222_v2 }
 0x288   :  { %vm1036_vm8 = vmor %vm1034_vm7, %vm1035_vm6 }
 0x289   :  { %v1030_v8 = vmul.f32 %v1222_v2, %v1029_v7 }
 0x28b   :  { %v1031_v9 = vmul.f32 0.5, %v1030_v8 }
 0x28d   :  { %v1032_v12 = vsub.f32 1.5, %v1031_v9 }
 0x28f   :  { %v1033_v17 = vmul.f32 %v1222_v2, %v1032_v12 }
 0x291   :  { %v1037_v18 = vsel %vm1036_vm8, %v1222_v2, %v1033_v17 }
 0x292   :  { %v1071_v50 = vmul.f32 %v1907_v11, %v1037_v18 }
 0x294   :  { %v1075_v21 = vmul.f32 %v1071_v50, %v1807_v38  ;;  %v1079_v32 = vmul.f32 %v1071_v50, %v1804_v36  ;;  %v1083_v28 = vmul.f32 %v1071_v50, %v1819_v6 }
 0x296   :  { %1087 = vst.msk [vmem:[%s2035_s18] sm:$0xff] %vm1004_vm3, %v1075_v21 }
 0x297   :  { %1189 = vst.msk [vmem:[%s2035_s18 + $0x20] sm:$0xff] %vm1004_vm3, %v1079_v32 }
 0x298   :  { %1193 = vst.msk [vmem:[%s2035_s18 + $0x40] sm:$0xff] %vm1004_vm3, %v1083_v28 }
 0x2a6   :  { %v875_v38 = vpop.xlane.xlu1 %874 }
 0x2a7   :  { %v885_v36 = vmul.f32 %v875_v38, %v1824_v3 }
 0x2a9   :  { %v889_v22 = vadd.f32 1e-05, %v885_v36 }
 0x2ab   :  { %1223 = vrsqrt.f32 %v889_v22  ;;  %vm899_vm10 = vweird.f32 %v889_v22 }
 0x2b1   :  { %v1224_v6 = vpop.eup %1223 }
 0x2b2   :  { %v894_v25 = vmul.f32 %v1224_v6, %v889_v22  ;;  %vm900_vm9 = vweird.f32 %v1224_v6 }
 0x2b3   :  { %vm901_vm11 = vmor %vm899_vm10, %vm900_vm9 }
 0x2b4   :  { %v895_v26 = vmul.f32 %v1224_v6, %v894_v25 }
 0x2b6   :  { %v896_v27 = vmul.f32 0.5, %v895_v26 }
 0x2b8   :  { %v897_v31 = vsub.f32 1.5, %v896_v27 }
 0x2ba   :  { %v898_v33 = vmul.f32 %v1224_v6, %v897_v31 }
 0x2bc   :  { %v902_v35 = vsel %vm901_vm11, %v1224_v6, %v898_v33 }
 0x2bd   :  { %v933_v14 = vmul.f32 %v902_v35, %v1827_v60 }
 0x2be   :  { %v878_v10 = vpop.xlane.xlu2 %877 }
 0x2bf   :  { %v940_v48 = vmul.f32 %v1929_v47, %v933_v14  ;;  %v886_v40 = vmul.f32 %v878_v10, %v1824_v3 }
 0x2c1   :  { %v947_v41 = vadd.f32 %v1934_v37, %v940_v48  ;;  %v890_v43 = vadd.f32 1e-05, %v886_v40 }
 0x2c3   :  { %951 = vst.msk [vmem:[%s2036_s17] sm:$0xff] %vm841_vm2, %v947_v41  ;;  %1225 = vrsqrt.f32 %v890_v43  ;;  %vm909_vm13 = vweird.f32 %v890_v43 }
 0x2c6   :  { %v1016_v44 = vpop.xlane.xlu2 %1015 }
 0x2c7   :  { %v1027_v5 = vmul.f32 %v1900_v61, %v1016_v44 }
 0x2c9   :  { %v1226_v63 = vpop.eup %1225  ;;  %1227 = vrsqrt.f32 %v1027_v5  ;;  %vm1064_vm0 = vweird.f32 %v1027_v5 }
 0x2ca   :  { %v904_v60 = vmul.f32 %v1226_v63, %v890_v43  ;;  %vm910_vm12 = vweird.f32 %v1226_v63 }
 0x2cb   :  { %vm911_vm14 = vmor %vm909_vm13, %vm910_vm12 }
 0x2cc   :  { %v905_v45 = vmul.f32 %v1226_v63, %v904_v60 }
 0x2ce   :  { %v906_v51 = vmul.f32 0.5, %v905_v45 }
 0x2cf   :  { %v1228_v53 = vpop.eup %1227 }
 0x2d0   :  { %v907_v52 = vsub.f32 1.5, %v906_v51  ;;  %v1059_v54 = vmul.f32 %v1228_v53, %v1027_v5  ;;  %vm1065_vm15 = vweird.f32 %v1228_v53 }
 0x2d1   :  { %vm1066_vm1 = vmor %vm1064_vm0, %vm1065_vm15 }
 0x2d2   :  { %v908_v55 = vmul.f32 %v1226_v63, %v907_v52  ;;  %v1060_v24 = vmul.f32 %v1228_v53, %v1059_v54 }
 0x2d4   :  { %v912_v23 = vsel %vm911_vm14, %v1226_v63, %v908_v55  ;;  %v1061_v57 = vmul.f32 0.5, %v1060_v24 }
 0x2d5   :  { %v934_v19 = vmul.f32 %v912_v23, %v1849_v34 }
 0x2d6   :  { %v1062_v58 = vsub.f32 1.5, %v1061_v57  ;;  %v881_v59 = vpop.xlane.xlu0 %880 }
 0x2d7   :  { %v941_v62 = vmul.f32 %v1929_v47, %v934_v19  ;;  %v887_v0 = vmul.f32 %v881_v59, %v1824_v3 }
 0x2d8   :  { %v1063_v1 = vmul.f32 %v1228_v53, %v1062_v58 }
 0x2d9   :  { %v948_v39 = vadd.f32 %v1934_v37, %v941_v62  ;;  %v891_v2 = vadd.f32 1e-05, %v887_v0 }
 0x2da   :  { %v1067_v7 = vsel %vm1066_vm1, %v1228_v53, %v1063_v1 }
 0x2db   :  { %952 = vst.msk [vmem:[%s2036_s17 + $0x8] sm:$0xff] %vm841_vm2, %v948_v39  ;;  %v1074_v34 = vmul.f32 %v1907_v11, %v1067_v7  ;;  %1229 = vrsqrt.f32 %v891_v2  ;;  %vm919_vm5 = vweird.f32 %v891_v2 }
 0x2dd   :  { %v1078_v8 = vmul.f32 %v1074_v34, %v1836_v42  ;;  %v1082_v9 = vmul.f32 %v1074_v34, %v1833_v13  ;;  %v1086_v12 = vmul.f32 %v1074_v34, %v1839_v16 }
 0x2de   :  { %v1010_v17 = vpop.xlane.xlu0 %1009 }
 0x2df   :  { %1090 = vst.msk [vmem:[%s2035_s18 + $0x18] sm:$0xff] %vm1004_vm3, %v1078_v8  ;;  %v1025_v18 = vmul.f32 %v1900_v61, %v1010_v17 }
 0x2e0   :  { %1192 = vst.msk [vmem:[%s2035_s18 + $0x38] sm:$0xff] %vm1004_vm3, %v1082_v9 }
 0x2e1   :  { %v1230_v50 = vpop.eup %1229  ;;  %1196 = vst.msk [vmem:[%s2035_s18 + $0x58] sm:$0xff] %vm1004_vm3, %v1086_v12  ;;  %1231 = vrsqrt.f32 %v1025_v18  ;;  %vm1044_vm8 = vweird.f32 %v1025_v18 }
 0x2e2   :  { %v914_v13 = vmul.f32 %v1230_v50, %v891_v2  ;;  %vm920_vm4 = vweird.f32 %v1230_v50 }
 0x2e3   :  { %vm921_vm6 = vmor %vm919_vm5, %vm920_vm4 }
 0x2e4   :  { %v915_v42 = vmul.f32 %v1230_v50, %v914_v13 }
 0x2e6   :  { %v916_v16 = vmul.f32 0.5, %v915_v42 }
 0x2e7   :  { %v1232_v21 = vpop.eup %1231 }
 0x2e8   :  { %v917_v32 = vsub.f32 1.5, %v916_v16  ;;  %v1039_v28 = vmul.f32 %v1232_v21, %v1025_v18  ;;  %vm1045_vm7 = vweird.f32 %v1232_v21 }
 0x2e9   :  { %vm1046_vm9 = vmor %vm1044_vm8, %vm1045_vm7 }
 0x2ea   :  { %v918_v38 = vmul.f32 %v1230_v50, %v917_v32  ;;  %v1040_v36 = vmul.f32 %v1232_v21, %v1039_v28 }
 0x2ec   :  { %v922_v22 = vsel %vm921_vm6, %v1230_v50, %v918_v38  ;;  %v1041_v6 = vmul.f32 0.5, %v1040_v36 }
 0x2ed   :  { %v935_v25 = vmul.f32 %v922_v22, %v1872_v15 }
 0x2ee   :  { %v1042_v26 = vsub.f32 1.5, %v1041_v6  ;;  %v884_v27 = vpop.xlane.xlu1 %883 }
 0x2ef   :  { %v942_v31 = vmul.f32 %v1929_v47, %v935_v25  ;;  %v888_v33 = vmul.f32 %v884_v27, %v1824_v3 }
 0x2f0   :  { %v1043_v35 = vmul.f32 %v1232_v21, %v1042_v26 }
 0x2f1   :  { %v949_v14 = vadd.f32 %v1934_v37, %v942_v31  ;;  %v892_v10 = vadd.f32 1e-05, %v888_v33 }
 0x2f2   :  { %v1047_v48 = vsel %vm1046_vm9, %v1232_v21, %v1043_v35 }
 0x2f3   :  { %953 = vst.msk [vmem:[%s2036_s17 + $0x10] sm:$0xff] %vm841_vm2, %v949_v14  ;;  %v1072_v15 = vmul.f32 %v1907_v11, %v1047_v48  ;;  %1233 = vrsqrt.f32 %v892_v10  ;;  %vm929_vm11 = vweird.f32 %v892_v10 }
 0x2f5   :  { %v1076_v40 = vmul.f32 %v1072_v15, %v1859_v30  ;;  %v1080_v41 = vmul.f32 %v1072_v15, %v1856_v29  ;;  %v1084_v3 = vmul.f32 %v1072_v15, %v1862_v20 }
 0x2f6   :  { %v1013_v43 = vpop.xlane.xlu1 %1012 }
 0x2f7   :  { %1088 = vst.msk [vmem:[%s2035_s18 + $0x8] sm:$0xff] %vm1004_vm3, %v1076_v40  ;;  %v1026_v44 = vmul.f32 %v1900_v61, %v1013_v43 }
 0x2f8   :  { %1190 = vst.msk [vmem:[%s2035_s18 + $0x28] sm:$0xff] %vm1004_vm3, %v1080_v41 }
 0x2f9   :  { %v1234_v5 = vpop.eup %1233  ;;  %1194 = vst.msk [vmem:[%s2035_s18 + $0x48] sm:$0xff] %vm1004_vm3, %v1084_v3  ;;  %1235 = vrsqrt.f32 %v1026_v44  ;;  %vm1054_vm14 = vweird.f32 %v1026_v44 }
 0x2fa   :  { %v924_v29 = vmul.f32 %v1234_v5, %v892_v10  ;;  %vm930_vm10 = vweird.f32 %v1234_v5 }
 0x2fb   :  { %vm931_vm12 = vmor %vm929_vm11, %vm930_vm10 }
 0x2fc   :  { %v925_v30 = vmul.f32 %v1234_v5, %v924_v29 }
 0x2fe   :  { %v926_v20 = vmul.f32 0.5, %v925_v30 }
 0x2ff   :  { %v1236_v63 = vpop.eup %1235 }
 0x300   :  { %v927_v60 = vsub.f32 1.5, %v926_v20  ;;  %v1049_v45 = vmul.f32 %v1236_v63, %v1026_v44  ;;  %vm1055_vm13 = vweird.f32 %v1236_v63 }
 0x301   :  { %vm1056_vm15 = vmor %vm1054_vm14, %vm1055_vm13 }
 0x302   :  { %v928_v61 = vmul.f32 %v1234_v5, %v927_v60  ;;  %v1050_v51 = vmul.f32 %v1236_v63, %v1049_v45 }
 0x304   :  { %v932_v53 = vsel %vm931_vm12, %v1234_v5, %v928_v61  ;;  %v1051_v52 = vmul.f32 0.5, %v1050_v51 }
 0x305   :  { %v936_v54 = vmul.f32 %v932_v53, %v1895_v56 }
 0x306   :  { %v1052_v55 = vsub.f32 1.5, %v1051_v52 }
 0x307   :  { %v943_v24 = vmul.f32 %v1929_v47, %v936_v54 }
 0x308   :  { %v1053_v23 = vmul.f32 %v1236_v63, %v1052_v55 }
 0x309   :  { %v950_v57 = vadd.f32 %v1934_v37, %v943_v24 }
 0x30a   :  { %v1057_v19 = vsel %vm1056_vm15, %v1236_v63, %v1053_v23 }
 0x30b   :  { %954 = vst.msk [vmem:[%s2036_s17 + $0x18] sm:$0xff] %vm841_vm2, %v950_v57  ;;  %v1073_v58 = vmul.f32 %v1907_v11, %v1057_v19 }
 0x30d   :  { %v1077_v59 = vmul.f32 %v1073_v58, %v1882_v46  ;;  %v1081_v56 = vmul.f32 %v1073_v58, %v1879_v4  ;;  %v1085_v62 = vmul.f32 %v1073_v58, %v1885_v49 }
 0x30f   :  { %1089 = vst.msk [vmem:[%s2035_s18 + $0x10] sm:$0xff] %vm1004_vm3, %v1077_v59 }
 0x310   :  { %1191 = vst.msk [vmem:[%s2035_s18 + $0x30] sm:$0xff] %vm1004_vm3, %v1081_v56 }
 0x311   :  { %1195 = vst.msk [vmem:[%s2035_s18 + $0x50] sm:$0xff] %vm1004_vm3, %v1085_v62 }

// kernel: run.18
= control target key start
LH: loop header
LB: loop body
LE: loop exit
PB: predicated region body
PF: predicated region fallthrough
CT: control target
= control target key end

     0   :  { %v16_v12 = vlaneseq  ;;  %v78_v19 = vmov 1.0   ;;  %s148_s1 = inlined_call_operand.vmem [shape: f32[128,128], index: 1, kind: input, shape index: {}]   ;;  %s149_s0 = inlined_call_operand.vmem [shape: s32[1,128], index: 0, kind: input, shape index: {}]   ;;  %s150_s2 = inlined_call_operand.vmem [shape: f32[8,128], index: 2, kind: output, shape index: {}]  }
   0x1   :  { %v42_v0 = vld [vmem:[%s148_s1 + $0x78] sm:$0xff]  ;;  %v41_v1 = vld [vmem:[%s148_s1 + $0x70] sm:$0xff]  ;;  %v40_v2 = vld [vmem:[%s148_s1 + $0x68] sm:$0xff] }
   0x2   :  { %43 = vmatpush.msra.mxu0 %v42_v0  ;;  %v39_v3 = vld [vmem:[%s148_s1 + $0x60] sm:$0xff]  ;;  %v38_v4 = vld [vmem:[%s148_s1 + $0x58] sm:$0xff]  ;;  %v37_v5 = vld [vmem:[%s148_s1 + $0x50] sm:$0xff]  ;;  %v17_v15 = vshrl.u32 %v16_v12, 7 }
   0x3   :  { %v36_v6 = vld [vmem:[%s148_s1 + $0x48] sm:$0xff]  ;;  %v35_v7 = vld [vmem:[%s148_s1 + $0x40] sm:$0xff]  ;;  %v34_v8 = vld [vmem:[%s148_s1 + $0x38] sm:$0xff] }
   0x4   :  { %44 = vmatpush.msra.mxu0 %v41_v1  ;;  %v33_v9 = vld [vmem:[%s148_s1 + $0x30] sm:$0xff]  ;;  %v32_v10 = vld [vmem:[%s148_s1 + $0x28] sm:$0xff]  ;;  %v31_v11 = vld [vmem:[%s148_s1 + $0x20] sm:$0xff] }
   0x5   :  { %v30_v13 = vld [vmem:[%s148_s1 + $0x18] sm:$0xff]  ;;  %v29_v14 = vld [vmem:[%s148_s1 + $0x10] sm:$0xff]  ;;  %v77_v16 = vld [vmem:[%s149_s0] ss:$0 sm:$0xff] }
   0x6   :  { %45 = vmatpush.msra.mxu0 %v40_v2  ;;  %v28_v17 = vld [vmem:[%s148_s1 + $0x8] sm:$0xff]  ;;  %v27_v18 = vld [vmem:[%s148_s1] sm:$0xff]  ;;  %vm23_vm0 = vcmp.eq.s32.totalorder %v17_v15, %v77_v16 }
   0x8   :  { %46 = vmatpush.msra.mxu0 %v39_v3 }
   0xa   :  { %47 = vmatpush.msra.mxu0 %v38_v4 }
   0xc   :  { %48 = vmatpush.msra.mxu0 %v37_v5 }
   0xe   :  { %49 = vmatpush.msra.mxu0 %v36_v6 }
  0x10   :  { %50 = vmatpush.msra.mxu0 %v35_v7 }
  0x12   :  { %51 = vmatpush.msra.mxu0 %v34_v8 }
  0x14   :  { %52 = vmatpush.msra.mxu0 %v33_v9 }
  0x16   :  { %53 = vmatpush.msra.mxu0 %v32_v10 }
  0x18   :  { %54 = vmatpush.msra.mxu0 %v31_v11 }
  0x1a   :  { %55 = vmatpush.msra.mxu0 %v30_v13 }
  0x1c   :  { %56 = vmatpush.msra.mxu0 %v29_v14 }
  0x1e   :  { %57 = vmatpush.msra.mxu0 %v28_v17 }
  0x20   :  { %58 = vmatpush.msra.mxu0 %v27_v18 }
  0x21   :  { %75 = vmatmul.msk.f32.vlgmr.msra.gmra.mxu0 %vm23_vm0, %v78_v19 }
  0x9e   :  { %v60_v20 = vpop.f32.mrf.mxu0 }
  0x9f   :  { %69 = vst [vmem:[%s150_s2] sm:$0xff] %v60_v20 }

// kernel: run.19
= control target key start
LH: loop header
LB: loop body
LE: loop exit
PB: predicated region body
PF: predicated region fallthrough
CT: control target
= control target key end

     0   :  { %s1625_s6 = smov 1   ;;  %s1626_s10 = smov 2   ;;  %s2068_s0 = inlined_call_operand.smem [shape: u32[31], index: -1, kind: input, shape index: {}] }
   0x1   :  { %s1682_s5 = sld [smem:[%s2068_s0]]   ;;  %s1627_s14 = smov 3  }
   0x2   :  { %s1687_s9 = sld [smem:[%s2068_s0 + %s1625_s6]]   ;;  %s1628_s18 = smov 4  }
   0x3   :  { %s1692_s13 = sld [smem:[%s2068_s0 + %s1626_s10]]   ;;  %s1629_s22 = smov 5  }
   0x4   :  { %s1697_s17 = sld [smem:[%s2068_s0 + %s1627_s14]]   ;;  %s1630_s26 = smov 6  }
   0x5   :  { %s1702_s21 = sld [smem:[%s2068_s0 + %s1628_s18]]   ;;  %s1631_s30 = smov 7  }
   0x6   :  { %s1707_s25 = sld [smem:[%s2068_s0 + %s1629_s22]]   ;;  %s1632_s4 = smov 8  }
   0x7   :  { %s1712_s29 = sld [smem:[%s2068_s0 + %s1630_s26]]   ;;  %s1633_s10 = smov 9  }
   0x8   :  { %s1717_s3 = sld [smem:[%s2068_s0 + %s1631_s30]]   ;;  %s1634_s15 = smov 10  }
   0x9   :  { %s1722_s8 = sld [smem:[%s2068_s0 + %s1632_s4]]   ;;  %s1635_s20 = smov 11  }
   0xa   :  { %s1727_s14 = sld [smem:[%s2068_s0 + %s1633_s10]]   ;;  %s1636_s26 = smov 12  }
   0xb   :  { %2070 = sst [smem:[#allocation5_spill]] %s1702_s21  ;;  %s1637_s1 = smov 13  }
   0xc   :  { %s1732_s19 = sld [smem:[%s2068_s0 + %s1634_s15]]   ;;  %s1638_s7 = smov 14  }
   0xd   :  { %s1737_s24 = sld [smem:[%s2068_s0 + %s1635_s20]]   ;;  %s1639_s15 = smov 15  }
   0xe   :  { %s1742_s30 = sld [smem:[%s2068_s0 + %s1636_s26]]   ;;  %s1640_s22 = smov 16  }
   0xf   :  { %s1747_s6 = sld [smem:[%s2068_s0 + %s1637_s1]]   ;;  %s1641_s28 = smov 17  }
  0x10   :  { %2071 = sst [smem:[#allocation6_spill]] %s1727_s14 }
  0x11   :  { %s1752_s12 = sld [smem:[%s2068_s0 + %s1638_s7]]   ;;  %s1642_s7 = smov 18  }
  0x12   :  { %s1757_s20 = sld [smem:[%s2068_s0 + %s1639_s15]]   ;;  %s1643_s15 = smov 19  }
  0x13   :  { %s1762_s27 = sld [smem:[%s2068_s0 + %s1640_s22]]   ;;  %s1644_s22 = smov 20  }
  0x14   :  { %s1767_s4 = sld [smem:[%s2068_s0 + %s1641_s28]]   ;;  %s1645_s28 = smov 21  }
  0x15   :  { %2072 = sst [smem:[#allocation7_spill]] %s1747_s6 }
  0x16   :  { %s1772_s14 = sld [smem:[%s2068_s0 + %s1642_s7]]   ;;  %s1646_s7 = smov 22  }
  0x17   :  { %2073 = sst [smem:[#allocation8_spill]] %s1752_s12 }
  0x18   :  { %s1777_s12 = sld [smem:[%s2068_s0 + %s1643_s15]]   ;;  %s1647_s15 = smov 23  }
  0x19   :  { %s1782_s21 = sld [smem:[%s2068_s0 + %s1644_s22]]   ;;  %s1648_s22 = smov 24  }
  0x1a   :  { %2074 = sst [smem:[#allocation9_spill]] %s1767_s4 }
  0x1b   :  { %s1787_s4 = sld [smem:[%s2068_s0 + %s1645_s28]]   ;;  %s1649_s28 = smov 25  }
  0x1c   :  { %2075 = sst [smem:[#allocation10_spill]] %s1772_s14 }
  0x1d   :  { %s1792_s14 = sld [smem:[%s2068_s0 + %s1646_s7]]   ;;  %s1650_s7 = smov 26  }
  0x1e   :  { %2076 = sst [smem:[#allocation11_spill]] %s1777_s12 }
  0x1f   :  { %s1797_s12 = sld [smem:[%s2068_s0 + %s1647_s15]]   ;;  %s1651_s15 = smov 27  }
  0x20   :  { %s1802_s6 = sld [smem:[%s2068_s0 + %s1648_s22]]   ;;  %s1652_s22 = smov 28  }
  0x21   :  { %2077 = sst [smem:[#allocation12_spill]] %s1787_s4 }
  0x22   :  { %s1807_s4 = sld [smem:[%s2068_s0 + %s1649_s28]]   ;;  %s1653_s28 = smov 29  }
  0x23   :  { %2078 = sst [smem:[#allocation13_spill]] %s1792_s14 }
  0x24   :  { %s1812_s14 = sld [smem:[%s2068_s0 + %s1650_s7]]   ;;  %s1654_s7 = smov 30  }
  0x25   :  { %2079 = sst [smem:[#allocation14_spill]] %s1797_s12 }
  0x26   :  { %2080 = sst [smem:[#allocation15_spill]] %s1802_s6 }
  0x27   :  { %s1817_s12 = sld [smem:[%s2068_s0 + %s1651_s15]]  }
  0x28   :  { %2081 = sst [smem:[#allocation16_spill]] %s1807_s4 }
  0x29   :  { %s1822_s6 = sld [smem:[%s2068_s0 + %s1652_s22]]  }
  0x2a   :  { %2082 = sst [smem:[#allocation17_spill]] %s1812_s14 }
  0x2b   :  { %s1827_s4 = sld [smem:[%s2068_s0 + %s1653_s28]]  }
  0x2c   :  { %s1832_s14 = sld [smem:[%s2068_s0 + %s1654_s7]]  }
  0x2d   :  { %v1835_v0 = vld [vmem:[%s1682_s5] sm:$0x3]  ;;  %v1655_v1 = vmov 36  }
  0x2e   :  { %1557 = vset.pattern.permute.xlu0 %v1655_v1  ;;  %v161_v2 = vmax.f32 %v1835_v0, 1.0 }
  0x2f   :  { %67 = vsyncpa [#allocation3], 0  ;;  %v1656_v3 = vmov 22   ;;  %s1657_s0 = smov 96   ;;  %s1658_s5 = smov 104   ;;  %vm275_vm4 = vcmask 1043456  }
  0x30   :  { %166 = vperm.xlu0 %1557, %v161_v2   ;;  %1558 = vset.pattern.permute.xlu1 %v1656_v3  ;;  %s1659_s15 = smov 100   ;;  %v1855_v16 = vld [vmem:[%s1692_s13] sm:$0x3]  ;;  %vm272_vm5 = vcmask 31744   ;;  %s1660_s13 = smov 108   ;;  %vm609_vm10 = vcmask 1041408  }
  0x31   :  { %v496_v17 = vmax.f32 %v1855_v16, 1.0  ;;  %v126_v20 = vld [vmem:[%s1712_s29] sm:$0xf]  ;;  %s1661_s29 = smov 110   ;;  %s1662_s16 = smov 112   ;;  %vm606_vm15 = vcmask 15360  }
  0x32   :  { %1448 = vmatpush.msk.msra.mxu2 %vm275_vm4, %v126_v20  ;;  %1444 = vmatpush.msk.msra.mxu0 %vm275_vm4, %v126_v20  ;;  %v495_v37 = vld [vmem:[%s1697_s17] sm:$0x3]  ;;  %s1663_s18 = smov 12   ;;  %s1664_s22 = smov 6  }
  0x33   :  { %v1460_v18 = vadd.f32 -1.0, %v496_v17  ;;  %1446 = vmatpush.msk.msra.mxu1 %vm275_vm4, %v126_v20  ;;  %s1665_s23 = smov 2   ;;  %s1666_s17 = smov 8   ;;  %v135_v41 = vld [vmem:[%s1732_s19] sm:$0xf] }
  0x34   :  { %1456 = vmatpush.msk.msrb.mxu2 %vm275_vm4, %v135_v41  ;;  %v1888_v43 = vld [vmem:[%s1737_s24] sm:$0x3]  ;;  %s1669_s19 = smov 16   ;;  %s1670_s24 = smov 20  }
  0x35   :  { %v498_v19 = vmax.f32 %v1460_v18, 1.0  ;;  %1454 = vmatpush.msk.msrb.mxu1 %vm275_vm4, %v135_v41  ;;  %v133_v50 = vld [vmem:[%s1722_s8] sm:$0xf]  ;;  %s1668_s8 = smov 4   ;;  %s2088_s26 = sld [smem:[#allocation8_spill]] }
  0x36   :  { %1450 = vmatpush.msk.msra.mxu3 %vm275_vm4, %v133_v50  ;;  %v139_v50 = vld [vmem:[%s1742_s30 + $0x10] sm:$0xff]  ;;  %s2089_s28 = sld [smem:[#allocation12_spill]] }
  0x37   :  { %s2090_s1 = sld [smem:[#allocation13_spill]] }
  0x38   :  { %1458 = vmatpush.msk.msrb.mxu3 %vm275_vm4, %v135_v41  ;;  %s2091_s2 = sld [smem:[#allocation6_spill]] }
  0x39   :  { %s2092_s7 = sld [smem:[#allocation16_spill]] }
  0x3a   :  { %s2093_s10 = sld [smem:[#allocation14_spill]] }
  0x3b   :  { %s2094_s11 = sld [smem:[#allocation15_spill]] }
  0xa2   :  { %v1841_v4 = vpop.permute.xlu0 %166 }
  0xa3   :  { %1567 = vrcp.f32 %v1841_v4  ;;  %v180_v8 = vand.u32 2147483648, %v1841_v4  ;;  %v178_v10 = vand.u32 2147483647, %v1841_v4  ;;  %vm174_vm1 = vweird.f32 %v1841_v4 }
  0xa5   :  { %v181_v12 = vor.u32 1.1754944e-38, %v180_v8  ;;  %vm179_vm3 = vcmp.eq.f32.partialorder %v178_v10, 8.507059e+37 }
  0xa9   :  { %v1568_v5 = vpop.eup %1567 }
  0xaa   :  { %v170_v6 = vmul.f32 %v1568_v5, %v1841_v4  ;;  %vm175_vm0 = vweird.f32 %v1568_v5 }
  0xab   :  { %vm176_vm2 = vmor %vm174_vm1, %vm175_vm0 }
  0xac   :  { %v171_v7 = vsub.f32 1.0, %v170_v6 }
  0xae   :  { %v172_v9 = vmul.f32 %v1568_v5, %v171_v7 }
  0xb0   :  { %v173_v11 = vadd.f32 %v1568_v5, %v172_v9 }
  0xb2   :  { %v177_v13 = vsel %vm176_vm2, %v1568_v5, %v173_v11 }
  0xb3   :  { %v182_v14 = vsel %vm179_vm3, %v181_v12, %v177_v13 }
  0xb4   :  { %v1849_v15 = vmul.f32 %v182_v14, %v1835_v0 }
  0xb6   :  { %323 = vrot.lane.b32.xlu2 %v1849_v15, %s1657_s0  ;;  %270 = vrot.lane.b32.xlu1 %v1849_v15, %s1658_s5  ;;  %v184_v39 = vmul.f32 %v1849_v15, %v1841_v4  ;;  %s1400_s0 = sshll.u32 %s1827_s4, 4  ;;  %s1401_s0 = int_to_ptr.hbm [resolvable:$true] %s1400_s0 }
  0xb7   :  { %299 = vrot.lane.b32.xlu0 %v1849_v15, %s1659_s15  ;;  %s1611_s5 = sshra.s32 %s1401_s0, 4  ;;  %s1612_s5 = int_to_ptr.hbm [resolvable:$true] %s1611_s5 }
  0xb8   :  { %v1879_v40 = vmul.f32 %v184_v39, %v1849_v15  ;;  %s1613_s15 = scalar_lea.hbm %s1612_s5, 2  ;;  %p1616_p1 = scmp.lt.s32.totalorder %s1612_s5, %s1827_s4 }
  0xb9   :  { %p1614_p0 = scmp.ne.s32.totalorder %s1612_s5, %s1613_s15 }
  0xbe   :  { %501 = vperm.xlu1 %1558, %v496_v17  }
  0xc6   :  { %529 = vperm.xlu1 %1558, %v498_v19  }
 0x110   :  { %v324_v21 = vpop.permute.xlu2 %323 }
 0x111   :  { %1449 = vmatmul.msk.f32.vlgmr.msra.gmra.mxu2 %vm272_vm5, %v324_v21 }
 0x112   :  { %1463 = vmatpush.msk.msra.mxu2 %vm609_vm10, %v1888_v43 }
 0x128   :  { %v271_v22 = vpop.permute.xlu1 %270 }
 0x129   :  { %v300_v23 = vpop.permute.xlu0 %299  ;;  %1445 = vmatmul.msk.f32.vlgmr.msra.gmra.mxu0 %vm272_vm5, %v271_v22 }
 0x12a   :  { %1447 = vmatmul.msk.f32.vlgmr.msra.gmra.mxu1 %vm272_vm5, %v300_v23 }
 0x12b   :  { %1461 = vmatpush.msk.msra.mxu1 %vm609_vm10, %v1888_v43 }
 0x130   :  { %v502_v24 = vpop.permute.xlu1 %501 }
 0x131   :  { %1569 = vrcp.f32 %v502_v24  ;;  %v515_v28 = vand.u32 2147483648, %v502_v24  ;;  %v513_v30 = vand.u32 2147483647, %v502_v24  ;;  %vm509_vm7 = vweird.f32 %v502_v24 }
 0x133   :  { %v516_v32 = vor.u32 1.1754944e-38, %v515_v28  ;;  %vm514_vm9 = vcmp.eq.f32.partialorder %v513_v30, 8.507059e+37  ;;  %v1443_v30 = vadd.f32 -1.0, %v161_v2 }
 0x137   :  { %v1570_v25 = vpop.eup %1569 }
 0x138   :  { %v505_v26 = vmul.f32 %v1570_v25, %v502_v24  ;;  %vm510_vm6 = vweird.f32 %v1570_v25  ;;  %v530_v42 = vpop.permute.xlu1 %529 }
 0x139   :  { %vm511_vm8 = vmor %vm509_vm7, %vm510_vm6  ;;  %1571 = vrcp.f32 %v530_v42  ;;  %v543_v51 = vand.u32 2147483648, %v530_v42  ;;  %vm537_vm12 = vweird.f32 %v530_v42  ;;  %v541_v52 = vand.u32 2147483647, %v530_v42 }
 0x13a   :  { %v506_v27 = vsub.f32 1.0, %v505_v26 }
 0x13b   :  { %v544_v60 = vor.u32 1.1754944e-38, %v543_v51  ;;  %vm542_vm14 = vcmp.eq.f32.partialorder %v541_v52, 8.507059e+37  ;;  %v138_v51 = vld [vmem:[%s1742_s30 + $0x8] sm:$0xff]  ;;  %v137_v52 = vld [vmem:[%s1742_s30] sm:$0xff] }
 0x13c   :  { %v507_v29 = vmul.f32 %v1570_v25, %v506_v27 }
 0x13e   :  { %v508_v31 = vadd.f32 %v1570_v25, %v507_v29 }
 0x13f   :  { %v1572_v44 = vpop.eup %1571 }
 0x140   :  { %v512_v33 = vsel %vm511_vm8, %v1570_v25, %v508_v31  ;;  %v533_v45 = vmul.f32 %v1572_v44, %v530_v42  ;;  %vm538_vm11 = vweird.f32 %v1572_v44  ;;  %vm729_vm8 = vcmask 1045504  }
 0x141   :  { %v517_v34 = vsel %vm514_vm9, %v516_v32, %v512_v33  ;;  %vm539_vm13 = vmor %vm537_vm12, %vm538_vm11  ;;  %vm592_vm9 = vcmask 48128   ;;  %vm594_vm11 = vcmask 97280   ;;  %vm596_vm12 = vcmask 146432  }
 0x142   :  { %v1866_v35 = vmul.f32 %v517_v34, %v1855_v16  ;;  %v534_v46 = vsub.f32 1.0, %v533_v45 }
 0x144   :  { %657 = vrot.lane.b32.xlu1 %v1866_v35, %s1660_s13  ;;  %633 = vrot.lane.b32.xlu2 %v1866_v35, %s1661_s29  ;;  %v519_v36 = vmul.f32 %v1866_v35, %v502_v24  ;;  %v535_v48 = vmul.f32 %v1572_v44, %v534_v46  ;;  %s1615_s13 = scalar_lea.hbm %s1827_s4, 2 }
 0x145   :  { %604 = vrot.lane.b32.xlu0 %v1866_v35, %s1662_s16  ;;  %p1617_p2 = scmp.lt.s32.totalorder %s1615_s13, %s1613_s15 }
 0x146   :  { %v520_v38 = vmul.f32 %v519_v36, %v1866_v35  ;;  %v536_v49 = vadd.f32 %v1572_v44, %v535_v48 }
 0x147   :  { %p1618_p3 = por %p1617_p2, %p1616_p1 }
 0x148   :  { %v540_v57 = vsel %vm539_vm13, %v1572_v44, %v536_v49  ;;  %v1920_v49 = vld [vmem:[%s1757_s20] sm:$0x3]  ;;  %vm261_vm13 = vcmask 195584   ;;  %s2085_s20 = sld [smem:[#allocation5_spill]] }
 0x149   :  { %v545_v1 = vsel %vm542_vm14, %v544_v60, %v540_v57  ;;  %vm599_vm14 = vcmask 211968   ;;  %p1619_p4 = pnand %p1618_p3, %p1614_p0 }
 0x14c   :  { %585 = vrot.lane.b32.xlu1 %v495_v37, %s1663_s18  ;;  %522 = vrot.lane.b32.xlu2 %v520_v38, %s1664_s22 }
 0x14d   :  { %559 = vrot.lane.b32.xlu0 %v520_v38, %s1665_s23  ;;  %v160_v38 = vld [vmem:[%s1687_s9] sm:$0x3]  ;;  %s1667_s9 = smov 14  }
 0x154   :  { %578 = vrot.lane.b32.xlu2 %v495_v37, %s1664_s22  ;;  %187 = vrot.lane.b32.xlu1 %v1879_v40, %s1666_s17 }
 0x194   :  { %v344_v55 = vpop.f32.mrf.mxu2 }
 0x195   :  { %v350_v63 = vmul.f32 %v344_v55, %v344_v55 }
 0x19e   :  { %v634_v47 = vpop.permute.xlu2 %633 }
 0x1a6   :  { %v523_v53 = vpop.permute.xlu2 %522  ;;  %v296_v54 = vpop.f32.mrf.mxu0 }
 0x1a7   :  { %v525_v56 = vsub.f32 %v1855_v16, %v523_v53  ;;  %v347_v58 = vmul.f32 %v296_v54, %v296_v54  ;;  %v320_v59 = vpop.f32.mrf.mxu1  ;;  %1455 = vmatmul.msk.f32.vlgmr.msrb.gmra.mxu1 %vm272_vm5, %v296_v54 }
 0x1a8   :  { %v348_v61 = vmul.f32 %v320_v59, %v320_v59  ;;  %1457 = vmatmul.msk.f32.vlgmr.msrb.gmra.mxu2 %vm272_vm5, %v320_v59 }
 0x1a9   :  { %v526_v62 = vmax.f32 %v525_v56, 0.0  ;;  %1471 = vmatpush.msk.msrb.mxu2 %vm609_vm10, %v1920_v49 }
 0x1aa   :  { %v349_v4 = vadd.f32 %v348_v61, %v347_v58 }
 0x1ab   :  { %v546_v5 = vmul.f32 %v545_v1, %v526_v62 }
 0x1ac   :  { %v351_v6 = vadd.f32 %v350_v63, %v349_v4 }
 0x1ad   :  { %1573 = vrsqrt.f32 %v546_v5  ;;  %vm554_vm0 = vcmp.eq.f32.partialorder %v546_v5, inf  ;;  %v557_v24 = vand.u32 2147483648, %v546_v5  ;;  %vm556_vm1 = vcmp.eq.f32.partialorder %v546_v5, 0.0 }
 0x1ae   :  { %v352_v7 = vmax.f32 %v351_v6, 1e-08  ;;  %v1477_v6 = vld [vmem:[%s1707_s25 + $0x2] sm:$0x3] }
 0x1b0   :  { %1464 = vmatmul.msk.f32.vlgmr.msra.gmra.mxu2 %vm606_vm15, %v634_v47  ;;  %1575 = vrsqrt.f32 %v352_v7  ;;  %vm360_vm2 = vcmp.eq.f32.partialorder %v352_v7, inf  ;;  %v363_v32 = vand.u32 2147483648, %v352_v7  ;;  %vm362_vm3 = vcmp.eq.f32.partialorder %v352_v7, 0.0 }
 0x1b3   :  { %v1574_v8 = vpop.eup %1573 }
 0x1b4   :  { %v548_v9 = vmul.f32 %v1574_v8, %v546_v5 }
 0x1b6   :  { %v1576_v10 = vpop.eup %1575  ;;  %v549_v11 = vmul.f32 %v1574_v8, %v548_v9  ;;  %v658_v44 = vpop.permute.xlu1 %657 }
 0x1b7   :  { %v605_v12 = vpop.permute.xlu0 %604  ;;  %v354_v13 = vmul.f32 %v1576_v10, %v352_v7 }
 0x1b8   :  { %1462 = vmatmul.msk.f32.vlgmr.msra.gmra.mxu1 %vm606_vm15, %v605_v12  ;;  %v550_v14 = vmul.f32 0.5, %v549_v11 }
 0x1b9   :  { %v355_v17 = vmul.f32 %v1576_v10, %v354_v13 }
 0x1ba   :  { %v551_v18 = vsub.f32 1.5, %v550_v14 }
 0x1bb   :  { %v356_v19 = vmul.f32 0.5, %v355_v17 }
 0x1bc   :  { %v552_v20 = vmul.f32 %v1574_v8, %v551_v18  ;;  %v830_v8 = vld [vmem:[%s1707_s25] sm:$0x3] }
 0x1bd   :  { %v357_v21 = vsub.f32 1.5, %v356_v19 }
 0x1be   :  { %v553_v22 = vmul.f32 %v552_v20, %v546_v5  ;;  %v586_v60 = vpop.permute.xlu1 %585 }
 0x1bf   :  { %v560_v23 = vpop.permute.xlu0 %559  ;;  %v358_v25 = vmul.f32 %v1576_v10, %v357_v21 }
 0x1c0   :  { %v562_v26 = vsub.f32 %v1855_v16, %v560_v23  ;;  %v555_v27 = vsel %vm554_vm0, %v546_v5, %v553_v22  ;;  %v163_v16 = vmax.f32 %v1443_v30, 1.0  ;;  %vm601_vm0 = vcmask 228352   ;;  %v1478_v5 = vld [vmem:[%s1707_s25 + $0x4] sm:$0x3] }
 0x1c1   :  { %v558_v28 = vsel %vm556_vm1, %v557_v24, %v555_v27  ;;  %v359_v29 = vmul.f32 %v358_v25, %v352_v7  ;;  %vm725_vm1 = vcmask 244736  }
 0x1c2   :  { %v563_v31 = vmax.f32 %v562_v26, 0.0  ;;  %582 = vrot.lane.b32.xlu0 %v558_v28, %s1663_s18 }
 0x1c3   :  { %v361_v33 = vsel %vm360_vm2, %v352_v7, %v359_v29 }
 0x1c4   :  { %v564_v34 = vmul.f32 %v563_v31, %v545_v1  ;;  %v364_v36 = vsel %vm362_vm3, %v363_v32, %v361_v33 }
 0x1c5   :  { %1451 = vmatmul.msk.f32.vlgmr.msra.gmra.mxu3 %vm272_vm5, %v364_v36 }
 0x1c6   :  { %1465 = vmatpush.msk.msra.mxu3 %vm609_vm10, %v1888_v43  ;;  %1577 = vrsqrt.f32 %v564_v34  ;;  %vm572_vm6 = vcmp.eq.f32.partialorder %v564_v34, inf  ;;  %v575_v46 = vand.u32 2147483648, %v564_v34  ;;  %vm574_vm7 = vcmp.eq.f32.partialorder %v564_v34, 0.0  ;;  %v188_v10 = vpop.permute.xlu1 %187 }
 0x1c7   :  { %v190_v14 = vsub.f32 %v1835_v0, %v188_v10 }
 0x1c9   :  { %v191_v23 = vmax.f32 %v190_v14, 0.0 }
 0x1ca   :  { %194 = vperm.xlu0 %1557, %v163_v16  }
 0x1cc   :  { %v1578_v37 = vpop.eup %1577 }
 0x1cd   :  { %1459 = vmatmul.msk.f32.vlgmr.msrb.gmra.mxu3 %vm272_vm5, %v344_v55  ;;  %v566_v2 = vmul.f32 %v1578_v37, %v564_v34  ;;  %v579_v55 = vpop.permute.xlu2 %578 }
 0x1ce   :  { %1473 = vmatpush.msk.msrb.mxu3 %vm609_vm10, %v1920_v49  ;;  %v593_v56 = vsel %vm592_vm9, %v1866_v35, %v579_v55 }
 0x1cf   :  { %v567_v39 = vmul.f32 %v1578_v37, %v566_v2  ;;  %v595_v58 = vsel %vm594_vm11, %v593_v56, %v579_v55 }
 0x1d1   :  { %v568_v41 = vmul.f32 0.5, %v567_v39 }
 0x1d2   :  { %243 = vrot.lane.b32.xlu0 %v160_v38, %s1666_s17 }
 0x1d3   :  { %v569_v42 = vsub.f32 1.5, %v568_v41  ;;  %1559 = vset.pattern.permute.xlu0 %v1656_v3  ;;  %v140_v3 = vld [vmem:[%s1742_s30 + $0x18] sm:$0x3f]  ;;  %s2084_s30 = sld [smem:[#allocation9_spill]] }
 0x1d4   :  { %1469 = vmatpush.msk.msrb.mxu1 %vm729_vm8, %v140_v3  ;;  %v1960_v3 = vld [vmem:[%s1782_s21] sm:$0x3]  ;;  %s2083_s21 = sld [smem:[#allocation7_spill]] }
 0x1d5   :  { %1466 = vmatmul.msk.f32.vlgmr.msra.gmra.mxu3 %vm606_vm15, %v658_v44  ;;  %v570_v43 = vmul.f32 %v1578_v37, %v569_v42 }
 0x1d6   :  { %746 = vmatpush.msrb.mxu1 %v139_v50 }
 0x1d7   :  { %v571_v45 = vmul.f32 %v570_v43, %v564_v34 }
 0x1d8   :  { %747 = vmatpush.msrb.mxu1 %v138_v51  ;;  %v132_v51 = vld [vmem:[%s1717_s3 + $0x28] sm:$0xf] }
 0x1d9   :  { %v573_v47 = vsel %vm572_vm6, %v564_v34, %v571_v45  ;;  %1452 = vmatpush.msk.msrb.mxu0 %vm275_vm4, %v132_v51  ;;  %vm955_vm4 = vcmask 1044480  }
 0x1da   :  { %v576_v48 = vsel %vm574_vm7, %v575_v46, %v573_v47  ;;  %748 = vmatpush.msrb.mxu1 %v137_v52  ;;  %v131_v52 = vld [vmem:[%s1717_s3 + $0x20] sm:$0xff] }
 0x1db   :  { %589 = vrot.lane.b32.xlu2 %v576_v48, %s1667_s9  ;;  %409 = vmatpush.msrb.mxu0 %v131_v52 }
 0x1e3   :  { %224 = vrot.lane.b32.xlu2 %v1879_v40, %s1668_s8  ;;  %v144_v40 = vld [vmem:[%s1762_s27] sm:$0x3]  ;;  %s2087_s27 = sld [smem:[#allocation11_spill]] }
 0x1e4   :  { %1481 = vmatpush.msk.msra.mxu2 %vm609_vm10, %v144_v40  ;;  %1483 = vmatpush.msk.msra.mxu3 %vm609_vm10, %v144_v40 }
 0x1e5   :  { %1479 = vmatpush.msk.msra.mxu1 %vm609_vm10, %v144_v40  ;;  %v130_v40 = vld [vmem:[%s1717_s3 + $0x18] sm:$0xff] }
 0x1e6   :  { %410 = vmatpush.msrb.mxu0 %v130_v40 }
 0x1eb   :  { %250 = vrot.lane.b32.xlu2 %v160_v38, %s1669_s19 }
 0x224   :  { %v1935_v54 = vpop.f32.mrf.mxu1 }
 0x22b   :  { %v1933_v53 = vpop.f32.mrf.mxu2 }
 0x233   :  { %v1939_v57 = vpop.f32.mrf.mxu2 }
 0x234   :  { %1474 = vmatmul.msk.f32.vlgmr.msrb.gmra.mxu3 %vm606_vm15, %v1939_v57  ;;  %v583_v59 = vpop.permute.xlu0 %582 }
 0x235   :  { %v597_v61 = vsel %vm596_vm12, %v595_v58, %v583_v59  ;;  %v1943_v62 = vpop.f32.mrf.mxu1  ;;  %v590_v63 = vpop.permute.xlu2 %589  ;;  %1491 = vmatpush.msk.msrb.mxu3 %vm609_vm10, %v1960_v3  ;;  %v682_v58 = vmul.f32 %v1939_v57, %v1939_v57  ;;  %v141_v57 = vld [vmem:[%s2083_s21] sm:$0x3] }
 0x236   :  { %v598_v35 = vsel %vm261_vm13, %v597_v61, %v586_v60  ;;  %1472 = vmatmul.msk.f32.vlgmr.msrb.gmra.mxu2 %vm606_vm15, %v1943_v62  ;;  %v681_v56 = vmul.f32 %v1943_v62, %v1943_v62  ;;  %v127_v62 = vld [vmem:[%s1717_s3] sm:$0xff] }
 0x237   :  { %v600_v1 = vsel %vm599_vm14, %v598_v35, %v586_v60  ;;  %1489 = vmatpush.msk.msrb.mxu2 %vm609_vm10, %v1960_v3 }
 0x238   :  { %v602_v4 = vsel %vm601_vm0, %v600_v1, %v590_v63  ;;  %v683_v60 = vadd.f32 %v682_v58, %v681_v56  ;;  %v129_v1 = vld [vmem:[%s1717_s3 + $0x10] sm:$0xff]  ;;  %vm257_vm0 = vcmask 64512   ;;  %v1562_v56 = vld [vmem:[%s2087_s27] ss:$0 sm:$0xff] }
 0x239   :  { %1470 = vmatmul.msk.f32.vlgmr.msrb.gmra.mxu1 %vm725_vm1, %v602_v4  ;;  %411 = vmatpush.msrb.mxu0 %v129_v1  ;;  %vm259_vm1 = vcmask 130048  }
 0x23c   :  { %v195_v7 = vpop.permute.xlu0 %194  ;;  %1484 = vmatmul.msk.f32.vlgmr.msra.gmra.mxu3 %vm606_vm15, %v1478_v5  ;;  %v128_v5 = vld [vmem:[%s1717_s3 + $0x8] sm:$0xff]  ;;  %s2086_s3 = sld [smem:[#allocation10_spill]] }
 0x23d   :  { %1579 = vrcp.f32 %v195_v7  ;;  %v225_v12 = vpop.permute.xlu2 %224  ;;  %v208_v17 = vand.u32 2147483648, %v195_v7  ;;  %v206_v20 = vand.u32 2147483647, %v195_v7  ;;  %vm202_vm3 = vweird.f32 %v195_v7  ;;  %412 = vmatpush.msrb.mxu0 %v128_v5 }
 0x23e   :  { %1482 = vmatmul.msk.f32.vlgmr.msra.gmra.mxu2 %vm606_vm15, %v1477_v6  ;;  %v227_v18 = vsub.f32 %v1835_v0, %v225_v12 }
 0x23f   :  { %v209_v22 = vor.u32 1.1754944e-38, %v208_v17  ;;  %vm207_vm7 = vcmp.eq.f32.partialorder %v206_v20, 8.507059e+37  ;;  %413 = vmatpush.msrb.mxu0 %v127_v62  ;;  %v149_v62 = vld [vmem:[%s2089_s28] sm:$0xff] }
 0x240   :  { %v228_v24 = vmax.f32 %v227_v18, 0.0  ;;  %1137 = vmatpush.msra.mxu2 %v149_v62  ;;  %1160 = vmatpush.msra.mxu3 %v149_v62 }
 0x241   :  { %1480 = vmatmul.msk.f32.vlgmr.msra.gmra.mxu1 %vm606_vm15, %v830_v8  ;;  %1467 = vmatpush.msk.msra.mxu0 %vm609_vm10, %v141_v57 }
 0x243   :  { %v1580_v9 = vpop.eup %1579 }
 0x244   :  { %v198_v11 = vmul.f32 %v1580_v9, %v195_v7  ;;  %vm203_vm2 = vweird.f32 %v1580_v9 }
 0x245   :  { %vm204_vm6 = vmor %vm202_vm3, %vm203_vm2  ;;  %vm951_vm2 = vcmask 39936   ;;  %vm263_vm3 = vcmask 261120  }
 0x246   :  { %v199_v13 = vsub.f32 1.0, %v198_v11 }
 0x248   :  { %v200_v19 = vmul.f32 %v1580_v9, %v199_v13  ;;  %v1957_v48 = vpop.f32.mrf.mxu3 }
 0x24a   :  { %v201_v21 = vadd.f32 %v1580_v9, %v200_v19 }
 0x24c   :  { %v205_v25 = vsel %vm204_vm6, %v1580_v9, %v201_v21  ;;  %v145_v21 = vld [vmem:[%s2084_s30] sm:$0x1f]  ;;  %vm265_vm6 = vcmask 293888  }
 0x24d   :  { %v210_v26 = vsel %vm207_vm7, %v209_v22, %v205_v25  ;;  %1487 = vmatpush.msk.msrb.mxu1 %vm955_vm4, %v145_v21  ;;  %vm267_vm7 = vcmask 326656   ;;  %v1560_v21 = vld [vmem:[%s2091_s2] ss:$0 sm:$0xff]  ;;  %vm1206_vm4 = vcmask 154624  }
 0x24e   :  { %v211_v27 = vmul.f32 %v210_v26, %v191_v23  ;;  %v229_v28 = vmul.f32 %v228_v24, %v210_v26  ;;  %v244_v23 = vpop.permute.xlu0 %243  ;;  %v1996_v26 = vld [vmem:[%s2085_s20] sm:$0x3] }
 0x24f   :  { %v258_v24 = vsel %vm257_vm0, %v1849_v15, %v244_v23  ;;  %1488 = vmatmul.msk.f32.vlgmr.msrb.gmra.mxu1 %vm951_vm2, %v1996_v26 }
 0x250   :  { %1581 = vrsqrt.f32 %v229_v28  ;;  %vm237_vm8 = vcmp.eq.f32.partialorder %v229_v28, inf  ;;  %v240_v41 = vand.u32 2147483648, %v229_v28  ;;  %vm239_vm11 = vcmp.eq.f32.partialorder %v229_v28, 0.0  ;;  %v1966_v50 = vpop.f32.mrf.mxu3  ;;  %1114 = vmatpush.msra.mxu1 %v149_v62 }
 0x251   :  { %1583 = vrsqrt.f32 %v211_v27  ;;  %vm219_vm12 = vcmp.eq.f32.partialorder %v211_v27, inf  ;;  %v222_v43 = vand.u32 2147483648, %v211_v27  ;;  %vm221_vm14 = vcmp.eq.f32.partialorder %v211_v27, 0.0 }
 0x256   :  { %v1582_v29 = vpop.eup %1581 }
 0x257   :  { %v1584_v30 = vpop.eup %1583  ;;  %v231_v31 = vmul.f32 %v1582_v29, %v229_v28 }
 0x258   :  { %v213_v0 = vmul.f32 %v1584_v30, %v211_v27  ;;  %v1972_v55 = vpop.f32.mrf.mxu3 }
 0x259   :  { %v232_v32 = vmul.f32 %v1582_v29, %v231_v31  ;;  %v684_v59 = vmul.f32 %v1972_v55, %v1972_v55 }
 0x25a   :  { %v214_v33 = vmul.f32 %v1584_v30, %v213_v0 }
 0x25b   :  { %v233_v34 = vmul.f32 0.5, %v232_v32  ;;  %v685_v63 = vadd.f32 %v684_v59, %v683_v60 }
 0x25c   :  { %v215_v36 = vmul.f32 0.5, %v214_v33 }
 0x25d   :  { %v234_v16 = vsub.f32 1.5, %v233_v34  ;;  %v686_v6 = vmax.f32 %v685_v63, 1e-08 }
 0x25e   :  { %v216_v37 = vsub.f32 1.5, %v215_v36 }
 0x25f   :  { %v235_v2 = vmul.f32 %v1582_v29, %v234_v16  ;;  %1585 = vrsqrt.f32 %v686_v6  ;;  %v260_v29 = vsel %vm259_vm1, %v258_v24, %v244_v23  ;;  %vm1308_vm1 = vcmask 33792  }
 0x260   :  { %v217_v38 = vmul.f32 %v1584_v30, %v216_v37 }
 0x261   :  { %v236_v39 = vmul.f32 %v235_v2, %v229_v28 }
 0x262   :  { %v218_v42 = vmul.f32 %v217_v38, %v211_v27 }
 0x263   :  { %v238_v44 = vsel %vm237_vm8, %v229_v28, %v236_v39  ;;  %v251_v28 = vpop.permute.xlu2 %250  ;;  %vm391_vm8 = vcmask 359424   ;;  %v697_v39 = vand.u32 2147483648, %v686_v6 }
 0x264   :  { %v241_v45 = vsel %vm239_vm11, %v240_v41, %v238_v44  ;;  %v220_v46 = vsel %vm219_vm12, %v211_v27, %v218_v42  ;;  %vm694_vm11 = vcmp.eq.f32.partialorder %v686_v6, inf  ;;  %v146_v41 = vld [vmem:[%s2086_s3] sm:$0x3] }
 0x265   :  { %254 = vrot.lane.b32.xlu0 %v241_v45, %s1670_s24  ;;  %v223_v47 = vsel %vm221_vm14, %v222_v43, %v220_v46  ;;  %v1586_v14 = vpop.eup %1585 }
 0x266   :  { %247 = vrot.lane.b32.xlu1 %v223_v47, %s1669_s19  ;;  %v688_v18 = vmul.f32 %v1586_v14, %v686_v6 }
 0x268   :  { %v689_v20 = vmul.f32 %v1586_v14, %v688_v18 }
 0x26a   :  { %v690_v22 = vmul.f32 0.5, %v689_v20 }
 0x26c   :  { %v691_v25 = vsub.f32 1.5, %v690_v22 }
 0x26e   :  { %v692_v0 = vmul.f32 %v1586_v14, %v691_v25 }
 0x270   :  { %v693_v16 = vmul.f32 %v692_v0, %v686_v6 }
 0x272   :  { %v695_v2 = vsel %vm694_vm11, %v686_v6, %v693_v16 }
 0x2b6   :  { %v1980_v61 = vpop.f32.mrf.mxu1 }
 0x2b7   :  { %v803_v35 = vpop.f32.mrf.mxu3 }
 0x2b8   :  { %1077 = vrot.lane.b32.xlu1 %v803_v35, %s1668_s8 }
 0x2b9   :  { %v1984_v4 = vpop.f32.mrf.mxu2 }
 0x2be   :  { %v858_v7 = vpop.f32.mrf.mxu1 }
 0x2bf   :  { %1490 = vmatmul.msk.f32.vlgmr.msrb.gmra.mxu2 %vm606_vm15, %v858_v7  ;;  %v907_v8 = vmul.f32 %v858_v7, %v858_v7  ;;  %v904_v10 = vpop.f32.mrf.mxu3 }
 0x2c0   :  { %v910_v13 = vmul.f32 %v904_v10, %v904_v10 }
 0x2c1   :  { %v881_v9 = vpop.f32.mrf.mxu2 }
 0x2c2   :  { %v908_v11 = vmul.f32 %v881_v9, %v881_v9  ;;  %1492 = vmatmul.msk.f32.vlgmr.msrb.gmra.mxu3 %vm606_vm15, %v881_v9  ;;  %v152_v9 = vld [vmem:[%s2090_s1 + $0x10] sm:$0x7] }
 0x2c4   :  { %v909_v12 = vadd.f32 %v908_v11, %v907_v8 }
 0x2c6   :  { %v911_v17 = vadd.f32 %v910_v13, %v909_v12 }
 0x2c8   :  { %v912_v19 = vmax.f32 %v911_v17, 1e-08 }
 0x2ca   :  { %1587 = vrsqrt.f32 %v912_v19  ;;  %vm920_vm12 = vcmp.eq.f32.partialorder %v912_v19, inf  ;;  %vm922_vm14 = vcmp.eq.f32.partialorder %v912_v19, 0.0 }
 0x2d0   :  { %v1588_v27 = vpop.eup %1587 }
 0x2d1   :  { %v914_v32 = vmul.f32 %v1588_v27, %v912_v19 }
 0x2d3   :  { %v915_v37 = vmul.f32 %v1588_v27, %v914_v32 }
 0x2d5   :  { %v916_v38 = vmul.f32 0.5, %v915_v37 }
 0x2d7   :  { %v255_v15 = vpop.permute.xlu0 %254  ;;  %v917_v44 = vsub.f32 1.5, %v916_v38 }
 0x2d8   :  { %v248_v30 = vpop.permute.xlu1 %247 }
 0x2d9   :  { %v262_v31 = vsel %vm261_vm13, %v260_v29, %v248_v30  ;;  %vm696_vm13 = vcmp.eq.f32.partialorder %v686_v6, 0.0  ;;  %v918_v43 = vmul.f32 %v1588_v27, %v917_v44  ;;  %v155_v27 = vld [vmem:[%s2092_s7] sm:$0xff] }
 0x2da   :  { %v264_v33 = vsel %vm263_vm3, %v262_v31, %v251_v28  ;;  %v698_v42 = vsel %vm696_vm13, %v697_v39, %v695_v2  ;;  %1279 = vmatpush.msrb.mxu3 %v155_v27  ;;  %1256 = vmatpush.msrb.mxu2 %v155_v27 }
 0x2db   :  { %v266_v34 = vsel %vm265_vm6, %v264_v33, %v251_v28  ;;  %v919_v45 = vmul.f32 %v918_v43, %v912_v19  ;;  %v153_v28 = vld [vmem:[%s2093_s10] sm:$0xff] }
 0x2dc   :  { %v268_v36 = vsel %vm267_vm7, %v266_v34, %v255_v15 }
 0x2dd   :  { %1453 = vmatmul.msk.f32.vlgmr.msrb.gmra.mxu0 %vm391_vm8, %v268_v36  ;;  %v921_v46 = vsel %vm920_vm12, %v912_v19, %v919_v45  ;;  %v1563_v45 = vld [vmem:[%s2094_s11] ss:$0 sm:$0xff] }
 0x2de   :  { %1475 = vmatpush.msk.msrb.mxu0 %vm609_vm10, %v1920_v49  ;;  %v923_v49 = vand.u32 2147483648, %v912_v19 }
 0x2e0   :  { %v924_v47 = vsel %vm922_vm14, %v923_v49, %v921_v46  ;;  %v1347_v46 = vld [vmem:[%s1707_s25] sm:$0x3] }
 0x2e5   :  { %1468 = vmatmul.msk.f32.vlgmr.msra.gmra.mxu0 %vm606_vm15, %v698_v42 }
 0x2e6   :  { %1485 = vmatpush.msk.msra.mxu0 %vm609_vm10, %v146_v41 }
 0x2ed   :  { %1476 = vmatmul.msk.f32.vlgmr.msrb.gmra.mxu0 %vm606_vm15, %v1972_v55 }
 0x2ee   :  { %1493 = vmatpush.msk.msrb.mxu0 %vm609_vm10, %v1960_v3  ;;  %v976_v3 = vpop.f32.mrf.mxu1  ;;  %vm1210_vm10 = vcmask 1042432  }
 0x2ef   :  { %1499 = vmatpush.msk.msrb.mxu1 %vm1210_vm10, %v152_v9 }
 0x2f5   :  { %1486 = vmatmul.msk.f32.vlgmr.msra.gmra.mxu0 %vm606_vm15, %v924_v47 }
 0x2f6   :  { %1201 = vmatpush.msra.mxu0 %v153_v28 }
 0x2fd   :  { %1494 = vmatmul.msk.f32.vlgmr.msrb.gmra.mxu0 %vm606_vm15, %v904_v10  ;;  %v150_v10 = vld [vmem:[%s2090_s1] sm:$0xff]  ;;  %vm1064_vm15 = vcmask 113664  }
 0x2fe   :  { %1302 = vmatpush.msrb.mxu0 %v155_v27 }
 0x32a   :  { %v1078_v6 = vpop.permute.xlu1 %1077 }
 0x32b   :  { %v1084_v57 = vsel %vm272_vm5, %v1933_v53, %v1078_v6 }
 0x342   :  { %v1006_v58 = vpop.f32.mrf.mxu2 }
 0x345   :  { %v1029_v51 = vpop.f32.mrf.mxu3 }
 0x346   :  { %1081 = vrot.lane.b32.xlu2 %v1029_v51, %s1664_s22 }
 0x34e   :  { %1067 = vrot.lane.b32.xlu2 %v1984_v4, %s1668_s8  ;;  %v1561_v4 = vld [vmem:[%s2088_s26] ss:$0 sm:$0xff] }
 0x35a   :  { %v415_v52 = vpop.f32.mrf.mxu0 }
 0x35b   :  { %v416_v20 = vadd.f32 %v415_v52, %v1957_v48 }
 0x35d   :  { %v421_v22 = vadd.f32 %v1560_v21, %v416_v20 }
 0x362   :  { %v722_v40 = vpop.f32.mrf.mxu0 }
 0x363   :  { %v751_v1 = vadd.f32 %v1980_v61, %v722_v40  ;;  %v151_v61 = vld [vmem:[%s2090_s1 + $0x8] sm:$0xff]  ;;  %v1504_v40 = vld [vmem:[%s1707_s25 + $0x2] sm:$0x3] }
 0x364   :  { %1228 = vmatpush.msrb.mxu1 %v151_v61  ;;  %v1672_v61 = vmov 2.0  }
 0x365   :  { %v756_v5 = vadd.f32 %v1561_v4, %v751_v1 }
 0x366   :  { %1229 = vmatpush.msrb.mxu1 %v150_v10 }
 0x36a   :  { %v826_v55 = vpop.f32.mrf.mxu0 }
 0x36b   :  { %1087 = vrot.lane.b32.xlu0 %v826_v55, %s1668_s8 }
 0x372   :  { %v948_v59 = vpop.f32.mrf.mxu0 }
 0x373   :  { %v977_v60 = vadd.f32 %v976_v3, %v948_v59  ;;  %1071 = vrot.lane.b32.xlu0 %v1006_v58, %s1664_s22  ;;  %v1505_v59 = vld [vmem:[%s1707_s25 + $0x4] sm:$0x3]  ;;  %s2095_s25 = sld [smem:[#allocation17_spill]] }
 0x375   :  { %v982_v35 = vadd.f32 %v1562_v56, %v977_v60 }
 0x377   :  { %1060 = vrot.lane.b32.xlu2 %v982_v35, %s1667_s9 }
 0x37a   :  { %v1052_v63 = vpop.f32.mrf.mxu0 }
 0x37b   :  { %1091 = vrot.lane.b32.xlu1 %v1052_v63, %s1664_s22 }
 0x383   :  { %1056 = vrot.lane.b32.xlu1 %v756_v5, %s1666_s17 }
 0x3a0   :  { %v1082_v7 = vpop.permute.xlu2 %1081 }
 0x3a1   :  { %v1085_v8 = vsel %vm592_vm9, %v1084_v57, %v1082_v7 }
 0x3a2   :  { %1496 = vmatmul.msk.f32.vlgmr.msra.gmra.mxu2 %vm257_vm0, %v1085_v8  ;;  %v1671_v8 = vmov 5.0  }
 0x3a8   :  { %v1068_v12 = vpop.permute.xlu2 %1067 }
 0x3a9   :  { %v1074_v13 = vsel %vm272_vm5, %v1935_v54, %v1068_v12 }
 0x3d1   :  { %v1061_v23 = vpop.permute.xlu2 %1060 }
 0x3dd   :  { %v1088_v11 = vpop.permute.xlu0 %1087 }
 0x3de   :  { %v1094_v17 = vsel %vm272_vm5, %v1966_v50, %v1088_v11 }
 0x3e5   :  { %v1072_v14 = vpop.permute.xlu0 %1071 }
 0x3e6   :  { %v1075_v53 = vsel %vm592_vm9, %v1074_v13, %v1072_v14 }
 0x3e7   :  { %1495 = vmatmul.msk.f32.vlgmr.msra.gmra.mxu1 %vm257_vm0, %v1075_v53 }
 0x3ed   :  { %v1092_v18 = vpop.permute.xlu1 %1091 }
 0x3ee   :  { %v1095_v19 = vsel %vm592_vm9, %v1094_v17, %v1092_v18 }
 0x3ef   :  { %1497 = vmatmul.msk.f32.vlgmr.msra.gmra.mxu3 %vm257_vm0, %v1095_v19 }
 0x3f5   :  { %v1057_v54 = vpop.permute.xlu1 %1056 }
 0x3f6   :  { %v1063_v24 = vsel %vm257_vm0, %v421_v22, %v1057_v54 }
 0x3f7   :  { %v1065_v25 = vsel %vm1064_vm15, %v1063_v24, %v1061_v23 }
 0x3f8   :  { %1500 = vmatmul.msk.f32.vlgmr.msrb.gmra.mxu1 %vm1206_vm4, %v1065_v25 }
 0x425   :  { %v1139_v50 = vpop.f32.mrf.mxu2 }
 0x426   :  { %1502 = vmatmul.msk.f32.vlgmr.msrb.gmra.mxu3 %vm257_vm0, %v1139_v50  ;;  %v1166_v30 = vmul.f32 %v1139_v50, %v1139_v50 }
 0x464   :  { %v1116_v48 = vpop.f32.mrf.mxu1 }
 0x465   :  { %1501 = vmatmul.msk.f32.vlgmr.msrb.gmra.mxu2 %vm257_vm0, %v1116_v48  ;;  %v1165_v29 = vmul.f32 %v1116_v48, %v1116_v48 }
 0x467   :  { %v1167_v0 = vadd.f32 %v1166_v30, %v1165_v29 }
 0x472   :  { %v1162_v31 = vpop.f32.mrf.mxu3 }
 0x473   :  { %v1168_v32 = vmul.f32 %v1162_v31, %v1162_v31 }
 0x475   :  { %v1169_v33 = vadd.f32 %v1168_v32, %v1167_v0  ;;  %v1231_v43 = vpop.f32.mrf.mxu1 }
 0x477   :  { %v1170_v15 = vmax.f32 %v1169_v33, 1e-08 }
 0x479   :  { %1589 = vrsqrt.f32 %v1170_v15  ;;  %vm1178_vm5 = vcmp.eq.f32.partialorder %v1170_v15, inf  ;;  %v1181_v41 = vand.u32 2147483648, %v1170_v15  ;;  %vm1180_vm9 = vcmp.eq.f32.partialorder %v1170_v15, 0.0 }
 0x47a   :  { %1591 = vrcp.f32 %v1671_v8 }
 0x47b   :  { %1593 = vrcp.f32 %v1672_v61 }
 0x47f   :  { %v1590_v34 = vpop.eup %1589 }
 0x480   :  { %v1172_v36 = vmul.f32 %v1590_v34, %v1170_v15  ;;  %v1592_v9 = vpop.eup %1591 }
 0x481   :  { %v1594_v11 = vpop.eup %1593  ;;  %vm1317_vm2 = vweird.f32 %v1592_v9 }
 0x482   :  { %v1173_v16 = vmul.f32 %v1590_v34, %v1172_v36  ;;  %v1364_v13 = vmul.f32 2.0, %v1594_v11  ;;  %vm1368_vm3 = vweird.f32 %v1594_v11 }
 0x484   :  { %v1174_v37 = vmul.f32 0.5, %v1173_v16  ;;  %v1365_v53 = vsub.f32 1.0, %v1364_v13 }
 0x486   :  { %v1175_v2 = vsub.f32 1.5, %v1174_v37  ;;  %v1366_v19 = vmul.f32 %v1594_v11, %v1365_v53 }
 0x488   :  { %v1176_v38 = vmul.f32 %v1590_v34, %v1175_v2  ;;  %v1367_v22 = vadd.f32 %v1594_v11, %v1366_v19 }
 0x48a   :  { %v1177_v39 = vmul.f32 %v1176_v38, %v1170_v15  ;;  %v1369_v24 = vsel %vm1368_vm3, %v1594_v11, %v1367_v22 }
 0x48c   :  { %v1179_v42 = vsel %vm1178_vm5, %v1170_v15, %v1177_v39 }
 0x48d   :  { %v1182_v44 = vsel %vm1180_vm9, %v1181_v41, %v1179_v42 }
 0x48e   :  { %1498 = vmatmul.msk.f32.vlgmr.msra.gmra.mxu0 %vm257_vm0, %v1182_v44 }
 0x496   :  { %1503 = vmatmul.msk.f32.vlgmr.msrb.gmra.mxu0 %vm257_vm0, %v1162_v31  ;;  %vm1359_vm0 = vcmask 9216   ;;  %v1564_v31 = vld [vmem:[%s1822_s6] ss:$0 sm:$0xff] }
 0x4a9   :  { %v1281_v52 = vpop.f32.mrf.mxu3 }
 0x4aa   :  { %v1350_v56 = vadd.f32 %v1504_v40, %v1281_v52 }
 0x4ac   :  { %v1354_v1 = vmul.f32 %v1350_v56, %v1350_v56 }
 0x4e8   :  { %v1258_v49 = vpop.f32.mrf.mxu2 }
 0x4e9   :  { %v1348_v55 = vadd.f32 %v1347_v46, %v1258_v49 }
 0x4eb   :  { %v1353_v60 = vmul.f32 %v1348_v55, %v1348_v55 }
 0x4ed   :  { %v1355_v5 = vadd.f32 %v1354_v1, %v1353_v60 }
 0x50b   :  { %v1203_v47 = vpop.f32.mrf.mxu0 }
 0x50c   :  { %v1232_v51 = vadd.f32 %v1231_v43, %v1203_v47  ;;  %v1566_v47 = vld [vmem:[%s1817_s12] ss:$0 sm:$0xff] }
 0x50e   :  { %v1237_v3 = vadd.f32 %v1563_v45, %v1232_v51  ;;  %v1565_v45 = vld [vmem:[%s2095_s25] ss:$0 sm:$0xff] }
 0x510   :  { %v1307_v58 = vadd.f32 %v1237_v3, %v1996_v26  ;;  %v1313_v26 = vmul.f32 5.0, %v1592_v9 }
 0x512   :  { %v1309_v35 = vsel %vm1308_vm1, %v1307_v58, 0.0  ;;  %v1314_v10 = vsub.f32 1.0, %v1313_v26 }
 0x513   :  { %v1304_v63 = vpop.f32.mrf.mxu0  ;;  %1310 = vadd.xlane.f32.xlu0 %v1309_v35 }
 0x514   :  { %v1352_v4 = vadd.f32 %v1505_v59, %v1304_v63  ;;  %v1315_v12 = vmul.f32 %v1592_v9, %v1314_v10 }
 0x516   :  { %v1356_v62 = vmul.f32 %v1352_v4, %v1352_v4  ;;  %v1316_v14 = vadd.f32 %v1592_v9, %v1315_v12 }
 0x518   :  { %v1357_v6 = vadd.f32 %v1356_v62, %v1355_v5  ;;  %v1318_v17 = vsel %vm1317_vm2, %v1592_v9, %v1316_v14 }
 0x51a   :  { %v1358_v57 = vmax.f32 %v1357_v6, 1e-08 }
 0x51c   :  { %v1360_v7 = vsel %vm1359_vm0, %v1358_v57, 0.0 }
 0x51d   :  { %1361 = vadd.xlane.f32.xlu2 %v1360_v7 }
 0x586   :  { %v1311_v18 = vpop.xlane.xlu0 %1310 }
 0x587   :  { %v1319_v20 = vmul.f32 %v1318_v17, %v1311_v18 }
 0x589   :  { %v1320_v21 = vsub.f32 %v1307_v58, %v1319_v20 }
 0x58b   :  { %v1321_v54 = vmul.f32 %v1320_v21, %v1320_v21 }
 0x58d   :  { %v1322_v23 = vsel %vm1308_vm1, %v1321_v54, 0.0 }
 0x58e   :  { %1323 = vadd.xlane.f32.xlu1 %v1322_v23 }
 0x590   :  { %v1362_v25 = vpop.xlane.xlu2 %1361 }
 0x591   :  { %v1370_v27 = vmul.f32 %v1369_v24, %v1362_v25 }
 0x593   :  { %1595 = vrsqrt.f32 %v1370_v27  ;;  %vm1377_vm7 = vweird.f32 %v1370_v27 }
 0x599   :  { %v1596_v50 = vpop.eup %1595 }
 0x59a   :  { %v1372_v28 = vmul.f32 %v1596_v50, %v1370_v27  ;;  %vm1378_vm6 = vweird.f32 %v1596_v50 }
 0x59b   :  { %vm1379_vm8 = vmor %vm1377_vm7, %vm1378_vm6 }
 0x59c   :  { %v1373_v48 = vmul.f32 %v1596_v50, %v1372_v28 }
 0x59e   :  { %v1374_v29 = vmul.f32 0.5, %v1373_v48 }
 0x5a0   :  { %v1375_v30 = vsub.f32 1.5, %v1374_v29 }
 0x5a2   :  { %v1376_v0 = vmul.f32 %v1596_v50, %v1375_v30 }
 0x5a4   :  { %v1380_v32 = vsel %vm1379_vm8, %v1596_v50, %v1376_v0 }
 0x5a5   :  { %v1384_v33 = vmul.f32 %v1564_v31, %v1380_v32 }
 0x5a7   :  { %v1385_v15 = vmul.f32 %v1384_v33, %v1348_v55  ;;  %v1386_v34 = vmul.f32 %v1384_v33, %v1350_v56  ;;  %v1387_v36 = vmul.f32 %v1384_v33, %v1352_v4 }
 0x5a9   :  { %1388 = vst.msk [vmem:[%s1832_s14] sm:$0x3] %vm1359_vm0, %v1385_v15 }
 0x5aa   :  { %1506 = vst.msk [vmem:[%s1832_s14 + $0x2] sm:$0x3] %vm1359_vm0, %v1386_v34 }
 0x5ab   :  { %1507 = vst.msk [vmem:[%s1832_s14 + $0x4] sm:$0x3] %vm1359_vm0, %v1387_v36  ;;  %s1673_s14 = smov [#allocation2]  }
 0x5ac   :  { %s1398_s6 = sshll.u32 %s1673_s14, 4  ;;  %s1399_s6 = int_to_ptr.vmem [resolvable:$true] %s1398_s6 }
 0x601   :  { %v1324_v16 = vpop.xlane.xlu1 %1323 }
 0x602   :  { %v1325_v37 = vmul.f32 %v1324_v16, %v1318_v17 }
 0x604   :  { %v1326_v2 = vadd.f32 1e-05, %v1325_v37 }
 0x606   :  { %1597 = vrsqrt.f32 %v1326_v2  ;;  %vm1333_vm13 = vweird.f32 %v1326_v2 }
 0x60c   :  { %v1598_v38 = vpop.eup %1597 }
 0x60d   :  { %v1328_v39 = vmul.f32 %v1598_v38, %v1326_v2  ;;  %vm1334_vm11 = vweird.f32 %v1598_v38 }
 0x60e   :  { %vm1335_vm12 = vmor %vm1333_vm13, %vm1334_vm11 }
 0x60f   :  { %v1329_v41 = vmul.f32 %v1598_v38, %v1328_v39 }
 0x611   :  { %v1330_v42 = vmul.f32 0.5, %v1329_v41 }
 0x613   :  { %v1331_v44 = vsub.f32 1.5, %v1330_v42 }
 0x615   :  { %v1332_v43 = vmul.f32 %v1598_v38, %v1331_v44 }
 0x617   :  { %v1336_v49 = vsel %vm1335_vm12, %v1598_v38, %v1332_v43 }
 0x618   :  { %v1337_v46 = vmul.f32 %v1336_v49, %v1320_v21 }
 0x61a   :  { %v1341_v51 = vmul.f32 %v1565_v45, %v1337_v46 }
 0x61c   :  { %v1345_v52 = vadd.f32 %v1566_v47, %v1341_v51 }
 0x61e   :  { %1346 = vst.msk [vmem:[#allocation2] sm:$0x3] %vm1308_vm1, %v1345_v52 }
 0x61f   :  { %1622 = shalt.err (!%p1619_p4)
}
 0x620   :  { %1403 = dma.vmem_to_hbm [thread:$0]  %s1399_s6, 32, %s1401_s0, [#allocation3]  }
 0x621   :  { %1623 = dma.done.wait [#allocation3], 32  }
 0x622   :  { %1624 = vsyncadd [#allocation3], 4294967264 }
 0x623   :  { %1412 = vsyncpa [#allocation3], 1 }

</bundles_post_ra>
